<compile_context>
chip_gen: v7x
topology: tpu7x:2x2x1
jax: 0.10.0
libtpu: 0.0.40
codegen_flags: <defaults>
</compile_context>

<pallas_src>
import functools

import jax
import jax.numpy as jnp
from jax import lax
from jax.experimental import pallas as pl

HIDDEN = 320        # hardcoded in the PyTorch module
HIDDEN_PAD = 384    # 3 * 128: each gate slab is lane-aligned


# ------------------------- fused LSTM + head kernel --------------------------
def lstm_head_kernel(gx_ref, whh_ref, w1_ref, b1_ref, w2_ref, b2_ref,
                     w3_ref, b3_ref, o_ref):
    """Single invocation: full LSTM recurrence + FC head + softmax.

    gx_ref : (T, B, 4*Hp) f32  precomputed x_t @ W_ih + (b_ih + b_hh), gate-padded
    whh_ref: (Hp, 4*Hp)        recurrent weights (f32, or bf16 on v6e/v7x)
    w1/b1, w2/b2, w3/b3        head weights (pre-transposed; w1 rows zero-padded)
    o_ref  : (B, num_classes)  softmax probabilities
    """
    T, B, G = gx_ref.shape
    Hp = G // 4
    whh = whh_ref[...]          # loaded once, resident in VMEM
    mdt = whh.dtype             # MXU operand dtype (f32, or bf16 on v6e/v7x)

    def step(t, carry):
        h, c = carry
        # Only the recurrent matmul is on the serial critical path.
        gates = gx_ref[t] + jnp.dot(h.astype(mdt), whh,
                                    preferred_element_type=jnp.float32)
        # PyTorch gate order [i, f, g, o]; each slab is Hp wide -> slice starts
        # at 0/384/768/1152, all multiples of 128 (lane-aligned, no XLU shifts).
        i_g = jax.nn.sigmoid(gates[:, 0 * Hp:1 * Hp])
        f_g = jax.nn.sigmoid(gates[:, 1 * Hp:2 * Hp])
        g_g = jnp.tanh(gates[:, 2 * Hp:3 * Hp])
        o_g = jax.nn.sigmoid(gates[:, 3 * Hp:4 * Hp])
        c = f_g * c + i_g * g_g
        h = o_g * jnp.tanh(c)   # padded lanes stay exactly 0 (elementwise f32)
        return h, c

    h0 = jnp.zeros((B, Hp), jnp.float32)
    c0 = jnp.zeros((B, Hp), jnp.float32)
    h, _ = lax.fori_loop(0, T, step, (h0, c0), unroll=True)

    # Fused FC head (Dropout(0.5) = identity in eval mode) + softmax(dim=1).
    z = jnp.dot(h, w1_ref[...], preferred_element_type=jnp.float32) + b1_ref[...]
    z = jnp.dot(z, w2_ref[...], preferred_element_type=jnp.float32) + b2_ref[...]
    z = jnp.dot(z, w3_ref[...], preferred_element_type=jnp.float32) + b3_ref[...]
    z = z - jnp.max(z, axis=1, keepdims=True)
    e = jnp.exp(z)
    o_ref[...] = (e / jnp.sum(e, axis=1, keepdims=True)).astype(o_ref.dtype)


# ------------------------------- wrapper -------------------------------------
@functools.partial(jax.jit, static_argnames=("num_classes", "use_bf16"))
def lstm_model_forward(tokens, prep, *, num_classes, use_bf16=False):
    """tokens: (B, T, D) last_hidden_state. prep: prepare_params(...) output."""
    B, T, D = tokens.shape
    mdt = jnp.bfloat16 if use_bf16 else jnp.float32

    # Hoisted input projection: one large (T,B,D)@(D,4Hp) matmul instead of T
    # tiny per-step matmuls inside the recurrence.  Accumulation stays f32.
    x_tm = jnp.transpose(tokens, (1, 0, 2)).astype(mdt)            # (T, B, D)
    gates_x = lax.dot_general(
        x_tm, prep["wih_t"].astype(mdt),
        dimension_numbers=(((2,), (0,)), ((), ())),
        preferred_element_type=jnp.float32,
    ) + prep["b"]                                                  # (T, B, 4*Hp)

    whh = prep["whh_t"].astype(mdt)

    # Single pallas_call, no grid: everything (gates_x ~0.1 MB, W_hh ~2.4 MB,
    # head weights) sits in VMEM for one invocation; no pipelining buffers.
    return pl.pallas_call(
        lstm_head_kernel,
        out_shape=jax.ShapeDtypeStruct((B, num_classes), jnp.float32),
    )(gates_x, whh,
      prep["w1_t"], prep["b1"],
      prep["w2_t"], prep["b2"],
      prep["w3_t"], prep["b3"])


# --------------------------- one-time weight prep -----------------------------
def prepare_params(params):
    """Pre-transpose, fuse biases and zero-pad the gate layout (done once)."""
    H, Hp = HIDDEN, HIDDEN_PAD

    def pad_gate_cols(w):  # (rows, 4H) -> (rows, 4Hp), per-gate zero padding
        parts = jnp.split(w, 4, axis=1)
        return jnp.concatenate(
            [jnp.pad(p, ((0, 0), (0, Hp - H))) for p in parts], axis=1)

    wih_t = pad_gate_cols(params["w_ih"].T)                               # (D, 4Hp)
    whh_t = pad_gate_cols(jnp.pad(params["w_hh"].T, ((0, Hp - H), (0, 0))))  # (Hp, 4Hp)
    b = pad_gate_cols((params["b_ih"] + params["b_hh"]).reshape(1, 4 * H))   # (1, 4Hp)
    w1_t = jnp.pad(params["w1"].T, ((0, Hp - H), (0, 0)))                 # (Hp, 80)
    return {
        "wih_t": wih_t, "whh_t": whh_t, "b": b,
        "w1_t": w1_t, "b1": params["b1"].reshape(1, -1),
        "w2_t": params["w2"].T, "b2": params["b2"].reshape(1, -1),
        "w3_t": params["w3"].T, "b3": params["b3"].reshape(1, -1),
    }


# --------------------------- pure-JAX reference -------------------------------
def reference_forward(tokens, params, num_classes):
    B, T, D = tokens.shape
    H = HIDDEN
    wih, whh = params["w_ih"], params["w_hh"]
    b = params["b_ih"] + params["b_hh"]

    def step(carry, x_t):
        h, c = carry
        g = x_t @ wih.T + h @ whh.T + b
        i = jax.nn.sigmoid(g[:, 0 * H:1 * H])
        f = jax.nn.sigmoid(g[:, 1 * H:2 * H])
        gg = jnp.tanh(g[:, 2 * H:3 * H])
        o = jax.nn.sigmoid(g[:, 3 * H:4 * H])
        c = f * c + i * gg
        h = o * jnp.tanh(c)
        return (h, c), None

    (h, _), _ = jax.lax.scan(
        step,
        (jnp.zeros((B, H), jnp.float32), jnp.zeros((B, H), jnp.float32)),
        jnp.transpose(tokens, (1, 0, 2)).astype(jnp.float32),
    )
    x = h @ params["w1"].T + params["b1"]
    x = x @ params["w2"].T + params["b2"]
    x = x @ params["w3"].T + params["b3"]
    return jax.nn.softmax(x, axis=1)


# ------------------------------- params ---------------------------------------
def init_params(key, input_size, num_classes):
    H = HIDDEN
    ks = jax.random.split(key, 10)
    k_lstm = 1.0 / jnp.sqrt(H)

    def uni(k, shape, bound):
        return jax.random.uniform(k, shape, jnp.float32, -bound, bound)

    return {
        "w_ih": uni(ks[0], (4 * H, input_size), k_lstm),
        "w_hh": uni(ks[1], (4 * H, H), k_lstm),
        "b_ih": uni(ks[2], (4 * H,), k_lstm),
        "b_hh": uni(ks[3], (4 * H,), k_lstm),
        "w1": uni(ks[4], (80, H), 1.0 / jnp.sqrt(H)),
        "b1": uni(ks[5], (80,), 1.0 / jnp.sqrt(H)),
        "w2": uni(ks[6], (20, 80), 1.0 / jnp.sqrt(80.0)),
        "b2": uni(ks[7], (20,), 1.0 / jnp.sqrt(80.0)),
        "w3": uni(ks[8], (num_classes, 20), 1.0 / jnp.sqrt(20.0)),
        "b3": uni(ks[9], (num_classes,), 1.0 / jnp.sqrt(20.0)),
    }


if __name__ == "__main__":
    B, T, D = 2, 8, 64          # batch, seq, input_size (base_model hidden dim)
    NUM_CLASSES = 10

    root = jax.random.PRNGKey(0)
    k_x, k_p = jax.random.split(root)
    tokens = jax.random.normal(k_x, (B, T, D), jnp.float32)  # last_hidden_state
    params = init_params(k_p, D, NUM_CLASSES)
    prep = prepare_params(params)                            # one-time weight prep

    ref = reference_forward(tokens, params, NUM_CLASSES)

    # f32 path: must match the reference tightly.
    out = lstm_model_forward(tokens, prep, num_classes=NUM_CLASSES)
    out = jax.block_until_ready(out)
    assert out.shape == (B, NUM_CLASSES)
    assert jnp.allclose(jnp.sum(out, axis=1), 1.0, atol=1e-5)
    assert jnp.allclose(out, ref, rtol=1e-4, atol=1e-5)

    # bf16-MXU path (v6e/v7x recommendation): f32 accumulate + f32 elementwise.
    out_bf16 = lstm_model_forward(tokens, prep, num_classes=NUM_CLASSES,
                                  use_bf16=True)
    out_bf16 = jax.block_until_ready(out_bf16)
    assert jnp.allclose(out_bf16, ref, atol=2e-2)

    print("KERNEL_OK")
</pallas_src>

<mosaic_0001>
module attributes {stable_mosaic.version = 11 : i64} {
  func.func @lstm_head_kernel(%arg0: memref<8x2x1536xf32, #tpu.memory_space<vmem>>, %arg1: memref<384x1536xf32, #tpu.memory_space<vmem>>, %arg2: memref<384x80xf32, #tpu.memory_space<vmem>>, %arg3: memref<1x80xf32, #tpu.memory_space<vmem>>, %arg4: memref<80x20xf32, #tpu.memory_space<vmem>>, %arg5: memref<1x20xf32, #tpu.memory_space<vmem>>, %arg6: memref<20x10xf32, #tpu.memory_space<vmem>>, %arg7: memref<1x10xf32, #tpu.memory_space<vmem>>, %arg8: memref<2x10xf32, #tpu.memory_space<vmem>>) attributes {dimension_semantics = [], scalar_prefetch = 0 : i64, scratch_operands = 0 : i64, tpu.core_type = #tpu.core_type<tc>} {
    %c0 = arith.constant 0 : index
    %c0_0 = arith.constant 0 : index
    %0 = vector.load %arg1[%c0, %c0_0] : memref<384x1536xf32, #tpu.memory_space<vmem>>, vector<384x1536xf32>
    %cst = arith.constant 0.000000e+00 : f32
    %1 = vector.broadcast %cst : f32 to vector<2x384xf32>
    %cst_1 = arith.constant 0.000000e+00 : f32
    %2 = vector.broadcast %cst_1 : f32 to vector<2x384xf32>
    %c0_i32 = arith.constant 0 : i32
    %3 = arith.index_cast %c0_i32 : i32 to index
    %c0_2 = arith.constant 0 : index
    %c0_3 = arith.constant 0 : index
    %4 = vector.load %arg0[%3, %c0_2, %c0_3] : memref<8x2x1536xf32, #tpu.memory_space<vmem>>, vector<1x2x1536xf32>
    %5 = vector.shape_cast %4 : vector<1x2x1536xf32> to vector<2x1536xf32>
    %cst_4 = arith.constant dense<0.000000e+00> : vector<2x1536xf32>
    %6 = tpu.matmul %1, %0, %cst_4 {dimension_numbers = #tpu.dot_dimension_numbers<[1], [0], [0], [1], [0, 0, 1, 1], [], []>} : vector<2x384xf32>, vector<384x1536xf32>, vector<2x1536xf32> -> vector<2x1536xf32>
    %7 = arith.addf %5, %6 : vector<2x1536xf32>
    %8 = vector.extract_strided_slice %7 {offsets = [0, 0], sizes = [2, 384], strides = [1, 1]} : vector<2x1536xf32> to vector<2x384xf32>
    %9 = arith.negf %8 : vector<2x384xf32>
    %10 = math.exp %9 : vector<2x384xf32>
    %cst_5 = arith.constant 1.000000e+00 : f32
    %11 = vector.broadcast %cst_5 : f32 to vector<2x384xf32>
    %12 = arith.addf %11, %10 : vector<2x384xf32>
    %13 = arith.divf %11, %12 : vector<2x384xf32>
    %14 = vector.extract_strided_slice %7 {offsets = [0, 384], sizes = [2, 384], strides = [1, 1]} : vector<2x1536xf32> to vector<2x384xf32>
    %15 = arith.negf %14 : vector<2x384xf32>
    %16 = math.exp %15 : vector<2x384xf32>
    %cst_6 = arith.constant 1.000000e+00 : f32
    %17 = vector.broadcast %cst_6 : f32 to vector<2x384xf32>
    %18 = arith.addf %17, %16 : vector<2x384xf32>
    %19 = arith.divf %17, %18 : vector<2x384xf32>
    %20 = vector.extract_strided_slice %7 {offsets = [0, 768], sizes = [2, 384], strides = [1, 1]} : vector<2x1536xf32> to vector<2x384xf32>
    %21 = math.tanh %20 : vector<2x384xf32>
    %22 = vector.extract_strided_slice %7 {offsets = [0, 1152], sizes = [2, 384], strides = [1, 1]} : vector<2x1536xf32> to vector<2x384xf32>
    %23 = arith.negf %22 : vector<2x384xf32>
    %24 = math.exp %23 : vector<2x384xf32>
    %cst_7 = arith.constant 1.000000e+00 : f32
    %25 = vector.broadcast %cst_7 : f32 to vector<2x384xf32>
    %26 = arith.addf %25, %24 : vector<2x384xf32>
    %27 = arith.divf %25, %26 : vector<2x384xf32>
    %28 = arith.mulf %19, %2 : vector<2x384xf32>
    %29 = arith.mulf %13, %21 : vector<2x384xf32>
    %30 = arith.addf %28, %29 : vector<2x384xf32>
    %31 = math.tanh %30 : vector<2x384xf32>
    %32 = arith.mulf %27, %31 : vector<2x384xf32>
    %c1_i32 = arith.constant 1 : i32
    %33 = arith.index_cast %c1_i32 : i32 to index
    %c0_8 = arith.constant 0 : index
    %c0_9 = arith.constant 0 : index
    %34 = vector.load %arg0[%33, %c0_8, %c0_9] : memref<8x2x1536xf32, #tpu.memory_space<vmem>>, vector<1x2x1536xf32>
    %35 = vector.shape_cast %34 : vector<1x2x1536xf32> to vector<2x1536xf32>
    %cst_10 = arith.constant dense<0.000000e+00> : vector<2x1536xf32>
    %36 = tpu.matmul %32, %0, %cst_10 {dimension_numbers = #tpu.dot_dimension_numbers<[1], [0], [0], [1], [0, 0, 1, 1], [], []>} : vector<2x384xf32>, vector<384x1536xf32>, vector<2x1536xf32> -> vector<2x1536xf32>
    %37 = arith.addf %35, %36 : vector<2x1536xf32>
    %38 = vector.extract_strided_slice %37 {offsets = [0, 0], sizes = [2, 384], strides = [1, 1]} : vector<2x1536xf32> to vector<2x384xf32>
    %39 = arith.negf %38 : vector<2x384xf32>
    %40 = math.exp %39 : vector<2x384xf32>
    %cst_11 = arith.constant 1.000000e+00 : f32
    %41 = vector.broadcast %cst_11 : f32 to vector<2x384xf32>
    %42 = arith.addf %41, %40 : vector<2x384xf32>
    %43 = arith.divf %41, %42 : vector<2x384xf32>
    %44 = vector.extract_strided_slice %37 {offsets = [0, 384], sizes = [2, 384], strides = [1, 1]} : vector<2x1536xf32> to vector<2x384xf32>
    %45 = arith.negf %44 : vector<2x384xf32>
    %46 = math.exp %45 : vector<2x384xf32>
    %cst_12 = arith.constant 1.000000e+00 : f32
    %47 = vector.broadcast %cst_12 : f32 to vector<2x384xf32>
    %48 = arith.addf %47, %46 : vector<2x384xf32>
    %49 = arith.divf %47, %48 : vector<2x384xf32>
    %50 = vector.extract_strided_slice %37 {offsets = [0, 768], sizes = [2, 384], strides = [1, 1]} : vector<2x1536xf32> to vector<2x384xf32>
    %51 = math.tanh %50 : vector<2x384xf32>
    %52 = vector.extract_strided_slice %37 {offsets = [0, 1152], sizes = [2, 384], strides = [1, 1]} : vector<2x1536xf32> to vector<2x384xf32>
    %53 = arith.negf %52 : vector<2x384xf32>
    %54 = math.exp %53 : vector<2x384xf32>
    %cst_13 = arith.constant 1.000000e+00 : f32
    %55 = vector.broadcast %cst_13 : f32 to vector<2x384xf32>
    %56 = arith.addf %55, %54 : vector<2x384xf32>
    %57 = arith.divf %55, %56 : vector<2x384xf32>
    %58 = arith.mulf %49, %30 : vector<2x384xf32>
    %59 = arith.mulf %43, %51 : vector<2x384xf32>
    %60 = arith.addf %58, %59 : vector<2x384xf32>
    %61 = math.tanh %60 : vector<2x384xf32>
    %62 = arith.mulf %57, %61 : vector<2x384xf32>
    %c2_i32 = arith.constant 2 : i32
    %63 = arith.index_cast %c2_i32 : i32 to index
    %c0_14 = arith.constant 0 : index
    %c0_15 = arith.constant 0 : index
    %64 = vector.load %arg0[%63, %c0_14, %c0_15] : memref<8x2x1536xf32, #tpu.memory_space<vmem>>, vector<1x2x1536xf32>
    %65 = vector.shape_cast %64 : vector<1x2x1536xf32> to vector<2x1536xf32>
    %cst_16 = arith.constant dense<0.000000e+00> : vector<2x1536xf32>
    %66 = tpu.matmul %62, %0, %cst_16 {dimension_numbers = #tpu.dot_dimension_numbers<[1], [0], [0], [1], [0, 0, 1, 1], [], []>} : vector<2x384xf32>, vector<384x1536xf32>, vector<2x1536xf32> -> vector<2x1536xf32>
    %67 = arith.addf %65, %66 : vector<2x1536xf32>
    %68 = vector.extract_strided_slice %67 {offsets = [0, 0], sizes = [2, 384], strides = [1, 1]} : vector<2x1536xf32> to vector<2x384xf32>
    %69 = arith.negf %68 : vector<2x384xf32>
    %70 = math.exp %69 : vector<2x384xf32>
    %cst_17 = arith.constant 1.000000e+00 : f32
    %71 = vector.broadcast %cst_17 : f32 to vector<2x384xf32>
    %72 = arith.addf %71, %70 : vector<2x384xf32>
    %73 = arith.divf %71, %72 : vector<2x384xf32>
    %74 = vector.extract_strided_slice %67 {offsets = [0, 384], sizes = [2, 384], strides = [1, 1]} : vector<2x1536xf32> to vector<2x384xf32>
    %75 = arith.negf %74 : vector<2x384xf32>
    %76 = math.exp %75 : vector<2x384xf32>
    %cst_18 = arith.constant 1.000000e+00 : f32
    %77 = vector.broadcast %cst_18 : f32 to vector<2x384xf32>
    %78 = arith.addf %77, %76 : vector<2x384xf32>
    %79 = arith.divf %77, %78 : vector<2x384xf32>
    %80 = vector.extract_strided_slice %67 {offsets = [0, 768], sizes = [2, 384], strides = [1, 1]} : vector<2x1536xf32> to vector<2x384xf32>
    %81 = math.tanh %80 : vector<2x384xf32>
    %82 = vector.extract_strided_slice %67 {offsets = [0, 1152], sizes = [2, 384], strides = [1, 1]} : vector<2x1536xf32> to vector<2x384xf32>
    %83 = arith.negf %82 : vector<2x384xf32>
    %84 = math.exp %83 : vector<2x384xf32>
    %cst_19 = arith.constant 1.000000e+00 : f32
    %85 = vector.broadcast %cst_19 : f32 to vector<2x384xf32>
    %86 = arith.addf %85, %84 : vector<2x384xf32>
    %87 = arith.divf %85, %86 : vector<2x384xf32>
    %88 = arith.mulf %79, %60 : vector<2x384xf32>
    %89 = arith.mulf %73, %81 : vector<2x384xf32>
    %90 = arith.addf %88, %89 : vector<2x384xf32>
    %91 = math.tanh %90 : vector<2x384xf32>
    %92 = arith.mulf %87, %91 : vector<2x384xf32>
    %c3_i32 = arith.constant 3 : i32
    %93 = arith.index_cast %c3_i32 : i32 to index
    %c0_20 = arith.constant 0 : index
    %c0_21 = arith.constant 0 : index
    %94 = vector.load %arg0[%93, %c0_20, %c0_21] : memref<8x2x1536xf32, #tpu.memory_space<vmem>>, vector<1x2x1536xf32>
    %95 = vector.shape_cast %94 : vector<1x2x1536xf32> to vector<2x1536xf32>
    %cst_22 = arith.constant dense<0.000000e+00> : vector<2x1536xf32>
    %96 = tpu.matmul %92, %0, %cst_22 {dimension_numbers = #tpu.dot_dimension_numbers<[1], [0], [0], [1], [0, 0, 1, 1], [], []>} : vector<2x384xf32>, vector<384x1536xf32>, vector<2x1536xf32> -> vector<2x1536xf32>
    %97 = arith.addf %95, %96 : vector<2x1536xf32>
    %98 = vector.extract_strided_slice %97 {offsets = [0, 0], sizes = [2, 384], strides = [1, 1]} : vector<2x1536xf32> to vector<2x384xf32>
    %99 = arith.negf %98 : vector<2x384xf32>
    %100 = math.exp %99 : vector<2x384xf32>
    %cst_23 = arith.constant 1.000000e+00 : f32
    %101 = vector.broadcast %cst_23 : f32 to vector<2x384xf32>
    %102 = arith.addf %101, %100 : vector<2x384xf32>
    %103 = arith.divf %101, %102 : vector<2x384xf32>
    %104 = vector.extract_strided_slice %97 {offsets = [0, 384], sizes = [2, 384], strides = [1, 1]} : vector<2x1536xf32> to vector<2x384xf32>
    %105 = arith.negf %104 : vector<2x384xf32>
    %106 = math.exp %105 : vector<2x384xf32>
    %cst_24 = arith.constant 1.000000e+00 : f32
    %107 = vector.broadcast %cst_24 : f32 to vector<2x384xf32>
    %108 = arith.addf %107, %106 : vector<2x384xf32>
    %109 = arith.divf %107, %108 : vector<2x384xf32>
    %110 = vector.extract_strided_slice %97 {offsets = [0, 768], sizes = [2, 384], strides = [1, 1]} : vector<2x1536xf32> to vector<2x384xf32>
    %111 = math.tanh %110 : vector<2x384xf32>
    %112 = vector.extract_strided_slice %97 {offsets = [0, 1152], sizes = [2, 384], strides = [1, 1]} : vector<2x1536xf32> to vector<2x384xf32>
    %113 = arith.negf %112 : vector<2x384xf32>
    %114 = math.exp %113 : vector<2x384xf32>
    %cst_25 = arith.constant 1.000000e+00 : f32
    %115 = vector.broadcast %cst_25 : f32 to vector<2x384xf32>
    %116 = arith.addf %115, %114 : vector<2x384xf32>
    %117 = arith.divf %115, %116 : vector<2x384xf32>
    %118 = arith.mulf %109, %90 : vector<2x384xf32>
    %119 = arith.mulf %103, %111 : vector<2x384xf32>
    %120 = arith.addf %118, %119 : vector<2x384xf32>
    %121 = math.tanh %120 : vector<2x384xf32>
    %122 = arith.mulf %117, %121 : vector<2x384xf32>
    %c4_i32 = arith.constant 4 : i32
    %123 = arith.index_cast %c4_i32 : i32 to index
    %c0_26 = arith.constant 0 : index
    %c0_27 = arith.constant 0 : index
    %124 = vector.load %arg0[%123, %c0_26, %c0_27] : memref<8x2x1536xf32, #tpu.memory_space<vmem>>, vector<1x2x1536xf32>
    %125 = vector.shape_cast %124 : vector<1x2x1536xf32> to vector<2x1536xf32>
    %cst_28 = arith.constant dense<0.000000e+00> : vector<2x1536xf32>
    %126 = tpu.matmul %122, %0, %cst_28 {dimension_numbers = #tpu.dot_dimension_numbers<[1], [0], [0], [1], [0, 0, 1, 1], [], []>} : vector<2x384xf32>, vector<384x1536xf32>, vector<2x1536xf32> -> vector<2x1536xf32>
    %127 = arith.addf %125, %126 : vector<2x1536xf32>
    %128 = vector.extract_strided_slice %127 {offsets = [0, 0], sizes = [2, 384], strides = [1, 1]} : vector<2x1536xf32> to vector<2x384xf32>
    %129 = arith.negf %128 : vector<2x384xf32>
    %130 = math.exp %129 : vector<2x384xf32>
    %cst_29 = arith.constant 1.000000e+00 : f32
    %131 = vector.broadcast %cst_29 : f32 to vector<2x384xf32>
    %132 = arith.addf %131, %130 : vector<2x384xf32>
    %133 = arith.divf %131, %132 : vector<2x384xf32>
    %134 = vector.extract_strided_slice %127 {offsets = [0, 384], sizes = [2, 384], strides = [1, 1]} : vector<2x1536xf32> to vector<2x384xf32>
    %135 = arith.negf %134 : vector<2x384xf32>
    %136 = math.exp %135 : vector<2x384xf32>
    %cst_30 = arith.constant 1.000000e+00 : f32
    %137 = vector.broadcast %cst_30 : f32 to vector<2x384xf32>
    %138 = arith.addf %137, %136 : vector<2x384xf32>
    %139 = arith.divf %137, %138 : vector<2x384xf32>
    %140 = vector.extract_strided_slice %127 {offsets = [0, 768], sizes = [2, 384], strides = [1, 1]} : vector<2x1536xf32> to vector<2x384xf32>
    %141 = math.tanh %140 : vector<2x384xf32>
    %142 = vector.extract_strided_slice %127 {offsets = [0, 1152], sizes = [2, 384], strides = [1, 1]} : vector<2x1536xf32> to vector<2x384xf32>
    %143 = arith.negf %142 : vector<2x384xf32>
    %144 = math.exp %143 : vector<2x384xf32>
    %cst_31 = arith.constant 1.000000e+00 : f32
    %145 = vector.broadcast %cst_31 : f32 to vector<2x384xf32>
    %146 = arith.addf %145, %144 : vector<2x384xf32>
    %147 = arith.divf %145, %146 : vector<2x384xf32>
    %148 = arith.mulf %139, %120 : vector<2x384xf32>
    %149 = arith.mulf %133, %141 : vector<2x384xf32>
    %150 = arith.addf %148, %149 : vector<2x384xf32>
    %151 = math.tanh %150 : vector<2x384xf32>
    %152 = arith.mulf %147, %151 : vector<2x384xf32>
    %c5_i32 = arith.constant 5 : i32
    %153 = arith.index_cast %c5_i32 : i32 to index
    %c0_32 = arith.constant 0 : index
    %c0_33 = arith.constant 0 : index
    %154 = vector.load %arg0[%153, %c0_32, %c0_33] : memref<8x2x1536xf32, #tpu.memory_space<vmem>>, vector<1x2x1536xf32>
    %155 = vector.shape_cast %154 : vector<1x2x1536xf32> to vector<2x1536xf32>
    %cst_34 = arith.constant dense<0.000000e+00> : vector<2x1536xf32>
    %156 = tpu.matmul %152, %0, %cst_34 {dimension_numbers = #tpu.dot_dimension_numbers<[1], [0], [0], [1], [0, 0, 1, 1], [], []>} : vector<2x384xf32>, vector<384x1536xf32>, vector<2x1536xf32> -> vector<2x1536xf32>
    %157 = arith.addf %155, %156 : vector<2x1536xf32>
    %158 = vector.extract_strided_slice %157 {offsets = [0, 0], sizes = [2, 384], strides = [1, 1]} : vector<2x1536xf32> to vector<2x384xf32>
    %159 = arith.negf %158 : vector<2x384xf32>
    %160 = math.exp %159 : vector<2x384xf32>
    %cst_35 = arith.constant 1.000000e+00 : f32
    %161 = vector.broadcast %cst_35 : f32 to vector<2x384xf32>
    %162 = arith.addf %161, %160 : vector<2x384xf32>
    %163 = arith.divf %161, %162 : vector<2x384xf32>
    %164 = vector.extract_strided_slice %157 {offsets = [0, 384], sizes = [2, 384], strides = [1, 1]} : vector<2x1536xf32> to vector<2x384xf32>
    %165 = arith.negf %164 : vector<2x384xf32>
    %166 = math.exp %165 : vector<2x384xf32>
    %cst_36 = arith.constant 1.000000e+00 : f32
    %167 = vector.broadcast %cst_36 : f32 to vector<2x384xf32>
    %168 = arith.addf %167, %166 : vector<2x384xf32>
    %169 = arith.divf %167, %168 : vector<2x384xf32>
    %170 = vector.extract_strided_slice %157 {offsets = [0, 768], sizes = [2, 384], strides = [1, 1]} : vector<2x1536xf32> to vector<2x384xf32>
    %171 = math.tanh %170 : vector<2x384xf32>
    %172 = vector.extract_strided_slice %157 {offsets = [0, 1152], sizes = [2, 384], strides = [1, 1]} : vector<2x1536xf32> to vector<2x384xf32>
    %173 = arith.negf %172 : vector<2x384xf32>
    %174 = math.exp %173 : vector<2x384xf32>
    %cst_37 = arith.constant 1.000000e+00 : f32
    %175 = vector.broadcast %cst_37 : f32 to vector<2x384xf32>
    %176 = arith.addf %175, %174 : vector<2x384xf32>
    %177 = arith.divf %175, %176 : vector<2x384xf32>
    %178 = arith.mulf %169, %150 : vector<2x384xf32>
    %179 = arith.mulf %163, %171 : vector<2x384xf32>
    %180 = arith.addf %178, %179 : vector<2x384xf32>
    %181 = math.tanh %180 : vector<2x384xf32>
    %182 = arith.mulf %177, %181 : vector<2x384xf32>
    %c6_i32 = arith.constant 6 : i32
    %183 = arith.index_cast %c6_i32 : i32 to index
    %c0_38 = arith.constant 0 : index
    %c0_39 = arith.constant 0 : index
    %184 = vector.load %arg0[%183, %c0_38, %c0_39] : memref<8x2x1536xf32, #tpu.memory_space<vmem>>, vector<1x2x1536xf32>
    %185 = vector.shape_cast %184 : vector<1x2x1536xf32> to vector<2x1536xf32>
    %cst_40 = arith.constant dense<0.000000e+00> : vector<2x1536xf32>
    %186 = tpu.matmul %182, %0, %cst_40 {dimension_numbers = #tpu.dot_dimension_numbers<[1], [0], [0], [1], [0, 0, 1, 1], [], []>} : vector<2x384xf32>, vector<384x1536xf32>, vector<2x1536xf32> -> vector<2x1536xf32>
    %187 = arith.addf %185, %186 : vector<2x1536xf32>
    %188 = vector.extract_strided_slice %187 {offsets = [0, 0], sizes = [2, 384], strides = [1, 1]} : vector<2x1536xf32> to vector<2x384xf32>
    %189 = arith.negf %188 : vector<2x384xf32>
    %190 = math.exp %189 : vector<2x384xf32>
    %cst_41 = arith.constant 1.000000e+00 : f32
    %191 = vector.broadcast %cst_41 : f32 to vector<2x384xf32>
    %192 = arith.addf %191, %190 : vector<2x384xf32>
    %193 = arith.divf %191, %192 : vector<2x384xf32>
    %194 = vector.extract_strided_slice %187 {offsets = [0, 384], sizes = [2, 384], strides = [1, 1]} : vector<2x1536xf32> to vector<2x384xf32>
    %195 = arith.negf %194 : vector<2x384xf32>
    %196 = math.exp %195 : vector<2x384xf32>
    %cst_42 = arith.constant 1.000000e+00 : f32
    %197 = vector.broadcast %cst_42 : f32 to vector<2x384xf32>
    %198 = arith.addf %197, %196 : vector<2x384xf32>
    %199 = arith.divf %197, %198 : vector<2x384xf32>
    %200 = vector.extract_strided_slice %187 {offsets = [0, 768], sizes = [2, 384], strides = [1, 1]} : vector<2x1536xf32> to vector<2x384xf32>
    %201 = math.tanh %200 : vector<2x384xf32>
    %202 = vector.extract_strided_slice %187 {offsets = [0, 1152], sizes = [2, 384], strides = [1, 1]} : vector<2x1536xf32> to vector<2x384xf32>
    %203 = arith.negf %202 : vector<2x384xf32>
    %204 = math.exp %203 : vector<2x384xf32>
    %cst_43 = arith.constant 1.000000e+00 : f32
    %205 = vector.broadcast %cst_43 : f32 to vector<2x384xf32>
    %206 = arith.addf %205, %204 : vector<2x384xf32>
    %207 = arith.divf %205, %206 : vector<2x384xf32>
    %208 = arith.mulf %199, %180 : vector<2x384xf32>
    %209 = arith.mulf %193, %201 : vector<2x384xf32>
    %210 = arith.addf %208, %209 : vector<2x384xf32>
    %211 = math.tanh %210 : vector<2x384xf32>
    %212 = arith.mulf %207, %211 : vector<2x384xf32>
    %c7_i32 = arith.constant 7 : i32
    %213 = arith.index_cast %c7_i32 : i32 to index
    %c0_44 = arith.constant 0 : index
    %c0_45 = arith.constant 0 : index
    %214 = vector.load %arg0[%213, %c0_44, %c0_45] : memref<8x2x1536xf32, #tpu.memory_space<vmem>>, vector<1x2x1536xf32>
    %215 = vector.shape_cast %214 : vector<1x2x1536xf32> to vector<2x1536xf32>
    %cst_46 = arith.constant dense<0.000000e+00> : vector<2x1536xf32>
    %216 = tpu.matmul %212, %0, %cst_46 {dimension_numbers = #tpu.dot_dimension_numbers<[1], [0], [0], [1], [0, 0, 1, 1], [], []>} : vector<2x384xf32>, vector<384x1536xf32>, vector<2x1536xf32> -> vector<2x1536xf32>
    %217 = arith.addf %215, %216 : vector<2x1536xf32>
    %218 = vector.extract_strided_slice %217 {offsets = [0, 0], sizes = [2, 384], strides = [1, 1]} : vector<2x1536xf32> to vector<2x384xf32>
    %219 = arith.negf %218 : vector<2x384xf32>
    %220 = math.exp %219 : vector<2x384xf32>
    %cst_47 = arith.constant 1.000000e+00 : f32
    %221 = vector.broadcast %cst_47 : f32 to vector<2x384xf32>
    %222 = arith.addf %221, %220 : vector<2x384xf32>
    %223 = arith.divf %221, %222 : vector<2x384xf32>
    %224 = vector.extract_strided_slice %217 {offsets = [0, 384], sizes = [2, 384], strides = [1, 1]} : vector<2x1536xf32> to vector<2x384xf32>
    %225 = arith.negf %224 : vector<2x384xf32>
    %226 = math.exp %225 : vector<2x384xf32>
    %cst_48 = arith.constant 1.000000e+00 : f32
    %227 = vector.broadcast %cst_48 : f32 to vector<2x384xf32>
    %228 = arith.addf %227, %226 : vector<2x384xf32>
    %229 = arith.divf %227, %228 : vector<2x384xf32>
    %230 = vector.extract_strided_slice %217 {offsets = [0, 768], sizes = [2, 384], strides = [1, 1]} : vector<2x1536xf32> to vector<2x384xf32>
    %231 = math.tanh %230 : vector<2x384xf32>
    %232 = vector.extract_strided_slice %217 {offsets = [0, 1152], sizes = [2, 384], strides = [1, 1]} : vector<2x1536xf32> to vector<2x384xf32>
    %233 = arith.negf %232 : vector<2x384xf32>
    %234 = math.exp %233 : vector<2x384xf32>
    %cst_49 = arith.constant 1.000000e+00 : f32
    %235 = vector.broadcast %cst_49 : f32 to vector<2x384xf32>
    %236 = arith.addf %235, %234 : vector<2x384xf32>
    %237 = arith.divf %235, %236 : vector<2x384xf32>
    %238 = arith.mulf %229, %210 : vector<2x384xf32>
    %239 = arith.mulf %223, %231 : vector<2x384xf32>
    %240 = arith.addf %238, %239 : vector<2x384xf32>
    %241 = math.tanh %240 : vector<2x384xf32>
    %242 = arith.mulf %237, %241 : vector<2x384xf32>
    %c8_i32 = arith.constant 8 : i32
    %c0_50 = arith.constant 0 : index
    %c0_51 = arith.constant 0 : index
    %243 = vector.load %arg2[%c0_50, %c0_51] : memref<384x80xf32, #tpu.memory_space<vmem>>, vector<384x80xf32>
    %cst_52 = arith.constant dense<0.000000e+00> : vector<2x80xf32>
    %244 = tpu.matmul %242, %243, %cst_52 {dimension_numbers = #tpu.dot_dimension_numbers<[1], [0], [0], [1], [0, 0, 1, 1], [], []>} : vector<2x384xf32>, vector<384x80xf32>, vector<2x80xf32> -> vector<2x80xf32>
    %c0_53 = arith.constant 0 : index
    %c0_54 = arith.constant 0 : index
    %245 = vector.load %arg3[%c0_53, %c0_54] : memref<1x80xf32, #tpu.memory_space<vmem>>, vector<1x80xf32>
    %246 = vector.broadcast %245 : vector<1x80xf32> to vector<2x80xf32>
    %247 = arith.addf %244, %246 : vector<2x80xf32>
    %c0_55 = arith.constant 0 : index
    %c0_56 = arith.constant 0 : index
    %248 = vector.load %arg4[%c0_55, %c0_56] : memref<80x20xf32, #tpu.memory_space<vmem>>, vector<80x20xf32>
    %cst_57 = arith.constant dense<0.000000e+00> : vector<2x20xf32>
    %249 = tpu.matmul %247, %248, %cst_57 {dimension_numbers = #tpu.dot_dimension_numbers<[1], [0], [0], [1], [0, 0, 1, 1], [], []>} : vector<2x80xf32>, vector<80x20xf32>, vector<2x20xf32> -> vector<2x20xf32>
    %c0_58 = arith.constant 0 : index
    %c0_59 = arith.constant 0 : index
    %250 = vector.load %arg5[%c0_58, %c0_59] : memref<1x20xf32, #tpu.memory_space<vmem>>, vector<1x20xf32>
    %251 = vector.broadcast %250 : vector<1x20xf32> to vector<2x20xf32>
    %252 = arith.addf %249, %251 : vector<2x20xf32>
    %c0_60 = arith.constant 0 : index
    %c0_61 = arith.constant 0 : index
    %253 = vector.load %arg6[%c0_60, %c0_61] : memref<20x10xf32, #tpu.memory_space<vmem>>, vector<20x10xf32>
    %cst_62 = arith.constant dense<0.000000e+00> : vector<2x10xf32>
    %254 = tpu.matmul %252, %253, %cst_62 {dimension_numbers = #tpu.dot_dimension_numbers<[1], [0], [0], [1], [0, 0, 1, 1], [], []>} : vector<2x20xf32>, vector<20x10xf32>, vector<2x10xf32> -> vector<2x10xf32>
    %c0_63 = arith.constant 0 : index
    %c0_64 = arith.constant 0 : index
    %255 = vector.load %arg7[%c0_63, %c0_64] : memref<1x10xf32, #tpu.memory_space<vmem>>, vector<1x10xf32>
    %256 = vector.broadcast %255 : vector<1x10xf32> to vector<2x10xf32>
    %257 = arith.addf %254, %256 : vector<2x10xf32>
    %cst_65 = arith.constant dense<0xFF800000> : vector<2xf32>
    %258 = vector.multi_reduction <maximumf>, %257, %cst_65 [1] : vector<2x10xf32> to vector<2xf32>
    %259 = vector.shape_cast %258 : vector<2xf32> to vector<2x1xf32>
    %260 = vector.broadcast %259 : vector<2x1xf32> to vector<2x10xf32>
    %261 = arith.subf %257, %260 : vector<2x10xf32>
    %262 = math.exp %261 : vector<2x10xf32>
    %cst_66 = arith.constant dense<0.000000e+00> : vector<2xf32>
    %263 = vector.multi_reduction <add>, %262, %cst_66 [1] : vector<2x10xf32> to vector<2xf32>
    %264 = vector.shape_cast %263 : vector<2xf32> to vector<2x1xf32>
    %265 = vector.broadcast %264 : vector<2x1xf32> to vector<2x10xf32>
    %266 = arith.divf %262, %265 : vector<2x10xf32>
    %c0_67 = arith.constant 0 : index
    %c0_68 = arith.constant 0 : index
    %267 = vector.load %arg8[%c0_67, %c0_68] : memref<2x10xf32, #tpu.memory_space<vmem>>, vector<2x10xf32>
    tpu.vector_store %arg8[%c0_67, %c0_68], %266 {strides = array<i32>} : memref<2x10xf32, #tpu.memory_space<vmem>>, vector<2x10xf32>,
    return
  }
}

</mosaic_0001>

<bundles_post_ra>
// kernel: lstm_model_forward.1
= control target key start
LH: loop header
LB: loop body
LE: loop exit
PB: predicated region body
PF: predicated region fallthrough
CT: control target
= control target key end

     0   :  { %13 = vsyncpa [#allocation3], 0  ;;  %s17789_s0 = inlined_call_operand.vmem [shape: f32[8,2,1536], index: 0, kind: input, shape index: {}]   ;;  %s17790_s1 = inlined_call_operand.hbm [shape: f32[384,1536], index: 1, kind: input, shape index: {}]   ;;  %s17791_s2 = inlined_call_operand.vmem [shape: f32[384,80], index: 2, kind: input, shape index: {}]   ;;  %s17792_s3 = inlined_call_operand.hbm [shape: f32[1,80], index: 3, kind: input, shape index: {}]   ;;  %s17793_s4 = inlined_call_operand.vmem [shape: f32[80,20], index: 4, kind: input, shape index: {}]   ;;  %s17794_s5 = inlined_call_operand.hbm [shape: f32[1,20], index: 5, kind: input, shape index: {}]   ;;  %s17795_s6 = inlined_call_operand.vmem [shape: f32[20,10], index: 6, kind: input, shape index: {}]   ;;  %s17796_s7 = inlined_call_operand.hbm [shape: f32[1,10], index: 7, kind: input, shape index: {}]   ;;  %s17797_s8 = inlined_call_operand.hbm [shape: f32[2,10], index: 8, kind: output, shape index: {}]  }
   0x1   :  { %14 = vsyncpa [#allocation6], 0 }
   0x2   :  { %15 = vsyncpa [#allocation9], 0 }
   0x3   :  { %16 = vsyncpa [#allocation4], 0  ;;  %s14139_s27 = smov [#allocation5]   ;;  %s14140_s29 = smov [#allocation2]  }
   0x4   :  { %s39_s28 = sshll.u32 %s14139_s27, 4  ;;  %s24_s30 = sshll.u32 %s14140_s29, 4  ;;  %s40_s28 = int_to_ptr.vmem [resolvable:$true] %s39_s28  ;;  %s14195_s30 = int_to_ptr.vmem [resolvable:$true] %s24_s30 }
   0x5   :  { %s14021_s11 = scalar_lea.hbm %s17792_s3, 16 }
   0x6   :  { %p14022_p0 = scmp.ne.s32.totalorder %s17792_s3, %s14021_s11  ;;  %p14025_p1 = scmp.lt.u32.totalorder %s14021_s11, %s17792_s3 }
   0x8   :  { %p14027_p2 = pnand %p14025_p1, %p14022_p0 }
   0xa   :  { %14030 = shalt.err (!%p14027_p2)
}
   0xb   :  { %s14031_s16 = scalar_lea.vmem %s40_s28, 16  ;;  %s14035_s17 = scalar_lea.vmem %s40_s28, 32 }
   0xc   :  { %p14032_p3 = scmp.ne.s32.totalorder %s40_s28, %s14031_s16  ;;  %p14036_p4 = scmp.lt.s32.totalorder %s40_s28, %s40_s28 }
   0xd   :  { %p14037_p5 = scmp.lt.s32.totalorder %s14035_s17, %s14031_s16 }
   0xf   :  { %p14038_p6 = por %p14037_p5, %p14036_p4 }
  0x11   :  { %p14039_p7 = pnand %p14038_p6, %p14032_p3 }
  0x13   :  { %14042 = shalt.err (!%p14039_p7)
}
  0x14   :  { %42 = dma.hbm_to_vmem [thread:$0]  %s17792_s3, 16, %s40_s28, [#allocation6]  }
  0x15   :  { %s14043_s22 = scalar_lea.hbm %s17790_s1, 73728 }
  0x16   :  { %p14044_p8 = scmp.ne.s32.totalorder %s17790_s1, %s14043_s22  ;;  %p14047_p9 = scmp.lt.u32.totalorder %s14043_s22, %s17790_s1 }
  0x18   :  { %p14049_p10 = pnand %p14047_p9, %p14044_p8 }
  0x1a   :  { %14052 = shalt.err (!%p14049_p10)
}
  0x1b   :  { %s14053_s27 = scalar_lea.vmem %s14195_s30, 73728  ;;  %p14058_p12 = scmp.lt.s32.totalorder %s14195_s30, %s14195_s30 }
  0x1c   :  { %p14054_p11 = scmp.ne.s32.totalorder %s14195_s30, %s14053_s27  ;;  %p14059_p13 = scmp.lt.s32.totalorder %s14053_s27, %s14053_s27 }
  0x1e   :  { %p14060_p0 = por %p14059_p13, %p14058_p12 }
  0x20   :  { %p14061_p1 = pnand %p14060_p0, %p14054_p11 }
  0x22   :  { %14064 = shalt.err (!%p14061_p1)
}
  0x23   :  { %s14141_s3 = smov 1536   ;;  %s14142_s28 = smov 96  }
  0x24   :  { %30 = dma.hbm_to_vmem [thread:$0]  %s17790_s1, 73728, %s14195_s30, [#allocation3], %s14141_s3, %s14141_s3, %s14142_s28  }
  0x25   :  { %s14143_s10 = smov [#allocation7]   ;;  %s14144_s12 = smov [#allocation8]  }
  0x26   :  { %s51_s11 = sshll.u32 %s14143_s10, 4  ;;  %s63_s13 = sshll.u32 %s14144_s12, 4  ;;  %s52_s11 = int_to_ptr.vmem [resolvable:$true] %s51_s11  ;;  %s64_s13 = int_to_ptr.vmem [resolvable:$true] %s63_s13 }
  0x27   :  { %s14065_s16 = scalar_lea.hbm %s17794_s5, 16 }
  0x28   :  { %p14066_p2 = scmp.ne.s32.totalorder %s17794_s5, %s14065_s16  ;;  %p14069_p3 = scmp.lt.u32.totalorder %s14065_s16, %s17794_s5 }
  0x2a   :  { %p14071_p4 = pnand %p14069_p3, %p14066_p2 }
  0x2c   :  { %14074 = shalt.err (!%p14071_p4)
}
  0x2d   :  { %s14075_s1 = scalar_lea.vmem %s52_s11, 16  ;;  %s14079_s30 = scalar_lea.vmem %s52_s11, 32 }
  0x2e   :  { %p14076_p5 = scmp.ne.s32.totalorder %s52_s11, %s14075_s1  ;;  %p14080_p6 = scmp.lt.s32.totalorder %s52_s11, %s52_s11 }
  0x2f   :  { %p14081_p7 = scmp.lt.s32.totalorder %s14079_s30, %s14075_s1 }
  0x31   :  { %p14082_p8 = por %p14081_p7, %p14080_p6 }
  0x33   :  { %p14083_p9 = pnand %p14082_p8, %p14076_p5 }
  0x35   :  { %14086 = shalt.err (!%p14083_p9)
}
  0x36   :  { %54 = dma.hbm_to_vmem [thread:$0]  %s17794_s5, 16, %s52_s11, [#allocation6]  }
  0x37   :  { %s14087_s25 = scalar_lea.hbm %s17796_s7, 16 }
  0x38   :  { %p14088_p10 = scmp.ne.s32.totalorder %s17796_s7, %s14087_s25  ;;  %p14091_p11 = scmp.lt.u32.totalorder %s14087_s25, %s17796_s7 }
  0x3a   :  { %p14093_p12 = pnand %p14091_p11, %p14088_p10 }
  0x3c   :  { %14096 = shalt.err (!%p14093_p12)
}
  0x3d   :  { %s14097_s29 = scalar_lea.vmem %s64_s13, 16  ;;  %s14101_s9 = scalar_lea.vmem %s64_s13, 32 }
  0x3e   :  { %p14098_p13 = scmp.ne.s32.totalorder %s64_s13, %s14097_s29  ;;  %p14102_p0 = scmp.lt.s32.totalorder %s64_s13, %s64_s13 }
  0x3f   :  { %p14103_p1 = scmp.lt.s32.totalorder %s14101_s9, %s14097_s29 }
  0x41   :  { %p14104_p2 = por %p14103_p1, %p14102_p0 }
  0x43   :  { %p14105_p3 = pnand %p14104_p2, %p14098_p13 }
  0x45   :  { %14108 = shalt.err (!%p14105_p3)
}
  0x46   :  { %66 = dma.hbm_to_vmem [thread:$0]  %s17796_s7, 16, %s64_s13, [#allocation9]  }
  0x47   :  { %14131 = dma.done.wait [#allocation3], 73728  }
  0x48   :  { %14132 = vsyncadd [#allocation3], 4294893568 }
  0x49   :  { %14133 = dma.done.wait [#allocation6], 32  }
  0x4a   :  { %14134 = vsyncadd [#allocation6], 4294967264 }
  0x4b   :  { %14135 = dma.done.wait [#allocation9], 16  }
  0x4c   :  { %14136 = vsyncadd [#allocation9], 4294967280  ;;  %v17798_v0 = vmov 0.0   ;;  %v80_v1 = vld [vmem:[#allocation2 + $0x8] sm:$0xff]  ;;  %v82_v3 = vld [vmem:[#allocation2 + $0x18] sm:$0xff]  ;;  %vm1589_vm0 = vcmask 1041408  }
  0x4d   :  { %722 = vmatprep.mubr.f32.mxu0 %v17798_v0  ;;  %864 = vmatprep.mubr.f32.mxu1 %v17798_v0  ;;  %v92_v2 = vld [vmem:[#allocation2 + $0x68] sm:$0xff]  ;;  %v94_v5 = vld [vmem:[#allocation2 + $0x78] sm:$0xff]  ;;  %v79_v6 = vld [vmem:[#allocation2] sm:$0xff]  ;;  %vm1601_vm1 = vcmask 1043456   ;;  %vm14148_vm2 = vmmov 0   ;;  %vm8724_vm3 = vcmask 654336  }
  0x4e   :  { %v14252_v4 = vpack.c.bf16 %v92_v2, %v80_v1  ;;  %v91_v7 = vld [vmem:[#allocation2 + $0x60] sm:$0xff]  ;;  %v14254_v8 = vpack.c.bf16 %v94_v5, %v82_v3  ;;  %v81_v10 = vld [vmem:[#allocation2 + $0x10] sm:$0xff]  ;;  %v104_v12 = vld [vmem:[#allocation2 + $0xc8] sm:$0xff]  ;;  %vm8808_vm4 = vcmask 162816   ;;  %vm8885_vm5 = vcmask 74752  }
  0x4f   :  { %v14256_v9 = vpack.c.bf16 %v91_v7, %v79_v6  ;;  %v93_v11 = vld [vmem:[#allocation2 + $0x70] sm:$0xff]  ;;  %v116_v14 = vld [vmem:[#allocation2 + $0x128] sm:$0xff]  ;;  %v106_v15 = vld [vmem:[#allocation2 + $0xd8] sm:$0xff] }
  0x50   :  { %18424 = vst [vmem:[#allocation15_spill] sm:$0xff] %v14252_v4  ;;  %18425 = vst [vmem:[#allocation16_spill] sm:$0xff] %v14254_v8  ;;  %9101 = vmatprep.subr.bf16.mxu0 %v14252_v4  ;;  %v14259_v13 = vpack.c.bf16 %v93_v11, %v81_v10  ;;  %v118_v16 = vld [vmem:[#allocation2 + $0x138] sm:$0xff]  ;;  %9197 = vmatprep.subr.bf16.mxu1 %v14254_v8  ;;  %v14263_v17 = vpack.c.bf16 %v116_v14, %v104_v12  ;;  %v103_v19 = vld [vmem:[#allocation2 + $0xc0] sm:$0xff] }
  0x51   :  { %18426 = vst [vmem:[#allocation17_spill] sm:$0xff] %v14256_v9  ;;  %9103 = vmatpush1.bf16.msra.mxu0 %v14256_v9  ;;  %v14265_v18 = vpack.c.bf16 %v118_v16, %v106_v15  ;;  %v115_v20 = vld [vmem:[#allocation2 + $0x120] sm:$0xff]  ;;  %v105_v21 = vld [vmem:[#allocation2 + $0xd0] sm:$0xff]  ;;  %v128_v24 = vld [vmem:[#allocation2 + $0x188] sm:$0xff] }
  0x52   :  { %18427 = vst [vmem:[#allocation18_spill] sm:$0xff] %v14259_v13  ;;  %18428 = vst [vmem:[#allocation19_spill] sm:$0xff] %v14263_v17  ;;  %9199 = vmatpush1.bf16.msra.mxu1 %v14259_v13  ;;  %v14268_v22 = vpack.c.bf16 %v115_v20, %v103_v19  ;;  %v117_v23 = vld [vmem:[#allocation2 + $0x130] sm:$0xff]  ;;  %v140_v25 = vld [vmem:[#allocation2 + $0x1e8] sm:$0xff]  ;;  %9105 = vmatprep.subr.bf16.mxu0 %v14263_v17 }
  0x53   :  { %18429 = vst [vmem:[#allocation20_spill] sm:$0xff] %v14265_v18  ;;  %9201 = vmatprep.subr.bf16.mxu1 %v14265_v18  ;;  %v14272_v26 = vpack.c.bf16 %v117_v23, %v105_v21  ;;  %v14274_v27 = vpack.c.bf16 %v140_v25, %v128_v24  ;;  %v130_v28 = vld [vmem:[#allocation2 + $0x198] sm:$0xff]  ;;  %v127_v30 = vld [vmem:[#allocation2 + $0x180] sm:$0xff]  ;;  %v129_v33 = vld [vmem:[#allocation2 + $0x190] sm:$0xff] }
  0x54   :  { %18430 = vst [vmem:[#allocation21_spill] sm:$0xff] %v14268_v22  ;;  %v142_v29 = vld [vmem:[#allocation2 + $0x1f8] sm:$0xff]  ;;  %v139_v32 = vld [vmem:[#allocation2 + $0x1e0] sm:$0xff]  ;;  %v141_v34 = vld [vmem:[#allocation2 + $0x1f0] sm:$0xff] }
  0x55   :  { %18431 = vst [vmem:[#allocation22_spill] sm:$0xff] %v14272_v26  ;;  %18432 = vst [vmem:[#allocation23_spill] sm:$0xff] %v14274_v27  ;;  %v14276_v31 = vpack.c.bf16 %v142_v29, %v130_v28  ;;  %9107 = vmatpush1.bf16.msra.mxu0 %v14268_v22  ;;  %v14279_v35 = vpack.c.bf16 %v139_v32, %v127_v30  ;;  %v152_v36 = vld [vmem:[#allocation2 + $0x248] sm:$0xff]  ;;  %v154_v38 = vld [vmem:[#allocation2 + $0x258] sm:$0xff]  ;;  %v14283_v39 = vpack.c.bf16 %v141_v34, %v129_v33 }
  0x56   :  { %v164_v37 = vld [vmem:[#allocation2 + $0x2a8] sm:$0xff]  ;;  %9203 = vmatpush1.bf16.msra.mxu1 %v14272_v26  ;;  %9109 = vmatprep.subr.bf16.mxu0 %v14274_v27  ;;  %v166_v41 = vld [vmem:[#allocation2 + $0x2b8] sm:$0xff]  ;;  %v151_v42 = vld [vmem:[#allocation2 + $0x240] sm:$0xff] }
  0x57   :  { %18433 = vst [vmem:[#allocation24_spill] sm:$0xff] %v14276_v31  ;;  %18434 = vst [vmem:[#allocation25_spill] sm:$0xff] %v14279_v35  ;;  %v14285_v40 = vpack.c.bf16 %v164_v37, %v152_v36  ;;  %v163_v43 = vld [vmem:[#allocation2 + $0x2a0] sm:$0xff]  ;;  %9205 = vmatprep.subr.bf16.mxu1 %v14276_v31  ;;  %v14288_v44 = vpack.c.bf16 %v166_v41, %v154_v38  ;;  %v153_v45 = vld [vmem:[#allocation2 + $0x250] sm:$0xff] }
  0x58   :  { %18435 = vst [vmem:[#allocation26_spill] sm:$0xff] %v14283_v39  ;;  %v165_v46 = vld [vmem:[#allocation2 + $0x2b0] sm:$0xff]  ;;  %v176_v47 = vld [vmem:[#allocation2 + $0x308] sm:$0xff]  ;;  %v178_v49 = vld [vmem:[#allocation2 + $0x318] sm:$0xff]  ;;  %v14291_v51 = vpack.c.bf16 %v163_v43, %v151_v42 }
  0x59   :  { %18436 = vst [vmem:[#allocation27_spill] sm:$0xff] %v14285_v40  ;;  %18437 = vst [vmem:[#allocation28_spill] sm:$0xff] %v14288_v44  ;;  %v188_v48 = vld [vmem:[#allocation2 + $0x368] sm:$0xff]  ;;  %v190_v50 = vld [vmem:[#allocation2 + $0x378] sm:$0xff]  ;;  %9111 = vmatpush1.bf16.msra.mxu0 %v14279_v35  ;;  %v14295_v52 = vpack.c.bf16 %v165_v46, %v153_v45 }
  0x5a   :  { %18438 = vst [vmem:[#allocation29_spill] sm:$0xff] %v14291_v51  ;;  %9207 = vmatpush1.bf16.msra.mxu1 %v14283_v39  ;;  %9113 = vmatprep.subr.bf16.mxu0 %v14285_v40  ;;  %v14297_v53 = vpack.c.bf16 %v188_v48, %v176_v47  ;;  %v175_v54 = vld [vmem:[#allocation2 + $0x300] sm:$0xff]  ;;  %v177_v56 = vld [vmem:[#allocation2 + $0x310] sm:$0xff]  ;;  %v14300_v57 = vpack.c.bf16 %v190_v50, %v178_v49  ;;  %v200_v59 = vld [vmem:[#allocation2 + $0x3c8] sm:$0xff] }
  0x5b   :  { %18439 = vst [vmem:[#allocation30_spill] sm:$0xff] %v14295_v52  ;;  %v187_v55 = vld [vmem:[#allocation2 + $0x360] sm:$0xff]  ;;  %9209 = vmatprep.subr.bf16.mxu1 %v14288_v44  ;;  %v189_v58 = vld [vmem:[#allocation2 + $0x370] sm:$0xff]  ;;  %v212_v60 = vld [vmem:[#allocation2 + $0x428] sm:$0xff] }
  0x5c   :  { %18440 = vst [vmem:[#allocation31_spill] sm:$0xff] %v14297_v53  ;;  %18441 = vst [vmem:[#allocation32_spill] sm:$0xff] %v14300_v57  ;;  %v202_v61 = vld [vmem:[#allocation2 + $0x3d8] sm:$0xff]  ;;  %v14303_v63 = vpack.c.bf16 %v187_v55, %v175_v54  ;;  %v14307_v1 = vpack.c.bf16 %v189_v58, %v177_v56  ;;  %v14309_v2 = vpack.c.bf16 %v212_v60, %v200_v59  ;;  %v199_v3 = vld [vmem:[#allocation2 + $0x3c0] sm:$0xff] }
  0x5d   :  { %v214_v62 = vld [vmem:[#allocation2 + $0x438] sm:$0xff]  ;;  %9115 = vmatpush1.bf16.msra.mxu0 %v14291_v51  ;;  %v211_v5 = vld [vmem:[#allocation2 + $0x420] sm:$0xff]  ;;  %v201_v6 = vld [vmem:[#allocation2 + $0x3d0] sm:$0xff] }
  0x5e   :  { %18442 = vst [vmem:[#allocation33_spill] sm:$0xff] %v14303_v63  ;;  %9211 = vmatpush1.bf16.msra.mxu1 %v14295_v52  ;;  %9117 = vmatprep.subr.bf16.mxu0 %v14297_v53  ;;  %18443 = vst [vmem:[#allocation34_spill] sm:$0xff] %v14307_v1  ;;  %v14312_v7 = vpack.c.bf16 %v214_v62, %v202_v61  ;;  %v213_v10 = vld [vmem:[#allocation2 + $0x430] sm:$0xff]  ;;  %v224_v11 = vld [vmem:[#allocation2 + $0x488] sm:$0xff]  ;;  %v14315_v16 = vpack.c.bf16 %v211_v5, %v199_v3 }
  0x5f   :  { %18444 = vst [vmem:[#allocation35_spill] sm:$0xff] %v14309_v2  ;;  %9213 = vmatprep.subr.bf16.mxu1 %v14300_v57  ;;  %v236_v12 = vld [vmem:[#allocation2 + $0x4e8] sm:$0xff]  ;;  %v226_v14 = vld [vmem:[#allocation2 + $0x498] sm:$0xff]  ;;  %v14319_v19 = vpack.c.bf16 %v213_v10, %v201_v6  ;;  %v223_v21 = vld [vmem:[#allocation2 + $0x480] sm:$0xff] }
  0x60   :  { %18445 = vst [vmem:[#allocation36_spill] sm:$0xff] %v14312_v7  ;;  %v238_v15 = vld [vmem:[#allocation2 + $0x4f8] sm:$0xff]  ;;  %18446 = vst [vmem:[#allocation37_spill] sm:$0xff] %v14315_v16  ;;  %v14321_v20 = vpack.c.bf16 %v236_v12, %v224_v11  ;;  %v235_v23 = vld [vmem:[#allocation2 + $0x4e0] sm:$0xff] }
  0x61   :  { %9119 = vmatpush1.bf16.msra.mxu0 %v14303_v63  ;;  %18447 = vst [vmem:[#allocation38_spill] sm:$0xff] %v14319_v19  ;;  %v225_v24 = vld [vmem:[#allocation2 + $0x490] sm:$0xff]  ;;  %v14324_v25 = vpack.c.bf16 %v238_v15, %v226_v14  ;;  %v248_v29 = vld [vmem:[#allocation2 + $0x548] sm:$0xff]  ;;  %v250_v32 = vld [vmem:[#allocation2 + $0x558] sm:$0xff]  ;;  %v14327_v34 = vpack.c.bf16 %v235_v23, %v223_v21 }
  0x62   :  { %9215 = vmatpush1.bf16.msra.mxu1 %v14307_v1  ;;  %9121 = vmatprep.subr.bf16.mxu0 %v14309_v2  ;;  %18448 = vst [vmem:[#allocation39_spill] sm:$0xff] %v14321_v20  ;;  %v237_v28 = vld [vmem:[#allocation2 + $0x4f0] sm:$0xff]  ;;  %v260_v30 = vld [vmem:[#allocation2 + $0x5a8] sm:$0xff]  ;;  %v262_v33 = vld [vmem:[#allocation2 + $0x5b8] sm:$0xff] }
  0x63   :  { %9217 = vmatprep.subr.bf16.mxu1 %v14312_v7  ;;  %18449 = vst [vmem:[#allocation40_spill] sm:$0xff] %v14324_v25  ;;  %18450 = vst [vmem:[#allocation41_spill] sm:$0xff] %v14327_v34  ;;  %v14331_v36 = vpack.c.bf16 %v237_v28, %v225_v24  ;;  %v14333_v37 = vpack.c.bf16 %v260_v30, %v248_v29  ;;  %v247_v38 = vld [vmem:[#allocation2 + $0x540] sm:$0xff]  ;;  %v249_v42 = vld [vmem:[#allocation2 + $0x550] sm:$0xff]  ;;  %v14336_v43 = vpack.c.bf16 %v262_v33, %v250_v32 }
  0x64   :  { %v259_v41 = vld [vmem:[#allocation2 + $0x5a0] sm:$0xff]  ;;  %v261_v45 = vld [vmem:[#allocation2 + $0x5b0] sm:$0xff]  ;;  %v272_v46 = vld [vmem:[#allocation2 + $0x608] sm:$0xff] }
  0x65   :  { %9123 = vmatpush1.bf16.msra.mxu0 %v14315_v16  ;;  %18451 = vst [vmem:[#allocation42_spill] sm:$0xff] %v14331_v36  ;;  %18452 = vst [vmem:[#allocation43_spill] sm:$0xff] %v14333_v37  ;;  %v284_v47 = vld [vmem:[#allocation2 + $0x668] sm:$0xff]  ;;  %v274_v48 = vld [vmem:[#allocation2 + $0x618] sm:$0xff]  ;;  %v14339_v50 = vpack.c.bf16 %v259_v41, %v247_v38  ;;  %v14343_v54 = vpack.c.bf16 %v261_v45, %v249_v42 }
  0x66   :  { %9219 = vmatpush1.bf16.msra.mxu1 %v14319_v19  ;;  %9125 = vmatprep.subr.bf16.mxu0 %v14321_v20  ;;  %18453 = vst [vmem:[#allocation44_spill] sm:$0xff] %v14336_v43  ;;  %v286_v49 = vld [vmem:[#allocation2 + $0x678] sm:$0xff]  ;;  %v14345_v55 = vpack.c.bf16 %v284_v47, %v272_v46  ;;  %v271_v56 = vld [vmem:[#allocation2 + $0x600] sm:$0xff]  ;;  %v273_v59 = vld [vmem:[#allocation2 + $0x610] sm:$0xff] }
  0x67   :  { %9221 = vmatprep.subr.bf16.mxu1 %v14324_v25  ;;  %18454 = vst [vmem:[#allocation45_spill] sm:$0xff] %v14339_v50  ;;  %18455 = vst [vmem:[#allocation46_spill] sm:$0xff] %v14343_v54  ;;  %v283_v58 = vld [vmem:[#allocation2 + $0x660] sm:$0xff]  ;;  %v14348_v60 = vpack.c.bf16 %v286_v49, %v274_v48  ;;  %v285_v61 = vld [vmem:[#allocation2 + $0x670] sm:$0xff] }
  0x68   :  { %18456 = vst [vmem:[#allocation47_spill] sm:$0xff] %v14345_v55  ;;  %v296_v62 = vld [vmem:[#allocation2 + $0x6c8] sm:$0xff]  ;;  %v298_v5 = vld [vmem:[#allocation2 + $0x6d8] sm:$0xff]  ;;  %v14351_v10 = vpack.c.bf16 %v283_v58, %v271_v56  ;;  %v14355_v11 = vpack.c.bf16 %v285_v61, %v273_v59  ;;  %v295_v14 = vld [vmem:[#allocation2 + $0x6c0] sm:$0xff] }
  0x69   :  { %9127 = vmatpush1.bf16.msra.mxu0 %v14327_v34  ;;  %18457 = vst [vmem:[#allocation48_spill] sm:$0xff] %v14348_v60  ;;  %v308_v3 = vld [vmem:[#allocation2 + $0x728] sm:$0xff]  ;;  %v310_v6 = vld [vmem:[#allocation2 + $0x738] sm:$0xff]  ;;  %v307_v15 = vld [vmem:[#allocation2 + $0x720] sm:$0xff] }
  0x6a   :  { %9223 = vmatpush1.bf16.msra.mxu1 %v14331_v36  ;;  %9129 = vmatprep.subr.bf16.mxu0 %v14333_v37  ;;  %18458 = vst [vmem:[#allocation49_spill] sm:$0xff] %v14351_v10  ;;  %18459 = vst [vmem:[#allocation50_spill] sm:$0xff] %v14355_v11  ;;  %v14357_v12 = vpack.c.bf16 %v308_v3, %v296_v62  ;;  %v297_v21 = vld [vmem:[#allocation2 + $0x6d0] sm:$0xff]  ;;  %v14360_v23 = vpack.c.bf16 %v310_v6, %v298_v5  ;;  %v320_v28 = vld [vmem:[#allocation2 + $0x788] sm:$0xff] }
  0x6b   :  { %9225 = vmatprep.subr.bf16.mxu1 %v14336_v43  ;;  %v309_v24 = vld [vmem:[#allocation2 + $0x730] sm:$0xff]  ;;  %v332_v29 = vld [vmem:[#allocation2 + $0x7e8] sm:$0xff]  ;;  %v322_v30 = vld [vmem:[#allocation2 + $0x798] sm:$0xff]  ;;  %v14363_v33 = vpack.c.bf16 %v307_v15, %v295_v14 }
  0x6c   :  { %18460 = vst [vmem:[#allocation51_spill] sm:$0xff] %v14357_v12  ;;  %18461 = vst [vmem:[#allocation52_spill] sm:$0xff] %v14360_v23  ;;  %v334_v32 = vld [vmem:[#allocation2 + $0x7f8] sm:$0xff]  ;;  %v14367_v38 = vpack.c.bf16 %v309_v24, %v297_v21  ;;  %v14369_v41 = vpack.c.bf16 %v332_v29, %v320_v28  ;;  %v319_v42 = vld [vmem:[#allocation2 + $0x780] sm:$0xff] }
  0x6d   :  { %9131 = vmatpush1.bf16.msra.mxu0 %v14339_v50  ;;  %18462 = vst [vmem:[#allocation53_spill] sm:$0xff] %v14363_v33  ;;  %v331_v45 = vld [vmem:[#allocation2 + $0x7e0] sm:$0xff]  ;;  %v321_v46 = vld [vmem:[#allocation2 + $0x790] sm:$0xff]  ;;  %v14372_v47 = vpack.c.bf16 %v334_v32, %v322_v30  ;;  %v344_v49 = vld [vmem:[#allocation2 + $0x848] sm:$0xff] }
  0x6e   :  { %9227 = vmatpush1.bf16.msra.mxu1 %v14343_v54  ;;  %9133 = vmatprep.subr.bf16.mxu0 %v14345_v55  ;;  %18463 = vst [vmem:[#allocation54_spill] sm:$0xff] %v14367_v38  ;;  %18464 = vst [vmem:[#allocation55_spill] sm:$0xff] %v14369_v41  ;;  %v333_v48 = vld [vmem:[#allocation2 + $0x7f0] sm:$0xff]  ;;  %v356_v56 = vld [vmem:[#allocation2 + $0x8a8] sm:$0xff]  ;;  %v14375_v61 = vpack.c.bf16 %v331_v45, %v319_v42 }
  0x6f   :  { %9229 = vmatprep.subr.bf16.mxu1 %v14348_v60  ;;  %18465 = vst [vmem:[#allocation56_spill] sm:$0xff] %v14372_v47  ;;  %v346_v58 = vld [vmem:[#allocation2 + $0x858] sm:$0xff]  ;;  %v14379_v62 = vpack.c.bf16 %v333_v48, %v321_v46  ;;  %v14381_v3 = vpack.c.bf16 %v356_v56, %v344_v49  ;;  %v343_v5 = vld [vmem:[#allocation2 + $0x840] sm:$0xff]  ;;  %v345_v14 = vld [vmem:[#allocation2 + $0x850] sm:$0xff] }
  0x70   :  { %v358_v59 = vld [vmem:[#allocation2 + $0x8b8] sm:$0xff]  ;;  %18466 = vst [vmem:[#allocation57_spill] sm:$0xff] %v14375_v61  ;;  %v355_v6 = vld [vmem:[#allocation2 + $0x8a0] sm:$0xff]  ;;  %v357_v21 = vld [vmem:[#allocation2 + $0x8b0] sm:$0xff] }
  0x71   :  { %9135 = vmatpush1.bf16.msra.mxu0 %v14351_v10  ;;  %18467 = vst [vmem:[#allocation58_spill] sm:$0xff] %v14379_v62  ;;  %18468 = vst [vmem:[#allocation59_spill] sm:$0xff] %v14381_v3  ;;  %v14384_v15 = vpack.c.bf16 %v358_v59, %v346_v58  ;;  %v368_v24 = vld [vmem:[#allocation2 + $0x908] sm:$0xff]  ;;  %v370_v29 = vld [vmem:[#allocation2 + $0x918] sm:$0xff]  ;;  %v14387_v32 = vpack.c.bf16 %v355_v6, %v343_v5  ;;  %v14391_v42 = vpack.c.bf16 %v357_v21, %v345_v14 }
  0x72   :  { %9231 = vmatpush1.bf16.msra.mxu1 %v14355_v11  ;;  %9137 = vmatprep.subr.bf16.mxu0 %v14357_v12  ;;  %v380_v28 = vld [vmem:[#allocation2 + $0x968] sm:$0xff]  ;;  %v382_v30 = vld [vmem:[#allocation2 + $0x978] sm:$0xff]  ;;  %v367_v46 = vld [vmem:[#allocation2 + $0x900] sm:$0xff] }
  0x73   :  { %9233 = vmatprep.subr.bf16.mxu1 %v14360_v23  ;;  %18469 = vst [vmem:[#allocation60_spill] sm:$0xff] %v14384_v15  ;;  %18470 = vst [vmem:[#allocation61_spill] sm:$0xff] %v14387_v32  ;;  %v14393_v45 = vpack.c.bf16 %v380_v28, %v368_v24  ;;  %v379_v48 = vld [vmem:[#allocation2 + $0x960] sm:$0xff]  ;;  %v369_v49 = vld [vmem:[#allocation2 + $0x910] sm:$0xff]  ;;  %v14396_v56 = vpack.c.bf16 %v382_v30, %v370_v29 }
  0x74   :  { %18471 = vst [vmem:[#allocation62_spill] sm:$0xff] %v14391_v42  ;;  %v381_v58 = vld [vmem:[#allocation2 + $0x970] sm:$0xff]  ;;  %v392_v59 = vld [vmem:[#allocation2 + $0x9c8] sm:$0xff]  ;;  %v394_v5 = vld [vmem:[#allocation2 + $0x9d8] sm:$0xff] }
  0x75   :  { %9139 = vmatpush1.bf16.msra.mxu0 %v14363_v33  ;;  %18472 = vst [vmem:[#allocation63_spill] sm:$0xff] %v14393_v45  ;;  %18473 = vst [vmem:[#allocation64_spill] sm:$0xff] %v14396_v56  ;;  %v404_v0 = vld [vmem:[#allocation2 + $0xa28] sm:$0xff]  ;;  %v406_v6 = vld [vmem:[#allocation2 + $0xa38] sm:$0xff]  ;;  %v14403_v14 = vpack.c.bf16 %v381_v58, %v369_v49 }
  0x76   :  { %9235 = vmatpush1.bf16.msra.mxu1 %v14367_v38  ;;  %9141 = vmatprep.subr.bf16.mxu0 %v14369_v41  ;;  %v14405_v21 = vpack.c.bf16 %v404_v0, %v392_v59  ;;  %v391_v24 = vld [vmem:[#allocation2 + $0x9c0] sm:$0xff]  ;;  %v393_v29 = vld [vmem:[#allocation2 + $0x9d0] sm:$0xff]  ;;  %v14408_v30 = vpack.c.bf16 %v406_v6, %v394_v5 }
  0x77   :  { %9237 = vmatprep.subr.bf16.mxu1 %v14372_v47  ;;  %18475 = vst [vmem:[#allocation66_spill] sm:$0xff] %v14403_v14  ;;  %v403_v28 = vld [vmem:[#allocation2 + $0xa20] sm:$0xff]  ;;  %v417_v5 = vld [vmem:[#allocation2 + $0xa90] sm:$0xff] }
  0x78   :  { %18476 = vst [vmem:[#allocation67_spill] sm:$0xff] %v14405_v21  ;;  %18477 = vst [vmem:[#allocation68_spill] sm:$0xff] %v14408_v30  ;;  %v415_v58 = vld [vmem:[#allocation2 + $0xa80] sm:$0xff] }
  0x79   :  { %9143 = vmatpush1.bf16.msra.mxu0 %v14375_v61  ;;  %v427_v59 = vld [vmem:[#allocation2 + $0xae0] sm:$0xff]  ;;  %v548_v61 = vld [vmem:[#allocation2 + $0xea8] sm:$0xff] }
  0x7a   :  { %9239 = vmatpush1.bf16.msra.mxu1 %v14379_v62  ;;  %9145 = vmatprep.subr.bf16.mxu0 %v14381_v3  ;;  %v14399_v62 = vpack.c.bf16 %v379_v48, %v367_v46  ;;  %v416_v3 = vld [vmem:[#allocation2 + $0xa88] sm:$0xff]  ;;  %v418_v46 = vld [vmem:[#allocation2 + $0xa98] sm:$0xff] }
  0x7b   :  { %9241 = vmatprep.subr.bf16.mxu1 %v14384_v15  ;;  %v405_v15 = vld [vmem:[#allocation2 + $0xa30] sm:$0xff]  ;;  %v430_v48 = vld [vmem:[#allocation2 + $0xaf8] sm:$0xff] }
  0x7c   :  { %18474 = vst [vmem:[#allocation65_spill] sm:$0xff] %v14399_v62  ;;  %v14415_v0 = vpack.c.bf16 %v405_v15, %v393_v29  ;;  %v14420_v6 = vpack.c.bf16 %v430_v48, %v418_v46  ;;  %v451_v29 = vld [vmem:[#allocation2 + $0xba0] sm:$0xff]  ;;  %v441_v46 = vld [vmem:[#allocation2 + $0xb50] sm:$0xff] }
  0x7d   :  { %9147 = vmatpush1.bf16.msra.mxu0 %v14387_v32  ;;  %v428_v32 = vld [vmem:[#allocation2 + $0xae8] sm:$0xff] }
  0x7e   :  { %9243 = vmatpush1.bf16.msra.mxu1 %v14391_v42  ;;  %9149 = vmatprep.subr.bf16.mxu0 %v14393_v45  ;;  %v14411_v42 = vpack.c.bf16 %v403_v28, %v391_v24  ;;  %18479 = vst [vmem:[#allocation70_spill] sm:$0xff] %v14415_v0  ;;  %v14417_v49 = vpack.c.bf16 %v428_v32, %v416_v3  ;;  %18481 = vst [vmem:[#allocation72_spill] sm:$0xff] %v14420_v6  ;;  %v440_v45 = vld [vmem:[#allocation2 + $0xb48] sm:$0xff]  ;;  %v442_v24 = vld [vmem:[#allocation2 + $0xb58] sm:$0xff] }
  0x7f   :  { %9245 = vmatprep.subr.bf16.mxu1 %v14396_v56  ;;  %v429_v56 = vld [vmem:[#allocation2 + $0xaf0] sm:$0xff]  ;;  %v454_v28 = vld [vmem:[#allocation2 + $0xbb8] sm:$0xff]  ;;  %v439_v32 = vld [vmem:[#allocation2 + $0xb40] sm:$0xff] }
  0x80   :  { %18478 = vst [vmem:[#allocation69_spill] sm:$0xff] %v14411_v42  ;;  %18480 = vst [vmem:[#allocation71_spill] sm:$0xff] %v14417_v49  ;;  %v14427_v3 = vpack.c.bf16 %v429_v56, %v417_v5  ;;  %v14432_v48 = vpack.c.bf16 %v454_v28, %v442_v24  ;;  %v463_v56 = vld [vmem:[#allocation2 + $0xc00] sm:$0xff]  ;;  %v465_v24 = vld [vmem:[#allocation2 + $0xc10] sm:$0xff] }
  0x81   :  { %9151 = vmatpush1.bf16.msra.mxu0 %v14399_v62  ;;  %v452_v62 = vld [vmem:[#allocation2 + $0xba8] sm:$0xff]  ;;  %v475_v5 = vld [vmem:[#allocation2 + $0xc60] sm:$0xff] }
  0x82   :  { %9247 = vmatpush1.bf16.msra.mxu1 %v14403_v14  ;;  %9153 = vmatprep.subr.bf16.mxu0 %v14405_v21  ;;  %v14423_v14 = vpack.c.bf16 %v427_v59, %v415_v58  ;;  %18483 = vst [vmem:[#allocation74_spill] sm:$0xff] %v14427_v3  ;;  %v14429_v15 = vpack.c.bf16 %v452_v62, %v440_v45  ;;  %18485 = vst [vmem:[#allocation76_spill] sm:$0xff] %v14432_v48  ;;  %v464_v21 = vld [vmem:[#allocation2 + $0xc08] sm:$0xff]  ;;  %v466_v58 = vld [vmem:[#allocation2 + $0xc18] sm:$0xff] }
  0x83   :  { %9249 = vmatprep.subr.bf16.mxu1 %v14408_v30  ;;  %v453_v30 = vld [vmem:[#allocation2 + $0xbb0] sm:$0xff]  ;;  %v478_v59 = vld [vmem:[#allocation2 + $0xc78] sm:$0xff] }
  0x84   :  { %18482 = vst [vmem:[#allocation73_spill] sm:$0xff] %v14423_v14  ;;  %18484 = vst [vmem:[#allocation75_spill] sm:$0xff] %v14429_v15  ;;  %v14439_v62 = vpack.c.bf16 %v453_v30, %v441_v46  ;;  %v14444_v28 = vpack.c.bf16 %v478_v59, %v466_v58  ;;  %v487_v30 = vld [vmem:[#allocation2 + $0xcc0] sm:$0xff]  ;;  %v489_v58 = vld [vmem:[#allocation2 + $0xcd0] sm:$0xff] }
  0x85   :  { %9155 = vmatpush1.bf16.msra.mxu0 %v14411_v42  ;;  %v476_v42 = vld [vmem:[#allocation2 + $0xc68] sm:$0xff]  ;;  %v499_v46 = vld [vmem:[#allocation2 + $0xd20] sm:$0xff] }
  0x86   :  { %9251 = vmatpush1.bf16.msra.mxu1 %v14415_v0  ;;  %9157 = vmatprep.subr.bf16.mxu0 %v14417_v49  ;;  %v14435_v0 = vpack.c.bf16 %v451_v29, %v439_v32  ;;  %18487 = vst [vmem:[#allocation78_spill] sm:$0xff] %v14439_v62  ;;  %v14441_v45 = vpack.c.bf16 %v476_v42, %v464_v21  ;;  %18489 = vst [vmem:[#allocation80_spill] sm:$0xff] %v14444_v28  ;;  %v488_v49 = vld [vmem:[#allocation2 + $0xcc8] sm:$0xff]  ;;  %v490_v32 = vld [vmem:[#allocation2 + $0xcd8] sm:$0xff] }
  0x87   :  { %9253 = vmatprep.subr.bf16.mxu1 %v14420_v6  ;;  %v477_v6 = vld [vmem:[#allocation2 + $0xc70] sm:$0xff]  ;;  %v502_v29 = vld [vmem:[#allocation2 + $0xd38] sm:$0xff] }
  0x88   :  { %18486 = vst [vmem:[#allocation77_spill] sm:$0xff] %v14435_v0  ;;  %18488 = vst [vmem:[#allocation79_spill] sm:$0xff] %v14441_v45  ;;  %v14451_v42 = vpack.c.bf16 %v477_v6, %v465_v24  ;;  %v14456_v59 = vpack.c.bf16 %v502_v29, %v490_v32  ;;  %v511_v24 = vld [vmem:[#allocation2 + $0xd80] sm:$0xff]  ;;  %v513_v29 = vld [vmem:[#allocation2 + $0xd90] sm:$0xff] }
  0x89   :  { %9159 = vmatpush1.bf16.msra.mxu0 %v14423_v14  ;;  %v500_v14 = vld [vmem:[#allocation2 + $0xd28] sm:$0xff]  ;;  %v523_v32 = vld [vmem:[#allocation2 + $0xde0] sm:$0xff] }
  0x8a   :  { %9255 = vmatpush1.bf16.msra.mxu1 %v14427_v3  ;;  %9161 = vmatprep.subr.bf16.mxu0 %v14429_v15  ;;  %v14447_v3 = vpack.c.bf16 %v475_v5, %v463_v56  ;;  %18491 = vst [vmem:[#allocation82_spill] sm:$0xff] %v14451_v42  ;;  %v14453_v21 = vpack.c.bf16 %v500_v14, %v488_v49  ;;  %18493 = vst [vmem:[#allocation84_spill] sm:$0xff] %v14456_v59  ;;  %v512_v15 = vld [vmem:[#allocation2 + $0xd88] sm:$0xff]  ;;  %v18494_v56 = vmov 0.0   ;;  %v514_v5 = vld [vmem:[#allocation2 + $0xd98] sm:$0xff] }
  0x8b   :  { %9257 = vmatprep.subr.bf16.mxu1 %v14432_v48  ;;  %v501_v48 = vld [vmem:[#allocation2 + $0xd30] sm:$0xff]  ;;  %v14461_v14 = vpack.c.bf16 %v499_v46, %v487_v30  ;;  %v538_v30 = vld [vmem:[#allocation2 + $0xe58] sm:$0xff] }
  0x8c   :  { %18490 = vst [vmem:[#allocation81_spill] sm:$0xff] %v14447_v3  ;;  %18492 = vst [vmem:[#allocation83_spill] sm:$0xff] %v14453_v21  ;;  %v14465_v49 = vpack.c.bf16 %v501_v48, %v489_v58  ;;  %v550_v46 = vld [vmem:[#allocation2 + $0xeb8] sm:$0xff]  ;;  %v547_v58 = vld [vmem:[#allocation2 + $0xea0] sm:$0xff] }
  0x8d   :  { %9163 = vmatpush1.bf16.msra.mxu0 %v14435_v0  ;;  %v524_v0 = vld [vmem:[#allocation2 + $0xde8] sm:$0xff]  ;;  %18495 = vst [vmem:[#allocation85_spill] sm:$0xff] %v14461_v14 }
  0x8e   :  { %9259 = vmatpush1.bf16.msra.mxu1 %v14439_v62  ;;  %9165 = vmatprep.subr.bf16.mxu0 %v14441_v45  ;;  %v526_v62 = vld [vmem:[#allocation2 + $0xdf8] sm:$0xff]  ;;  %18496 = vst [vmem:[#allocation86_spill] sm:$0xff] %v14465_v49  ;;  %v14467_v6 = vpack.c.bf16 %v524_v0, %v512_v15  ;;  %v536_v45 = vld [vmem:[#allocation2 + $0xe48] sm:$0xff]  ;;  %v14475_v0 = vpack.c.bf16 %v523_v32, %v511_v24 }
  0x8f   :  { %9261 = vmatprep.subr.bf16.mxu1 %v14444_v28  ;;  %v14470_v28 = vpack.c.bf16 %v526_v62, %v514_v5  ;;  %v14481_v48 = vpack.c.bf16 %v548_v61, %v536_v45  ;;  %v535_v62 = vld [vmem:[#allocation2 + $0xe40] sm:$0xff]  ;;  %v537_v5 = vld [vmem:[#allocation2 + $0xe50] sm:$0xff]  ;;  %v562_v24 = vld [vmem:[#allocation2 + $0xf18] sm:$0xff] }
  0x90   :  { %723 = vmatmul.mubr.f32.vlgmr.msra.gmra.mrb[0].mxu0 %v18494_v56  ;;  %18497 = vst [vmem:[#allocation87_spill] sm:$0xff] %v14467_v6  ;;  %18499 = vst [vmem:[#allocation89_spill] sm:$0xff] %v14475_v0  ;;  %v574_v32 = vld [vmem:[#allocation2 + $0xf78] sm:$0xff]  ;;  %v559_v45 = vld [vmem:[#allocation2 + $0xf00] sm:$0xff] }
  0x91   :  { %9167 = vmatpush1.bf16.msra.mxu0 %v14447_v3  ;;  %865 = vmatmul.mubr.f32.vlgmr.msra.gmra.mrb[0].mxu1 %v18494_v56  ;;  %18498 = vst [vmem:[#allocation88_spill] sm:$0xff] %v14470_v28  ;;  %v525_v3 = vld [vmem:[#allocation2 + $0xdf0] sm:$0xff]  ;;  %18501 = vst [vmem:[#allocation91_spill] sm:$0xff] %v14481_v48 }
  0x92   :  { %9263 = vmatpush1.bf16.msra.mxu1 %v14451_v42  ;;  %9169 = vmatprep.subr.bf16.mxu0 %v14453_v21  ;;  %v14479_v15 = vpack.c.bf16 %v525_v3, %v513_v29  ;;  %v549_v21 = vld [vmem:[#allocation2 + $0xeb0] sm:$0xff]  ;;  %v560_v42 = vld [vmem:[#allocation2 + $0xf08] sm:$0xff]  ;;  %v571_v29 = vld [vmem:[#allocation2 + $0xf60] sm:$0xff] }
  0x93   :  { %9265 = vmatprep.subr.bf16.mxu1 %v14456_v59  ;;  %793 = vmatprep.mubr.f32.mxu0 %v18494_v56  ;;  %v14484_v59 = vpack.c.bf16 %v550_v46, %v538_v30  ;;  %v14491_v61 = vpack.c.bf16 %v549_v21, %v537_v5  ;;  %v561_v30 = vld [vmem:[#allocation2 + $0xf10] sm:$0xff]  ;;  %v14496_v46 = vpack.c.bf16 %v574_v32, %v562_v24  ;;  %v595_v5 = vld [vmem:[#allocation2 + $0x1020] sm:$0xff] }
  0x94   :  { %935 = vmatprep.mubr.f32.mxu1 %v18494_v56  ;;  %18500 = vst [vmem:[#allocation90_spill] sm:$0xff] %v14479_v15  ;;  %v585_v24 = vld [vmem:[#allocation2 + $0xfd0] sm:$0xff] }
  0x95   :  { %9171 = vmatpush1.bf16.msra.mxu0 %v14461_v14  ;;  %18502 = vst [vmem:[#allocation92_spill] sm:$0xff] %v14484_v59  ;;  %v572_v14 = vld [vmem:[#allocation2 + $0xf68] sm:$0xff]  ;;  %18504 = vst [vmem:[#allocation94_spill] sm:$0xff] %v14491_v61 }
  0x96   :  { %9267 = vmatpush1.bf16.msra.mxu1 %v14465_v49  ;;  %9173 = vmatprep.subr.bf16.mxu0 %v14467_v6  ;;  %v14487_v49 = vpack.c.bf16 %v547_v58, %v535_v62  ;;  %v14493_v3 = vpack.c.bf16 %v572_v14, %v560_v42  ;;  %18506 = vst [vmem:[#allocation96_spill] sm:$0xff] %v14496_v46  ;;  %v584_v6 = vld [vmem:[#allocation2 + $0xfc8] sm:$0xff]  ;;  %v586_v62 = vld [vmem:[#allocation2 + $0xfd8] sm:$0xff]  ;;  %v583_v14 = vld [vmem:[#allocation2 + $0xfc0] sm:$0xff] }
  0x97   :  { %9269 = vmatprep.subr.bf16.mxu1 %v14470_v28  ;;  %v573_v28 = vld [vmem:[#allocation2 + $0xf70] sm:$0xff]  ;;  %v598_v58 = vld [vmem:[#allocation2 + $0x1038] sm:$0xff] }
  0x98   :  { %18503 = vst [vmem:[#allocation93_spill] sm:$0xff] %v14487_v49  ;;  %18505 = vst [vmem:[#allocation95_spill] sm:$0xff] %v14493_v3  ;;  %v14503_v42 = vpack.c.bf16 %v573_v28, %v561_v30  ;;  %v14508_v32 = vpack.c.bf16 %v598_v58, %v586_v62  ;;  %v619_v30 = vld [vmem:[#allocation2 + $0x10e0] sm:$0xff]  ;;  %v609_v62 = vld [vmem:[#allocation2 + $0x1090] sm:$0xff] }
  0x99   :  { %9175 = vmatpush1.bf16.msra.mxu0 %v14475_v0  ;;  %v596_v0 = vld [vmem:[#allocation2 + $0x1028] sm:$0xff] }
  0x9a   :  { %9271 = vmatpush1.bf16.msra.mxu1 %v14479_v15  ;;  %9177 = vmatprep.subr.bf16.mxu0 %v14481_v48  ;;  %v14499_v15 = vpack.c.bf16 %v571_v29, %v559_v45  ;;  %18508 = vst [vmem:[#allocation98_spill] sm:$0xff] %v14503_v42  ;;  %v14505_v21 = vpack.c.bf16 %v596_v0, %v584_v6  ;;  %18510 = vst [vmem:[#allocation100_spill] sm:$0xff] %v14508_v32  ;;  %v608_v48 = vld [vmem:[#allocation2 + $0x1088] sm:$0xff]  ;;  %v610_v45 = vld [vmem:[#allocation2 + $0x1098] sm:$0xff] }
  0x9b   :  { %9273 = vmatprep.subr.bf16.mxu1 %v14484_v59  ;;  %v597_v59 = vld [vmem:[#allocation2 + $0x1030] sm:$0xff]  ;;  %v622_v29 = vld [vmem:[#allocation2 + $0x10f8] sm:$0xff]  ;;  %v607_v0 = vld [vmem:[#allocation2 + $0x1080] sm:$0xff] }
  0x9c   :  { %18507 = vst [vmem:[#allocation97_spill] sm:$0xff] %v14499_v15  ;;  %18509 = vst [vmem:[#allocation99_spill] sm:$0xff] %v14505_v21  ;;  %v14515_v28 = vpack.c.bf16 %v597_v59, %v585_v24  ;;  %v14520_v58 = vpack.c.bf16 %v622_v29, %v610_v45  ;;  %v643_v24 = vld [vmem:[#allocation2 + $0x11a0] sm:$0xff]  ;;  %v633_v45 = vld [vmem:[#allocation2 + $0x1150] sm:$0xff] }
  0x9d   :  { %9179 = vmatpush1.bf16.msra.mxu0 %v14487_v49  ;;  %v620_v49 = vld [vmem:[#allocation2 + $0x10e8] sm:$0xff] }
  0x9e   :  { %9275 = vmatpush1.bf16.msra.mxu1 %v14491_v61  ;;  %9181 = vmatprep.subr.bf16.mxu0 %v14493_v3  ;;  %v14511_v61 = vpack.c.bf16 %v595_v5, %v583_v14  ;;  %18512 = vst [vmem:[#allocation102_spill] sm:$0xff] %v14515_v28  ;;  %v14517_v6 = vpack.c.bf16 %v620_v49, %v608_v48  ;;  %18514 = vst [vmem:[#allocation104_spill] sm:$0xff] %v14520_v58  ;;  %v632_v3 = vld [vmem:[#allocation2 + $0x1148] sm:$0xff]  ;;  %v634_v14 = vld [vmem:[#allocation2 + $0x1158] sm:$0xff] }
  0x9f   :  { %9277 = vmatprep.subr.bf16.mxu1 %v14496_v46  ;;  %v621_v46 = vld [vmem:[#allocation2 + $0x10f0] sm:$0xff]  ;;  %v646_v5 = vld [vmem:[#allocation2 + $0x11b8] sm:$0xff]  ;;  %v631_v48 = vld [vmem:[#allocation2 + $0x1140] sm:$0xff] }
  0xa0   :  { %18511 = vst [vmem:[#allocation101_spill] sm:$0xff] %v14511_v61  ;;  %18513 = vst [vmem:[#allocation103_spill] sm:$0xff] %v14517_v6  ;;  %v14527_v59 = vpack.c.bf16 %v621_v46, %v609_v62  ;;  %v14532_v29 = vpack.c.bf16 %v646_v5, %v634_v14  ;;  %v83_v46 = vld [vmem:[#allocation2 + $0x20] sm:$0xff]  ;;  %v85_v14 = vld [vmem:[#allocation2 + $0x30] sm:$0xff] }
  0xa1   :  { %9183 = vmatpush1.bf16.msra.mxu0 %v14499_v15  ;;  %v644_v15 = vld [vmem:[#allocation2 + $0x11a8] sm:$0xff]  ;;  %v95_v62 = vld [vmem:[#allocation2 + $0x80] sm:$0xff] }
  0xa2   :  { %9279 = vmatpush1.bf16.msra.mxu1 %v14503_v42  ;;  %9185 = vmatprep.subr.bf16.mxu0 %v14505_v21  ;;  %v14523_v42 = vpack.c.bf16 %v619_v30, %v607_v0  ;;  %18516 = vst [vmem:[#allocation106_spill] sm:$0xff] %v14527_v59  ;;  %v14529_v49 = vpack.c.bf16 %v644_v15, %v632_v3  ;;  %18518 = vst [vmem:[#allocation108_spill] sm:$0xff] %v14532_v29  ;;  %v84_v21 = vld [vmem:[#allocation2 + $0x28] sm:$0xff]  ;;  %v86_v0 = vld [vmem:[#allocation2 + $0x38] sm:$0xff] }
  0xa3   :  { %9281 = vmatprep.subr.bf16.mxu1 %v14508_v32  ;;  %v645_v32 = vld [vmem:[#allocation2 + $0x11b0] sm:$0xff]  ;;  %v98_v30 = vld [vmem:[#allocation2 + $0x98] sm:$0xff] }
  0xa4   :  { %18515 = vst [vmem:[#allocation105_spill] sm:$0xff] %v14523_v42  ;;  %18517 = vst [vmem:[#allocation107_spill] sm:$0xff] %v14529_v49  ;;  %v14539_v15 = vpack.c.bf16 %v645_v32, %v633_v45  ;;  %v14544_v5 = vpack.c.bf16 %v98_v30, %v86_v0  ;;  %v107_v32 = vld [vmem:[#allocation2 + $0xe0] sm:$0xff]  ;;  %v109_v0 = vld [vmem:[#allocation2 + $0xf0] sm:$0xff] }
  0xa5   :  { %9187 = vmatpush1.bf16.msra.mxu0 %v14511_v61  ;;  %v96_v61 = vld [vmem:[#allocation2 + $0x88] sm:$0xff]  ;;  %v119_v45 = vld [vmem:[#allocation2 + $0x140] sm:$0xff] }
  0xa6   :  { %9283 = vmatpush1.bf16.msra.mxu1 %v14515_v28  ;;  %9189 = vmatprep.subr.bf16.mxu0 %v14517_v6  ;;  %v14535_v28 = vpack.c.bf16 %v643_v24, %v631_v48  ;;  %18520 = vst [vmem:[#allocation110_spill] sm:$0xff] %v14539_v15  ;;  %v14541_v3 = vpack.c.bf16 %v96_v61, %v84_v21  ;;  %18522 = vst [vmem:[#allocation112_spill] sm:$0xff] %v14544_v5  ;;  %v108_v6 = vld [vmem:[#allocation2 + $0xe8] sm:$0xff]  ;;  %v110_v48 = vld [vmem:[#allocation2 + $0xf8] sm:$0xff] }
  0xa7   :  { %9285 = vmatprep.subr.bf16.mxu1 %v14520_v58  ;;  %v97_v58 = vld [vmem:[#allocation2 + $0x90] sm:$0xff]  ;;  %v122_v24 = vld [vmem:[#allocation2 + $0x158] sm:$0xff] }
  0xa8   :  { %18519 = vst [vmem:[#allocation109_spill] sm:$0xff] %v14535_v28  ;;  %18521 = vst [vmem:[#allocation111_spill] sm:$0xff] %v14541_v3  ;;  %v14551_v61 = vpack.c.bf16 %v97_v58, %v85_v14  ;;  %v14556_v30 = vpack.c.bf16 %v122_v24, %v110_v48  ;;  %v131_v14 = vld [vmem:[#allocation2 + $0x1a0] sm:$0xff]  ;;  %v133_v24 = vld [vmem:[#allocation2 + $0x1b0] sm:$0xff] }
  0xa9   :  { %9191 = vmatpush1.bf16.msra.mxu0 %v14523_v42  ;;  %v120_v42 = vld [vmem:[#allocation2 + $0x148] sm:$0xff]  ;;  %v143_v48 = vld [vmem:[#allocation2 + $0x200] sm:$0xff] }
  0xaa   :  { %9287 = vmatpush1.bf16.msra.mxu1 %v14527_v59  ;;  %9193 = vmatprep.subr.bf16.mxu0 %v14529_v49  ;;  %v14547_v59 = vpack.c.bf16 %v95_v62, %v83_v46  ;;  %18524 = vst [vmem:[#allocation114_spill] sm:$0xff] %v14551_v61  ;;  %v14553_v21 = vpack.c.bf16 %v120_v42, %v108_v6  ;;  %18526 = vst [vmem:[#allocation116_spill] sm:$0xff] %v14556_v30  ;;  %v132_v49 = vld [vmem:[#allocation2 + $0x1a8] sm:$0xff]  ;;  %v134_v46 = vld [vmem:[#allocation2 + $0x1b8] sm:$0xff] }
  0xab   :  { %9289 = vmatprep.subr.bf16.mxu1 %v14532_v29  ;;  %v121_v29 = vld [vmem:[#allocation2 + $0x150] sm:$0xff]  ;;  %v146_v62 = vld [vmem:[#allocation2 + $0x218] sm:$0xff]  ;;  %v14561_v42 = vpack.c.bf16 %v119_v45, %v107_v32 }
  0xac   :  { %18523 = vst [vmem:[#allocation113_spill] sm:$0xff] %v14547_v59  ;;  %18525 = vst [vmem:[#allocation115_spill] sm:$0xff] %v14553_v21  ;;  %v14565_v6 = vpack.c.bf16 %v121_v29, %v109_v0  ;;  %v158_v32 = vld [vmem:[#allocation2 + $0x278] sm:$0xff]  ;;  %v155_v0 = vld [vmem:[#allocation2 + $0x260] sm:$0xff] }
  0xad   :  { %9195 = vmatpush1.bf16.msra.mxu0 %v14535_v28  ;;  %v144_v28 = vld [vmem:[#allocation2 + $0x208] sm:$0xff]  ;;  %18527 = vst [vmem:[#allocation117_spill] sm:$0xff] %v14561_v42  ;;  %v170_v45 = vld [vmem:[#allocation2 + $0x2d8] sm:$0xff] }
  0xae   :  { %9291 = vmatpush1.bf16.msra.mxu1 %v14539_v15  ;;  %9293 = vmatprep.subr.bf16.mxu0 %v14541_v3  ;;  %18528 = vst [vmem:[#allocation118_spill] sm:$0xff] %v14565_v6  ;;  %v14567_v58 = vpack.c.bf16 %v144_v28, %v132_v49  ;;  %v145_v3 = vld [vmem:[#allocation2 + $0x210] sm:$0xff]  ;;  %v156_v15 = vld [vmem:[#allocation2 + $0x268] sm:$0xff]  ;;  %v14575_v28 = vpack.c.bf16 %v143_v48, %v131_v14  ;;  %v182_v14 = vld [vmem:[#allocation2 + $0x338] sm:$0xff] }
  0xaf   :  { %9389 = vmatprep.subr.bf16.mxu1 %v14544_v5  ;;  %v14570_v5 = vpack.c.bf16 %v146_v62, %v134_v46  ;;  %v14579_v49 = vpack.c.bf16 %v145_v3, %v133_v24  ;;  %v167_v46 = vld [vmem:[#allocation2 + $0x2c0] sm:$0xff]  ;;  %v157_v62 = vld [vmem:[#allocation2 + $0x270] sm:$0xff]  ;;  %v194_v48 = vld [vmem:[#allocation2 + $0x398] sm:$0xff] }
  0xb0   :  { %794 = vmatmul.mubr.f32.vlgmr.msra.gmra.mrb[0].mxu0 %v18494_v56  ;;  %18529 = vst [vmem:[#allocation119_spill] sm:$0xff] %v14567_v58  ;;  %18531 = vst [vmem:[#allocation121_spill] sm:$0xff] %v14575_v28  ;;  %v179_v3 = vld [vmem:[#allocation2 + $0x320] sm:$0xff] }
  0xb1   :  { %936 = vmatmul.mubr.f32.vlgmr.msra.gmra.mrb[0].mxu1 %v18494_v56  ;;  %9295 = vmatpush1.bf16.msra.mxu0 %v14547_v59  ;;  %18530 = vst [vmem:[#allocation120_spill] sm:$0xff] %v14570_v5  ;;  %v168_v59 = vld [vmem:[#allocation2 + $0x2c8] sm:$0xff]  ;;  %18532 = vst [vmem:[#allocation122_spill] sm:$0xff] %v14579_v49  ;;  %v191_v24 = vld [vmem:[#allocation2 + $0x380] sm:$0xff] }
  0xb2   :  { %9391 = vmatpush1.bf16.msra.mxu1 %v14551_v61  ;;  %9297 = vmatprep.subr.bf16.mxu0 %v14553_v21  ;;  %v14581_v29 = vpack.c.bf16 %v168_v59, %v156_v15  ;;  %v169_v21 = vld [vmem:[#allocation2 + $0x2d0] sm:$0xff]  ;;  %v180_v61 = vld [vmem:[#allocation2 + $0x328] sm:$0xff] }
  0xb3   :  { %9393 = vmatprep.subr.bf16.mxu1 %v14556_v30  ;;  %1006 = vmatprep.mubr.f32.mxu0 %v18494_v56  ;;  %v14584_v30 = vpack.c.bf16 %v170_v45, %v158_v32  ;;  %v14591_v59 = vpack.c.bf16 %v169_v21, %v157_v62  ;;  %v181_v32 = vld [vmem:[#allocation2 + $0x330] sm:$0xff]  ;;  %v14596_v45 = vpack.c.bf16 %v194_v48, %v182_v14  ;;  %v215_v62 = vld [vmem:[#allocation2 + $0x440] sm:$0xff] }
  0xb4   :  { %1148 = vmatprep.mubr.f32.mxu1 %v18494_v56  ;;  %18533 = vst [vmem:[#allocation123_spill] sm:$0xff] %v14581_v29  ;;  %v205_v14 = vld [vmem:[#allocation2 + $0x3f0] sm:$0xff] }
  0xb5   :  { %9299 = vmatpush1.bf16.msra.mxu0 %v14561_v42  ;;  %18534 = vst [vmem:[#allocation124_spill] sm:$0xff] %v14584_v30  ;;  %v192_v42 = vld [vmem:[#allocation2 + $0x388] sm:$0xff]  ;;  %18536 = vst [vmem:[#allocation126_spill] sm:$0xff] %v14591_v59 }
  0xb6   :  { %9395 = vmatpush1.bf16.msra.mxu1 %v14565_v6  ;;  %9301 = vmatprep.subr.bf16.mxu0 %v14567_v58  ;;  %v14587_v6 = vpack.c.bf16 %v167_v46, %v155_v0  ;;  %v14593_v15 = vpack.c.bf16 %v192_v42, %v180_v61  ;;  %18538 = vst [vmem:[#allocation128_spill] sm:$0xff] %v14596_v45  ;;  %v204_v58 = vld [vmem:[#allocation2 + $0x3e8] sm:$0xff]  ;;  %v206_v0 = vld [vmem:[#allocation2 + $0x3f8] sm:$0xff]  ;;  %v203_v42 = vld [vmem:[#allocation2 + $0x3e0] sm:$0xff] }
  0xb7   :  { %9397 = vmatprep.subr.bf16.mxu1 %v14570_v5  ;;  %v193_v5 = vld [vmem:[#allocation2 + $0x390] sm:$0xff]  ;;  %v218_v46 = vld [vmem:[#allocation2 + $0x458] sm:$0xff] }
  0xb8   :  { %18535 = vst [vmem:[#allocation125_spill] sm:$0xff] %v14587_v6  ;;  %18537 = vst [vmem:[#allocation127_spill] sm:$0xff] %v14593_v15  ;;  %v14603_v61 = vpack.c.bf16 %v193_v5, %v181_v32  ;;  %v14608_v48 = vpack.c.bf16 %v218_v46, %v206_v0  ;;  %v239_v32 = vld [vmem:[#allocation2 + $0x500] sm:$0xff]  ;;  %v229_v0 = vld [vmem:[#allocation2 + $0x4b0] sm:$0xff] }
  0xb9   :  { %9303 = vmatpush1.bf16.msra.mxu0 %v14575_v28  ;;  %v216_v28 = vld [vmem:[#allocation2 + $0x448] sm:$0xff] }
  0xba   :  { %9399 = vmatpush1.bf16.msra.mxu1 %v14579_v49  ;;  %9305 = vmatprep.subr.bf16.mxu0 %v14581_v29  ;;  %v14599_v49 = vpack.c.bf16 %v191_v24, %v179_v3  ;;  %18540 = vst [vmem:[#allocation130_spill] sm:$0xff] %v14603_v61  ;;  %v14605_v21 = vpack.c.bf16 %v216_v28, %v204_v58  ;;  %18542 = vst [vmem:[#allocation132_spill] sm:$0xff] %v14608_v48  ;;  %v228_v29 = vld [vmem:[#allocation2 + $0x4a8] sm:$0xff]  ;;  %v230_v3 = vld [vmem:[#allocation2 + $0x4b8] sm:$0xff] }
  0xbb   :  { %9401 = vmatprep.subr.bf16.mxu1 %v14584_v30  ;;  %v217_v30 = vld [vmem:[#allocation2 + $0x450] sm:$0xff]  ;;  %v242_v24 = vld [vmem:[#allocation2 + $0x518] sm:$0xff]  ;;  %v227_v28 = vld [vmem:[#allocation2 + $0x4a0] sm:$0xff] }
  0xbc   :  { %18539 = vst [vmem:[#allocation129_spill] sm:$0xff] %v14599_v49  ;;  %18541 = vst [vmem:[#allocation131_spill] sm:$0xff] %v14605_v21  ;;  %v14615_v5 = vpack.c.bf16 %v217_v30, %v205_v14  ;;  %v14620_v46 = vpack.c.bf16 %v242_v24, %v230_v3  ;;  %v263_v14 = vld [vmem:[#allocation2 + $0x5c0] sm:$0xff]  ;;  %v253_v3 = vld [vmem:[#allocation2 + $0x570] sm:$0xff] }
  0xbd   :  { %9307 = vmatpush1.bf16.msra.mxu0 %v14587_v6  ;;  %v240_v6 = vld [vmem:[#allocation2 + $0x508] sm:$0xff] }
  0xbe   :  { %9403 = vmatpush1.bf16.msra.mxu1 %v14591_v59  ;;  %9309 = vmatprep.subr.bf16.mxu0 %v14593_v15  ;;  %v14611_v59 = vpack.c.bf16 %v215_v62, %v203_v42  ;;  %18544 = vst [vmem:[#allocation134_spill] sm:$0xff] %v14615_v5  ;;  %v14617_v58 = vpack.c.bf16 %v240_v6, %v228_v29  ;;  %18546 = vst [vmem:[#allocation136_spill] sm:$0xff] %v14620_v46  ;;  %v252_v15 = vld [vmem:[#allocation2 + $0x568] sm:$0xff]  ;;  %v254_v42 = vld [vmem:[#allocation2 + $0x578] sm:$0xff] }
  0xbf   :  { %9405 = vmatprep.subr.bf16.mxu1 %v14596_v45  ;;  %v241_v45 = vld [vmem:[#allocation2 + $0x510] sm:$0xff]  ;;  %v266_v62 = vld [vmem:[#allocation2 + $0x5d8] sm:$0xff]  ;;  %v251_v29 = vld [vmem:[#allocation2 + $0x560] sm:$0xff] }
  0xc0   :  { %18543 = vst [vmem:[#allocation133_spill] sm:$0xff] %v14611_v59  ;;  %18545 = vst [vmem:[#allocation135_spill] sm:$0xff] %v14617_v58  ;;  %v14627_v30 = vpack.c.bf16 %v241_v45, %v229_v0  ;;  %v14632_v24 = vpack.c.bf16 %v266_v62, %v254_v42  ;;  %v275_v45 = vld [vmem:[#allocation2 + $0x620] sm:$0xff]  ;;  %v277_v42 = vld [vmem:[#allocation2 + $0x630] sm:$0xff] }
  0xc1   :  { %9311 = vmatpush1.bf16.msra.mxu0 %v14599_v49  ;;  %v264_v49 = vld [vmem:[#allocation2 + $0x5c8] sm:$0xff]  ;;  %v287_v0 = vld [vmem:[#allocation2 + $0x680] sm:$0xff] }
  0xc2   :  { %9407 = vmatpush1.bf16.msra.mxu1 %v14603_v61  ;;  %9313 = vmatprep.subr.bf16.mxu0 %v14605_v21  ;;  %v14623_v61 = vpack.c.bf16 %v239_v32, %v227_v28  ;;  %18548 = vst [vmem:[#allocation138_spill] sm:$0xff] %v14627_v30  ;;  %v14629_v6 = vpack.c.bf16 %v264_v49, %v252_v15  ;;  %18550 = vst [vmem:[#allocation140_spill] sm:$0xff] %v14632_v24  ;;  %v276_v21 = vld [vmem:[#allocation2 + $0x628] sm:$0xff]  ;;  %v278_v28 = vld [vmem:[#allocation2 + $0x638] sm:$0xff] }
  0xc3   :  { %9409 = vmatprep.subr.bf16.mxu1 %v14608_v48  ;;  %v265_v48 = vld [vmem:[#allocation2 + $0x5d0] sm:$0xff]  ;;  %v290_v32 = vld [vmem:[#allocation2 + $0x698] sm:$0xff] }
  0xc4   :  { %18547 = vst [vmem:[#allocation137_spill] sm:$0xff] %v14623_v61  ;;  %18549 = vst [vmem:[#allocation139_spill] sm:$0xff] %v14629_v6  ;;  %v14639_v49 = vpack.c.bf16 %v265_v48, %v253_v3  ;;  %v14644_v62 = vpack.c.bf16 %v290_v32, %v278_v28  ;;  %v299_v48 = vld [vmem:[#allocation2 + $0x6e0] sm:$0xff]  ;;  %v301_v28 = vld [vmem:[#allocation2 + $0x6f0] sm:$0xff] }
  0xc5   :  { %9315 = vmatpush1.bf16.msra.mxu0 %v14611_v59  ;;  %v288_v59 = vld [vmem:[#allocation2 + $0x688] sm:$0xff]  ;;  %v311_v3 = vld [vmem:[#allocation2 + $0x740] sm:$0xff] }
  0xc6   :  { %9411 = vmatpush1.bf16.msra.mxu1 %v14615_v5  ;;  %9317 = vmatprep.subr.bf16.mxu0 %v14617_v58  ;;  %v14635_v5 = vpack.c.bf16 %v263_v14, %v251_v29  ;;  %18552 = vst [vmem:[#allocation142_spill] sm:$0xff] %v14639_v49  ;;  %v14641_v15 = vpack.c.bf16 %v288_v59, %v276_v21  ;;  %18554 = vst [vmem:[#allocation144_spill] sm:$0xff] %v14644_v62  ;;  %v300_v58 = vld [vmem:[#allocation2 + $0x6e8] sm:$0xff]  ;;  %v302_v29 = vld [vmem:[#allocation2 + $0x6f8] sm:$0xff] }
  0xc7   :  { %9413 = vmatprep.subr.bf16.mxu1 %v14620_v46  ;;  %v289_v46 = vld [vmem:[#allocation2 + $0x690] sm:$0xff]  ;;  %v314_v14 = vld [vmem:[#allocation2 + $0x758] sm:$0xff] }
  0xc8   :  { %18551 = vst [vmem:[#allocation141_spill] sm:$0xff] %v14635_v5  ;;  %18553 = vst [vmem:[#allocation143_spill] sm:$0xff] %v14641_v15  ;;  %v14651_v59 = vpack.c.bf16 %v289_v46, %v277_v42  ;;  %v14656_v32 = vpack.c.bf16 %v314_v14, %v302_v29  ;;  %v323_v46 = vld [vmem:[#allocation2 + $0x7a0] sm:$0xff]  ;;  %v325_v29 = vld [vmem:[#allocation2 + $0x7b0] sm:$0xff] }
  0xc9   :  { %9319 = vmatpush1.bf16.msra.mxu0 %v14623_v61  ;;  %v312_v61 = vld [vmem:[#allocation2 + $0x748] sm:$0xff]  ;;  %v335_v42 = vld [vmem:[#allocation2 + $0x800] sm:$0xff] }
  0xca   :  { %9415 = vmatpush1.bf16.msra.mxu1 %v14627_v30  ;;  %9321 = vmatprep.subr.bf16.mxu0 %v14629_v6  ;;  %v14647_v30 = vpack.c.bf16 %v287_v0, %v275_v45  ;;  %18556 = vst [vmem:[#allocation146_spill] sm:$0xff] %v14651_v59  ;;  %v14653_v21 = vpack.c.bf16 %v312_v61, %v300_v58  ;;  %18558 = vst [vmem:[#allocation148_spill] sm:$0xff] %v14656_v32  ;;  %v324_v6 = vld [vmem:[#allocation2 + $0x7a8] sm:$0xff]  ;;  %v326_v45 = vld [vmem:[#allocation2 + $0x7b8] sm:$0xff] }
  0xcb   :  { %9417 = vmatprep.subr.bf16.mxu1 %v14632_v24  ;;  %v313_v24 = vld [vmem:[#allocation2 + $0x750] sm:$0xff]  ;;  %v338_v0 = vld [vmem:[#allocation2 + $0x818] sm:$0xff] }
  0xcc   :  { %18555 = vst [vmem:[#allocation145_spill] sm:$0xff] %v14647_v30  ;;  %18557 = vst [vmem:[#allocation147_spill] sm:$0xff] %v14653_v21  ;;  %v14663_v61 = vpack.c.bf16 %v313_v24, %v301_v28  ;;  %v14668_v14 = vpack.c.bf16 %v338_v0, %v326_v45  ;;  %v347_v24 = vld [vmem:[#allocation2 + $0x860] sm:$0xff]  ;;  %v349_v45 = vld [vmem:[#allocation2 + $0x870] sm:$0xff] }
  0xcd   :  { %9323 = vmatpush1.bf16.msra.mxu0 %v14635_v5  ;;  %v336_v5 = vld [vmem:[#allocation2 + $0x808] sm:$0xff]  ;;  %v359_v28 = vld [vmem:[#allocation2 + $0x8c0] sm:$0xff] }
  0xce   :  { %9419 = vmatpush1.bf16.msra.mxu1 %v14639_v49  ;;  %9325 = vmatprep.subr.bf16.mxu0 %v14641_v15  ;;  %v14659_v49 = vpack.c.bf16 %v311_v3, %v299_v48  ;;  %18560 = vst [vmem:[#allocation150_spill] sm:$0xff] %v14663_v61  ;;  %v14665_v58 = vpack.c.bf16 %v336_v5, %v324_v6  ;;  %18562 = vst [vmem:[#allocation152_spill] sm:$0xff] %v14668_v14  ;;  %v348_v15 = vld [vmem:[#allocation2 + $0x868] sm:$0xff]  ;;  %v350_v48 = vld [vmem:[#allocation2 + $0x878] sm:$0xff] }
  0xcf   :  { %9421 = vmatprep.subr.bf16.mxu1 %v14644_v62  ;;  %v337_v62 = vld [vmem:[#allocation2 + $0x810] sm:$0xff]  ;;  %v362_v3 = vld [vmem:[#allocation2 + $0x8d8] sm:$0xff] }
  0xd0   :  { %18559 = vst [vmem:[#allocation149_spill] sm:$0xff] %v14659_v49  ;;  %18561 = vst [vmem:[#allocation151_spill] sm:$0xff] %v14665_v58  ;;  %v14675_v5 = vpack.c.bf16 %v337_v62, %v325_v29  ;;  %v14680_v0 = vpack.c.bf16 %v362_v3, %v350_v48  ;;  %v371_v62 = vld [vmem:[#allocation2 + $0x920] sm:$0xff]  ;;  %v373_v48 = vld [vmem:[#allocation2 + $0x930] sm:$0xff] }
  0xd1   :  { %9327 = vmatpush1.bf16.msra.mxu0 %v14647_v30  ;;  %v360_v30 = vld [vmem:[#allocation2 + $0x8c8] sm:$0xff]  ;;  %v383_v29 = vld [vmem:[#allocation2 + $0x980] sm:$0xff] }
  0xd2   :  { %9423 = vmatpush1.bf16.msra.mxu1 %v14651_v59  ;;  %9329 = vmatprep.subr.bf16.mxu0 %v14653_v21  ;;  %v14671_v59 = vpack.c.bf16 %v335_v42, %v323_v46  ;;  %18564 = vst [vmem:[#allocation154_spill] sm:$0xff] %v14675_v5  ;;  %v14677_v6 = vpack.c.bf16 %v360_v30, %v348_v15  ;;  %18566 = vst [vmem:[#allocation156_spill] sm:$0xff] %v14680_v0  ;;  %v372_v21 = vld [vmem:[#allocation2 + $0x928] sm:$0xff]  ;;  %v374_v46 = vld [vmem:[#allocation2 + $0x938] sm:$0xff] }
  0xd3   :  { %9425 = vmatprep.subr.bf16.mxu1 %v14656_v32  ;;  %v361_v32 = vld [vmem:[#allocation2 + $0x8d0] sm:$0xff]  ;;  %v386_v42 = vld [vmem:[#allocation2 + $0x998] sm:$0xff] }
  0xd4   :  { %18563 = vst [vmem:[#allocation153_spill] sm:$0xff] %v14671_v59  ;;  %18565 = vst [vmem:[#allocation155_spill] sm:$0xff] %v14677_v6  ;;  %v14687_v30 = vpack.c.bf16 %v361_v32, %v349_v45  ;;  %v14692_v3 = vpack.c.bf16 %v386_v42, %v374_v46  ;;  %v395_v32 = vld [vmem:[#allocation2 + $0x9e0] sm:$0xff]  ;;  %v397_v46 = vld [vmem:[#allocation2 + $0x9f0] sm:$0xff] }
  0xd5   :  { %9331 = vmatpush1.bf16.msra.mxu0 %v14659_v49  ;;  %v384_v49 = vld [vmem:[#allocation2 + $0x988] sm:$0xff]  ;;  %v407_v45 = vld [vmem:[#allocation2 + $0xa40] sm:$0xff] }
  0xd6   :  { %9427 = vmatpush1.bf16.msra.mxu1 %v14663_v61  ;;  %9333 = vmatprep.subr.bf16.mxu0 %v14665_v58  ;;  %v14683_v61 = vpack.c.bf16 %v359_v28, %v347_v24  ;;  %18568 = vst [vmem:[#allocation158_spill] sm:$0xff] %v14687_v30  ;;  %v14689_v15 = vpack.c.bf16 %v384_v49, %v372_v21  ;;  %18570 = vst [vmem:[#allocation160_spill] sm:$0xff] %v14692_v3  ;;  %v396_v58 = vld [vmem:[#allocation2 + $0x9e8] sm:$0xff]  ;;  %v398_v24 = vld [vmem:[#allocation2 + $0x9f8] sm:$0xff] }
  0xd7   :  { %9429 = vmatprep.subr.bf16.mxu1 %v14668_v14  ;;  %v385_v14 = vld [vmem:[#allocation2 + $0x990] sm:$0xff]  ;;  %v410_v28 = vld [vmem:[#allocation2 + $0xa58] sm:$0xff] }
  0xd8   :  { %18567 = vst [vmem:[#allocation157_spill] sm:$0xff] %v14683_v61  ;;  %18569 = vst [vmem:[#allocation159_spill] sm:$0xff] %v14689_v15  ;;  %v14699_v49 = vpack.c.bf16 %v385_v14, %v373_v48  ;;  %v14704_v42 = vpack.c.bf16 %v410_v28, %v398_v24  ;;  %v419_v14 = vld [vmem:[#allocation2 + $0xaa0] sm:$0xff]  ;;  %v421_v24 = vld [vmem:[#allocation2 + $0xab0] sm:$0xff] }
  0xd9   :  { %9335 = vmatpush1.bf16.msra.mxu0 %v14671_v59  ;;  %v408_v59 = vld [vmem:[#allocation2 + $0xa48] sm:$0xff]  ;;  %v431_v48 = vld [vmem:[#allocation2 + $0xb00] sm:$0xff] }
  0xda   :  { %9431 = vmatpush1.bf16.msra.mxu1 %v14675_v5  ;;  %9337 = vmatprep.subr.bf16.mxu0 %v14677_v6  ;;  %v14695_v5 = vpack.c.bf16 %v383_v29, %v371_v62  ;;  %18572 = vst [vmem:[#allocation162_spill] sm:$0xff] %v14699_v49  ;;  %v14701_v21 = vpack.c.bf16 %v408_v59, %v396_v58  ;;  %18574 = vst [vmem:[#allocation164_spill] sm:$0xff] %v14704_v42  ;;  %v420_v6 = vld [vmem:[#allocation2 + $0xaa8] sm:$0xff]  ;;  %v422_v62 = vld [vmem:[#allocation2 + $0xab8] sm:$0xff] }
  0xdb   :  { %9433 = vmatprep.subr.bf16.mxu1 %v14680_v0  ;;  %v409_v0 = vld [vmem:[#allocation2 + $0xa50] sm:$0xff]  ;;  %v434_v29 = vld [vmem:[#allocation2 + $0xb18] sm:$0xff] }
  0xdc   :  { %18571 = vst [vmem:[#allocation161_spill] sm:$0xff] %v14695_v5  ;;  %18573 = vst [vmem:[#allocation163_spill] sm:$0xff] %v14701_v21  ;;  %v14711_v59 = vpack.c.bf16 %v409_v0, %v397_v46  ;;  %v14716_v28 = vpack.c.bf16 %v434_v29, %v422_v62  ;;  %v443_v0 = vld [vmem:[#allocation2 + $0xb60] sm:$0xff]  ;;  %v445_v62 = vld [vmem:[#allocation2 + $0xb70] sm:$0xff] }
  0xdd   :  { %9339 = vmatpush1.bf16.msra.mxu0 %v14683_v61  ;;  %v432_v61 = vld [vmem:[#allocation2 + $0xb08] sm:$0xff]  ;;  %v455_v46 = vld [vmem:[#allocation2 + $0xbc0] sm:$0xff] }
  0xde   :  { %9435 = vmatpush1.bf16.msra.mxu1 %v14687_v30  ;;  %9341 = vmatprep.subr.bf16.mxu0 %v14689_v15  ;;  %v14707_v30 = vpack.c.bf16 %v407_v45, %v395_v32  ;;  %18576 = vst [vmem:[#allocation166_spill] sm:$0xff] %v14711_v59  ;;  %v14713_v58 = vpack.c.bf16 %v432_v61, %v420_v6  ;;  %18578 = vst [vmem:[#allocation168_spill] sm:$0xff] %v14716_v28  ;;  %v444_v15 = vld [vmem:[#allocation2 + $0xb68] sm:$0xff]  ;;  %v446_v32 = vld [vmem:[#allocation2 + $0xb78] sm:$0xff] }
  0xdf   :  { %9437 = vmatprep.subr.bf16.mxu1 %v14692_v3  ;;  %v433_v3 = vld [vmem:[#allocation2 + $0xb10] sm:$0xff]  ;;  %v458_v45 = vld [vmem:[#allocation2 + $0xbd8] sm:$0xff] }
  0xe0   :  { %18575 = vst [vmem:[#allocation165_spill] sm:$0xff] %v14707_v30  ;;  %18577 = vst [vmem:[#allocation167_spill] sm:$0xff] %v14713_v58  ;;  %v14723_v61 = vpack.c.bf16 %v433_v3, %v421_v24  ;;  %v14728_v29 = vpack.c.bf16 %v458_v45, %v446_v32  ;;  %v467_v3 = vld [vmem:[#allocation2 + $0xc20] sm:$0xff]  ;;  %v469_v32 = vld [vmem:[#allocation2 + $0xc30] sm:$0xff] }
  0xe1   :  { %9343 = vmatpush1.bf16.msra.mxu0 %v14695_v5  ;;  %v456_v5 = vld [vmem:[#allocation2 + $0xbc8] sm:$0xff]  ;;  %v479_v24 = vld [vmem:[#allocation2 + $0xc80] sm:$0xff] }
  0xe2   :  { %9439 = vmatpush1.bf16.msra.mxu1 %v14699_v49  ;;  %9345 = vmatprep.subr.bf16.mxu0 %v14701_v21  ;;  %v14719_v49 = vpack.c.bf16 %v431_v48, %v419_v14  ;;  %18580 = vst [vmem:[#allocation170_spill] sm:$0xff] %v14723_v61  ;;  %v14725_v6 = vpack.c.bf16 %v456_v5, %v444_v15  ;;  %18582 = vst [vmem:[#allocation172_spill] sm:$0xff] %v14728_v29  ;;  %v468_v21 = vld [vmem:[#allocation2 + $0xc28] sm:$0xff]  ;;  %v470_v14 = vld [vmem:[#allocation2 + $0xc38] sm:$0xff] }
  0xe3   :  { %9441 = vmatprep.subr.bf16.mxu1 %v14704_v42  ;;  %v457_v42 = vld [vmem:[#allocation2 + $0xbd0] sm:$0xff]  ;;  %v482_v48 = vld [vmem:[#allocation2 + $0xc98] sm:$0xff] }
  0xe4   :  { %18579 = vst [vmem:[#allocation169_spill] sm:$0xff] %v14719_v49  ;;  %18581 = vst [vmem:[#allocation171_spill] sm:$0xff] %v14725_v6  ;;  %v14735_v5 = vpack.c.bf16 %v457_v42, %v445_v62  ;;  %v14740_v45 = vpack.c.bf16 %v482_v48, %v470_v14  ;;  %v491_v42 = vld [vmem:[#allocation2 + $0xce0] sm:$0xff]  ;;  %v493_v14 = vld [vmem:[#allocation2 + $0xcf0] sm:$0xff] }
  0xe5   :  { %9347 = vmatpush1.bf16.msra.mxu0 %v14707_v30  ;;  %v480_v30 = vld [vmem:[#allocation2 + $0xc88] sm:$0xff]  ;;  %v503_v62 = vld [vmem:[#allocation2 + $0xd40] sm:$0xff] }
  0xe6   :  { %9443 = vmatpush1.bf16.msra.mxu1 %v14711_v59  ;;  %9349 = vmatprep.subr.bf16.mxu0 %v14713_v58  ;;  %v14731_v59 = vpack.c.bf16 %v455_v46, %v443_v0  ;;  %18584 = vst [vmem:[#allocation174_spill] sm:$0xff] %v14735_v5  ;;  %v14737_v15 = vpack.c.bf16 %v480_v30, %v468_v21  ;;  %18586 = vst [vmem:[#allocation176_spill] sm:$0xff] %v14740_v45  ;;  %v492_v58 = vld [vmem:[#allocation2 + $0xce8] sm:$0xff]  ;;  %v494_v0 = vld [vmem:[#allocation2 + $0xcf8] sm:$0xff] }
  0xe7   :  { %9445 = vmatprep.subr.bf16.mxu1 %v14716_v28  ;;  %v481_v28 = vld [vmem:[#allocation2 + $0xc90] sm:$0xff]  ;;  %v506_v46 = vld [vmem:[#allocation2 + $0xd58] sm:$0xff] }
  0xe8   :  { %18583 = vst [vmem:[#allocation173_spill] sm:$0xff] %v14731_v59  ;;  %18585 = vst [vmem:[#allocation175_spill] sm:$0xff] %v14737_v15  ;;  %v14747_v30 = vpack.c.bf16 %v481_v28, %v469_v32  ;;  %v14752_v48 = vpack.c.bf16 %v506_v46, %v494_v0  ;;  %v515_v32 = vld [vmem:[#allocation2 + $0xda0] sm:$0xff]  ;;  %v517_v46 = vld [vmem:[#allocation2 + $0xdb0] sm:$0xff] }
  0xe9   :  { %9351 = vmatpush1.bf16.msra.mxu0 %v14719_v49  ;;  %v504_v49 = vld [vmem:[#allocation2 + $0xd48] sm:$0xff]  ;;  %v527_v0 = vld [vmem:[#allocation2 + $0xe00] sm:$0xff] }
  0xea   :  { %9447 = vmatpush1.bf16.msra.mxu1 %v14723_v61  ;;  %9353 = vmatprep.subr.bf16.mxu0 %v14725_v6  ;;  %v14743_v61 = vpack.c.bf16 %v479_v24, %v467_v3  ;;  %18588 = vst [vmem:[#allocation178_spill] sm:$0xff] %v14747_v30  ;;  %v14749_v21 = vpack.c.bf16 %v504_v49, %v492_v58  ;;  %18590 = vst [vmem:[#allocation180_spill] sm:$0xff] %v14752_v48  ;;  %v516_v6 = vld [vmem:[#allocation2 + $0xda8] sm:$0xff]  ;;  %v518_v3 = vld [vmem:[#allocation2 + $0xdb8] sm:$0xff] }
  0xeb   :  { %9449 = vmatprep.subr.bf16.mxu1 %v14728_v29  ;;  %v505_v29 = vld [vmem:[#allocation2 + $0xd50] sm:$0xff]  ;;  %v530_v24 = vld [vmem:[#allocation2 + $0xe18] sm:$0xff]  ;;  %v14757_v49 = vpack.c.bf16 %v503_v62, %v491_v42 }
  0xec   :  { %18587 = vst [vmem:[#allocation177_spill] sm:$0xff] %v14743_v61  ;;  %18589 = vst [vmem:[#allocation179_spill] sm:$0xff] %v14749_v21  ;;  %v14761_v58 = vpack.c.bf16 %v505_v29, %v493_v14  ;;  %v542_v42 = vld [vmem:[#allocation2 + $0xe78] sm:$0xff]  ;;  %v539_v14 = vld [vmem:[#allocation2 + $0xe60] sm:$0xff] }
  0xed   :  { %9355 = vmatpush1.bf16.msra.mxu0 %v14731_v59  ;;  %v528_v59 = vld [vmem:[#allocation2 + $0xe08] sm:$0xff]  ;;  %18591 = vst [vmem:[#allocation181_spill] sm:$0xff] %v14757_v49  ;;  %v554_v62 = vld [vmem:[#allocation2 + $0xed8] sm:$0xff] }
  0xee   :  { %9451 = vmatpush1.bf16.msra.mxu1 %v14735_v5  ;;  %9357 = vmatprep.subr.bf16.mxu0 %v14737_v15  ;;  %18592 = vst [vmem:[#allocation182_spill] sm:$0xff] %v14761_v58  ;;  %v14763_v28 = vpack.c.bf16 %v528_v59, %v516_v6  ;;  %v540_v15 = vld [vmem:[#allocation2 + $0xe68] sm:$0xff]  ;;  %v14771_v59 = vpack.c.bf16 %v527_v0, %v515_v32  ;;  %v566_v32 = vld [vmem:[#allocation2 + $0xf38] sm:$0xff] }
  0xef   :  { %9453 = vmatprep.subr.bf16.mxu1 %v14740_v45  ;;  %v14766_v45 = vpack.c.bf16 %v530_v24, %v518_v3  ;;  %v552_v5 = vld [vmem:[#allocation2 + $0xec8] sm:$0xff]  ;;  %v551_v3 = vld [vmem:[#allocation2 + $0xec0] sm:$0xff]  ;;  %v541_v24 = vld [vmem:[#allocation2 + $0xe70] sm:$0xff] }
  0xf0   :  { %1007 = vmatmul.mubr.f32.vlgmr.msra.gmra.mrb[2].mxu0 %v18494_v56  ;;  %18593 = vst [vmem:[#allocation183_spill] sm:$0xff] %v14763_v28  ;;  %18595 = vst [vmem:[#allocation185_spill] sm:$0xff] %v14771_v59  ;;  %v14777_v29 = vpack.c.bf16 %v552_v5, %v540_v15  ;;  %v578_v0 = vld [vmem:[#allocation2 + $0xf98] sm:$0xff]  ;;  %v563_v15 = vld [vmem:[#allocation2 + $0xf20] sm:$0xff] }
  0xf1   :  { %9359 = vmatpush1.bf16.msra.mxu0 %v14743_v61  ;;  %1149 = vmatmul.mubr.f32.vlgmr.msra.gmra.mrb[2].mxu1 %v18494_v56  ;;  %18594 = vst [vmem:[#allocation184_spill] sm:$0xff] %v14766_v45  ;;  %v529_v61 = vld [vmem:[#allocation2 + $0xe10] sm:$0xff] }
  0xf2   :  { %9455 = vmatpush1.bf16.msra.mxu1 %v14747_v30  ;;  %9361 = vmatprep.subr.bf16.mxu0 %v14749_v21  ;;  %v14775_v6 = vpack.c.bf16 %v529_v61, %v517_v46  ;;  %18597 = vst [vmem:[#allocation187_spill] sm:$0xff] %v14777_v29  ;;  %v553_v21 = vld [vmem:[#allocation2 + $0xed0] sm:$0xff]  ;;  %v564_v30 = vld [vmem:[#allocation2 + $0xf28] sm:$0xff]  ;;  %v575_v46 = vld [vmem:[#allocation2 + $0xf80] sm:$0xff] }
  0xf3   :  { %9457 = vmatprep.subr.bf16.mxu1 %v14752_v48  ;;  %1077 = vmatprep.mubr.f32.mxu0 %v18494_v56  ;;  %v14780_v48 = vpack.c.bf16 %v554_v62, %v542_v42  ;;  %v14787_v61 = vpack.c.bf16 %v553_v21, %v541_v24  ;;  %v565_v42 = vld [vmem:[#allocation2 + $0xf30] sm:$0xff]  ;;  %v14792_v62 = vpack.c.bf16 %v578_v0, %v566_v32  ;;  %v599_v24 = vld [vmem:[#allocation2 + $0x1040] sm:$0xff] }
  0xf4   :  { %1219 = vmatprep.mubr.f32.mxu1 %v18494_v56  ;;  %18596 = vst [vmem:[#allocation186_spill] sm:$0xff] %v14775_v6  ;;  %v589_v32 = vld [vmem:[#allocation2 + $0xff0] sm:$0xff] }
  0xf5   :  { %9363 = vmatpush1.bf16.msra.mxu0 %v14757_v49  ;;  %18598 = vst [vmem:[#allocation188_spill] sm:$0xff] %v14780_v48  ;;  %v576_v49 = vld [vmem:[#allocation2 + $0xf88] sm:$0xff]  ;;  %18600 = vst [vmem:[#allocation190_spill] sm:$0xff] %v14787_v61 }
  0xf6   :  { %9459 = vmatpush1.bf16.msra.mxu1 %v14761_v58  ;;  %9365 = vmatprep.subr.bf16.mxu0 %v14763_v28  ;;  %v14783_v58 = vpack.c.bf16 %v551_v3, %v539_v14  ;;  %v14789_v5 = vpack.c.bf16 %v576_v49, %v564_v30  ;;  %18602 = vst [vmem:[#allocation192_spill] sm:$0xff] %v14792_v62  ;;  %v588_v28 = vld [vmem:[#allocation2 + $0xfe8] sm:$0xff]  ;;  %v590_v14 = vld [vmem:[#allocation2 + $0xff8] sm:$0xff]  ;;  %v587_v49 = vld [vmem:[#allocation2 + $0xfe0] sm:$0xff] }
  0xf7   :  { %9461 = vmatprep.subr.bf16.mxu1 %v14766_v45  ;;  %v577_v45 = vld [vmem:[#allocation2 + $0xf90] sm:$0xff]  ;;  %v602_v3 = vld [vmem:[#allocation2 + $0x1058] sm:$0xff] }
  0xf8   :  { %18599 = vst [vmem:[#allocation189_spill] sm:$0xff] %v14783_v58  ;;  %18601 = vst [vmem:[#allocation191_spill] sm:$0xff] %v14789_v5  ;;  %v14799_v30 = vpack.c.bf16 %v577_v45, %v565_v42  ;;  %v14804_v0 = vpack.c.bf16 %v602_v3, %v590_v14  ;;  %v623_v42 = vld [vmem:[#allocation2 + $0x1100] sm:$0xff]  ;;  %v613_v14 = vld [vmem:[#allocation2 + $0x10b0] sm:$0xff] }
  0xf9   :  { %9367 = vmatpush1.bf16.msra.mxu0 %v14771_v59  ;;  %v600_v59 = vld [vmem:[#allocation2 + $0x1048] sm:$0xff] }
  0xfa   :  { %9463 = vmatpush1.bf16.msra.mxu1 %v14775_v6  ;;  %9369 = vmatprep.subr.bf16.mxu0 %v14777_v29  ;;  %v14795_v6 = vpack.c.bf16 %v575_v46, %v563_v15  ;;  %18604 = vst [vmem:[#allocation194_spill] sm:$0xff] %v14799_v30  ;;  %v14801_v21 = vpack.c.bf16 %v600_v59, %v588_v28  ;;  %18606 = vst [vmem:[#allocation196_spill] sm:$0xff] %v14804_v0  ;;  %v612_v29 = vld [vmem:[#allocation2 + $0x10a8] sm:$0xff]  ;;  %v614_v15 = vld [vmem:[#allocation2 + $0x10b8] sm:$0xff] }
  0xfb   :  { %9465 = vmatprep.subr.bf16.mxu1 %v14780_v48  ;;  %v601_v48 = vld [vmem:[#allocation2 + $0x1050] sm:$0xff]  ;;  %v626_v46 = vld [vmem:[#allocation2 + $0x1118] sm:$0xff]  ;;  %v611_v59 = vld [vmem:[#allocation2 + $0x10a0] sm:$0xff] }
  0xfc   :  { %18603 = vst [vmem:[#allocation193_spill] sm:$0xff] %v14795_v6  ;;  %18605 = vst [vmem:[#allocation195_spill] sm:$0xff] %v14801_v21  ;;  %v14811_v45 = vpack.c.bf16 %v601_v48, %v589_v32  ;;  %v14816_v3 = vpack.c.bf16 %v626_v46, %v614_v15  ;;  %v647_v32 = vld [vmem:[#allocation2 + $0x11c0] sm:$0xff]  ;;  %v637_v15 = vld [vmem:[#allocation2 + $0x1170] sm:$0xff] }
  0xfd   :  { %9371 = vmatpush1.bf16.msra.mxu0 %v14783_v58  ;;  %v624_v58 = vld [vmem:[#allocation2 + $0x1108] sm:$0xff] }
  0xfe   :  { %9467 = vmatpush1.bf16.msra.mxu1 %v14787_v61  ;;  %9373 = vmatprep.subr.bf16.mxu0 %v14789_v5  ;;  %v14807_v61 = vpack.c.bf16 %v599_v24, %v587_v49  ;;  %18608 = vst [vmem:[#allocation198_spill] sm:$0xff] %v14811_v45  ;;  %v14813_v28 = vpack.c.bf16 %v624_v58, %v612_v29  ;;  %18610 = vst [vmem:[#allocation200_spill] sm:$0xff] %v14816_v3  ;;  %v636_v5 = vld [vmem:[#allocation2 + $0x1168] sm:$0xff]  ;;  %v638_v49 = vld [vmem:[#allocation2 + $0x1178] sm:$0xff] }
  0xff   :  { %9469 = vmatprep.subr.bf16.mxu1 %v14792_v62  ;;  %v625_v62 = vld [vmem:[#allocation2 + $0x1110] sm:$0xff]  ;;  %v650_v24 = vld [vmem:[#allocation2 + $0x11d8] sm:$0xff]  ;;  %v635_v29 = vld [vmem:[#allocation2 + $0x1160] sm:$0xff] }
 0x100   :  { %18607 = vst [vmem:[#allocation197_spill] sm:$0xff] %v14807_v61  ;;  %18609 = vst [vmem:[#allocation199_spill] sm:$0xff] %v14813_v28  ;;  %v14823_v48 = vpack.c.bf16 %v625_v62, %v613_v14  ;;  %v14828_v46 = vpack.c.bf16 %v650_v24, %v638_v49  ;;  %v87_v62 = vld [vmem:[#allocation2 + $0x40] sm:$0xff]  ;;  %v89_v49 = vld [vmem:[#allocation2 + $0x50] sm:$0xff] }
 0x101   :  { %9375 = vmatpush1.bf16.msra.mxu0 %v14795_v6  ;;  %v648_v6 = vld [vmem:[#allocation2 + $0x11c8] sm:$0xff]  ;;  %v99_v14 = vld [vmem:[#allocation2 + $0xa0] sm:$0xff] }
 0x102   :  { %9471 = vmatpush1.bf16.msra.mxu1 %v14799_v30  ;;  %9377 = vmatprep.subr.bf16.mxu0 %v14801_v21  ;;  %v14819_v30 = vpack.c.bf16 %v623_v42, %v611_v59  ;;  %18612 = vst [vmem:[#allocation202_spill] sm:$0xff] %v14823_v48  ;;  %v14825_v58 = vpack.c.bf16 %v648_v6, %v636_v5  ;;  %18614 = vst [vmem:[#allocation204_spill] sm:$0xff] %v14828_v46  ;;  %v88_v21 = vld [vmem:[#allocation2 + $0x48] sm:$0xff]  ;;  %v90_v59 = vld [vmem:[#allocation2 + $0x58] sm:$0xff] }
 0x103   :  { %9473 = vmatprep.subr.bf16.mxu1 %v14804_v0  ;;  %v649_v0 = vld [vmem:[#allocation2 + $0x11d0] sm:$0xff]  ;;  %v102_v42 = vld [vmem:[#allocation2 + $0xb8] sm:$0xff] }
 0x104   :  { %18611 = vst [vmem:[#allocation201_spill] sm:$0xff] %v14819_v30  ;;  %18613 = vst [vmem:[#allocation203_spill] sm:$0xff] %v14825_v58  ;;  %v14835_v6 = vpack.c.bf16 %v649_v0, %v637_v15  ;;  %v14840_v24 = vpack.c.bf16 %v102_v42, %v90_v59  ;;  %v111_v0 = vld [vmem:[#allocation2 + $0x100] sm:$0xff]  ;;  %v113_v59 = vld [vmem:[#allocation2 + $0x110] sm:$0xff] }
 0x105   :  { %9379 = vmatpush1.bf16.msra.mxu0 %v14807_v61  ;;  %v100_v61 = vld [vmem:[#allocation2 + $0xa8] sm:$0xff]  ;;  %v123_v15 = vld [vmem:[#allocation2 + $0x160] sm:$0xff] }
 0x106   :  { %9475 = vmatpush1.bf16.msra.mxu1 %v14811_v45  ;;  %9381 = vmatprep.subr.bf16.mxu0 %v14813_v28  ;;  %v14831_v45 = vpack.c.bf16 %v647_v32, %v635_v29  ;;  %18616 = vst [vmem:[#allocation206_spill] sm:$0xff] %v14835_v6  ;;  %v14837_v5 = vpack.c.bf16 %v100_v61, %v88_v21  ;;  %18618 = vst [vmem:[#allocation208_spill] sm:$0xff] %v14840_v24  ;;  %v112_v28 = vld [vmem:[#allocation2 + $0x108] sm:$0xff]  ;;  %v114_v29 = vld [vmem:[#allocation2 + $0x118] sm:$0xff] }
 0x107   :  { %9477 = vmatprep.subr.bf16.mxu1 %v14816_v3  ;;  %v101_v3 = vld [vmem:[#allocation2 + $0xb0] sm:$0xff]  ;;  %v126_v32 = vld [vmem:[#allocation2 + $0x178] sm:$0xff] }
 0x108   :  { %18615 = vst [vmem:[#allocation205_spill] sm:$0xff] %v14831_v45  ;;  %18617 = vst [vmem:[#allocation207_spill] sm:$0xff] %v14837_v5  ;;  %v14847_v61 = vpack.c.bf16 %v101_v3, %v89_v49  ;;  %v14852_v42 = vpack.c.bf16 %v126_v32, %v114_v29  ;;  %v135_v49 = vld [vmem:[#allocation2 + $0x1c0] sm:$0xff]  ;;  %v137_v32 = vld [vmem:[#allocation2 + $0x1d0] sm:$0xff] }
 0x109   :  { %9383 = vmatpush1.bf16.msra.mxu0 %v14819_v30  ;;  %v124_v30 = vld [vmem:[#allocation2 + $0x168] sm:$0xff]  ;;  %v147_v29 = vld [vmem:[#allocation2 + $0x220] sm:$0xff] }
 0x10a   :  { %9479 = vmatpush1.bf16.msra.mxu1 %v14823_v48  ;;  %9385 = vmatprep.subr.bf16.mxu0 %v14825_v58  ;;  %v14843_v48 = vpack.c.bf16 %v99_v14, %v87_v62  ;;  %18620 = vst [vmem:[#allocation210_spill] sm:$0xff] %v14847_v61  ;;  %v14849_v21 = vpack.c.bf16 %v124_v30, %v112_v28  ;;  %18622 = vst [vmem:[#allocation212_spill] sm:$0xff] %v14852_v42  ;;  %v136_v58 = vld [vmem:[#allocation2 + $0x1c8] sm:$0xff]  ;;  %v138_v62 = vld [vmem:[#allocation2 + $0x1d8] sm:$0xff] }
 0x10b   :  { %9481 = vmatprep.subr.bf16.mxu1 %v14828_v46  ;;  %v125_v46 = vld [vmem:[#allocation2 + $0x170] sm:$0xff]  ;;  %v150_v14 = vld [vmem:[#allocation2 + $0x238] sm:$0xff]  ;;  %v14857_v30 = vpack.c.bf16 %v123_v15, %v111_v0 }
 0x10c   :  { %18619 = vst [vmem:[#allocation209_spill] sm:$0xff] %v14843_v48  ;;  %18621 = vst [vmem:[#allocation211_spill] sm:$0xff] %v14849_v21  ;;  %v14861_v28 = vpack.c.bf16 %v125_v46, %v113_v59  ;;  %v162_v0 = vld [vmem:[#allocation2 + $0x298] sm:$0xff]  ;;  %v159_v59 = vld [vmem:[#allocation2 + $0x280] sm:$0xff] }
 0x10d   :  { %9387 = vmatpush1.bf16.msra.mxu0 %v14831_v45  ;;  %v148_v45 = vld [vmem:[#allocation2 + $0x228] sm:$0xff]  ;;  %18623 = vst [vmem:[#allocation213_spill] sm:$0xff] %v14857_v30  ;;  %v174_v15 = vld [vmem:[#allocation2 + $0x2f8] sm:$0xff] }
 0x10e   :  { %9483 = vmatpush1.bf16.msra.mxu1 %v14835_v6  ;;  %9485 = vmatprep.subr.bf16.mxu0 %v14837_v5  ;;  %18624 = vst [vmem:[#allocation214_spill] sm:$0xff] %v14861_v28  ;;  %v14863_v3 = vpack.c.bf16 %v148_v45, %v136_v58  ;;  %v149_v5 = vld [vmem:[#allocation2 + $0x230] sm:$0xff]  ;;  %v160_v6 = vld [vmem:[#allocation2 + $0x288] sm:$0xff]  ;;  %v14871_v45 = vpack.c.bf16 %v147_v29, %v135_v49  ;;  %v186_v49 = vld [vmem:[#allocation2 + $0x358] sm:$0xff] }
 0x10f   :  { %9581 = vmatprep.subr.bf16.mxu1 %v14840_v24  ;;  %v14866_v24 = vpack.c.bf16 %v150_v14, %v138_v62  ;;  %v14875_v58 = vpack.c.bf16 %v149_v5, %v137_v32  ;;  %v171_v62 = vld [vmem:[#allocation2 + $0x2e0] sm:$0xff]  ;;  %v161_v14 = vld [vmem:[#allocation2 + $0x290] sm:$0xff]  ;;  %v198_v29 = vld [vmem:[#allocation2 + $0x3b8] sm:$0xff] }
 0x110   :  { %1078 = vmatmul.mubr.f32.vlgmr.msra.gmra.mrb[2].mxu0 %v18494_v56  ;;  %18625 = vst [vmem:[#allocation215_spill] sm:$0xff] %v14863_v3  ;;  %18627 = vst [vmem:[#allocation217_spill] sm:$0xff] %v14871_v45  ;;  %v183_v5 = vld [vmem:[#allocation2 + $0x340] sm:$0xff] }
 0x111   :  { %1220 = vmatmul.mubr.f32.vlgmr.msra.gmra.mrb[2].mxu1 %v18494_v56  ;;  %9487 = vmatpush1.bf16.msra.mxu0 %v14843_v48  ;;  %18626 = vst [vmem:[#allocation216_spill] sm:$0xff] %v14866_v24  ;;  %v172_v48 = vld [vmem:[#allocation2 + $0x2e8] sm:$0xff]  ;;  %18628 = vst [vmem:[#allocation218_spill] sm:$0xff] %v14875_v58  ;;  %v195_v32 = vld [vmem:[#allocation2 + $0x3a0] sm:$0xff] }
 0x112   :  { %9583 = vmatpush1.bf16.msra.mxu1 %v14847_v61  ;;  %9489 = vmatprep.subr.bf16.mxu0 %v14849_v21  ;;  %v14877_v46 = vpack.c.bf16 %v172_v48, %v160_v6  ;;  %v173_v21 = vld [vmem:[#allocation2 + $0x2f0] sm:$0xff]  ;;  %v184_v61 = vld [vmem:[#allocation2 + $0x348] sm:$0xff] }
 0x113   :  { %9585 = vmatprep.subr.bf16.mxu1 %v14852_v42  ;;  %1290 = vmatprep.mubr.f32.mxu0 %v18494_v56  ;;  %v14880_v42 = vpack.c.bf16 %v174_v15, %v162_v0  ;;  %v14887_v48 = vpack.c.bf16 %v173_v21, %v161_v14  ;;  %v185_v0 = vld [vmem:[#allocation2 + $0x350] sm:$0xff]  ;;  %v14892_v15 = vpack.c.bf16 %v198_v29, %v186_v49  ;;  %v219_v14 = vld [vmem:[#allocation2 + $0x460] sm:$0xff] }
 0x114   :  { %1432 = vmatprep.mubr.f32.mxu1 %v18494_v56  ;;  %18629 = vst [vmem:[#allocation219_spill] sm:$0xff] %v14877_v46  ;;  %v209_v49 = vld [vmem:[#allocation2 + $0x410] sm:$0xff] }
 0x115   :  { %9491 = vmatpush1.bf16.msra.mxu0 %v14857_v30  ;;  %18630 = vst [vmem:[#allocation220_spill] sm:$0xff] %v14880_v42  ;;  %v196_v30 = vld [vmem:[#allocation2 + $0x3a8] sm:$0xff]  ;;  %18632 = vst [vmem:[#allocation222_spill] sm:$0xff] %v14887_v48 }
 0x116   :  { %9587 = vmatpush1.bf16.msra.mxu1 %v14861_v28  ;;  %9493 = vmatprep.subr.bf16.mxu0 %v14863_v3  ;;  %v14883_v28 = vpack.c.bf16 %v171_v62, %v159_v59  ;;  %v14889_v6 = vpack.c.bf16 %v196_v30, %v184_v61  ;;  %18634 = vst [vmem:[#allocation224_spill] sm:$0xff] %v14892_v15  ;;  %v208_v3 = vld [vmem:[#allocation2 + $0x408] sm:$0xff]  ;;  %v210_v59 = vld [vmem:[#allocation2 + $0x418] sm:$0xff]  ;;  %v207_v30 = vld [vmem:[#allocation2 + $0x400] sm:$0xff] }
 0x117   :  { %9589 = vmatprep.subr.bf16.mxu1 %v14866_v24  ;;  %v197_v24 = vld [vmem:[#allocation2 + $0x3b0] sm:$0xff]  ;;  %v222_v62 = vld [vmem:[#allocation2 + $0x478] sm:$0xff] }
 0x118   :  { %18631 = vst [vmem:[#allocation221_spill] sm:$0xff] %v14883_v28  ;;  %18633 = vst [vmem:[#allocation223_spill] sm:$0xff] %v14889_v6  ;;  %v14899_v61 = vpack.c.bf16 %v197_v24, %v185_v0  ;;  %v14904_v29 = vpack.c.bf16 %v222_v62, %v210_v59  ;;  %v243_v0 = vld [vmem:[#allocation2 + $0x520] sm:$0xff]  ;;  %v233_v59 = vld [vmem:[#allocation2 + $0x4d0] sm:$0xff] }
 0x119   :  { %9495 = vmatpush1.bf16.msra.mxu0 %v14871_v45  ;;  %v220_v45 = vld [vmem:[#allocation2 + $0x468] sm:$0xff] }
 0x11a   :  { %9591 = vmatpush1.bf16.msra.mxu1 %v14875_v58  ;;  %9497 = vmatprep.subr.bf16.mxu0 %v14877_v46  ;;  %v14895_v58 = vpack.c.bf16 %v195_v32, %v183_v5  ;;  %18636 = vst [vmem:[#allocation226_spill] sm:$0xff] %v14899_v61  ;;  %v14901_v21 = vpack.c.bf16 %v220_v45, %v208_v3  ;;  %18638 = vst [vmem:[#allocation228_spill] sm:$0xff] %v14904_v29  ;;  %v232_v46 = vld [vmem:[#allocation2 + $0x4c8] sm:$0xff]  ;;  %v234_v5 = vld [vmem:[#allocation2 + $0x4d8] sm:$0xff] }
 0x11b   :  { %9593 = vmatprep.subr.bf16.mxu1 %v14880_v42  ;;  %v221_v42 = vld [vmem:[#allocation2 + $0x470] sm:$0xff]  ;;  %v246_v32 = vld [vmem:[#allocation2 + $0x538] sm:$0xff]  ;;  %v231_v45 = vld [vmem:[#allocation2 + $0x4c0] sm:$0xff] }
 0x11c   :  { %18635 = vst [vmem:[#allocation225_spill] sm:$0xff] %v14895_v58  ;;  %18637 = vst [vmem:[#allocation227_spill] sm:$0xff] %v14901_v21  ;;  %v14911_v24 = vpack.c.bf16 %v221_v42, %v209_v49  ;;  %v14916_v62 = vpack.c.bf16 %v246_v32, %v234_v5  ;;  %v267_v49 = vld [vmem:[#allocation2 + $0x5e0] sm:$0xff]  ;;  %v257_v5 = vld [vmem:[#allocation2 + $0x590] sm:$0xff] }
 0x11d   :  { %9499 = vmatpush1.bf16.msra.mxu0 %v14883_v28  ;;  %v244_v28 = vld [vmem:[#allocation2 + $0x528] sm:$0xff] }
 0x11e   :  { %9595 = vmatpush1.bf16.msra.mxu1 %v14887_v48  ;;  %9501 = vmatprep.subr.bf16.mxu0 %v14889_v6  ;;  %v14907_v48 = vpack.c.bf16 %v219_v14, %v207_v30  ;;  %18640 = vst [vmem:[#allocation230_spill] sm:$0xff] %v14911_v24  ;;  %v14913_v3 = vpack.c.bf16 %v244_v28, %v232_v46  ;;  %18642 = vst [vmem:[#allocation232_spill] sm:$0xff] %v14916_v62  ;;  %v256_v6 = vld [vmem:[#allocation2 + $0x588] sm:$0xff]  ;;  %v258_v30 = vld [vmem:[#allocation2 + $0x598] sm:$0xff] }
 0x11f   :  { %9597 = vmatprep.subr.bf16.mxu1 %v14892_v15  ;;  %v245_v15 = vld [vmem:[#allocation2 + $0x530] sm:$0xff]  ;;  %v270_v14 = vld [vmem:[#allocation2 + $0x5f8] sm:$0xff]  ;;  %v255_v46 = vld [vmem:[#allocation2 + $0x580] sm:$0xff] }
 0x120   :  { %18639 = vst [vmem:[#allocation229_spill] sm:$0xff] %v14907_v48  ;;  %18641 = vst [vmem:[#allocation231_spill] sm:$0xff] %v14913_v3  ;;  %v14923_v42 = vpack.c.bf16 %v245_v15, %v233_v59  ;;  %v14928_v32 = vpack.c.bf16 %v270_v14, %v258_v30  ;;  %v279_v15 = vld [vmem:[#allocation2 + $0x640] sm:$0xff]  ;;  %v281_v30 = vld [vmem:[#allocation2 + $0x650] sm:$0xff] }
 0x121   :  { %9503 = vmatpush1.bf16.msra.mxu0 %v14895_v58  ;;  %v268_v58 = vld [vmem:[#allocation2 + $0x5e8] sm:$0xff]  ;;  %v291_v59 = vld [vmem:[#allocation2 + $0x6a0] sm:$0xff] }
 0x122   :  { %9599 = vmatpush1.bf16.msra.mxu1 %v14899_v61  ;;  %9505 = vmatprep.subr.bf16.mxu0 %v14901_v21  ;;  %v14919_v61 = vpack.c.bf16 %v243_v0, %v231_v45  ;;  %18644 = vst [vmem:[#allocation234_spill] sm:$0xff] %v14923_v42  ;;  %v14925_v28 = vpack.c.bf16 %v268_v58, %v256_v6  ;;  %18646 = vst [vmem:[#allocation236_spill] sm:$0xff] %v14928_v32  ;;  %v280_v21 = vld [vmem:[#allocation2 + $0x648] sm:$0xff]  ;;  %v282_v45 = vld [vmem:[#allocation2 + $0x658] sm:$0xff] }
 0x123   :  { %9601 = vmatprep.subr.bf16.mxu1 %v14904_v29  ;;  %v269_v29 = vld [vmem:[#allocation2 + $0x5f0] sm:$0xff]  ;;  %v294_v0 = vld [vmem:[#allocation2 + $0x6b8] sm:$0xff] }
 0x124   :  { %18643 = vst [vmem:[#allocation233_spill] sm:$0xff] %v14919_v61  ;;  %18645 = vst [vmem:[#allocation235_spill] sm:$0xff] %v14925_v28  ;;  %v14935_v58 = vpack.c.bf16 %v269_v29, %v257_v5  ;;  %v14940_v14 = vpack.c.bf16 %v294_v0, %v282_v45  ;;  %v303_v29 = vld [vmem:[#allocation2 + $0x700] sm:$0xff]  ;;  %v305_v45 = vld [vmem:[#allocation2 + $0x710] sm:$0xff] }
 0x125   :  { %9507 = vmatpush1.bf16.msra.mxu0 %v14907_v48  ;;  %v292_v48 = vld [vmem:[#allocation2 + $0x6a8] sm:$0xff]  ;;  %v315_v5 = vld [vmem:[#allocation2 + $0x760] sm:$0xff] }
 0x126   :  { %9603 = vmatpush1.bf16.msra.mxu1 %v14911_v24  ;;  %9509 = vmatprep.subr.bf16.mxu0 %v14913_v3  ;;  %v14931_v24 = vpack.c.bf16 %v267_v49, %v255_v46  ;;  %18648 = vst [vmem:[#allocation238_spill] sm:$0xff] %v14935_v58  ;;  %v14937_v6 = vpack.c.bf16 %v292_v48, %v280_v21  ;;  %18650 = vst [vmem:[#allocation240_spill] sm:$0xff] %v14940_v14  ;;  %v304_v3 = vld [vmem:[#allocation2 + $0x708] sm:$0xff]  ;;  %v306_v46 = vld [vmem:[#allocation2 + $0x718] sm:$0xff] }
 0x127   :  { %9605 = vmatprep.subr.bf16.mxu1 %v14916_v62  ;;  %v293_v62 = vld [vmem:[#allocation2 + $0x6b0] sm:$0xff]  ;;  %v318_v49 = vld [vmem:[#allocation2 + $0x778] sm:$0xff] }
 0x128   :  { %18647 = vst [vmem:[#allocation237_spill] sm:$0xff] %v14931_v24  ;;  %18649 = vst [vmem:[#allocation239_spill] sm:$0xff] %v14937_v6  ;;  %v14947_v48 = vpack.c.bf16 %v293_v62, %v281_v30  ;;  %v14952_v0 = vpack.c.bf16 %v318_v49, %v306_v46  ;;  %v327_v62 = vld [vmem:[#allocation2 + $0x7c0] sm:$0xff]  ;;  %v329_v46 = vld [vmem:[#allocation2 + $0x7d0] sm:$0xff] }
 0x129   :  { %9511 = vmatpush1.bf16.msra.mxu0 %v14919_v61  ;;  %v316_v61 = vld [vmem:[#allocation2 + $0x768] sm:$0xff]  ;;  %v339_v30 = vld [vmem:[#allocation2 + $0x820] sm:$0xff] }
 0x12a   :  { %9607 = vmatpush1.bf16.msra.mxu1 %v14923_v42  ;;  %9513 = vmatprep.subr.bf16.mxu0 %v14925_v28  ;;  %v14943_v42 = vpack.c.bf16 %v291_v59, %v279_v15  ;;  %18652 = vst [vmem:[#allocation242_spill] sm:$0xff] %v14947_v48  ;;  %v14949_v21 = vpack.c.bf16 %v316_v61, %v304_v3  ;;  %18654 = vst [vmem:[#allocation244_spill] sm:$0xff] %v14952_v0  ;;  %v328_v28 = vld [vmem:[#allocation2 + $0x7c8] sm:$0xff]  ;;  %v330_v15 = vld [vmem:[#allocation2 + $0x7d8] sm:$0xff] }
 0x12b   :  { %9609 = vmatprep.subr.bf16.mxu1 %v14928_v32  ;;  %v317_v32 = vld [vmem:[#allocation2 + $0x770] sm:$0xff]  ;;  %v342_v59 = vld [vmem:[#allocation2 + $0x838] sm:$0xff] }
 0x12c   :  { %18651 = vst [vmem:[#allocation241_spill] sm:$0xff] %v14943_v42  ;;  %18653 = vst [vmem:[#allocation243_spill] sm:$0xff] %v14949_v21  ;;  %v14959_v61 = vpack.c.bf16 %v317_v32, %v305_v45  ;;  %v14964_v49 = vpack.c.bf16 %v342_v59, %v330_v15  ;;  %v351_v32 = vld [vmem:[#allocation2 + $0x880] sm:$0xff]  ;;  %v353_v15 = vld [vmem:[#allocation2 + $0x890] sm:$0xff] }
 0x12d   :  { %9515 = vmatpush1.bf16.msra.mxu0 %v14931_v24  ;;  %v340_v24 = vld [vmem:[#allocation2 + $0x828] sm:$0xff]  ;;  %v363_v45 = vld [vmem:[#allocation2 + $0x8e0] sm:$0xff] }
 0x12e   :  { %9611 = vmatpush1.bf16.msra.mxu1 %v14935_v58  ;;  %9517 = vmatprep.subr.bf16.mxu0 %v14937_v6  ;;  %v14955_v58 = vpack.c.bf16 %v315_v5, %v303_v29  ;;  %18656 = vst [vmem:[#allocation246_spill] sm:$0xff] %v14959_v61  ;;  %v14961_v3 = vpack.c.bf16 %v340_v24, %v328_v28  ;;  %18658 = vst [vmem:[#allocation248_spill] sm:$0xff] %v14964_v49  ;;  %v352_v6 = vld [vmem:[#allocation2 + $0x888] sm:$0xff]  ;;  %v354_v29 = vld [vmem:[#allocation2 + $0x898] sm:$0xff] }
 0x12f   :  { %9613 = vmatprep.subr.bf16.mxu1 %v14940_v14  ;;  %v341_v14 = vld [vmem:[#allocation2 + $0x830] sm:$0xff]  ;;  %v366_v5 = vld [vmem:[#allocation2 + $0x8f8] sm:$0xff] }
 0x130   :  { %18655 = vst [vmem:[#allocation245_spill] sm:$0xff] %v14955_v58  ;;  %18657 = vst [vmem:[#allocation247_spill] sm:$0xff] %v14961_v3  ;;  %v14971_v24 = vpack.c.bf16 %v341_v14, %v329_v46  ;;  %v14976_v59 = vpack.c.bf16 %v366_v5, %v354_v29  ;;  %v375_v14 = vld [vmem:[#allocation2 + $0x940] sm:$0xff]  ;;  %v377_v29 = vld [vmem:[#allocation2 + $0x950] sm:$0xff] }
 0x131   :  { %9519 = vmatpush1.bf16.msra.mxu0 %v14943_v42  ;;  %v364_v42 = vld [vmem:[#allocation2 + $0x8e8] sm:$0xff]  ;;  %v387_v46 = vld [vmem:[#allocation2 + $0x9a0] sm:$0xff] }
 0x132   :  { %9615 = vmatpush1.bf16.msra.mxu1 %v14947_v48  ;;  %9521 = vmatprep.subr.bf16.mxu0 %v14949_v21  ;;  %v14967_v48 = vpack.c.bf16 %v339_v30, %v327_v62  ;;  %18660 = vst [vmem:[#allocation250_spill] sm:$0xff] %v14971_v24  ;;  %v14973_v28 = vpack.c.bf16 %v364_v42, %v352_v6  ;;  %18662 = vst [vmem:[#allocation252_spill] sm:$0xff] %v14976_v59  ;;  %v376_v21 = vld [vmem:[#allocation2 + $0x948] sm:$0xff]  ;;  %v378_v62 = vld [vmem:[#allocation2 + $0x958] sm:$0xff] }
 0x133   :  { %9617 = vmatprep.subr.bf16.mxu1 %v14952_v0  ;;  %v365_v0 = vld [vmem:[#allocation2 + $0x8f0] sm:$0xff]  ;;  %v390_v30 = vld [vmem:[#allocation2 + $0x9b8] sm:$0xff] }
 0x134   :  { %18659 = vst [vmem:[#allocation249_spill] sm:$0xff] %v14967_v48  ;;  %18661 = vst [vmem:[#allocation251_spill] sm:$0xff] %v14973_v28  ;;  %v14983_v42 = vpack.c.bf16 %v365_v0, %v353_v15  ;;  %v14988_v5 = vpack.c.bf16 %v390_v30, %v378_v62  ;;  %v399_v0 = vld [vmem:[#allocation2 + $0xa00] sm:$0xff]  ;;  %v401_v62 = vld [vmem:[#allocation2 + $0xa10] sm:$0xff] }
 0x135   :  { %9523 = vmatpush1.bf16.msra.mxu0 %v14955_v58  ;;  %v388_v58 = vld [vmem:[#allocation2 + $0x9a8] sm:$0xff]  ;;  %v411_v15 = vld [vmem:[#allocation2 + $0xa60] sm:$0xff] }
 0x136   :  { %9619 = vmatpush1.bf16.msra.mxu1 %v14959_v61  ;;  %9525 = vmatprep.subr.bf16.mxu0 %v14961_v3  ;;  %v14979_v61 = vpack.c.bf16 %v363_v45, %v351_v32  ;;  %18664 = vst [vmem:[#allocation254_spill] sm:$0xff] %v14983_v42  ;;  %v14985_v6 = vpack.c.bf16 %v388_v58, %v376_v21  ;;  %18666 = vst [vmem:[#allocation256_spill] sm:$0xff] %v14988_v5  ;;  %v400_v3 = vld [vmem:[#allocation2 + $0xa08] sm:$0xff]  ;;  %v402_v32 = vld [vmem:[#allocation2 + $0xa18] sm:$0xff] }
 0x137   :  { %9621 = vmatprep.subr.bf16.mxu1 %v14964_v49  ;;  %v389_v49 = vld [vmem:[#allocation2 + $0x9b0] sm:$0xff]  ;;  %v414_v45 = vld [vmem:[#allocation2 + $0xa78] sm:$0xff] }
 0x138   :  { %18663 = vst [vmem:[#allocation253_spill] sm:$0xff] %v14979_v61  ;;  %18665 = vst [vmem:[#allocation255_spill] sm:$0xff] %v14985_v6  ;;  %v14995_v58 = vpack.c.bf16 %v389_v49, %v377_v29  ;;  %v15000_v30 = vpack.c.bf16 %v414_v45, %v402_v32  ;;  %v423_v49 = vld [vmem:[#allocation2 + $0xac0] sm:$0xff]  ;;  %v425_v32 = vld [vmem:[#allocation2 + $0xad0] sm:$0xff] }
 0x139   :  { %9527 = vmatpush1.bf16.msra.mxu0 %v14967_v48  ;;  %v412_v48 = vld [vmem:[#allocation2 + $0xa68] sm:$0xff]  ;;  %v435_v29 = vld [vmem:[#allocation2 + $0xb20] sm:$0xff] }
 0x13a   :  { %9623 = vmatpush1.bf16.msra.mxu1 %v14971_v24  ;;  %9529 = vmatprep.subr.bf16.mxu0 %v14973_v28  ;;  %v14991_v24 = vpack.c.bf16 %v387_v46, %v375_v14  ;;  %18668 = vst [vmem:[#allocation258_spill] sm:$0xff] %v14995_v58  ;;  %v14997_v21 = vpack.c.bf16 %v412_v48, %v400_v3  ;;  %18670 = vst [vmem:[#allocation260_spill] sm:$0xff] %v15000_v30  ;;  %v424_v28 = vld [vmem:[#allocation2 + $0xac8] sm:$0xff]  ;;  %v426_v14 = vld [vmem:[#allocation2 + $0xad8] sm:$0xff] }
 0x13b   :  { %9625 = vmatprep.subr.bf16.mxu1 %v14976_v59  ;;  %v413_v59 = vld [vmem:[#allocation2 + $0xa70] sm:$0xff]  ;;  %v438_v46 = vld [vmem:[#allocation2 + $0xb38] sm:$0xff] }
 0x13c   :  { %18667 = vst [vmem:[#allocation257_spill] sm:$0xff] %v14991_v24  ;;  %18669 = vst [vmem:[#allocation259_spill] sm:$0xff] %v14997_v21  ;;  %v15007_v48 = vpack.c.bf16 %v413_v59, %v401_v62  ;;  %v15012_v45 = vpack.c.bf16 %v438_v46, %v426_v14  ;;  %v447_v59 = vld [vmem:[#allocation2 + $0xb80] sm:$0xff]  ;;  %v449_v14 = vld [vmem:[#allocation2 + $0xb90] sm:$0xff] }
 0x13d   :  { %9531 = vmatpush1.bf16.msra.mxu0 %v14979_v61  ;;  %v436_v61 = vld [vmem:[#allocation2 + $0xb28] sm:$0xff]  ;;  %v459_v62 = vld [vmem:[#allocation2 + $0xbe0] sm:$0xff] }
 0x13e   :  { %9627 = vmatpush1.bf16.msra.mxu1 %v14983_v42  ;;  %9533 = vmatprep.subr.bf16.mxu0 %v14985_v6  ;;  %v15003_v42 = vpack.c.bf16 %v411_v15, %v399_v0  ;;  %18672 = vst [vmem:[#allocation262_spill] sm:$0xff] %v15007_v48  ;;  %v15009_v3 = vpack.c.bf16 %v436_v61, %v424_v28  ;;  %18674 = vst [vmem:[#allocation264_spill] sm:$0xff] %v15012_v45  ;;  %v448_v6 = vld [vmem:[#allocation2 + $0xb88] sm:$0xff]  ;;  %v450_v0 = vld [vmem:[#allocation2 + $0xb98] sm:$0xff] }
 0x13f   :  { %9629 = vmatprep.subr.bf16.mxu1 %v14988_v5  ;;  %v437_v5 = vld [vmem:[#allocation2 + $0xb30] sm:$0xff]  ;;  %v462_v15 = vld [vmem:[#allocation2 + $0xbf8] sm:$0xff] }
 0x140   :  { %18671 = vst [vmem:[#allocation261_spill] sm:$0xff] %v15003_v42  ;;  %18673 = vst [vmem:[#allocation263_spill] sm:$0xff] %v15009_v3  ;;  %v15019_v61 = vpack.c.bf16 %v437_v5, %v425_v32  ;;  %v15024_v46 = vpack.c.bf16 %v462_v15, %v450_v0  ;;  %v471_v5 = vld [vmem:[#allocation2 + $0xc40] sm:$0xff]  ;;  %v473_v0 = vld [vmem:[#allocation2 + $0xc50] sm:$0xff] }
 0x141   :  { %9535 = vmatpush1.bf16.msra.mxu0 %v14991_v24  ;;  %v460_v24 = vld [vmem:[#allocation2 + $0xbe8] sm:$0xff]  ;;  %v483_v32 = vld [vmem:[#allocation2 + $0xca0] sm:$0xff] }
 0x142   :  { %9631 = vmatpush1.bf16.msra.mxu1 %v14995_v58  ;;  %9537 = vmatprep.subr.bf16.mxu0 %v14997_v21  ;;  %v15015_v58 = vpack.c.bf16 %v435_v29, %v423_v49  ;;  %18676 = vst [vmem:[#allocation266_spill] sm:$0xff] %v15019_v61  ;;  %v15021_v28 = vpack.c.bf16 %v460_v24, %v448_v6  ;;  %18678 = vst [vmem:[#allocation268_spill] sm:$0xff] %v15024_v46  ;;  %v472_v21 = vld [vmem:[#allocation2 + $0xc48] sm:$0xff]  ;;  %v474_v49 = vld [vmem:[#allocation2 + $0xc58] sm:$0xff] }
 0x143   :  { %9633 = vmatprep.subr.bf16.mxu1 %v15000_v30  ;;  %v461_v30 = vld [vmem:[#allocation2 + $0xbf0] sm:$0xff]  ;;  %v486_v29 = vld [vmem:[#allocation2 + $0xcb8] sm:$0xff] }
 0x144   :  { %18675 = vst [vmem:[#allocation265_spill] sm:$0xff] %v15015_v58  ;;  %18677 = vst [vmem:[#allocation267_spill] sm:$0xff] %v15021_v28  ;;  %v15031_v24 = vpack.c.bf16 %v461_v30, %v449_v14  ;;  %v15036_v15 = vpack.c.bf16 %v486_v29, %v474_v49  ;;  %v495_v30 = vld [vmem:[#allocation2 + $0xd00] sm:$0xff]  ;;  %v497_v49 = vld [vmem:[#allocation2 + $0xd10] sm:$0xff] }
 0x145   :  { %9539 = vmatpush1.bf16.msra.mxu0 %v15003_v42  ;;  %v484_v42 = vld [vmem:[#allocation2 + $0xca8] sm:$0xff]  ;;  %v507_v14 = vld [vmem:[#allocation2 + $0xd60] sm:$0xff] }
 0x146   :  { %9635 = vmatpush1.bf16.msra.mxu1 %v15007_v48  ;;  %9541 = vmatprep.subr.bf16.mxu0 %v15009_v3  ;;  %v15027_v48 = vpack.c.bf16 %v459_v62, %v447_v59  ;;  %18680 = vst [vmem:[#allocation270_spill] sm:$0xff] %v15031_v24  ;;  %v15033_v6 = vpack.c.bf16 %v484_v42, %v472_v21  ;;  %18682 = vst [vmem:[#allocation272_spill] sm:$0xff] %v15036_v15  ;;  %v496_v3 = vld [vmem:[#allocation2 + $0xd08] sm:$0xff]  ;;  %v498_v59 = vld [vmem:[#allocation2 + $0xd18] sm:$0xff] }
 0x147   :  { %9637 = vmatprep.subr.bf16.mxu1 %v15012_v45  ;;  %v485_v45 = vld [vmem:[#allocation2 + $0xcb0] sm:$0xff]  ;;  %v510_v62 = vld [vmem:[#allocation2 + $0xd78] sm:$0xff] }
 0x148   :  { %18679 = vst [vmem:[#allocation269_spill] sm:$0xff] %v15027_v48  ;;  %18681 = vst [vmem:[#allocation271_spill] sm:$0xff] %v15033_v6  ;;  %v15043_v42 = vpack.c.bf16 %v485_v45, %v473_v0  ;;  %v15048_v29 = vpack.c.bf16 %v510_v62, %v498_v59  ;;  %v519_v0 = vld [vmem:[#allocation2 + $0xdc0] sm:$0xff]  ;;  %v521_v62 = vld [vmem:[#allocation2 + $0xdd0] sm:$0xff] }
 0x149   :  { %9543 = vmatpush1.bf16.msra.mxu0 %v15015_v58  ;;  %v508_v58 = vld [vmem:[#allocation2 + $0xd68] sm:$0xff]  ;;  %v531_v59 = vld [vmem:[#allocation2 + $0xe20] sm:$0xff] }
 0x14a   :  { %9639 = vmatpush1.bf16.msra.mxu1 %v15019_v61  ;;  %9545 = vmatprep.subr.bf16.mxu0 %v15021_v28  ;;  %v15039_v61 = vpack.c.bf16 %v483_v32, %v471_v5  ;;  %18684 = vst [vmem:[#allocation274_spill] sm:$0xff] %v15043_v42  ;;  %v15045_v21 = vpack.c.bf16 %v508_v58, %v496_v3  ;;  %18686 = vst [vmem:[#allocation276_spill] sm:$0xff] %v15048_v29  ;;  %v520_v28 = vld [vmem:[#allocation2 + $0xdc8] sm:$0xff]  ;;  %v522_v5 = vld [vmem:[#allocation2 + $0xdd8] sm:$0xff] }
 0x14b   :  { %9641 = vmatprep.subr.bf16.mxu1 %v15024_v46  ;;  %v509_v46 = vld [vmem:[#allocation2 + $0xd70] sm:$0xff]  ;;  %v534_v32 = vld [vmem:[#allocation2 + $0xe38] sm:$0xff]  ;;  %v15053_v58 = vpack.c.bf16 %v507_v14, %v495_v30 }
 0x14c   :  { %18683 = vst [vmem:[#allocation273_spill] sm:$0xff] %v15039_v61  ;;  %18685 = vst [vmem:[#allocation275_spill] sm:$0xff] %v15045_v21  ;;  %v15057_v3 = vpack.c.bf16 %v509_v46, %v497_v49  ;;  %v546_v30 = vld [vmem:[#allocation2 + $0xe98] sm:$0xff]  ;;  %v543_v49 = vld [vmem:[#allocation2 + $0xe80] sm:$0xff] }
 0x14d   :  { %9547 = vmatpush1.bf16.msra.mxu0 %v15027_v48  ;;  %v532_v48 = vld [vmem:[#allocation2 + $0xe28] sm:$0xff]  ;;  %18687 = vst [vmem:[#allocation277_spill] sm:$0xff] %v15053_v58  ;;  %v558_v14 = vld [vmem:[#allocation2 + $0xef8] sm:$0xff] }
 0x14e   :  { %9643 = vmatpush1.bf16.msra.mxu1 %v15031_v24  ;;  %9549 = vmatprep.subr.bf16.mxu0 %v15033_v6  ;;  %18688 = vst [vmem:[#allocation278_spill] sm:$0xff] %v15057_v3  ;;  %v15059_v45 = vpack.c.bf16 %v532_v48, %v520_v28  ;;  %v544_v6 = vld [vmem:[#allocation2 + $0xe88] sm:$0xff]  ;;  %v15067_v48 = vpack.c.bf16 %v531_v59, %v519_v0  ;;  %v570_v0 = vld [vmem:[#allocation2 + $0xf58] sm:$0xff] }
 0x14f   :  { %9645 = vmatprep.subr.bf16.mxu1 %v15036_v15  ;;  %v15062_v15 = vpack.c.bf16 %v534_v32, %v522_v5  ;;  %v556_v24 = vld [vmem:[#allocation2 + $0xee8] sm:$0xff]  ;;  %v555_v5 = vld [vmem:[#allocation2 + $0xee0] sm:$0xff]  ;;  %v545_v32 = vld [vmem:[#allocation2 + $0xe90] sm:$0xff] }
 0x150   :  { %1291 = vmatmul.mubr.f32.vlgmr.msra.gmra.mrb[4].mxu0 %v18494_v56  ;;  %18689 = vst [vmem:[#allocation279_spill] sm:$0xff] %v15059_v45  ;;  %18691 = vst [vmem:[#allocation281_spill] sm:$0xff] %v15067_v48  ;;  %v15073_v46 = vpack.c.bf16 %v556_v24, %v544_v6  ;;  %v582_v59 = vld [vmem:[#allocation2 + $0xfb8] sm:$0xff]  ;;  %v567_v6 = vld [vmem:[#allocation2 + $0xf40] sm:$0xff] }
 0x151   :  { %9551 = vmatpush1.bf16.msra.mxu0 %v15039_v61  ;;  %1433 = vmatmul.mubr.f32.vlgmr.msra.gmra.mrb[4].mxu1 %v18494_v56  ;;  %18690 = vst [vmem:[#allocation280_spill] sm:$0xff] %v15062_v15  ;;  %v533_v61 = vld [vmem:[#allocation2 + $0xe30] sm:$0xff] }
 0x152   :  { %9647 = vmatpush1.bf16.msra.mxu1 %v15043_v42  ;;  %9553 = vmatprep.subr.bf16.mxu0 %v15045_v21  ;;  %v15071_v28 = vpack.c.bf16 %v533_v61, %v521_v62  ;;  %18693 = vst [vmem:[#allocation283_spill] sm:$0xff] %v15073_v46  ;;  %v557_v21 = vld [vmem:[#allocation2 + $0xef0] sm:$0xff]  ;;  %v568_v42 = vld [vmem:[#allocation2 + $0xf48] sm:$0xff]  ;;  %v579_v62 = vld [vmem:[#allocation2 + $0xfa0] sm:$0xff] }
 0x153   :  { %9649 = vmatprep.subr.bf16.mxu1 %v15048_v29  ;;  %1361 = vmatprep.mubr.f32.mxu0 %v18494_v56  ;;  %v15076_v29 = vpack.c.bf16 %v558_v14, %v546_v30  ;;  %v15083_v61 = vpack.c.bf16 %v557_v21, %v545_v32  ;;  %v569_v30 = vld [vmem:[#allocation2 + $0xf50] sm:$0xff]  ;;  %v15088_v14 = vpack.c.bf16 %v582_v59, %v570_v0  ;;  %v603_v32 = vld [vmem:[#allocation2 + $0x1060] sm:$0xff] }
 0x154   :  { %1503 = vmatprep.mubr.f32.mxu1 %v18494_v56  ;;  %18692 = vst [vmem:[#allocation282_spill] sm:$0xff] %v15071_v28  ;;  %v593_v0 = vld [vmem:[#allocation2 + $0x1010] sm:$0xff] }
 0x155   :  { %9555 = vmatpush1.bf16.msra.mxu0 %v15053_v58  ;;  %18694 = vst [vmem:[#allocation284_spill] sm:$0xff] %v15076_v29  ;;  %v580_v58 = vld [vmem:[#allocation2 + $0xfa8] sm:$0xff]  ;;  %18696 = vst [vmem:[#allocation286_spill] sm:$0xff] %v15083_v61 }
 0x156   :  { %9651 = vmatpush1.bf16.msra.mxu1 %v15057_v3  ;;  %9557 = vmatprep.subr.bf16.mxu0 %v15059_v45  ;;  %v15079_v3 = vpack.c.bf16 %v555_v5, %v543_v49  ;;  %v15085_v24 = vpack.c.bf16 %v580_v58, %v568_v42  ;;  %18698 = vst [vmem:[#allocation288_spill] sm:$0xff] %v15088_v14  ;;  %v592_v45 = vld [vmem:[#allocation2 + $0x1008] sm:$0xff]  ;;  %v594_v49 = vld [vmem:[#allocation2 + $0x1018] sm:$0xff]  ;;  %v591_v58 = vld [vmem:[#allocation2 + $0x1000] sm:$0xff] }
 0x157   :  { %9653 = vmatprep.subr.bf16.mxu1 %v15062_v15  ;;  %v581_v15 = vld [vmem:[#allocation2 + $0xfb0] sm:$0xff]  ;;  %v606_v5 = vld [vmem:[#allocation2 + $0x1078] sm:$0xff] }
 0x158   :  { %18695 = vst [vmem:[#allocation285_spill] sm:$0xff] %v15079_v3  ;;  %18697 = vst [vmem:[#allocation287_spill] sm:$0xff] %v15085_v24  ;;  %v15095_v42 = vpack.c.bf16 %v581_v15, %v569_v30  ;;  %v15100_v59 = vpack.c.bf16 %v606_v5, %v594_v49  ;;  %v627_v30 = vld [vmem:[#allocation2 + $0x1120] sm:$0xff]  ;;  %v617_v49 = vld [vmem:[#allocation2 + $0x10d0] sm:$0xff] }
 0x159   :  { %9559 = vmatpush1.bf16.msra.mxu0 %v15067_v48  ;;  %v604_v48 = vld [vmem:[#allocation2 + $0x1068] sm:$0xff] }
 0x15a   :  { %9655 = vmatpush1.bf16.msra.mxu1 %v15071_v28  ;;  %9561 = vmatprep.subr.bf16.mxu0 %v15073_v46  ;;  %v15091_v28 = vpack.c.bf16 %v579_v62, %v567_v6  ;;  %18700 = vst [vmem:[#allocation290_spill] sm:$0xff] %v15095_v42  ;;  %v15097_v21 = vpack.c.bf16 %v604_v48, %v592_v45  ;;  %18702 = vst [vmem:[#allocation292_spill] sm:$0xff] %v15100_v59  ;;  %v616_v46 = vld [vmem:[#allocation2 + $0x10c8] sm:$0xff]  ;;  %v618_v6 = vld [vmem:[#allocation2 + $0x10d8] sm:$0xff] }
 0x15b   :  { %9657 = vmatprep.subr.bf16.mxu1 %v15076_v29  ;;  %v605_v29 = vld [vmem:[#allocation2 + $0x1070] sm:$0xff]  ;;  %v630_v62 = vld [vmem:[#allocation2 + $0x1138] sm:$0xff]  ;;  %v615_v48 = vld [vmem:[#allocation2 + $0x10c0] sm:$0xff] }
 0x15c   :  { %18699 = vst [vmem:[#allocation289_spill] sm:$0xff] %v15091_v28  ;;  %18701 = vst [vmem:[#allocation291_spill] sm:$0xff] %v15097_v21  ;;  %v15107_v15 = vpack.c.bf16 %v605_v29, %v593_v0  ;;  %v15112_v5 = vpack.c.bf16 %v630_v62, %v618_v6  ;;  %v651_v0 = vld [vmem:[#allocation2 + $0x11e0] sm:$0xff]  ;;  %v641_v62 = vld [vmem:[#allocation2 + $0x1190] sm:$0xff] }
 0x15d   :  { %9563 = vmatpush1.bf16.msra.mxu0 %v15079_v3  ;;  %v628_v3 = vld [vmem:[#allocation2 + $0x1128] sm:$0xff] }
 0x15e   :  { %9659 = vmatpush1.bf16.msra.mxu1 %v15083_v61  ;;  %9565 = vmatprep.subr.bf16.mxu0 %v15085_v24  ;;  %v15103_v61 = vpack.c.bf16 %v603_v32, %v591_v58  ;;  %18704 = vst [vmem:[#allocation294_spill] sm:$0xff] %v15107_v15  ;;  %v15109_v45 = vpack.c.bf16 %v628_v3, %v616_v46  ;;  %18706 = vst [vmem:[#allocation296_spill] sm:$0xff] %v15112_v5  ;;  %v640_v24 = vld [vmem:[#allocation2 + $0x1188] sm:$0xff]  ;;  %v642_v58 = vld [vmem:[#allocation2 + $0x1198] sm:$0xff] }
 0x15f   :  { %9661 = vmatprep.subr.bf16.mxu1 %v15088_v14  ;;  %v629_v14 = vld [vmem:[#allocation2 + $0x1130] sm:$0xff]  ;;  %v654_v32 = vld [vmem:[#allocation2 + $0x11f8] sm:$0xff]  ;;  %v639_v46 = vld [vmem:[#allocation2 + $0x1180] sm:$0xff] }
 0x160   :  { %18703 = vst [vmem:[#allocation293_spill] sm:$0xff] %v15103_v61  ;;  %18705 = vst [vmem:[#allocation295_spill] sm:$0xff] %v15109_v45  ;;  %v15119_v29 = vpack.c.bf16 %v629_v14, %v617_v49  ;;  %v15124_v6 = vpack.c.bf16 %v654_v32, %v642_v58 }
 0x161   :  { %9567 = vmatpush1.bf16.msra.mxu0 %v15091_v28  ;;  %v652_v28 = vld [vmem:[#allocation2 + $0x11e8] sm:$0xff] }
 0x162   :  { %9663 = vmatpush1.bf16.msra.mxu1 %v15095_v42  ;;  %9569 = vmatprep.subr.bf16.mxu0 %v15097_v21  ;;  %v15115_v42 = vpack.c.bf16 %v627_v30, %v615_v48  ;;  %18708 = vst [vmem:[#allocation298_spill] sm:$0xff] %v15119_v29  ;;  %v15121_v3 = vpack.c.bf16 %v652_v28, %v640_v24  ;;  %18710 = vst [vmem:[#allocation300_spill] sm:$0xff] %v15124_v6  ;;  %v14146_v28 = vmov 1983009808  }
 0x163   :  { %9665 = vmatprep.subr.bf16.mxu1 %v15100_v59  ;;  %v653_v59 = vld [vmem:[#allocation2 + $0x11f0] sm:$0xff]  ;;  %v15127_v48 = vpack.c.bf16 %v651_v0, %v639_v46  ;;  %v1525_v24 = vunpack.c.l.s4 %v14146_v28 }
 0x164   :  { %18707 = vst [vmem:[#allocation297_spill] sm:$0xff] %v15115_v42  ;;  %18709 = vst [vmem:[#allocation299_spill] sm:$0xff] %v15121_v3  ;;  %v15131_v14 = vpack.c.bf16 %v653_v59, %v641_v62  ;;  %v1527_v59 = vlaneseq }
 0x165   :  { %9571 = vmatpush1.bf16.msra.mxu0 %v15103_v61  ;;  %18711 = vst [vmem:[#allocation301_spill] sm:$0xff] %v15127_v48  ;;  %v1526_v30 = vunpack.c.0.s8 %v1525_v24 }
 0x166   :  { %9667 = vmatpush1.bf16.msra.mxu1 %v15107_v15  ;;  %9573 = vmatprep.subr.bf16.mxu0 %v15109_v45  ;;  %18712 = vst [vmem:[#allocation302_spill] sm:$0xff] %v15131_v14  ;;  %v1528_v49 = vshrl.u32 %v1527_v59, 7 }
 0x167   :  { %9669 = vmatprep.subr.bf16.mxu1 %v15112_v5 }
 0x168   :  { %v15159_v32 = vsub.s32 %v1526_v30, %v1528_v49 }
 0x169   :  { %9575 = vmatpush1.bf16.msra.mxu0 %v15115_v42 }
 0x16a   :  { %9671 = vmatpush1.bf16.msra.mxu1 %v15119_v29  ;;  %9577 = vmatprep.subr.bf16.mxu0 %v15121_v3 }
 0x16b   :  { %9673 = vmatprep.subr.bf16.mxu1 %v15124_v6 }
 0x16d   :  { %9579 = vmatpush1.bf16.msra.mxu0 %v15127_v48 }
 0x16e   :  { %9675 = vmatpush1.bf16.msra.mxu1 %v15131_v14  ;;  %9677 = vmatprep.subr.bf16.mxu0 %v14252_v4 }
 0x16f   :  { %9773 = vmatprep.subr.bf16.mxu1 %v14254_v8 }
 0x170   :  { %1362 = vmatmul.mubr.f32.vlgmr.msra.gmra.mrb[4].mxu0 %v18494_v56 }
 0x171   :  { %1504 = vmatmul.mubr.f32.vlgmr.msra.gmra.mrb[4].mxu1 %v18494_v56  ;;  %9679 = vmatpush1.bf16.msra.mxu0 %v14256_v9 }
 0x172   :  { %9775 = vmatpush1.bf16.msra.mxu1 %v14259_v13  ;;  %9681 = vmatprep.subr.bf16.mxu0 %v14263_v17 }
 0x173   :  { %9777 = vmatprep.subr.bf16.mxu1 %v14265_v18 }
 0x175   :  { %9683 = vmatpush1.bf16.msra.mxu0 %v14268_v22 }
 0x176   :  { %9779 = vmatpush1.bf16.msra.mxu1 %v14272_v26  ;;  %9685 = vmatprep.subr.bf16.mxu0 %v14274_v27 }
 0x177   :  { %9781 = vmatprep.subr.bf16.mxu1 %v14276_v31 }
 0x179   :  { %9687 = vmatpush1.bf16.msra.mxu0 %v14279_v35 }
 0x17a   :  { %9783 = vmatpush1.bf16.msra.mxu1 %v14283_v39  ;;  %9689 = vmatprep.subr.bf16.mxu0 %v14285_v40 }
 0x17b   :  { %9785 = vmatprep.subr.bf16.mxu1 %v14288_v44 }
 0x17d   :  { %9691 = vmatpush1.bf16.msra.mxu0 %v14291_v51 }
 0x17e   :  { %9787 = vmatpush1.bf16.msra.mxu1 %v14295_v52  ;;  %9693 = vmatprep.subr.bf16.mxu0 %v14297_v53 }
 0x17f   :  { %9789 = vmatprep.subr.bf16.mxu1 %v14300_v57 }
 0x181   :  { %9695 = vmatpush1.bf16.msra.mxu0 %v14303_v63 }
 0x182   :  { %9791 = vmatpush1.bf16.msra.mxu1 %v14307_v1  ;;  %9697 = vmatprep.subr.bf16.mxu0 %v14309_v2 }
 0x183   :  { %v795_v58 = vpop.f32.mrb[0].mxu0  ;;  %9793 = vmatprep.subr.bf16.mxu1 %v14312_v7 }
 0x184   :  { %v937_v46 = vpop.f32.mrb[0].mxu1  ;;  %v797_v0 = vpop.f32.mrb[1].mxu0 }
 0x185   :  { %v1522_v62 = vcombine.low %v795_v58, %v797_v0  ;;  %v939_v28 = vpop.f32.mrb[1].mxu1  ;;  %9699 = vmatpush1.bf16.msra.mxu0 %v14315_v16  ;;  %v18713_v58 = vld [vmem:[#allocation57_spill] sm:$0xff]  ;;  %v18715_v0 = vld [vmem:[#allocation59_spill] sm:$0xff] }
 0x186   :  { %v1523_v24 = vcombine.low %v937_v46, %v939_v28  ;;  %9795 = vmatpush1.bf16.msra.mxu1 %v14319_v19  ;;  %9701 = vmatprep.subr.bf16.mxu0 %v14321_v20  ;;  %v18714_v46 = vld [vmem:[#allocation58_spill] sm:$0xff]  ;;  %v18717_v28 = vld [vmem:[#allocation61_spill] sm:$0xff] }
 0x187   :  { %v1530_v59 = vrot.slane %v1522_v62, %v15159_v32  ;;  %9797 = vmatprep.subr.bf16.mxu1 %v14324_v25  ;;  %v18716_v62 = vld [vmem:[#allocation60_spill] sm:$0xff] }
 0x188   :  { %v1537_v30 = vrot.slane %v1523_v24, %v15159_v32  ;;  %v18718_v24 = vld [vmem:[#allocation62_spill] sm:$0xff] }
 0x189   :  { %9703 = vmatpush1.bf16.msra.mxu0 %v14327_v34 }
 0x18a   :  { %v1538_v49 = vcombine.low %v1530_v59, %v1537_v30  ;;  %9799 = vmatpush1.bf16.msra.mxu1 %v14331_v36  ;;  %9705 = vmatprep.subr.bf16.mxu0 %v14333_v37  ;;  %v18719_v59 = vld [vmem:[#allocation63_spill] sm:$0xff]  ;;  %v18720_v30 = vld [vmem:[#allocation64_spill] sm:$0xff] }
 0x18b   :  { %9801 = vmatprep.subr.bf16.mxu1 %v14336_v43 }
 0x18d   :  { %9707 = vmatpush1.bf16.msra.mxu0 %v14339_v50 }
 0x18e   :  { %9803 = vmatpush1.bf16.msra.mxu1 %v14343_v54  ;;  %9709 = vmatprep.subr.bf16.mxu0 %v14345_v55 }
 0x18f   :  { %9805 = vmatprep.subr.bf16.mxu1 %v14348_v60 }
 0x191   :  { %9711 = vmatpush1.bf16.msra.mxu0 %v14351_v10 }
 0x192   :  { %9807 = vmatpush1.bf16.msra.mxu1 %v14355_v11  ;;  %9713 = vmatprep.subr.bf16.mxu0 %v14357_v12 }
 0x193   :  { %9809 = vmatprep.subr.bf16.mxu1 %v14360_v23 }
 0x195   :  { %9715 = vmatpush1.bf16.msra.mxu0 %v14363_v33 }
 0x196   :  { %9811 = vmatpush1.bf16.msra.mxu1 %v14367_v38  ;;  %9717 = vmatprep.subr.bf16.mxu0 %v14369_v41  ;;  %v18721_v38 = vld [vmem:[#allocation65_spill] sm:$0xff]  ;;  %v18722_v41 = vld [vmem:[#allocation66_spill] sm:$0xff] }
 0x197   :  { %9813 = vmatprep.subr.bf16.mxu1 %v14372_v47  ;;  %v18723_v47 = vld [vmem:[#allocation67_spill] sm:$0xff] }
 0x199   :  { %9719 = vmatpush1.bf16.msra.mxu0 %v18713_v58  ;;  %v18724_v58 = vld [vmem:[#allocation68_spill] sm:$0xff] }
 0x19a   :  { %9815 = vmatpush1.bf16.msra.mxu1 %v18714_v46  ;;  %9721 = vmatprep.subr.bf16.mxu0 %v18715_v0  ;;  %v18725_v46 = vld [vmem:[#allocation69_spill] sm:$0xff]  ;;  %v18726_v0 = vld [vmem:[#allocation70_spill] sm:$0xff] }
 0x19b   :  { %9817 = vmatprep.subr.bf16.mxu1 %v18716_v62  ;;  %v18727_v62 = vld [vmem:[#allocation71_spill] sm:$0xff] }
 0x19d   :  { %9723 = vmatpush1.bf16.msra.mxu0 %v18717_v28  ;;  %v18728_v28 = vld [vmem:[#allocation72_spill] sm:$0xff] }
 0x19e   :  { %9819 = vmatpush1.bf16.msra.mxu1 %v18718_v24  ;;  %9725 = vmatprep.subr.bf16.mxu0 %v18719_v59  ;;  %v18729_v24 = vld [vmem:[#allocation73_spill] sm:$0xff]  ;;  %v18730_v59 = vld [vmem:[#allocation74_spill] sm:$0xff] }
 0x19f   :  { %9821 = vmatprep.subr.bf16.mxu1 %v18720_v30  ;;  %v18731_v30 = vld [vmem:[#allocation75_spill] sm:$0xff] }
 0x1a1   :  { %9727 = vmatpush1.bf16.msra.mxu0 %v18721_v38  ;;  %v18732_v38 = vld [vmem:[#allocation76_spill] sm:$0xff] }
 0x1a2   :  { %9823 = vmatpush1.bf16.msra.mxu1 %v18722_v41  ;;  %9729 = vmatprep.subr.bf16.mxu0 %v18723_v47  ;;  %v18733_v41 = vld [vmem:[#allocation77_spill] sm:$0xff]  ;;  %v18734_v47 = vld [vmem:[#allocation78_spill] sm:$0xff] }
 0x1a3   :  { %9825 = vmatprep.subr.bf16.mxu1 %v18724_v58  ;;  %v18735_v58 = vld [vmem:[#allocation79_spill] sm:$0xff] }
 0x1a5   :  { %9731 = vmatpush1.bf16.msra.mxu0 %v18725_v46  ;;  %v18736_v46 = vld [vmem:[#allocation80_spill] sm:$0xff] }
 0x1a6   :  { %9827 = vmatpush1.bf16.msra.mxu1 %v18726_v0  ;;  %9733 = vmatprep.subr.bf16.mxu0 %v18727_v62 }
 0x1a7   :  { %9829 = vmatprep.subr.bf16.mxu1 %v18728_v28 }
 0x1a9   :  { %9735 = vmatpush1.bf16.msra.mxu0 %v18729_v24 }
 0x1aa   :  { %9831 = vmatpush1.bf16.msra.mxu1 %v18730_v59  ;;  %9737 = vmatprep.subr.bf16.mxu0 %v18731_v30  ;;  %v655_v30 = vld [vmem:[%s17789_s0] sm:$0xff] }
 0x1ab   :  { %9833 = vmatprep.subr.bf16.mxu1 %v18732_v38 }
 0x1ad   :  { %9739 = vmatpush1.bf16.msra.mxu0 %v18733_v41 }
 0x1ae   :  { %9835 = vmatpush1.bf16.msra.mxu1 %v18734_v47  ;;  %9741 = vmatprep.subr.bf16.mxu0 %v18735_v58  ;;  %v656_v58 = vld [vmem:[%s17789_s0 + $0x8] sm:$0xff]  ;;  %v1576_v47 = vadd.f32 %v1538_v49, %v655_v30 }
 0x1af   :  { %9837 = vmatprep.subr.bf16.mxu1 %v18736_v46 }
 0x1b0   :  { %v1587_v12 = vrot.slane %v1576_v47, 6 }
 0x1e3   :  { %v1079_v0 = vpop.f32.mrb[2].mxu0 }
 0x1e4   :  { %v1221_v62 = vpop.f32.mrb[2].mxu1  ;;  %v1081_v33 = vpop.f32.mrb[3].mxu0 }
 0x1e5   :  { %v1539_v28 = vcombine.low %v1079_v0, %v1081_v33  ;;  %v1223_v23 = vpop.f32.mrb[3].mxu1 }
 0x1e6   :  { %v1540_v24 = vcombine.low %v1221_v62, %v1223_v23  ;;  %v8915_v62 = vmul.f32 -1.442695, %v1576_v47 }
 0x1e7   :  { %v1547_v38 = vrot.slane %v1539_v28, %v15159_v32 }
 0x1e8   :  { %v1554_v41 = vrot.slane %v1540_v24, %v15159_v32 }
 0x1ea   :  { %v1555_v46 = vcombine.low %v1547_v38, %v1554_v41 }
 0x1ec   :  { %v1577_v59 = vadd.f32 %v1555_v46, %v656_v58 }
 0x1ee   :  { %v1588_v33 = vrot.slane %v1577_v59, 6 }
 0x1f0   :  { %v1590_v23 = vsel %vm1589_vm0, %v1587_v12, %v1588_v33  ;;  %v657_v12 = vld [vmem:[%s17789_s0 + $0x10] sm:$0xff]  ;;  %v1599_v33 = vrot.slane %v1577_v59, 4 }
 0x1f1   :  { %v8916_v0 = vmul.f32 -1.442695, %v1590_v23 }
 0x1f3   :  { %13889 = vpow2.f32 %v8916_v0 }
 0x1f4   :  { %13891 = vpow2.f32 %v8915_v62 }
 0x1fd   :  { %v13890_v49 = vpop.eup %13889 }
 0x1fe   :  { %v13892_v41 = vpop.eup %13891  ;;  %v1595_v47 = vadd.f32 1.0, %v13890_v49 }
 0x1ff   :  { %v1582_v46 = vadd.f32 1.0, %v13892_v41 }
 0x200   :  { %13893 = vrcp.f32 %v1595_v47 }
 0x201   :  { %13895 = vrcp.f32 %v1582_v46  ;;  %v18737_v46 = vld [vmem:[#allocation81_spill] sm:$0xff] }
 0x243   :  { %v1363_v11 = vpop.f32.mrb[4].mxu0 }
 0x244   :  { %v1505_v28 = vpop.f32.mrb[4].mxu1  ;;  %v1365_v10 = vpop.f32.mrb[5].mxu0 }
 0x245   :  { %v1556_v24 = vcombine.low %v1363_v11, %v1365_v10  ;;  %v1507_v60 = vpop.f32.mrb[5].mxu1 }
 0x246   :  { %v1557_v55 = vcombine.low %v1505_v28, %v1507_v60 }
 0x247   :  { %v1564_v54 = vrot.slane %v1556_v24, %v15159_v32 }
 0x248   :  { %v1571_v38 = vrot.slane %v1557_v55, %v15159_v32  ;;  %v13894_v55 = vpop.eup %13893 }
 0x249   :  { %v13896_v0 = vpop.eup %13895  ;;  %v1613_v24 = vmul.f32 0.0, %v13894_v55  ;;  %v18744_v55 = vld [vmem:[#allocation88_spill] sm:$0xff] }
 0x24a   :  { %v1572_v58 = vcombine.low %v1564_v54, %v1571_v38 }
 0x24c   :  { %v1578_v30 = vadd.f32 %v1572_v58, %v657_v12 }
 0x24e   :  { %v1600_v23 = vrot.slane %v1578_v30, 4  ;;  %v1605_v10 = vrot.slane %v1578_v30, 2  ;;  %v18738_v30 = vld [vmem:[#allocation82_spill] sm:$0xff] }
 0x250   :  { %v1602_v60 = vsel %vm1601_vm1, %v1599_v33, %v1600_v23  ;;  %v8917_v11 = vmul.f32 -1.442695, %v1605_v10  ;;  %v18739_v33 = vld [vmem:[#allocation83_spill] sm:$0xff]  ;;  %v18740_v23 = vld [vmem:[#allocation84_spill] sm:$0xff]  ;;  %v18741_v10 = vld [vmem:[#allocation85_spill] sm:$0xff] }
 0x251   :  { %13897 = vtanh.f32 %v1602_v60  ;;  %v18742_v60 = vld [vmem:[#allocation86_spill] sm:$0xff] }
 0x252   :  { %13899 = vpow2.f32 %v8917_v11  ;;  %v18743_v11 = vld [vmem:[#allocation87_spill] sm:$0xff] }
 0x25b   :  { %v13898_v62 = vpop.eup %13897 }
 0x25c   :  { %v13900_v28 = vpop.eup %13899  ;;  %v1614_v54 = vmul.f32 %v13898_v62, %v13896_v0  ;;  %v18745_v0 = vld [vmem:[#allocation89_spill] sm:$0xff]  ;;  %v18746_v62 = vld [vmem:[#allocation90_spill] sm:$0xff] }
 0x25d   :  { %v1610_v49 = vadd.f32 1.0, %v13900_v28  ;;  %v18747_v28 = vld [vmem:[#allocation91_spill] sm:$0xff] }
 0x25e   :  { %v15223_v38 = vadd.f32 %v1614_v54, %v1613_v24  ;;  %v18748_v24 = vld [vmem:[#allocation92_spill] sm:$0xff]  ;;  %v18749_v54 = vld [vmem:[#allocation93_spill] sm:$0xff] }
 0x25f   :  { %13901 = vrcp.f32 %v1610_v49  ;;  %v18750_v49 = vld [vmem:[#allocation94_spill] sm:$0xff] }
 0x260   :  { %13903 = vtanh.f32 %v15223_v38 }
 0x269   :  { %v13902_v59 = vpop.eup %13901 }
 0x26a   :  { %v13904_v41 = vpop.eup %13903 }
 0x26b   :  { %v1617_v12 = vmul.f32 %v13904_v41, %v13902_v59  ;;  %v18751_v59 = vld [vmem:[#allocation95_spill] sm:$0xff]  ;;  %v18752_v41 = vld [vmem:[#allocation96_spill] sm:$0xff] }
 0x26d   :  { %v15227_v58 = vrot.slane %v1617_v12, %v15159_v32 }
 0x26f   :  { %v15231_v47 = vcombine.high %v15227_v58, %v15227_v58 }
 0x271   :  { %1706 = vmatprep.mubr.f32.mxu0 %v15231_v47  ;;  %1848 = vmatprep.mubr.f32.mxu1 %v15231_v47 }
 0x272   :  { %1707 = vmatmul.mubr.f32.vlgmr.msra.gmra.mrb[6].mxu0 %v15227_v58  ;;  %1849 = vmatmul.mubr.f32.vlgmr.msra.gmra.mrb[6].mxu1 %v15227_v58 }
 0x273   :  { %9743 = vmatpush1.bf16.msra.mxu0 %v18737_v46  ;;  %9839 = vmatpush1.bf16.msra.mxu1 %v18738_v30 }
 0x274   :  { %9745 = vmatprep.subr.bf16.mxu0 %v18739_v33  ;;  %9841 = vmatprep.subr.bf16.mxu1 %v18740_v23 }
 0x275   :  { %1777 = vmatprep.mubr.f32.mxu0 %v18494_v56  ;;  %1919 = vmatprep.mubr.f32.mxu1 %v18494_v56 }
 0x277   :  { %9747 = vmatpush1.bf16.msra.mxu0 %v18741_v10  ;;  %9843 = vmatpush1.bf16.msra.mxu1 %v18742_v60  ;;  %v18753_v60 = vld [vmem:[#allocation97_spill] sm:$0xff] }
 0x278   :  { %9749 = vmatprep.subr.bf16.mxu0 %v18743_v11  ;;  %9845 = vmatprep.subr.bf16.mxu1 %v18744_v55  ;;  %v18754_v11 = vld [vmem:[#allocation98_spill] sm:$0xff]  ;;  %v18755_v55 = vld [vmem:[#allocation99_spill] sm:$0xff] }
 0x27b   :  { %9751 = vmatpush1.bf16.msra.mxu0 %v18745_v0  ;;  %9847 = vmatpush1.bf16.msra.mxu1 %v18746_v62  ;;  %v18756_v0 = vld [vmem:[#allocation100_spill] sm:$0xff]  ;;  %v18757_v62 = vld [vmem:[#allocation101_spill] sm:$0xff] }
 0x27c   :  { %9753 = vmatprep.subr.bf16.mxu0 %v18747_v28  ;;  %9849 = vmatprep.subr.bf16.mxu1 %v18748_v24  ;;  %v18758_v28 = vld [vmem:[#allocation102_spill] sm:$0xff]  ;;  %v18759_v24 = vld [vmem:[#allocation103_spill] sm:$0xff] }
 0x27f   :  { %9755 = vmatpush1.bf16.msra.mxu0 %v18749_v54  ;;  %9851 = vmatpush1.bf16.msra.mxu1 %v18750_v49  ;;  %v18760_v54 = vld [vmem:[#allocation104_spill] sm:$0xff]  ;;  %v18761_v49 = vld [vmem:[#allocation105_spill] sm:$0xff] }
 0x280   :  { %9757 = vmatprep.subr.bf16.mxu0 %v18751_v59  ;;  %9853 = vmatprep.subr.bf16.mxu1 %v18752_v41  ;;  %v18762_v59 = vld [vmem:[#allocation106_spill] sm:$0xff]  ;;  %v18763_v41 = vld [vmem:[#allocation107_spill] sm:$0xff] }
 0x283   :  { %9759 = vmatpush1.bf16.msra.mxu0 %v18753_v60  ;;  %9855 = vmatpush1.bf16.msra.mxu1 %v18754_v11  ;;  %v18764_v60 = vld [vmem:[#allocation108_spill] sm:$0xff]  ;;  %v1623_v11 = vcombine.high %v1617_v12, %v1617_v12  ;;  %v18770_v12 = vld [vmem:[#allocation114_spill] sm:$0xff] }
 0x284   :  { %9761 = vmatprep.subr.bf16.mxu0 %v18755_v55  ;;  %9857 = vmatprep.subr.bf16.mxu1 %v18756_v0  ;;  %v18765_v55 = vld [vmem:[#allocation109_spill] sm:$0xff]  ;;  %v18766_v0 = vld [vmem:[#allocation110_spill] sm:$0xff] }
 0x287   :  { %9763 = vmatpush1.bf16.msra.mxu0 %v18757_v62  ;;  %9859 = vmatpush1.bf16.msra.mxu1 %v18758_v28  ;;  %v15270_v62 = vrot.slane %v1623_v11, %v15159_v32  ;;  %v18767_v28 = vld [vmem:[#allocation111_spill] sm:$0xff]  ;;  %v18772_v11 = vld [vmem:[#allocation116_spill] sm:$0xff] }
 0x288   :  { %9765 = vmatprep.subr.bf16.mxu0 %v18759_v24  ;;  %9861 = vmatprep.subr.bf16.mxu1 %v18760_v54  ;;  %v18768_v24 = vld [vmem:[#allocation112_spill] sm:$0xff]  ;;  %v18781_v54 = vld [vmem:[#allocation125_spill] sm:$0xff] }
 0x28b   :  { %9767 = vmatpush1.bf16.msra.mxu0 %v18761_v49  ;;  %9863 = vmatpush1.bf16.msra.mxu1 %v18762_v59  ;;  %v18769_v59 = vld [vmem:[#allocation113_spill] sm:$0xff]  ;;  %v18779_v49 = vld [vmem:[#allocation123_spill] sm:$0xff] }
 0x28c   :  { %9769 = vmatprep.subr.bf16.mxu0 %v18763_v41  ;;  %9865 = vmatprep.subr.bf16.mxu1 %v18764_v60  ;;  %v18776_v60 = vld [vmem:[#allocation120_spill] sm:$0xff]  ;;  %v18777_v41 = vld [vmem:[#allocation121_spill] sm:$0xff] }
 0x28f   :  { %9771 = vmatpush1.bf16.msra.mxu0 %v18765_v55  ;;  %9867 = vmatpush1.bf16.msra.mxu1 %v18766_v0  ;;  %v18771_v0 = vld [vmem:[#allocation115_spill] sm:$0xff]  ;;  %v18773_v55 = vld [vmem:[#allocation117_spill] sm:$0xff] }
 0x290   :  { %9869 = vmatprep.subr.bf16.mxu0 %v18767_v28  ;;  %9965 = vmatprep.subr.bf16.mxu1 %v18768_v24  ;;  %v18774_v28 = vld [vmem:[#allocation118_spill] sm:$0xff]  ;;  %v18775_v24 = vld [vmem:[#allocation119_spill] sm:$0xff] }
 0x292   :  { %1778 = vmatmul.mubr.f32.vlgmr.msra.gmra.mrb[6].mxu0 %v15270_v62  ;;  %1920 = vmatmul.mubr.f32.vlgmr.msra.gmra.mrb[6].mxu1 %v15270_v62 }
 0x293   :  { %9871 = vmatpush1.bf16.msra.mxu0 %v18769_v59  ;;  %1990 = vmatprep.mubr.f32.mxu0 %v15231_v47  ;;  %v18778_v59 = vld [vmem:[#allocation122_spill] sm:$0xff] }
 0x294   :  { %9967 = vmatpush1.bf16.msra.mxu1 %v18770_v12  ;;  %2132 = vmatprep.mubr.f32.mxu1 %v15231_v47  ;;  %v18780_v12 = vld [vmem:[#allocation124_spill] sm:$0xff] }
 0x295   :  { %9873 = vmatprep.subr.bf16.mxu0 %v18771_v0  ;;  %9969 = vmatprep.subr.bf16.mxu1 %v18772_v11  ;;  %v18782_v0 = vld [vmem:[#allocation126_spill] sm:$0xff]  ;;  %v18783_v11 = vld [vmem:[#allocation127_spill] sm:$0xff] }
 0x297   :  { %9875 = vmatpush1.bf16.msra.mxu0 %v18773_v55  ;;  %v18784_v55 = vld [vmem:[#allocation128_spill] sm:$0xff] }
 0x298   :  { %9971 = vmatpush1.bf16.msra.mxu1 %v18774_v28  ;;  %9877 = vmatprep.subr.bf16.mxu0 %v18775_v24  ;;  %v18785_v28 = vld [vmem:[#allocation129_spill] sm:$0xff]  ;;  %v18786_v24 = vld [vmem:[#allocation130_spill] sm:$0xff] }
 0x299   :  { %9973 = vmatprep.subr.bf16.mxu1 %v18776_v60  ;;  %v18787_v60 = vld [vmem:[#allocation131_spill] sm:$0xff] }
 0x29b   :  { %9879 = vmatpush1.bf16.msra.mxu0 %v18777_v41  ;;  %v18788_v41 = vld [vmem:[#allocation132_spill] sm:$0xff] }
 0x29c   :  { %9975 = vmatpush1.bf16.msra.mxu1 %v18778_v59  ;;  %9881 = vmatprep.subr.bf16.mxu0 %v18779_v49  ;;  %v18789_v59 = vld [vmem:[#allocation133_spill] sm:$0xff]  ;;  %v18790_v49 = vld [vmem:[#allocation134_spill] sm:$0xff] }
 0x29d   :  { %9977 = vmatprep.subr.bf16.mxu1 %v18780_v12  ;;  %v18791_v12 = vld [vmem:[#allocation135_spill] sm:$0xff] }
 0x29f   :  { %9883 = vmatpush1.bf16.msra.mxu0 %v18781_v54  ;;  %v18792_v54 = vld [vmem:[#allocation136_spill] sm:$0xff] }
 0x2a0   :  { %9979 = vmatpush1.bf16.msra.mxu1 %v18782_v0  ;;  %9885 = vmatprep.subr.bf16.mxu0 %v18783_v11  ;;  %v18793_v0 = vld [vmem:[#allocation137_spill] sm:$0xff]  ;;  %v18794_v11 = vld [vmem:[#allocation138_spill] sm:$0xff] }
 0x2a1   :  { %9981 = vmatprep.subr.bf16.mxu1 %v18784_v55  ;;  %v18795_v55 = vld [vmem:[#allocation139_spill] sm:$0xff] }
 0x2a3   :  { %9887 = vmatpush1.bf16.msra.mxu0 %v18785_v28  ;;  %v18796_v28 = vld [vmem:[#allocation140_spill] sm:$0xff] }
 0x2a4   :  { %9983 = vmatpush1.bf16.msra.mxu1 %v18786_v24  ;;  %9889 = vmatprep.subr.bf16.mxu0 %v18787_v60  ;;  %v18797_v24 = vld [vmem:[#allocation141_spill] sm:$0xff]  ;;  %v18798_v60 = vld [vmem:[#allocation142_spill] sm:$0xff] }
 0x2a5   :  { %9985 = vmatprep.subr.bf16.mxu1 %v18788_v41  ;;  %v18799_v41 = vld [vmem:[#allocation143_spill] sm:$0xff] }
 0x2a7   :  { %9891 = vmatpush1.bf16.msra.mxu0 %v18789_v59  ;;  %v18800_v59 = vld [vmem:[#allocation144_spill] sm:$0xff] }
 0x2a8   :  { %9987 = vmatpush1.bf16.msra.mxu1 %v18790_v49  ;;  %9893 = vmatprep.subr.bf16.mxu0 %v18791_v12  ;;  %v18801_v49 = vld [vmem:[#allocation145_spill] sm:$0xff]  ;;  %v18802_v12 = vld [vmem:[#allocation146_spill] sm:$0xff] }
 0x2a9   :  { %9989 = vmatprep.subr.bf16.mxu1 %v18792_v54  ;;  %v18803_v54 = vld [vmem:[#allocation147_spill] sm:$0xff] }
 0x2ab   :  { %9895 = vmatpush1.bf16.msra.mxu0 %v18793_v0  ;;  %v18804_v0 = vld [vmem:[#allocation148_spill] sm:$0xff] }
 0x2ac   :  { %9991 = vmatpush1.bf16.msra.mxu1 %v18794_v11  ;;  %9897 = vmatprep.subr.bf16.mxu0 %v18795_v55  ;;  %v18805_v11 = vld [vmem:[#allocation149_spill] sm:$0xff]  ;;  %v18806_v55 = vld [vmem:[#allocation150_spill] sm:$0xff] }
 0x2ad   :  { %9993 = vmatprep.subr.bf16.mxu1 %v18796_v28  ;;  %v18807_v28 = vld [vmem:[#allocation151_spill] sm:$0xff] }
 0x2af   :  { %9899 = vmatpush1.bf16.msra.mxu0 %v18797_v24  ;;  %v18808_v24 = vld [vmem:[#allocation152_spill] sm:$0xff] }
 0x2b0   :  { %9995 = vmatpush1.bf16.msra.mxu1 %v18798_v60  ;;  %9901 = vmatprep.subr.bf16.mxu0 %v18799_v41  ;;  %v18809_v60 = vld [vmem:[#allocation153_spill] sm:$0xff]  ;;  %v18810_v41 = vld [vmem:[#allocation154_spill] sm:$0xff] }
 0x2b1   :  { %9997 = vmatprep.subr.bf16.mxu1 %v18800_v59  ;;  %v18811_v59 = vld [vmem:[#allocation155_spill] sm:$0xff] }
 0x2b3   :  { %9903 = vmatpush1.bf16.msra.mxu0 %v18801_v49  ;;  %v18812_v49 = vld [vmem:[#allocation156_spill] sm:$0xff] }
 0x2b4   :  { %9999 = vmatpush1.bf16.msra.mxu1 %v18802_v12  ;;  %9905 = vmatprep.subr.bf16.mxu0 %v18803_v54  ;;  %v18813_v12 = vld [vmem:[#allocation157_spill] sm:$0xff]  ;;  %v18814_v54 = vld [vmem:[#allocation158_spill] sm:$0xff] }
 0x2b5   :  { %10001 = vmatprep.subr.bf16.mxu1 %v18804_v0  ;;  %v18815_v0 = vld [vmem:[#allocation159_spill] sm:$0xff] }
 0x2b7   :  { %9907 = vmatpush1.bf16.msra.mxu0 %v18805_v11  ;;  %v18816_v11 = vld [vmem:[#allocation160_spill] sm:$0xff] }
 0x2b8   :  { %10003 = vmatpush1.bf16.msra.mxu1 %v18806_v55  ;;  %9909 = vmatprep.subr.bf16.mxu0 %v18807_v28  ;;  %v18817_v55 = vld [vmem:[#allocation161_spill] sm:$0xff]  ;;  %v18818_v28 = vld [vmem:[#allocation162_spill] sm:$0xff] }
 0x2b9   :  { %10005 = vmatprep.subr.bf16.mxu1 %v18808_v24  ;;  %v18819_v24 = vld [vmem:[#allocation163_spill] sm:$0xff] }
 0x2bb   :  { %9911 = vmatpush1.bf16.msra.mxu0 %v18809_v60  ;;  %v18820_v60 = vld [vmem:[#allocation164_spill] sm:$0xff] }
 0x2bc   :  { %10007 = vmatpush1.bf16.msra.mxu1 %v18810_v41  ;;  %9913 = vmatprep.subr.bf16.mxu0 %v18811_v59  ;;  %v18821_v41 = vld [vmem:[#allocation165_spill] sm:$0xff]  ;;  %v18822_v59 = vld [vmem:[#allocation166_spill] sm:$0xff] }
 0x2bd   :  { %10009 = vmatprep.subr.bf16.mxu1 %v18812_v49  ;;  %v18823_v49 = vld [vmem:[#allocation167_spill] sm:$0xff] }
 0x2bf   :  { %9915 = vmatpush1.bf16.msra.mxu0 %v18813_v12  ;;  %v18824_v12 = vld [vmem:[#allocation168_spill] sm:$0xff] }
 0x2c0   :  { %10011 = vmatpush1.bf16.msra.mxu1 %v18814_v54  ;;  %9917 = vmatprep.subr.bf16.mxu0 %v18815_v0  ;;  %v18825_v54 = vld [vmem:[#allocation169_spill] sm:$0xff]  ;;  %v18826_v0 = vld [vmem:[#allocation170_spill] sm:$0xff] }
 0x2c1   :  { %10013 = vmatprep.subr.bf16.mxu1 %v18816_v11  ;;  %v18827_v11 = vld [vmem:[#allocation171_spill] sm:$0xff] }
 0x2c3   :  { %9919 = vmatpush1.bf16.msra.mxu0 %v18817_v55  ;;  %v18828_v55 = vld [vmem:[#allocation172_spill] sm:$0xff] }
 0x2c4   :  { %10015 = vmatpush1.bf16.msra.mxu1 %v18818_v28  ;;  %9921 = vmatprep.subr.bf16.mxu0 %v18819_v24  ;;  %v18829_v28 = vld [vmem:[#allocation173_spill] sm:$0xff]  ;;  %v18830_v24 = vld [vmem:[#allocation174_spill] sm:$0xff] }
 0x2c5   :  { %10017 = vmatprep.subr.bf16.mxu1 %v18820_v60  ;;  %v18831_v60 = vld [vmem:[#allocation175_spill] sm:$0xff] }
 0x2c7   :  { %9923 = vmatpush1.bf16.msra.mxu0 %v18821_v41  ;;  %v18832_v41 = vld [vmem:[#allocation176_spill] sm:$0xff] }
 0x2c8   :  { %10019 = vmatpush1.bf16.msra.mxu1 %v18822_v59  ;;  %9925 = vmatprep.subr.bf16.mxu0 %v18823_v49  ;;  %v18846_v49 = vld [vmem:[#allocation190_spill] sm:$0xff]  ;;  %v18847_v59 = vld [vmem:[#allocation191_spill] sm:$0xff] }
 0x2c9   :  { %10021 = vmatprep.subr.bf16.mxu1 %v18824_v12  ;;  %v18833_v12 = vld [vmem:[#allocation177_spill] sm:$0xff] }
 0x2cb   :  { %9927 = vmatpush1.bf16.msra.mxu0 %v18825_v54  ;;  %v18834_v54 = vld [vmem:[#allocation178_spill] sm:$0xff] }
 0x2cc   :  { %10023 = vmatpush1.bf16.msra.mxu1 %v18826_v0  ;;  %9929 = vmatprep.subr.bf16.mxu0 %v18827_v11  ;;  %v18835_v0 = vld [vmem:[#allocation179_spill] sm:$0xff]  ;;  %v18836_v11 = vld [vmem:[#allocation180_spill] sm:$0xff] }
 0x2cd   :  { %10025 = vmatprep.subr.bf16.mxu1 %v18828_v55  ;;  %v18841_v55 = vld [vmem:[#allocation185_spill] sm:$0xff] }
 0x2cf   :  { %9931 = vmatpush1.bf16.msra.mxu0 %v18829_v28  ;;  %v18840_v28 = vld [vmem:[#allocation184_spill] sm:$0xff] }
 0x2d0   :  { %10027 = vmatpush1.bf16.msra.mxu1 %v18830_v24  ;;  %9933 = vmatprep.subr.bf16.mxu0 %v18831_v60  ;;  %v18837_v24 = vld [vmem:[#allocation181_spill] sm:$0xff]  ;;  %v18838_v60 = vld [vmem:[#allocation182_spill] sm:$0xff] }
 0x2d1   :  { %10029 = vmatprep.subr.bf16.mxu1 %v18832_v41  ;;  %v18839_v41 = vld [vmem:[#allocation183_spill] sm:$0xff] }
 0x2d2   :  { %1991 = vmatmul.mubr.f32.vlgmr.msra.gmra.mrb[8].mxu0 %v15227_v58 }
 0x2d3   :  { %2133 = vmatmul.mubr.f32.vlgmr.msra.gmra.mrb[8].mxu1 %v15227_v58  ;;  %9935 = vmatpush1.bf16.msra.mxu0 %v18833_v12  ;;  %v18842_v12 = vld [vmem:[#allocation186_spill] sm:$0xff] }
 0x2d4   :  { %10031 = vmatpush1.bf16.msra.mxu1 %v18834_v54  ;;  %9937 = vmatprep.subr.bf16.mxu0 %v18835_v0  ;;  %v18843_v54 = vld [vmem:[#allocation187_spill] sm:$0xff]  ;;  %v18844_v0 = vld [vmem:[#allocation188_spill] sm:$0xff] }
 0x2d5   :  { %10033 = vmatprep.subr.bf16.mxu1 %v18836_v11  ;;  %2061 = vmatprep.mubr.f32.mxu0 %v18494_v56  ;;  %v18845_v11 = vld [vmem:[#allocation189_spill] sm:$0xff] }
 0x2d6   :  { %2203 = vmatprep.mubr.f32.mxu1 %v18494_v56 }
 0x2d7   :  { %9939 = vmatpush1.bf16.msra.mxu0 %v18837_v24  ;;  %v18848_v24 = vld [vmem:[#allocation192_spill] sm:$0xff] }
 0x2d8   :  { %10035 = vmatpush1.bf16.msra.mxu1 %v18838_v60  ;;  %9941 = vmatprep.subr.bf16.mxu0 %v18839_v41  ;;  %v18849_v60 = vld [vmem:[#allocation193_spill] sm:$0xff]  ;;  %v18850_v41 = vld [vmem:[#allocation194_spill] sm:$0xff] }
 0x2d9   :  { %10037 = vmatprep.subr.bf16.mxu1 %v18840_v28  ;;  %v18851_v28 = vld [vmem:[#allocation195_spill] sm:$0xff] }
 0x2db   :  { %9943 = vmatpush1.bf16.msra.mxu0 %v18841_v55  ;;  %v18852_v55 = vld [vmem:[#allocation196_spill] sm:$0xff] }
 0x2dc   :  { %10039 = vmatpush1.bf16.msra.mxu1 %v18842_v12  ;;  %9945 = vmatprep.subr.bf16.mxu0 %v18843_v54  ;;  %v18853_v12 = vld [vmem:[#allocation197_spill] sm:$0xff]  ;;  %v18854_v54 = vld [vmem:[#allocation198_spill] sm:$0xff] }
 0x2dd   :  { %10041 = vmatprep.subr.bf16.mxu1 %v18844_v0  ;;  %v18855_v0 = vld [vmem:[#allocation199_spill] sm:$0xff] }
 0x2df   :  { %9947 = vmatpush1.bf16.msra.mxu0 %v18845_v11  ;;  %v18856_v11 = vld [vmem:[#allocation200_spill] sm:$0xff] }
 0x2e0   :  { %10043 = vmatpush1.bf16.msra.mxu1 %v18846_v49  ;;  %9949 = vmatprep.subr.bf16.mxu0 %v18847_v59  ;;  %v18857_v49 = vld [vmem:[#allocation201_spill] sm:$0xff]  ;;  %v18858_v59 = vld [vmem:[#allocation202_spill] sm:$0xff] }
 0x2e1   :  { %10045 = vmatprep.subr.bf16.mxu1 %v18848_v24  ;;  %v18859_v24 = vld [vmem:[#allocation203_spill] sm:$0xff] }
 0x2e3   :  { %9951 = vmatpush1.bf16.msra.mxu0 %v18849_v60  ;;  %v18860_v60 = vld [vmem:[#allocation204_spill] sm:$0xff] }
 0x2e4   :  { %10047 = vmatpush1.bf16.msra.mxu1 %v18850_v41  ;;  %9953 = vmatprep.subr.bf16.mxu0 %v18851_v28  ;;  %v18861_v41 = vld [vmem:[#allocation205_spill] sm:$0xff]  ;;  %v18862_v28 = vld [vmem:[#allocation206_spill] sm:$0xff] }
 0x2e5   :  { %10049 = vmatprep.subr.bf16.mxu1 %v18852_v55  ;;  %v18863_v55 = vld [vmem:[#allocation207_spill] sm:$0xff] }
 0x2e7   :  { %9955 = vmatpush1.bf16.msra.mxu0 %v18853_v12  ;;  %v18864_v12 = vld [vmem:[#allocation208_spill] sm:$0xff] }
 0x2e8   :  { %10051 = vmatpush1.bf16.msra.mxu1 %v18854_v54  ;;  %9957 = vmatprep.subr.bf16.mxu0 %v18855_v0  ;;  %v18875_v0 = vld [vmem:[#allocation219_spill] sm:$0xff] }
 0x2e9   :  { %10053 = vmatprep.subr.bf16.mxu1 %v18856_v11  ;;  %v18865_v11 = vld [vmem:[#allocation209_spill] sm:$0xff] }
 0x2eb   :  { %9959 = vmatpush1.bf16.msra.mxu0 %v18857_v49  ;;  %v18873_v49 = vld [vmem:[#allocation217_spill] sm:$0xff] }
 0x2ec   :  { %10055 = vmatpush1.bf16.msra.mxu1 %v18858_v59  ;;  %9961 = vmatprep.subr.bf16.mxu0 %v18859_v24  ;;  %v18866_v59 = vld [vmem:[#allocation210_spill] sm:$0xff]  ;;  %v18872_v24 = vld [vmem:[#allocation216_spill] sm:$0xff] }
 0x2ed   :  { %10057 = vmatprep.subr.bf16.mxu1 %v18860_v60  ;;  %v18867_v60 = vld [vmem:[#allocation211_spill] sm:$0xff] }
 0x2ef   :  { %9963 = vmatpush1.bf16.msra.mxu0 %v18861_v41  ;;  %v18868_v41 = vld [vmem:[#allocation212_spill] sm:$0xff] }
 0x2f0   :  { %10059 = vmatpush1.bf16.msra.mxu1 %v18862_v28  ;;  %10061 = vmatprep.subr.bf16.mxu0 %v18863_v55  ;;  %v18869_v28 = vld [vmem:[#allocation213_spill] sm:$0xff]  ;;  %v18870_v55 = vld [vmem:[#allocation214_spill] sm:$0xff] }
 0x2f1   :  { %10157 = vmatprep.subr.bf16.mxu1 %v18864_v12  ;;  %v18871_v12 = vld [vmem:[#allocation215_spill] sm:$0xff] }
 0x2f2   :  { %2062 = vmatmul.mubr.f32.vlgmr.msra.gmra.mrb[8].mxu0 %v15270_v62 }
 0x2f3   :  { %2204 = vmatmul.mubr.f32.vlgmr.msra.gmra.mrb[8].mxu1 %v15270_v62  ;;  %10063 = vmatpush1.bf16.msra.mxu0 %v18865_v11  ;;  %v18874_v11 = vld [vmem:[#allocation218_spill] sm:$0xff] }
 0x2f4   :  { %2274 = vmatprep.mubr.f32.mxu0 %v15231_v47  ;;  %10159 = vmatpush1.bf16.msra.mxu1 %v18866_v59  ;;  %v18876_v59 = vld [vmem:[#allocation220_spill] sm:$0xff] }
 0x2f5   :  { %2416 = vmatprep.mubr.f32.mxu1 %v15231_v47  ;;  %10065 = vmatprep.subr.bf16.mxu0 %v18867_v60  ;;  %v18877_v47 = vld [vmem:[#allocation221_spill] sm:$0xff]  ;;  %v18878_v60 = vld [vmem:[#allocation222_spill] sm:$0xff] }
 0x2f6   :  { %10161 = vmatprep.subr.bf16.mxu1 %v18868_v41  ;;  %v18879_v41 = vld [vmem:[#allocation223_spill] sm:$0xff] }
 0x2f7   :  { %10067 = vmatpush1.bf16.msra.mxu0 %v18869_v28  ;;  %v18880_v28 = vld [vmem:[#allocation224_spill] sm:$0xff] }
 0x2f8   :  { %10163 = vmatpush1.bf16.msra.mxu1 %v18870_v55  ;;  %10069 = vmatprep.subr.bf16.mxu0 %v18871_v12  ;;  %v18881_v55 = vld [vmem:[#allocation225_spill] sm:$0xff]  ;;  %v18882_v12 = vld [vmem:[#allocation226_spill] sm:$0xff] }
 0x2f9   :  { %10165 = vmatprep.subr.bf16.mxu1 %v18872_v24  ;;  %v18883_v24 = vld [vmem:[#allocation227_spill] sm:$0xff] }
 0x2fb   :  { %10071 = vmatpush1.bf16.msra.mxu0 %v18873_v49  ;;  %v18884_v49 = vld [vmem:[#allocation228_spill] sm:$0xff] }
 0x2fc   :  { %10167 = vmatpush1.bf16.msra.mxu1 %v18874_v11  ;;  %10073 = vmatprep.subr.bf16.mxu0 %v18875_v0  ;;  %v18885_v11 = vld [vmem:[#allocation229_spill] sm:$0xff]  ;;  %v18886_v0 = vld [vmem:[#allocation230_spill] sm:$0xff] }
 0x2fd   :  { %10169 = vmatprep.subr.bf16.mxu1 %v18876_v59  ;;  %v18887_v59 = vld [vmem:[#allocation231_spill] sm:$0xff] }
 0x2ff   :  { %10075 = vmatpush1.bf16.msra.mxu0 %v18877_v47  ;;  %v18888_v47 = vld [vmem:[#allocation232_spill] sm:$0xff] }
 0x300   :  { %10171 = vmatpush1.bf16.msra.mxu1 %v18878_v60  ;;  %10077 = vmatprep.subr.bf16.mxu0 %v18879_v41  ;;  %v18889_v60 = vld [vmem:[#allocation233_spill] sm:$0xff]  ;;  %v18890_v41 = vld [vmem:[#allocation234_spill] sm:$0xff] }
 0x301   :  { %10173 = vmatprep.subr.bf16.mxu1 %v18880_v28  ;;  %v18891_v28 = vld [vmem:[#allocation235_spill] sm:$0xff] }
 0x303   :  { %10079 = vmatpush1.bf16.msra.mxu0 %v18881_v55  ;;  %v18892_v55 = vld [vmem:[#allocation236_spill] sm:$0xff] }
 0x304   :  { %10175 = vmatpush1.bf16.msra.mxu1 %v18882_v12  ;;  %10081 = vmatprep.subr.bf16.mxu0 %v18883_v24  ;;  %v18893_v12 = vld [vmem:[#allocation237_spill] sm:$0xff]  ;;  %v18894_v24 = vld [vmem:[#allocation238_spill] sm:$0xff] }
 0x305   :  { %10177 = vmatprep.subr.bf16.mxu1 %v18884_v49  ;;  %v18895_v49 = vld [vmem:[#allocation239_spill] sm:$0xff] }
 0x307   :  { %10083 = vmatpush1.bf16.msra.mxu0 %v18885_v11  ;;  %v18896_v11 = vld [vmem:[#allocation240_spill] sm:$0xff] }
 0x308   :  { %10179 = vmatpush1.bf16.msra.mxu1 %v18886_v0  ;;  %10085 = vmatprep.subr.bf16.mxu0 %v18887_v59  ;;  %v18897_v0 = vld [vmem:[#allocation241_spill] sm:$0xff]  ;;  %v18898_v59 = vld [vmem:[#allocation242_spill] sm:$0xff] }
 0x309   :  { %10181 = vmatprep.subr.bf16.mxu1 %v18888_v47  ;;  %v18899_v47 = vld [vmem:[#allocation243_spill] sm:$0xff] }
 0x30b   :  { %10087 = vmatpush1.bf16.msra.mxu0 %v18889_v60  ;;  %v18900_v60 = vld [vmem:[#allocation244_spill] sm:$0xff] }
 0x30c   :  { %10183 = vmatpush1.bf16.msra.mxu1 %v18890_v41  ;;  %10089 = vmatprep.subr.bf16.mxu0 %v18891_v28  ;;  %v18901_v41 = vld [vmem:[#allocation245_spill] sm:$0xff]  ;;  %v18902_v28 = vld [vmem:[#allocation246_spill] sm:$0xff] }
 0x30d   :  { %10185 = vmatprep.subr.bf16.mxu1 %v18892_v55  ;;  %v18903_v55 = vld [vmem:[#allocation247_spill] sm:$0xff] }
 0x30f   :  { %10091 = vmatpush1.bf16.msra.mxu0 %v18893_v12  ;;  %v18904_v12 = vld [vmem:[#allocation248_spill] sm:$0xff] }
 0x310   :  { %10187 = vmatpush1.bf16.msra.mxu1 %v18894_v24  ;;  %10093 = vmatprep.subr.bf16.mxu0 %v18895_v49  ;;  %v18905_v24 = vld [vmem:[#allocation249_spill] sm:$0xff]  ;;  %v18906_v49 = vld [vmem:[#allocation250_spill] sm:$0xff] }
 0x311   :  { %10189 = vmatprep.subr.bf16.mxu1 %v18896_v11  ;;  %v18907_v11 = vld [vmem:[#allocation251_spill] sm:$0xff] }
 0x313   :  { %10095 = vmatpush1.bf16.msra.mxu0 %v18897_v0  ;;  %v18908_v0 = vld [vmem:[#allocation252_spill] sm:$0xff] }
 0x314   :  { %10191 = vmatpush1.bf16.msra.mxu1 %v18898_v59  ;;  %10097 = vmatprep.subr.bf16.mxu0 %v18899_v47  ;;  %v18909_v59 = vld [vmem:[#allocation253_spill] sm:$0xff]  ;;  %v18910_v47 = vld [vmem:[#allocation254_spill] sm:$0xff] }
 0x315   :  { %10193 = vmatprep.subr.bf16.mxu1 %v18900_v60  ;;  %v18911_v60 = vld [vmem:[#allocation255_spill] sm:$0xff] }
 0x317   :  { %10099 = vmatpush1.bf16.msra.mxu0 %v18901_v41  ;;  %v18912_v41 = vld [vmem:[#allocation256_spill] sm:$0xff] }
 0x318   :  { %10195 = vmatpush1.bf16.msra.mxu1 %v18902_v28  ;;  %10101 = vmatprep.subr.bf16.mxu0 %v18903_v55  ;;  %v18913_v28 = vld [vmem:[#allocation257_spill] sm:$0xff]  ;;  %v18914_v55 = vld [vmem:[#allocation258_spill] sm:$0xff] }
 0x319   :  { %10197 = vmatprep.subr.bf16.mxu1 %v18904_v12  ;;  %v18915_v12 = vld [vmem:[#allocation259_spill] sm:$0xff] }
 0x31b   :  { %10103 = vmatpush1.bf16.msra.mxu0 %v18905_v24  ;;  %v18916_v24 = vld [vmem:[#allocation260_spill] sm:$0xff] }
 0x31c   :  { %10199 = vmatpush1.bf16.msra.mxu1 %v18906_v49  ;;  %10105 = vmatprep.subr.bf16.mxu0 %v18907_v11  ;;  %v18917_v49 = vld [vmem:[#allocation261_spill] sm:$0xff]  ;;  %v18918_v11 = vld [vmem:[#allocation262_spill] sm:$0xff] }
 0x31d   :  { %10201 = vmatprep.subr.bf16.mxu1 %v18908_v0  ;;  %v18919_v0 = vld [vmem:[#allocation263_spill] sm:$0xff] }
 0x31f   :  { %10107 = vmatpush1.bf16.msra.mxu0 %v18909_v59  ;;  %v18920_v59 = vld [vmem:[#allocation264_spill] sm:$0xff] }
 0x320   :  { %10203 = vmatpush1.bf16.msra.mxu1 %v18910_v47  ;;  %10109 = vmatprep.subr.bf16.mxu0 %v18911_v60  ;;  %v18921_v47 = vld [vmem:[#allocation265_spill] sm:$0xff]  ;;  %v18922_v60 = vld [vmem:[#allocation266_spill] sm:$0xff] }
 0x321   :  { %10205 = vmatprep.subr.bf16.mxu1 %v18912_v41  ;;  %v18923_v41 = vld [vmem:[#allocation267_spill] sm:$0xff] }
 0x323   :  { %10111 = vmatpush1.bf16.msra.mxu0 %v18913_v28  ;;  %v18924_v28 = vld [vmem:[#allocation268_spill] sm:$0xff] }
 0x324   :  { %10207 = vmatpush1.bf16.msra.mxu1 %v18914_v55  ;;  %10113 = vmatprep.subr.bf16.mxu0 %v18915_v12  ;;  %v18925_v55 = vld [vmem:[#allocation269_spill] sm:$0xff]  ;;  %v18926_v12 = vld [vmem:[#allocation270_spill] sm:$0xff] }
 0x325   :  { %10209 = vmatprep.subr.bf16.mxu1 %v18916_v24  ;;  %v18927_v24 = vld [vmem:[#allocation271_spill] sm:$0xff] }
 0x327   :  { %10115 = vmatpush1.bf16.msra.mxu0 %v18917_v49  ;;  %v18928_v49 = vld [vmem:[#allocation272_spill] sm:$0xff] }
 0x328   :  { %10211 = vmatpush1.bf16.msra.mxu1 %v18918_v11  ;;  %10117 = vmatprep.subr.bf16.mxu0 %v18919_v0  ;;  %v18943_v0 = vld [vmem:[#allocation287_spill] sm:$0xff] }
 0x329   :  { %10213 = vmatprep.subr.bf16.mxu1 %v18920_v59  ;;  %v18929_v59 = vld [vmem:[#allocation273_spill] sm:$0xff] }
 0x32b   :  { %10119 = vmatpush1.bf16.msra.mxu0 %v18921_v47  ;;  %v18930_v47 = vld [vmem:[#allocation274_spill] sm:$0xff] }
 0x32c   :  { %10215 = vmatpush1.bf16.msra.mxu1 %v18922_v60  ;;  %10121 = vmatprep.subr.bf16.mxu0 %v18923_v41  ;;  %v18931_v60 = vld [vmem:[#allocation275_spill] sm:$0xff]  ;;  %v18932_v41 = vld [vmem:[#allocation276_spill] sm:$0xff] }
 0x32d   :  { %10217 = vmatprep.subr.bf16.mxu1 %v18924_v28  ;;  %v18942_v28 = vld [vmem:[#allocation286_spill] sm:$0xff] }
 0x32f   :  { %10123 = vmatpush1.bf16.msra.mxu0 %v18925_v55  ;;  %v18936_v55 = vld [vmem:[#allocation280_spill] sm:$0xff] }
 0x330   :  { %10219 = vmatpush1.bf16.msra.mxu1 %v18926_v12  ;;  %10125 = vmatprep.subr.bf16.mxu0 %v18927_v24  ;;  %v18933_v12 = vld [vmem:[#allocation277_spill] sm:$0xff]  ;;  %v18934_v24 = vld [vmem:[#allocation278_spill] sm:$0xff] }
 0x331   :  { %10221 = vmatprep.subr.bf16.mxu1 %v18928_v49  ;;  %v18935_v49 = vld [vmem:[#allocation279_spill] sm:$0xff] }
 0x332   :  { %2275 = vmatmul.mubr.f32.vlgmr.msra.gmra.mrb[10].mxu0 %v15227_v58 }
 0x333   :  { %2417 = vmatmul.mubr.f32.vlgmr.msra.gmra.mrb[10].mxu1 %v15227_v58  ;;  %10127 = vmatpush1.bf16.msra.mxu0 %v18929_v59  ;;  %v18937_v58 = vld [vmem:[#allocation281_spill] sm:$0xff]  ;;  %v18938_v59 = vld [vmem:[#allocation282_spill] sm:$0xff] }
 0x334   :  { %10223 = vmatpush1.bf16.msra.mxu1 %v18930_v47  ;;  %10129 = vmatprep.subr.bf16.mxu0 %v18931_v60  ;;  %v18939_v47 = vld [vmem:[#allocation283_spill] sm:$0xff]  ;;  %v18940_v60 = vld [vmem:[#allocation284_spill] sm:$0xff] }
 0x335   :  { %10225 = vmatprep.subr.bf16.mxu1 %v18932_v41  ;;  %2345 = vmatprep.mubr.f32.mxu0 %v18494_v56  ;;  %v18941_v41 = vld [vmem:[#allocation285_spill] sm:$0xff] }
 0x336   :  { %2487 = vmatprep.mubr.f32.mxu1 %v18494_v56 }
 0x337   :  { %10131 = vmatpush1.bf16.msra.mxu0 %v18933_v12  ;;  %v18944_v12 = vld [vmem:[#allocation288_spill] sm:$0xff] }
 0x338   :  { %10227 = vmatpush1.bf16.msra.mxu1 %v18934_v24  ;;  %10133 = vmatprep.subr.bf16.mxu0 %v18935_v49  ;;  %v18945_v24 = vld [vmem:[#allocation289_spill] sm:$0xff]  ;;  %v18946_v49 = vld [vmem:[#allocation290_spill] sm:$0xff] }
 0x339   :  { %10229 = vmatprep.subr.bf16.mxu1 %v18936_v55 }
 0x33b   :  { %10135 = vmatpush1.bf16.msra.mxu0 %v18937_v58  ;;  %v18947_v58 = vld [vmem:[#allocation292_spill] sm:$0xff] }
 0x33c   :  { %10231 = vmatpush1.bf16.msra.mxu1 %v18938_v59  ;;  %10137 = vmatprep.subr.bf16.mxu0 %v18939_v47 }
 0x33d   :  { %10233 = vmatprep.subr.bf16.mxu1 %v18940_v60 }
 0x33f   :  { %10139 = vmatpush1.bf16.msra.mxu0 %v18941_v41 }
 0x340   :  { %10235 = vmatpush1.bf16.msra.mxu1 %v18942_v28  ;;  %10141 = vmatprep.subr.bf16.mxu0 %v18943_v0 }
 0x341   :  { %10237 = vmatprep.subr.bf16.mxu1 %v18944_v12 }
 0x343   :  { %10143 = vmatpush1.bf16.msra.mxu0 %v18945_v24 }
 0x344   :  { %10239 = vmatpush1.bf16.msra.mxu1 %v18946_v49  ;;  %10145 = vmatprep.subr.bf16.mxu0 %v15097_v21 }
 0x345   :  { %10241 = vmatprep.subr.bf16.mxu1 %v18947_v58 }
 0x347   :  { %10147 = vmatpush1.bf16.msra.mxu0 %v15103_v61 }
 0x348   :  { %10243 = vmatpush1.bf16.msra.mxu1 %v15107_v15  ;;  %10149 = vmatprep.subr.bf16.mxu0 %v15109_v45 }
 0x349   :  { %10245 = vmatprep.subr.bf16.mxu1 %v15112_v5 }
 0x34b   :  { %10151 = vmatpush1.bf16.msra.mxu0 %v15115_v42 }
 0x34c   :  { %10247 = vmatpush1.bf16.msra.mxu1 %v15119_v29  ;;  %10153 = vmatprep.subr.bf16.mxu0 %v15121_v3 }
 0x34d   :  { %10249 = vmatprep.subr.bf16.mxu1 %v15124_v6 }
 0x34f   :  { %10155 = vmatpush1.bf16.msra.mxu0 %v15127_v48 }
 0x350   :  { %10251 = vmatpush1.bf16.msra.mxu1 %v15131_v14  ;;  %10253 = vmatprep.subr.bf16.mxu0 %v14252_v4 }
 0x351   :  { %10349 = vmatprep.subr.bf16.mxu1 %v14254_v8 }
 0x352   :  { %2346 = vmatmul.mubr.f32.vlgmr.msra.gmra.mrb[10].mxu0 %v15270_v62 }
 0x353   :  { %2488 = vmatmul.mubr.f32.vlgmr.msra.gmra.mrb[10].mxu1 %v15270_v62  ;;  %10255 = vmatpush1.bf16.msra.mxu0 %v14256_v9 }
 0x354   :  { %10351 = vmatpush1.bf16.msra.mxu1 %v14259_v13  ;;  %10257 = vmatprep.subr.bf16.mxu0 %v14263_v17 }
 0x355   :  { %10353 = vmatprep.subr.bf16.mxu1 %v14265_v18 }
 0x357   :  { %10259 = vmatpush1.bf16.msra.mxu0 %v14268_v22 }
 0x358   :  { %10355 = vmatpush1.bf16.msra.mxu1 %v14272_v26  ;;  %10261 = vmatprep.subr.bf16.mxu0 %v14274_v27 }
 0x359   :  { %10357 = vmatprep.subr.bf16.mxu1 %v14276_v31 }
 0x35b   :  { %10263 = vmatpush1.bf16.msra.mxu0 %v14279_v35 }
 0x35c   :  { %10359 = vmatpush1.bf16.msra.mxu1 %v14283_v39  ;;  %10265 = vmatprep.subr.bf16.mxu0 %v14285_v40 }
 0x35d   :  { %10361 = vmatprep.subr.bf16.mxu1 %v14288_v44 }
 0x35f   :  { %10267 = vmatpush1.bf16.msra.mxu0 %v14291_v51 }
 0x360   :  { %10363 = vmatpush1.bf16.msra.mxu1 %v14295_v52  ;;  %10269 = vmatprep.subr.bf16.mxu0 %v14297_v53 }
 0x361   :  { %10365 = vmatprep.subr.bf16.mxu1 %v14300_v57 }
 0x363   :  { %10271 = vmatpush1.bf16.msra.mxu0 %v14303_v63 }
 0x364   :  { %10367 = vmatpush1.bf16.msra.mxu1 %v14307_v1  ;;  %10273 = vmatprep.subr.bf16.mxu0 %v14309_v2 }
 0x365   :  { %v1779_v62 = vpop.f32.mrb[6].mxu0  ;;  %v1921_v39 = vpop.f32.mrb[6].mxu1  ;;  %10369 = vmatprep.subr.bf16.mxu1 %v14312_v7 }
 0x366   :  { %v1781_v40 = vpop.f32.mrb[7].mxu0  ;;  %v1923_v44 = vpop.f32.mrb[7].mxu1 }
 0x367   :  { %v2506_v35 = vcombine.low %v1779_v62, %v1781_v40  ;;  %v2507_v51 = vcombine.low %v1921_v39, %v1923_v44  ;;  %10275 = vmatpush1.bf16.msra.mxu0 %v14315_v16  ;;  %v18948_v39 = vld [vmem:[#allocation46_spill] sm:$0xff]  ;;  %v18949_v40 = vld [vmem:[#allocation47_spill] sm:$0xff]  ;;  %v18951_v44 = vld [vmem:[#allocation49_spill] sm:$0xff] }
 0x368   :  { %10371 = vmatpush1.bf16.msra.mxu1 %v14319_v19  ;;  %10277 = vmatprep.subr.bf16.mxu0 %v14321_v20  ;;  %v18955_v62 = vld [vmem:[#allocation53_spill] sm:$0xff] }
 0x369   :  { %v2514_v63 = vrot.slane %v2506_v35, %v15159_v32  ;;  %v2521_v1 = vrot.slane %v2507_v51, %v15159_v32  ;;  %10373 = vmatprep.subr.bf16.mxu1 %v14324_v25  ;;  %v18950_v35 = vld [vmem:[#allocation48_spill] sm:$0xff]  ;;  %v18952_v51 = vld [vmem:[#allocation50_spill] sm:$0xff] }
 0x36b   :  { %v2522_v2 = vcombine.low %v2514_v63, %v2521_v1  ;;  %10279 = vmatpush1.bf16.msra.mxu0 %v14327_v34  ;;  %v18953_v63 = vld [vmem:[#allocation51_spill] sm:$0xff]  ;;  %v18954_v1 = vld [vmem:[#allocation52_spill] sm:$0xff] }
 0x36c   :  { %10375 = vmatpush1.bf16.msra.mxu1 %v14331_v36  ;;  %10281 = vmatprep.subr.bf16.mxu0 %v14333_v37  ;;  %v18956_v37 = vld [vmem:[#allocation54_spill] sm:$0xff] }
 0x36d   :  { %10377 = vmatprep.subr.bf16.mxu1 %v14336_v43  ;;  %v18957_v43 = vld [vmem:[#allocation55_spill] sm:$0xff] }
 0x36f   :  { %10283 = vmatpush1.bf16.msra.mxu0 %v14339_v50  ;;  %v18958_v50 = vld [vmem:[#allocation56_spill] sm:$0xff] }
 0x370   :  { %10379 = vmatpush1.bf16.msra.mxu1 %v18948_v39  ;;  %10285 = vmatprep.subr.bf16.mxu0 %v18949_v40  ;;  %v18959_v39 = vld [vmem:[#allocation57_spill] sm:$0xff]  ;;  %v18960_v40 = vld [vmem:[#allocation58_spill] sm:$0xff] }
 0x371   :  { %10381 = vmatprep.subr.bf16.mxu1 %v18950_v35  ;;  %v18961_v35 = vld [vmem:[#allocation59_spill] sm:$0xff] }
 0x373   :  { %10287 = vmatpush1.bf16.msra.mxu0 %v18951_v44  ;;  %v18962_v44 = vld [vmem:[#allocation60_spill] sm:$0xff] }
 0x374   :  { %10383 = vmatpush1.bf16.msra.mxu1 %v18952_v51  ;;  %10289 = vmatprep.subr.bf16.mxu0 %v18953_v63  ;;  %v18963_v51 = vld [vmem:[#allocation61_spill] sm:$0xff]  ;;  %v18964_v63 = vld [vmem:[#allocation62_spill] sm:$0xff] }
 0x375   :  { %10385 = vmatprep.subr.bf16.mxu1 %v18954_v1  ;;  %v18965_v1 = vld [vmem:[#allocation63_spill] sm:$0xff] }
 0x377   :  { %10291 = vmatpush1.bf16.msra.mxu0 %v18955_v62  ;;  %v18966_v62 = vld [vmem:[#allocation64_spill] sm:$0xff] }
 0x378   :  { %10387 = vmatpush1.bf16.msra.mxu1 %v18956_v37  ;;  %10293 = vmatprep.subr.bf16.mxu0 %v18957_v43  ;;  %v18967_v37 = vld [vmem:[#allocation65_spill] sm:$0xff]  ;;  %v18968_v43 = vld [vmem:[#allocation66_spill] sm:$0xff] }
 0x379   :  { %10389 = vmatprep.subr.bf16.mxu1 %v18958_v50  ;;  %v18969_v50 = vld [vmem:[#allocation67_spill] sm:$0xff] }
 0x37b   :  { %10295 = vmatpush1.bf16.msra.mxu0 %v18959_v39  ;;  %v18970_v39 = vld [vmem:[#allocation68_spill] sm:$0xff] }
 0x37c   :  { %10391 = vmatpush1.bf16.msra.mxu1 %v18960_v40  ;;  %10297 = vmatprep.subr.bf16.mxu0 %v18961_v35  ;;  %v18971_v40 = vld [vmem:[#allocation69_spill] sm:$0xff]  ;;  %v18972_v35 = vld [vmem:[#allocation70_spill] sm:$0xff] }
 0x37d   :  { %10393 = vmatprep.subr.bf16.mxu1 %v18962_v44  ;;  %v18973_v44 = vld [vmem:[#allocation71_spill] sm:$0xff] }
 0x37f   :  { %10299 = vmatpush1.bf16.msra.mxu0 %v18963_v51  ;;  %v18974_v51 = vld [vmem:[#allocation72_spill] sm:$0xff] }
 0x380   :  { %10395 = vmatpush1.bf16.msra.mxu1 %v18964_v63  ;;  %10301 = vmatprep.subr.bf16.mxu0 %v18965_v1  ;;  %v18975_v63 = vld [vmem:[#allocation73_spill] sm:$0xff]  ;;  %v18976_v1 = vld [vmem:[#allocation74_spill] sm:$0xff] }
 0x381   :  { %10397 = vmatprep.subr.bf16.mxu1 %v18966_v62  ;;  %v18977_v62 = vld [vmem:[#allocation75_spill] sm:$0xff] }
 0x383   :  { %10303 = vmatpush1.bf16.msra.mxu0 %v18967_v37  ;;  %v18978_v37 = vld [vmem:[#allocation76_spill] sm:$0xff] }
 0x384   :  { %10399 = vmatpush1.bf16.msra.mxu1 %v18968_v43  ;;  %10305 = vmatprep.subr.bf16.mxu0 %v18969_v50  ;;  %v18979_v43 = vld [vmem:[#allocation77_spill] sm:$0xff]  ;;  %v18980_v50 = vld [vmem:[#allocation78_spill] sm:$0xff] }
 0x385   :  { %10401 = vmatprep.subr.bf16.mxu1 %v18970_v39  ;;  %v18981_v39 = vld [vmem:[#allocation79_spill] sm:$0xff] }
 0x387   :  { %10307 = vmatpush1.bf16.msra.mxu0 %v18971_v40  ;;  %v18982_v40 = vld [vmem:[#allocation80_spill] sm:$0xff] }
 0x388   :  { %10403 = vmatpush1.bf16.msra.mxu1 %v18972_v35  ;;  %10309 = vmatprep.subr.bf16.mxu0 %v18973_v44 }
 0x389   :  { %10405 = vmatprep.subr.bf16.mxu1 %v18974_v51 }
 0x38b   :  { %10311 = vmatpush1.bf16.msra.mxu0 %v18975_v63 }
 0x38c   :  { %10407 = vmatpush1.bf16.msra.mxu1 %v18976_v1  ;;  %10313 = vmatprep.subr.bf16.mxu0 %v18977_v62  ;;  %v8918_v62 = vld [vmem:[%s17789_s0 + $0x18] sm:$0xff] }
 0x38d   :  { %10409 = vmatprep.subr.bf16.mxu1 %v18978_v37 }
 0x38f   :  { %10315 = vmatpush1.bf16.msra.mxu0 %v18979_v43 }
 0x390   :  { %10411 = vmatpush1.bf16.msra.mxu1 %v18980_v50  ;;  %10317 = vmatprep.subr.bf16.mxu0 %v18981_v39  ;;  %v8919_v39 = vld [vmem:[%s17789_s0 + $0x20] sm:$0xff]  ;;  %v2560_v50 = vadd.f32 %v8918_v62, %v2522_v2 }
 0x391   :  { %10413 = vmatprep.subr.bf16.mxu1 %v18982_v40 }
 0x392   :  { %v2571_v25 = vrot.slane %v2560_v50, 6 }
 0x3c5   :  { %v2063_v35 = vpop.f32.mrb[8].mxu0 }
 0x3c6   :  { %v2205_v44 = vpop.f32.mrb[8].mxu1  ;;  %v2065_v36 = vpop.f32.mrb[9].mxu0 }
 0x3c7   :  { %v2523_v51 = vcombine.low %v2063_v35, %v2065_v36  ;;  %v2207_v34 = vpop.f32.mrb[9].mxu1  ;;  %v8921_v35 = vmul.f32 -1.442695, %v2560_v50 }
 0x3c8   :  { %v2524_v63 = vcombine.low %v2205_v44, %v2207_v34 }
 0x3c9   :  { %v2531_v37 = vrot.slane %v2523_v51, %v15159_v32 }
 0x3ca   :  { %v2538_v43 = vrot.slane %v2524_v63, %v15159_v32 }
 0x3cc   :  { %v2539_v40 = vcombine.low %v2531_v37, %v2538_v43 }
 0x3ce   :  { %v2561_v1 = vadd.f32 %v8919_v39, %v2539_v40 }
 0x3d0   :  { %v2572_v20 = vrot.slane %v2561_v1, 6  ;;  %v2582_v40 = vrot.slane %v2561_v1, 4 }
 0x3d2   :  { %v2573_v36 = vsel %vm1589_vm0, %v2571_v25, %v2572_v20  ;;  %v8920_v20 = vld [vmem:[%s17789_s0 + $0x28] sm:$0xff] }
 0x3d3   :  { %v8922_v34 = vmul.f32 -1.442695, %v2573_v36 }
 0x3d5   :  { %13905 = vpow2.f32 %v8922_v34 }
 0x3d6   :  { %13907 = vpow2.f32 %v8921_v35 }
 0x3df   :  { %v13906_v53 = vpop.eup %13905 }
 0x3e0   :  { %v13908_v37 = vpop.eup %13907  ;;  %v2578_v43 = vadd.f32 1.0, %v13906_v53 }
 0x3e1   :  { %v2566_v50 = vadd.f32 1.0, %v13908_v37 }
 0x3e2   :  { %13909 = vrcp.f32 %v2578_v43  ;;  %v18984_v43 = vld [vmem:[#allocation87_spill] sm:$0xff] }
 0x3e3   :  { %13911 = vrcp.f32 %v2566_v50  ;;  %v18985_v50 = vld [vmem:[#allocation88_spill] sm:$0xff] }
 0x425   :  { %v2347_v44 = vpop.f32.mrb[10].mxu0 }
 0x426   :  { %v2489_v19 = vpop.f32.mrb[10].mxu1  ;;  %v2349_v51 = vpop.f32.mrb[11].mxu0 }
 0x427   :  { %v2540_v16 = vcombine.low %v2347_v44, %v2349_v51  ;;  %v2491_v63 = vpop.f32.mrb[11].mxu1 }
 0x428   :  { %v2541_v7 = vcombine.low %v2489_v19, %v2491_v63 }
 0x429   :  { %v2548_v57 = vrot.slane %v2540_v16, %v15159_v32 }
 0x42a   :  { %v2555_v2 = vrot.slane %v2541_v7, %v15159_v32  ;;  %v13910_v7 = vpop.eup %13909 }
 0x42b   :  { %v13912_v34 = vpop.eup %13911  ;;  %v2595_v51 = vmul.f32 %v13910_v7, %v15223_v38  ;;  %v18983_v38 = vld [vmem:[#allocation86_spill] sm:$0xff]  ;;  %v18992_v7 = vld [vmem:[#allocation95_spill] sm:$0xff] }
 0x42c   :  { %v2556_v25 = vcombine.low %v2548_v57, %v2555_v2 }
 0x42e   :  { %v2562_v39 = vadd.f32 %v8920_v20, %v2556_v25 }
 0x430   :  { %v2583_v62 = vrot.slane %v2562_v39, 4  ;;  %v2587_v36 = vrot.slane %v2562_v39, 2  ;;  %v18986_v39 = vld [vmem:[#allocation89_spill] sm:$0xff] }
 0x432   :  { %v2584_v19 = vsel %vm1601_vm1, %v2582_v40, %v2583_v62  ;;  %v8923_v16 = vmul.f32 -1.442695, %v2587_v36  ;;  %v18987_v40 = vld [vmem:[#allocation90_spill] sm:$0xff]  ;;  %v18988_v62 = vld [vmem:[#allocation91_spill] sm:$0xff]  ;;  %v18989_v36 = vld [vmem:[#allocation92_spill] sm:$0xff] }
 0x433   :  { %13913 = vtanh.f32 %v2584_v19  ;;  %v18990_v19 = vld [vmem:[#allocation93_spill] sm:$0xff] }
 0x434   :  { %13915 = vpow2.f32 %v8923_v16  ;;  %v18991_v16 = vld [vmem:[#allocation94_spill] sm:$0xff] }
 0x43d   :  { %v13914_v35 = vpop.eup %13913 }
 0x43e   :  { %v13916_v44 = vpop.eup %13915  ;;  %v2596_v57 = vmul.f32 %v13914_v35, %v13912_v34  ;;  %v18993_v34 = vld [vmem:[#allocation96_spill] sm:$0xff]  ;;  %v18994_v35 = vld [vmem:[#allocation97_spill] sm:$0xff] }
 0x43f   :  { %v2592_v53 = vadd.f32 1.0, %v13916_v44  ;;  %v18995_v44 = vld [vmem:[#allocation98_spill] sm:$0xff] }
 0x440   :  { %v15566_v63 = vadd.f32 %v2596_v57, %v2595_v51  ;;  %v18996_v51 = vld [vmem:[#allocation99_spill] sm:$0xff]  ;;  %v18997_v57 = vld [vmem:[#allocation100_spill] sm:$0xff] }
 0x441   :  { %13917 = vrcp.f32 %v2592_v53  ;;  %v18998_v53 = vld [vmem:[#allocation101_spill] sm:$0xff] }
 0x442   :  { %13919 = vtanh.f32 %v15566_v63 }
 0x44b   :  { %v13918_v1 = vpop.eup %13917 }
 0x44c   :  { %v13920_v2 = vpop.eup %13919 }
 0x44d   :  { %v2599_v37 = vmul.f32 %v13920_v2, %v13918_v1  ;;  %v18999_v1 = vld [vmem:[#allocation102_spill] sm:$0xff]  ;;  %v19000_v2 = vld [vmem:[#allocation103_spill] sm:$0xff] }
 0x44f   :  { %v15570_v20 = vrot.slane %v2599_v37, %v15159_v32 }
 0x451   :  { %v15574_v25 = vcombine.high %v15570_v20, %v15570_v20 }
 0x453   :  { %2688 = vmatprep.mubr.f32.mxu0 %v15574_v25  ;;  %2830 = vmatprep.mubr.f32.mxu1 %v15574_v25 }
 0x454   :  { %2689 = vmatmul.mubr.f32.vlgmr.msra.gmra.mrb[12].mxu0 %v15570_v20  ;;  %2831 = vmatmul.mubr.f32.vlgmr.msra.gmra.mrb[12].mxu1 %v15570_v20 }
 0x455   :  { %10319 = vmatpush1.bf16.msra.mxu0 %v18737_v46  ;;  %10415 = vmatpush1.bf16.msra.mxu1 %v18738_v30 }
 0x456   :  { %10321 = vmatprep.subr.bf16.mxu0 %v18739_v33  ;;  %10417 = vmatprep.subr.bf16.mxu1 %v18740_v23 }
 0x457   :  { %2759 = vmatprep.mubr.f32.mxu0 %v18494_v56  ;;  %2901 = vmatprep.mubr.f32.mxu1 %v18494_v56 }
 0x459   :  { %10323 = vmatpush1.bf16.msra.mxu0 %v18741_v10  ;;  %10419 = vmatpush1.bf16.msra.mxu1 %v18983_v38 }
 0x45a   :  { %10325 = vmatprep.subr.bf16.mxu0 %v18984_v43  ;;  %10421 = vmatprep.subr.bf16.mxu1 %v18985_v50 }
 0x45d   :  { %10327 = vmatpush1.bf16.msra.mxu0 %v18986_v39  ;;  %10423 = vmatpush1.bf16.msra.mxu1 %v18987_v40 }
 0x45e   :  { %10329 = vmatprep.subr.bf16.mxu0 %v18988_v62  ;;  %10425 = vmatprep.subr.bf16.mxu1 %v18989_v36 }
 0x461   :  { %10331 = vmatpush1.bf16.msra.mxu0 %v18990_v19  ;;  %10427 = vmatpush1.bf16.msra.mxu1 %v18991_v16  ;;  %v19001_v19 = vld [vmem:[#allocation104_spill] sm:$0xff]  ;;  %v19002_v16 = vld [vmem:[#allocation105_spill] sm:$0xff] }
 0x462   :  { %10333 = vmatprep.subr.bf16.mxu0 %v18992_v7  ;;  %10429 = vmatprep.subr.bf16.mxu1 %v18993_v34  ;;  %v19003_v7 = vld [vmem:[#allocation106_spill] sm:$0xff]  ;;  %v19004_v34 = vld [vmem:[#allocation107_spill] sm:$0xff] }
 0x465   :  { %10335 = vmatpush1.bf16.msra.mxu0 %v18994_v35  ;;  %10431 = vmatpush1.bf16.msra.mxu1 %v18995_v44  ;;  %v19005_v35 = vld [vmem:[#allocation108_spill] sm:$0xff]  ;;  %v2605_v44 = vcombine.high %v2599_v37, %v2599_v37  ;;  %v19011_v37 = vld [vmem:[#allocation114_spill] sm:$0xff] }
 0x466   :  { %10337 = vmatprep.subr.bf16.mxu0 %v18996_v51  ;;  %10433 = vmatprep.subr.bf16.mxu1 %v18997_v57  ;;  %v19006_v51 = vld [vmem:[#allocation109_spill] sm:$0xff]  ;;  %v19007_v57 = vld [vmem:[#allocation110_spill] sm:$0xff] }
 0x469   :  { %10339 = vmatpush1.bf16.msra.mxu0 %v18998_v53  ;;  %10435 = vmatpush1.bf16.msra.mxu1 %v18999_v1  ;;  %v15613_v53 = vrot.slane %v2605_v44, %v15159_v32  ;;  %v19008_v1 = vld [vmem:[#allocation111_spill] sm:$0xff]  ;;  %v19013_v44 = vld [vmem:[#allocation116_spill] sm:$0xff] }
 0x46a   :  { %10341 = vmatprep.subr.bf16.mxu0 %v19000_v2  ;;  %10437 = vmatprep.subr.bf16.mxu1 %v19001_v19  ;;  %v19009_v2 = vld [vmem:[#allocation112_spill] sm:$0xff]  ;;  %v19022_v19 = vld [vmem:[#allocation125_spill] sm:$0xff] }
 0x46d   :  { %10343 = vmatpush1.bf16.msra.mxu0 %v19002_v16  ;;  %10439 = vmatpush1.bf16.msra.mxu1 %v19003_v7  ;;  %v19010_v7 = vld [vmem:[#allocation113_spill] sm:$0xff]  ;;  %v19020_v16 = vld [vmem:[#allocation123_spill] sm:$0xff] }
 0x46e   :  { %10345 = vmatprep.subr.bf16.mxu0 %v19004_v34  ;;  %10441 = vmatprep.subr.bf16.mxu1 %v19005_v35  ;;  %v19017_v35 = vld [vmem:[#allocation120_spill] sm:$0xff]  ;;  %v19018_v34 = vld [vmem:[#allocation121_spill] sm:$0xff] }
 0x471   :  { %10347 = vmatpush1.bf16.msra.mxu0 %v19006_v51  ;;  %10443 = vmatpush1.bf16.msra.mxu1 %v19007_v57  ;;  %v19012_v57 = vld [vmem:[#allocation115_spill] sm:$0xff]  ;;  %v19014_v51 = vld [vmem:[#allocation117_spill] sm:$0xff] }
 0x472   :  { %10445 = vmatprep.subr.bf16.mxu0 %v19008_v1  ;;  %10541 = vmatprep.subr.bf16.mxu1 %v19009_v2  ;;  %v19015_v1 = vld [vmem:[#allocation118_spill] sm:$0xff]  ;;  %v19016_v2 = vld [vmem:[#allocation119_spill] sm:$0xff] }
 0x474   :  { %2760 = vmatmul.mubr.f32.vlgmr.msra.gmra.mrb[12].mxu0 %v15613_v53  ;;  %2902 = vmatmul.mubr.f32.vlgmr.msra.gmra.mrb[12].mxu1 %v15613_v53 }
 0x475   :  { %10447 = vmatpush1.bf16.msra.mxu0 %v19010_v7  ;;  %2972 = vmatprep.mubr.f32.mxu0 %v15574_v25  ;;  %v19019_v7 = vld [vmem:[#allocation122_spill] sm:$0xff] }
 0x476   :  { %10543 = vmatpush1.bf16.msra.mxu1 %v19011_v37  ;;  %3114 = vmatprep.mubr.f32.mxu1 %v15574_v25  ;;  %v19021_v37 = vld [vmem:[#allocation124_spill] sm:$0xff] }
 0x477   :  { %10449 = vmatprep.subr.bf16.mxu0 %v19012_v57  ;;  %10545 = vmatprep.subr.bf16.mxu1 %v19013_v44  ;;  %v19023_v57 = vld [vmem:[#allocation126_spill] sm:$0xff]  ;;  %v19024_v44 = vld [vmem:[#allocation127_spill] sm:$0xff] }
 0x479   :  { %10451 = vmatpush1.bf16.msra.mxu0 %v19014_v51  ;;  %v19025_v51 = vld [vmem:[#allocation128_spill] sm:$0xff] }
 0x47a   :  { %10547 = vmatpush1.bf16.msra.mxu1 %v19015_v1  ;;  %10453 = vmatprep.subr.bf16.mxu0 %v19016_v2  ;;  %v19026_v1 = vld [vmem:[#allocation129_spill] sm:$0xff]  ;;  %v19027_v2 = vld [vmem:[#allocation130_spill] sm:$0xff] }
 0x47b   :  { %10549 = vmatprep.subr.bf16.mxu1 %v19017_v35  ;;  %v19028_v35 = vld [vmem:[#allocation131_spill] sm:$0xff] }
 0x47d   :  { %10455 = vmatpush1.bf16.msra.mxu0 %v19018_v34  ;;  %v19029_v34 = vld [vmem:[#allocation132_spill] sm:$0xff] }
 0x47e   :  { %10551 = vmatpush1.bf16.msra.mxu1 %v19019_v7  ;;  %10457 = vmatprep.subr.bf16.mxu0 %v19020_v16  ;;  %v19030_v7 = vld [vmem:[#allocation133_spill] sm:$0xff]  ;;  %v19031_v16 = vld [vmem:[#allocation134_spill] sm:$0xff] }
 0x47f   :  { %10553 = vmatprep.subr.bf16.mxu1 %v19021_v37  ;;  %v19032_v37 = vld [vmem:[#allocation135_spill] sm:$0xff] }
 0x481   :  { %10459 = vmatpush1.bf16.msra.mxu0 %v19022_v19  ;;  %v19033_v19 = vld [vmem:[#allocation136_spill] sm:$0xff] }
 0x482   :  { %10555 = vmatpush1.bf16.msra.mxu1 %v19023_v57  ;;  %10461 = vmatprep.subr.bf16.mxu0 %v19024_v44  ;;  %v19034_v57 = vld [vmem:[#allocation137_spill] sm:$0xff]  ;;  %v19035_v44 = vld [vmem:[#allocation138_spill] sm:$0xff] }
 0x483   :  { %10557 = vmatprep.subr.bf16.mxu1 %v19025_v51  ;;  %v19036_v51 = vld [vmem:[#allocation139_spill] sm:$0xff] }
 0x485   :  { %10463 = vmatpush1.bf16.msra.mxu0 %v19026_v1  ;;  %v19037_v1 = vld [vmem:[#allocation140_spill] sm:$0xff] }
 0x486   :  { %10559 = vmatpush1.bf16.msra.mxu1 %v19027_v2  ;;  %10465 = vmatprep.subr.bf16.mxu0 %v19028_v35  ;;  %v19038_v2 = vld [vmem:[#allocation141_spill] sm:$0xff]  ;;  %v19039_v35 = vld [vmem:[#allocation142_spill] sm:$0xff] }
 0x487   :  { %10561 = vmatprep.subr.bf16.mxu1 %v19029_v34  ;;  %v19040_v34 = vld [vmem:[#allocation143_spill] sm:$0xff] }
 0x489   :  { %10467 = vmatpush1.bf16.msra.mxu0 %v19030_v7  ;;  %v19041_v7 = vld [vmem:[#allocation144_spill] sm:$0xff] }
 0x48a   :  { %10563 = vmatpush1.bf16.msra.mxu1 %v19031_v16  ;;  %10469 = vmatprep.subr.bf16.mxu0 %v19032_v37  ;;  %v19042_v16 = vld [vmem:[#allocation145_spill] sm:$0xff]  ;;  %v19043_v37 = vld [vmem:[#allocation146_spill] sm:$0xff] }
 0x48b   :  { %10565 = vmatprep.subr.bf16.mxu1 %v19033_v19  ;;  %v19044_v19 = vld [vmem:[#allocation147_spill] sm:$0xff] }
 0x48d   :  { %10471 = vmatpush1.bf16.msra.mxu0 %v19034_v57  ;;  %v19045_v57 = vld [vmem:[#allocation148_spill] sm:$0xff] }
 0x48e   :  { %10567 = vmatpush1.bf16.msra.mxu1 %v19035_v44  ;;  %10473 = vmatprep.subr.bf16.mxu0 %v19036_v51  ;;  %v19046_v44 = vld [vmem:[#allocation149_spill] sm:$0xff]  ;;  %v19047_v51 = vld [vmem:[#allocation150_spill] sm:$0xff] }
 0x48f   :  { %10569 = vmatprep.subr.bf16.mxu1 %v19037_v1  ;;  %v19048_v1 = vld [vmem:[#allocation151_spill] sm:$0xff] }
 0x491   :  { %10475 = vmatpush1.bf16.msra.mxu0 %v19038_v2  ;;  %v19049_v2 = vld [vmem:[#allocation152_spill] sm:$0xff] }
 0x492   :  { %10571 = vmatpush1.bf16.msra.mxu1 %v19039_v35  ;;  %10477 = vmatprep.subr.bf16.mxu0 %v19040_v34  ;;  %v19050_v35 = vld [vmem:[#allocation153_spill] sm:$0xff]  ;;  %v19051_v34 = vld [vmem:[#allocation154_spill] sm:$0xff] }
 0x493   :  { %10573 = vmatprep.subr.bf16.mxu1 %v19041_v7  ;;  %v19052_v7 = vld [vmem:[#allocation155_spill] sm:$0xff] }
 0x495   :  { %10479 = vmatpush1.bf16.msra.mxu0 %v19042_v16  ;;  %v19053_v16 = vld [vmem:[#allocation156_spill] sm:$0xff] }
 0x496   :  { %10575 = vmatpush1.bf16.msra.mxu1 %v19043_v37  ;;  %10481 = vmatprep.subr.bf16.mxu0 %v19044_v19  ;;  %v19054_v37 = vld [vmem:[#allocation157_spill] sm:$0xff]  ;;  %v19055_v19 = vld [vmem:[#allocation158_spill] sm:$0xff] }
 0x497   :  { %10577 = vmatprep.subr.bf16.mxu1 %v19045_v57  ;;  %v19056_v57 = vld [vmem:[#allocation159_spill] sm:$0xff] }
 0x499   :  { %10483 = vmatpush1.bf16.msra.mxu0 %v19046_v44  ;;  %v19057_v44 = vld [vmem:[#allocation160_spill] sm:$0xff] }
 0x49a   :  { %10579 = vmatpush1.bf16.msra.mxu1 %v19047_v51  ;;  %10485 = vmatprep.subr.bf16.mxu0 %v19048_v1  ;;  %v19058_v51 = vld [vmem:[#allocation161_spill] sm:$0xff]  ;;  %v19059_v1 = vld [vmem:[#allocation162_spill] sm:$0xff] }
 0x49b   :  { %10581 = vmatprep.subr.bf16.mxu1 %v19049_v2  ;;  %v19060_v2 = vld [vmem:[#allocation163_spill] sm:$0xff] }
 0x49d   :  { %10487 = vmatpush1.bf16.msra.mxu0 %v19050_v35  ;;  %v19061_v35 = vld [vmem:[#allocation164_spill] sm:$0xff] }
 0x49e   :  { %10583 = vmatpush1.bf16.msra.mxu1 %v19051_v34  ;;  %10489 = vmatprep.subr.bf16.mxu0 %v19052_v7  ;;  %v19062_v34 = vld [vmem:[#allocation165_spill] sm:$0xff]  ;;  %v19063_v7 = vld [vmem:[#allocation166_spill] sm:$0xff] }
 0x49f   :  { %10585 = vmatprep.subr.bf16.mxu1 %v19053_v16  ;;  %v19064_v16 = vld [vmem:[#allocation167_spill] sm:$0xff] }
 0x4a1   :  { %10491 = vmatpush1.bf16.msra.mxu0 %v19054_v37  ;;  %v19065_v37 = vld [vmem:[#allocation168_spill] sm:$0xff] }
 0x4a2   :  { %10587 = vmatpush1.bf16.msra.mxu1 %v19055_v19  ;;  %10493 = vmatprep.subr.bf16.mxu0 %v19056_v57  ;;  %v19066_v19 = vld [vmem:[#allocation169_spill] sm:$0xff]  ;;  %v19067_v57 = vld [vmem:[#allocation170_spill] sm:$0xff] }
 0x4a3   :  { %10589 = vmatprep.subr.bf16.mxu1 %v19057_v44  ;;  %v19068_v44 = vld [vmem:[#allocation171_spill] sm:$0xff] }
 0x4a5   :  { %10495 = vmatpush1.bf16.msra.mxu0 %v19058_v51  ;;  %v19069_v51 = vld [vmem:[#allocation172_spill] sm:$0xff] }
 0x4a6   :  { %10591 = vmatpush1.bf16.msra.mxu1 %v19059_v1  ;;  %10497 = vmatprep.subr.bf16.mxu0 %v19060_v2  ;;  %v19070_v1 = vld [vmem:[#allocation173_spill] sm:$0xff]  ;;  %v19071_v2 = vld [vmem:[#allocation174_spill] sm:$0xff] }
 0x4a7   :  { %10593 = vmatprep.subr.bf16.mxu1 %v19061_v35  ;;  %v19072_v35 = vld [vmem:[#allocation175_spill] sm:$0xff] }
 0x4a9   :  { %10499 = vmatpush1.bf16.msra.mxu0 %v19062_v34  ;;  %v19073_v34 = vld [vmem:[#allocation176_spill] sm:$0xff] }
 0x4aa   :  { %10595 = vmatpush1.bf16.msra.mxu1 %v19063_v7  ;;  %10501 = vmatprep.subr.bf16.mxu0 %v19064_v16  ;;  %v19087_v16 = vld [vmem:[#allocation190_spill] sm:$0xff]  ;;  %v19088_v7 = vld [vmem:[#allocation191_spill] sm:$0xff] }
 0x4ab   :  { %10597 = vmatprep.subr.bf16.mxu1 %v19065_v37  ;;  %v19074_v37 = vld [vmem:[#allocation177_spill] sm:$0xff] }
 0x4ad   :  { %10503 = vmatpush1.bf16.msra.mxu0 %v19066_v19  ;;  %v19075_v19 = vld [vmem:[#allocation178_spill] sm:$0xff] }
 0x4ae   :  { %10599 = vmatpush1.bf16.msra.mxu1 %v19067_v57  ;;  %10505 = vmatprep.subr.bf16.mxu0 %v19068_v44  ;;  %v19076_v57 = vld [vmem:[#allocation179_spill] sm:$0xff]  ;;  %v19077_v44 = vld [vmem:[#allocation180_spill] sm:$0xff] }
 0x4af   :  { %10601 = vmatprep.subr.bf16.mxu1 %v19069_v51  ;;  %v19082_v51 = vld [vmem:[#allocation185_spill] sm:$0xff] }
 0x4b1   :  { %10507 = vmatpush1.bf16.msra.mxu0 %v19070_v1  ;;  %v19081_v1 = vld [vmem:[#allocation184_spill] sm:$0xff] }
 0x4b2   :  { %10603 = vmatpush1.bf16.msra.mxu1 %v19071_v2  ;;  %10509 = vmatprep.subr.bf16.mxu0 %v19072_v35  ;;  %v19078_v2 = vld [vmem:[#allocation181_spill] sm:$0xff]  ;;  %v19079_v35 = vld [vmem:[#allocation182_spill] sm:$0xff] }
 0x4b3   :  { %10605 = vmatprep.subr.bf16.mxu1 %v19073_v34  ;;  %v19080_v34 = vld [vmem:[#allocation183_spill] sm:$0xff] }
 0x4b4   :  { %2973 = vmatmul.mubr.f32.vlgmr.msra.gmra.mrb[14].mxu0 %v15570_v20 }
 0x4b5   :  { %3115 = vmatmul.mubr.f32.vlgmr.msra.gmra.mrb[14].mxu1 %v15570_v20  ;;  %10511 = vmatpush1.bf16.msra.mxu0 %v19074_v37  ;;  %v19083_v37 = vld [vmem:[#allocation186_spill] sm:$0xff] }
 0x4b6   :  { %10607 = vmatpush1.bf16.msra.mxu1 %v19075_v19  ;;  %10513 = vmatprep.subr.bf16.mxu0 %v19076_v57  ;;  %v19084_v19 = vld [vmem:[#allocation187_spill] sm:$0xff]  ;;  %v19085_v57 = vld [vmem:[#allocation188_spill] sm:$0xff] }
 0x4b7   :  { %10609 = vmatprep.subr.bf16.mxu1 %v19077_v44  ;;  %3043 = vmatprep.mubr.f32.mxu0 %v18494_v56  ;;  %v19086_v44 = vld [vmem:[#allocation189_spill] sm:$0xff] }
 0x4b8   :  { %3185 = vmatprep.mubr.f32.mxu1 %v18494_v56 }
 0x4b9   :  { %10515 = vmatpush1.bf16.msra.mxu0 %v19078_v2  ;;  %v19089_v2 = vld [vmem:[#allocation192_spill] sm:$0xff] }
 0x4ba   :  { %10611 = vmatpush1.bf16.msra.mxu1 %v19079_v35  ;;  %10517 = vmatprep.subr.bf16.mxu0 %v19080_v34  ;;  %v19090_v35 = vld [vmem:[#allocation193_spill] sm:$0xff]  ;;  %v19091_v34 = vld [vmem:[#allocation194_spill] sm:$0xff] }
 0x4bb   :  { %10613 = vmatprep.subr.bf16.mxu1 %v19081_v1  ;;  %v19092_v1 = vld [vmem:[#allocation195_spill] sm:$0xff] }
 0x4bd   :  { %10519 = vmatpush1.bf16.msra.mxu0 %v19082_v51  ;;  %v19093_v51 = vld [vmem:[#allocation196_spill] sm:$0xff] }
 0x4be   :  { %10615 = vmatpush1.bf16.msra.mxu1 %v19083_v37  ;;  %10521 = vmatprep.subr.bf16.mxu0 %v19084_v19  ;;  %v19094_v37 = vld [vmem:[#allocation197_spill] sm:$0xff] }
 0x4bf   :  { %10617 = vmatprep.subr.bf16.mxu1 %v19085_v57  ;;  %v19095_v57 = vld [vmem:[#allocation199_spill] sm:$0xff] }
 0x4c1   :  { %10523 = vmatpush1.bf16.msra.mxu0 %v19086_v44  ;;  %v19096_v44 = vld [vmem:[#allocation200_spill] sm:$0xff] }
 0x4c2   :  { %10619 = vmatpush1.bf16.msra.mxu1 %v19087_v16  ;;  %10525 = vmatprep.subr.bf16.mxu0 %v19088_v7  ;;  %v19097_v16 = vld [vmem:[#allocation201_spill] sm:$0xff]  ;;  %v19098_v7 = vld [vmem:[#allocation202_spill] sm:$0xff] }
 0x4c3   :  { %10621 = vmatprep.subr.bf16.mxu1 %v19089_v2  ;;  %v19099_v2 = vld [vmem:[#allocation203_spill] sm:$0xff] }
 0x4c5   :  { %10527 = vmatpush1.bf16.msra.mxu0 %v19090_v35  ;;  %v19100_v35 = vld [vmem:[#allocation204_spill] sm:$0xff] }
 0x4c6   :  { %10623 = vmatpush1.bf16.msra.mxu1 %v19091_v34  ;;  %10529 = vmatprep.subr.bf16.mxu0 %v19092_v1  ;;  %v19101_v34 = vld [vmem:[#allocation205_spill] sm:$0xff]  ;;  %v19102_v1 = vld [vmem:[#allocation206_spill] sm:$0xff] }
 0x4c7   :  { %10625 = vmatprep.subr.bf16.mxu1 %v19093_v51  ;;  %v19103_v51 = vld [vmem:[#allocation207_spill] sm:$0xff] }
 0x4c9   :  { %10531 = vmatpush1.bf16.msra.mxu0 %v19094_v37  ;;  %v19104_v37 = vld [vmem:[#allocation208_spill] sm:$0xff] }
 0x4ca   :  { %10627 = vmatpush1.bf16.msra.mxu1 %v18854_v54  ;;  %10533 = vmatprep.subr.bf16.mxu0 %v19095_v57  ;;  %v19115_v57 = vld [vmem:[#allocation219_spill] sm:$0xff] }
 0x4cb   :  { %10629 = vmatprep.subr.bf16.mxu1 %v19096_v44  ;;  %v19105_v44 = vld [vmem:[#allocation209_spill] sm:$0xff] }
 0x4cd   :  { %10535 = vmatpush1.bf16.msra.mxu0 %v19097_v16  ;;  %v19113_v16 = vld [vmem:[#allocation217_spill] sm:$0xff] }
 0x4ce   :  { %10631 = vmatpush1.bf16.msra.mxu1 %v19098_v7  ;;  %10537 = vmatprep.subr.bf16.mxu0 %v19099_v2  ;;  %v19106_v7 = vld [vmem:[#allocation210_spill] sm:$0xff]  ;;  %v19112_v2 = vld [vmem:[#allocation216_spill] sm:$0xff] }
 0x4cf   :  { %10633 = vmatprep.subr.bf16.mxu1 %v19100_v35  ;;  %v19107_v35 = vld [vmem:[#allocation211_spill] sm:$0xff] }
 0x4d1   :  { %10539 = vmatpush1.bf16.msra.mxu0 %v19101_v34  ;;  %v19108_v34 = vld [vmem:[#allocation212_spill] sm:$0xff] }
 0x4d2   :  { %10635 = vmatpush1.bf16.msra.mxu1 %v19102_v1  ;;  %10637 = vmatprep.subr.bf16.mxu0 %v19103_v51  ;;  %v19109_v1 = vld [vmem:[#allocation213_spill] sm:$0xff]  ;;  %v19110_v51 = vld [vmem:[#allocation214_spill] sm:$0xff] }
 0x4d3   :  { %10733 = vmatprep.subr.bf16.mxu1 %v19104_v37  ;;  %v19111_v37 = vld [vmem:[#allocation215_spill] sm:$0xff] }
 0x4d4   :  { %3044 = vmatmul.mubr.f32.vlgmr.msra.gmra.mrb[14].mxu0 %v15613_v53 }
 0x4d5   :  { %3186 = vmatmul.mubr.f32.vlgmr.msra.gmra.mrb[14].mxu1 %v15613_v53  ;;  %10639 = vmatpush1.bf16.msra.mxu0 %v19105_v44  ;;  %v19114_v44 = vld [vmem:[#allocation218_spill] sm:$0xff] }
 0x4d6   :  { %3256 = vmatprep.mubr.f32.mxu0 %v15574_v25  ;;  %10735 = vmatpush1.bf16.msra.mxu1 %v19106_v7  ;;  %v19116_v7 = vld [vmem:[#allocation220_spill] sm:$0xff] }
 0x4d7   :  { %3398 = vmatprep.mubr.f32.mxu1 %v15574_v25  ;;  %10641 = vmatprep.subr.bf16.mxu0 %v19107_v35  ;;  %v19117_v25 = vld [vmem:[#allocation221_spill] sm:$0xff]  ;;  %v19118_v35 = vld [vmem:[#allocation222_spill] sm:$0xff] }
 0x4d8   :  { %10737 = vmatprep.subr.bf16.mxu1 %v19108_v34  ;;  %v19119_v34 = vld [vmem:[#allocation223_spill] sm:$0xff] }
 0x4d9   :  { %10643 = vmatpush1.bf16.msra.mxu0 %v19109_v1  ;;  %v19120_v1 = vld [vmem:[#allocation224_spill] sm:$0xff] }
 0x4da   :  { %10739 = vmatpush1.bf16.msra.mxu1 %v19110_v51  ;;  %10645 = vmatprep.subr.bf16.mxu0 %v19111_v37  ;;  %v19121_v51 = vld [vmem:[#allocation225_spill] sm:$0xff]  ;;  %v19122_v37 = vld [vmem:[#allocation226_spill] sm:$0xff] }
 0x4db   :  { %10741 = vmatprep.subr.bf16.mxu1 %v19112_v2  ;;  %v19123_v2 = vld [vmem:[#allocation227_spill] sm:$0xff] }
 0x4dd   :  { %10647 = vmatpush1.bf16.msra.mxu0 %v19113_v16  ;;  %v19124_v16 = vld [vmem:[#allocation228_spill] sm:$0xff] }
 0x4de   :  { %10743 = vmatpush1.bf16.msra.mxu1 %v19114_v44  ;;  %10649 = vmatprep.subr.bf16.mxu0 %v19115_v57  ;;  %v19125_v44 = vld [vmem:[#allocation229_spill] sm:$0xff]  ;;  %v19126_v57 = vld [vmem:[#allocation230_spill] sm:$0xff] }
 0x4df   :  { %10745 = vmatprep.subr.bf16.mxu1 %v19116_v7  ;;  %v19127_v7 = vld [vmem:[#allocation231_spill] sm:$0xff] }
 0x4e1   :  { %10651 = vmatpush1.bf16.msra.mxu0 %v19117_v25  ;;  %v19128_v25 = vld [vmem:[#allocation232_spill] sm:$0xff] }
 0x4e2   :  { %10747 = vmatpush1.bf16.msra.mxu1 %v19118_v35  ;;  %10653 = vmatprep.subr.bf16.mxu0 %v19119_v34  ;;  %v19129_v35 = vld [vmem:[#allocation233_spill] sm:$0xff]  ;;  %v19130_v34 = vld [vmem:[#allocation234_spill] sm:$0xff] }
 0x4e3   :  { %10749 = vmatprep.subr.bf16.mxu1 %v19120_v1  ;;  %v19131_v1 = vld [vmem:[#allocation235_spill] sm:$0xff] }
 0x4e5   :  { %10655 = vmatpush1.bf16.msra.mxu0 %v19121_v51  ;;  %v19132_v51 = vld [vmem:[#allocation236_spill] sm:$0xff] }
 0x4e6   :  { %10751 = vmatpush1.bf16.msra.mxu1 %v19122_v37  ;;  %10657 = vmatprep.subr.bf16.mxu0 %v19123_v2  ;;  %v19133_v37 = vld [vmem:[#allocation237_spill] sm:$0xff]  ;;  %v19134_v2 = vld [vmem:[#allocation238_spill] sm:$0xff] }
 0x4e7   :  { %10753 = vmatprep.subr.bf16.mxu1 %v19124_v16  ;;  %v19135_v16 = vld [vmem:[#allocation239_spill] sm:$0xff] }
 0x4e9   :  { %10659 = vmatpush1.bf16.msra.mxu0 %v19125_v44  ;;  %v19136_v44 = vld [vmem:[#allocation240_spill] sm:$0xff] }
 0x4ea   :  { %10755 = vmatpush1.bf16.msra.mxu1 %v19126_v57  ;;  %10661 = vmatprep.subr.bf16.mxu0 %v19127_v7  ;;  %v19137_v57 = vld [vmem:[#allocation241_spill] sm:$0xff]  ;;  %v19138_v7 = vld [vmem:[#allocation242_spill] sm:$0xff] }
 0x4eb   :  { %10757 = vmatprep.subr.bf16.mxu1 %v19128_v25  ;;  %v19139_v25 = vld [vmem:[#allocation243_spill] sm:$0xff] }
 0x4ed   :  { %10663 = vmatpush1.bf16.msra.mxu0 %v19129_v35  ;;  %v19140_v35 = vld [vmem:[#allocation244_spill] sm:$0xff] }
 0x4ee   :  { %10759 = vmatpush1.bf16.msra.mxu1 %v19130_v34  ;;  %10665 = vmatprep.subr.bf16.mxu0 %v19131_v1  ;;  %v19141_v34 = vld [vmem:[#allocation245_spill] sm:$0xff]  ;;  %v19142_v1 = vld [vmem:[#allocation246_spill] sm:$0xff] }
 0x4ef   :  { %10761 = vmatprep.subr.bf16.mxu1 %v19132_v51  ;;  %v19143_v51 = vld [vmem:[#allocation247_spill] sm:$0xff] }
 0x4f1   :  { %10667 = vmatpush1.bf16.msra.mxu0 %v19133_v37  ;;  %v19144_v37 = vld [vmem:[#allocation248_spill] sm:$0xff] }
 0x4f2   :  { %10763 = vmatpush1.bf16.msra.mxu1 %v19134_v2  ;;  %10669 = vmatprep.subr.bf16.mxu0 %v19135_v16  ;;  %v19145_v2 = vld [vmem:[#allocation249_spill] sm:$0xff]  ;;  %v19146_v16 = vld [vmem:[#allocation250_spill] sm:$0xff] }
 0x4f3   :  { %10765 = vmatprep.subr.bf16.mxu1 %v19136_v44  ;;  %v19147_v44 = vld [vmem:[#allocation251_spill] sm:$0xff] }
 0x4f5   :  { %10671 = vmatpush1.bf16.msra.mxu0 %v19137_v57  ;;  %v19148_v57 = vld [vmem:[#allocation252_spill] sm:$0xff] }
 0x4f6   :  { %10767 = vmatpush1.bf16.msra.mxu1 %v19138_v7  ;;  %10673 = vmatprep.subr.bf16.mxu0 %v19139_v25  ;;  %v19149_v7 = vld [vmem:[#allocation253_spill] sm:$0xff]  ;;  %v19150_v25 = vld [vmem:[#allocation254_spill] sm:$0xff] }
 0x4f7   :  { %10769 = vmatprep.subr.bf16.mxu1 %v19140_v35  ;;  %v19151_v35 = vld [vmem:[#allocation255_spill] sm:$0xff] }
 0x4f9   :  { %10675 = vmatpush1.bf16.msra.mxu0 %v19141_v34  ;;  %v19152_v34 = vld [vmem:[#allocation256_spill] sm:$0xff] }
 0x4fa   :  { %10771 = vmatpush1.bf16.msra.mxu1 %v19142_v1  ;;  %10677 = vmatprep.subr.bf16.mxu0 %v19143_v51  ;;  %v19153_v1 = vld [vmem:[#allocation257_spill] sm:$0xff]  ;;  %v19154_v51 = vld [vmem:[#allocation258_spill] sm:$0xff] }
 0x4fb   :  { %10773 = vmatprep.subr.bf16.mxu1 %v19144_v37  ;;  %v19155_v37 = vld [vmem:[#allocation259_spill] sm:$0xff] }
 0x4fd   :  { %10679 = vmatpush1.bf16.msra.mxu0 %v19145_v2  ;;  %v19156_v2 = vld [vmem:[#allocation260_spill] sm:$0xff] }
 0x4fe   :  { %10775 = vmatpush1.bf16.msra.mxu1 %v19146_v16  ;;  %10681 = vmatprep.subr.bf16.mxu0 %v19147_v44  ;;  %v19157_v16 = vld [vmem:[#allocation261_spill] sm:$0xff] }
 0x4ff   :  { %10777 = vmatprep.subr.bf16.mxu1 %v19148_v57  ;;  %v19158_v57 = vld [vmem:[#allocation263_spill] sm:$0xff] }
 0x501   :  { %10683 = vmatpush1.bf16.msra.mxu0 %v19149_v7  ;;  %v19159_v7 = vld [vmem:[#allocation264_spill] sm:$0xff] }
 0x502   :  { %10779 = vmatpush1.bf16.msra.mxu1 %v19150_v25  ;;  %10685 = vmatprep.subr.bf16.mxu0 %v19151_v35  ;;  %v19160_v25 = vld [vmem:[#allocation265_spill] sm:$0xff]  ;;  %v19161_v35 = vld [vmem:[#allocation266_spill] sm:$0xff] }
 0x503   :  { %10781 = vmatprep.subr.bf16.mxu1 %v19152_v34  ;;  %v19162_v34 = vld [vmem:[#allocation267_spill] sm:$0xff] }
 0x505   :  { %10687 = vmatpush1.bf16.msra.mxu0 %v19153_v1  ;;  %v19163_v1 = vld [vmem:[#allocation268_spill] sm:$0xff] }
 0x506   :  { %10783 = vmatpush1.bf16.msra.mxu1 %v19154_v51  ;;  %10689 = vmatprep.subr.bf16.mxu0 %v19155_v37  ;;  %v19164_v51 = vld [vmem:[#allocation269_spill] sm:$0xff]  ;;  %v19165_v37 = vld [vmem:[#allocation270_spill] sm:$0xff] }
 0x507   :  { %10785 = vmatprep.subr.bf16.mxu1 %v19156_v2  ;;  %v19166_v2 = vld [vmem:[#allocation271_spill] sm:$0xff] }
 0x509   :  { %10691 = vmatpush1.bf16.msra.mxu0 %v19157_v16  ;;  %v19167_v16 = vld [vmem:[#allocation272_spill] sm:$0xff] }
 0x50a   :  { %10787 = vmatpush1.bf16.msra.mxu1 %v18918_v11  ;;  %10693 = vmatprep.subr.bf16.mxu0 %v19158_v57 }
 0x50b   :  { %10789 = vmatprep.subr.bf16.mxu1 %v19159_v7  ;;  %v19168_v7 = vld [vmem:[#allocation273_spill] sm:$0xff] }
 0x50d   :  { %10695 = vmatpush1.bf16.msra.mxu0 %v19160_v25  ;;  %v19169_v25 = vld [vmem:[#allocation274_spill] sm:$0xff] }
 0x50e   :  { %10791 = vmatpush1.bf16.msra.mxu1 %v19161_v35  ;;  %10697 = vmatprep.subr.bf16.mxu0 %v19162_v34  ;;  %v19170_v35 = vld [vmem:[#allocation275_spill] sm:$0xff]  ;;  %v19171_v34 = vld [vmem:[#allocation276_spill] sm:$0xff] }
 0x50f   :  { %10793 = vmatprep.subr.bf16.mxu1 %v19163_v1 }
 0x511   :  { %10699 = vmatpush1.bf16.msra.mxu0 %v19164_v51 }
 0x512   :  { %10795 = vmatpush1.bf16.msra.mxu1 %v19165_v37  ;;  %10701 = vmatprep.subr.bf16.mxu0 %v19166_v2  ;;  %v19172_v37 = vld [vmem:[#allocation277_spill] sm:$0xff]  ;;  %v19173_v2 = vld [vmem:[#allocation278_spill] sm:$0xff] }
 0x513   :  { %10797 = vmatprep.subr.bf16.mxu1 %v19167_v16  ;;  %v19174_v16 = vld [vmem:[#allocation279_spill] sm:$0xff] }
 0x514   :  { %3257 = vmatmul.mubr.f32.vlgmr.msra.gmra.mrb[16].mxu0 %v15570_v20 }
 0x515   :  { %3399 = vmatmul.mubr.f32.vlgmr.msra.gmra.mrb[16].mxu1 %v15570_v20  ;;  %10703 = vmatpush1.bf16.msra.mxu0 %v19168_v7  ;;  %v19175_v20 = vld [vmem:[#allocation281_spill] sm:$0xff] }
 0x516   :  { %10799 = vmatpush1.bf16.msra.mxu1 %v19169_v25  ;;  %10705 = vmatprep.subr.bf16.mxu0 %v19170_v35 }
 0x517   :  { %10801 = vmatprep.subr.bf16.mxu1 %v19171_v34  ;;  %3327 = vmatprep.mubr.f32.mxu0 %v18494_v56 }
 0x518   :  { %3469 = vmatprep.mubr.f32.mxu1 %v18494_v56 }
 0x519   :  { %10707 = vmatpush1.bf16.msra.mxu0 %v19172_v37 }
 0x51a   :  { %10803 = vmatpush1.bf16.msra.mxu1 %v19173_v2  ;;  %10709 = vmatprep.subr.bf16.mxu0 %v19174_v16 }
 0x51b   :  { %10805 = vmatprep.subr.bf16.mxu1 %v18936_v55 }
 0x51d   :  { %10711 = vmatpush1.bf16.msra.mxu0 %v19175_v20 }
 0x51e   :  { %10807 = vmatpush1.bf16.msra.mxu1 %v18938_v59  ;;  %10713 = vmatprep.subr.bf16.mxu0 %v18939_v47 }
 0x51f   :  { %10809 = vmatprep.subr.bf16.mxu1 %v18940_v60 }
 0x521   :  { %10715 = vmatpush1.bf16.msra.mxu0 %v18941_v41 }
 0x522   :  { %10811 = vmatpush1.bf16.msra.mxu1 %v18942_v28  ;;  %10717 = vmatprep.subr.bf16.mxu0 %v18943_v0 }
 0x523   :  { %10813 = vmatprep.subr.bf16.mxu1 %v18944_v12 }
 0x525   :  { %10719 = vmatpush1.bf16.msra.mxu0 %v18945_v24 }
 0x526   :  { %10815 = vmatpush1.bf16.msra.mxu1 %v18946_v49  ;;  %10721 = vmatprep.subr.bf16.mxu0 %v15097_v21 }
 0x527   :  { %10817 = vmatprep.subr.bf16.mxu1 %v18947_v58 }
 0x529   :  { %10723 = vmatpush1.bf16.msra.mxu0 %v15103_v61 }
 0x52a   :  { %10819 = vmatpush1.bf16.msra.mxu1 %v15107_v15  ;;  %10725 = vmatprep.subr.bf16.mxu0 %v15109_v45 }
 0x52b   :  { %10821 = vmatprep.subr.bf16.mxu1 %v15112_v5 }
 0x52d   :  { %10727 = vmatpush1.bf16.msra.mxu0 %v15115_v42 }
 0x52e   :  { %10823 = vmatpush1.bf16.msra.mxu1 %v15119_v29  ;;  %10729 = vmatprep.subr.bf16.mxu0 %v15121_v3  ;;  %v19193_v3 = vld [vmem:[#allocation43_spill] sm:$0xff] }
 0x52f   :  { %10825 = vmatprep.subr.bf16.mxu1 %v15124_v6  ;;  %v19191_v6 = vld [vmem:[#allocation41_spill] sm:$0xff] }
 0x531   :  { %10731 = vmatpush1.bf16.msra.mxu0 %v15127_v48  ;;  %v19187_v48 = vld [vmem:[#allocation37_spill] sm:$0xff] }
 0x532   :  { %10827 = vmatpush1.bf16.msra.mxu1 %v15131_v14  ;;  %10829 = vmatprep.subr.bf16.mxu0 %v14252_v4  ;;  %v19177_v4 = vld [vmem:[#allocation26_spill] sm:$0xff] }
 0x533   :  { %10925 = vmatprep.subr.bf16.mxu1 %v14254_v8  ;;  %v19176_v8 = vld [vmem:[#allocation25_spill] sm:$0xff] }
 0x534   :  { %3328 = vmatmul.mubr.f32.vlgmr.msra.gmra.mrb[16].mxu0 %v15613_v53 }
 0x535   :  { %3470 = vmatmul.mubr.f32.vlgmr.msra.gmra.mrb[16].mxu1 %v15613_v53  ;;  %10831 = vmatpush1.bf16.msra.mxu0 %v14256_v9  ;;  %v19178_v53 = vld [vmem:[#allocation27_spill] sm:$0xff]  ;;  %v19179_v9 = vld [vmem:[#allocation28_spill] sm:$0xff] }
 0x536   :  { %10927 = vmatpush1.bf16.msra.mxu1 %v14259_v13  ;;  %10833 = vmatprep.subr.bf16.mxu0 %v14263_v17  ;;  %v19180_v13 = vld [vmem:[#allocation29_spill] sm:$0xff]  ;;  %v19186_v17 = vld [vmem:[#allocation36_spill] sm:$0xff] }
 0x537   :  { %10929 = vmatprep.subr.bf16.mxu1 %v14265_v18  ;;  %v19181_v18 = vld [vmem:[#allocation31_spill] sm:$0xff] }
 0x539   :  { %10835 = vmatpush1.bf16.msra.mxu0 %v14268_v22  ;;  %v19182_v22 = vld [vmem:[#allocation32_spill] sm:$0xff] }
 0x53a   :  { %10931 = vmatpush1.bf16.msra.mxu1 %v14272_v26  ;;  %10837 = vmatprep.subr.bf16.mxu0 %v14274_v27  ;;  %v19183_v26 = vld [vmem:[#allocation33_spill] sm:$0xff]  ;;  %v19184_v27 = vld [vmem:[#allocation34_spill] sm:$0xff] }
 0x53b   :  { %10933 = vmatprep.subr.bf16.mxu1 %v14276_v31  ;;  %v19185_v31 = vld [vmem:[#allocation35_spill] sm:$0xff] }
 0x53d   :  { %10839 = vmatpush1.bf16.msra.mxu0 %v19176_v8 }
 0x53e   :  { %10935 = vmatpush1.bf16.msra.mxu1 %v19177_v4  ;;  %10841 = vmatprep.subr.bf16.mxu0 %v19178_v53 }
 0x53f   :  { %10937 = vmatprep.subr.bf16.mxu1 %v19179_v9 }
 0x541   :  { %10843 = vmatpush1.bf16.msra.mxu0 %v19180_v13 }
 0x542   :  { %10939 = vmatpush1.bf16.msra.mxu1 %v14295_v52  ;;  %10845 = vmatprep.subr.bf16.mxu0 %v19181_v18  ;;  %v19188_v52 = vld [vmem:[#allocation38_spill] sm:$0xff]  ;;  %v19189_v18 = vld [vmem:[#allocation39_spill] sm:$0xff] }
 0x543   :  { %10941 = vmatprep.subr.bf16.mxu1 %v19182_v22  ;;  %v19190_v22 = vld [vmem:[#allocation40_spill] sm:$0xff] }
 0x545   :  { %10847 = vmatpush1.bf16.msra.mxu0 %v19183_v26 }
 0x546   :  { %10943 = vmatpush1.bf16.msra.mxu1 %v19184_v27  ;;  %10849 = vmatprep.subr.bf16.mxu0 %v19185_v31 }
 0x547   :  { %v2761_v8 = vpop.f32.mrb[12].mxu0  ;;  %v2903_v4 = vpop.f32.mrb[12].mxu1  ;;  %10945 = vmatprep.subr.bf16.mxu1 %v19186_v17  ;;  %v19192_v17 = vld [vmem:[#allocation42_spill] sm:$0xff] }
 0x548   :  { %v2763_v53 = vpop.f32.mrb[13].mxu0  ;;  %v2905_v9 = vpop.f32.mrb[13].mxu1 }
 0x549   :  { %v3488_v14 = vcombine.low %v2761_v8, %v2763_v53  ;;  %v3489_v13 = vcombine.low %v2903_v4, %v2905_v9  ;;  %10851 = vmatpush1.bf16.msra.mxu0 %v19187_v48  ;;  %v19194_v4 = vld [vmem:[#allocation44_spill] sm:$0xff]  ;;  %v19195_v8 = vld [vmem:[#allocation45_spill] sm:$0xff]  ;;  %v19196_v9 = vld [vmem:[#allocation46_spill] sm:$0xff] }
 0x54a   :  { %10947 = vmatpush1.bf16.msra.mxu1 %v19188_v52  ;;  %10853 = vmatprep.subr.bf16.mxu0 %v19189_v18  ;;  %v19197_v53 = vld [vmem:[#allocation47_spill] sm:$0xff] }
 0x54b   :  { %v3496_v26 = vrot.slane %v3488_v14, %v15159_v32  ;;  %v3503_v27 = vrot.slane %v3489_v13, %v15159_v32  ;;  %10949 = vmatprep.subr.bf16.mxu1 %v19190_v22  ;;  %v19198_v14 = vld [vmem:[#allocation48_spill] sm:$0xff]  ;;  %v19199_v13 = vld [vmem:[#allocation49_spill] sm:$0xff]  ;;  %v19200_v22 = vld [vmem:[#allocation50_spill] sm:$0xff] }
 0x54d   :  { %v3504_v31 = vcombine.low %v3496_v26, %v3503_v27  ;;  %10855 = vmatpush1.bf16.msra.mxu0 %v19191_v6  ;;  %v19201_v26 = vld [vmem:[#allocation51_spill] sm:$0xff]  ;;  %v19202_v27 = vld [vmem:[#allocation52_spill] sm:$0xff] }
 0x54e   :  { %10951 = vmatpush1.bf16.msra.mxu1 %v19192_v17  ;;  %10857 = vmatprep.subr.bf16.mxu0 %v19193_v3  ;;  %v19203_v17 = vld [vmem:[#allocation53_spill] sm:$0xff]  ;;  %v19204_v3 = vld [vmem:[#allocation54_spill] sm:$0xff] }
 0x54f   :  { %10953 = vmatprep.subr.bf16.mxu1 %v19194_v4  ;;  %v19205_v4 = vld [vmem:[#allocation55_spill] sm:$0xff] }
 0x551   :  { %10859 = vmatpush1.bf16.msra.mxu0 %v19195_v8  ;;  %v19206_v8 = vld [vmem:[#allocation56_spill] sm:$0xff] }
 0x552   :  { %10955 = vmatpush1.bf16.msra.mxu1 %v19196_v9  ;;  %10861 = vmatprep.subr.bf16.mxu0 %v19197_v53  ;;  %v19207_v9 = vld [vmem:[#allocation57_spill] sm:$0xff]  ;;  %v19208_v53 = vld [vmem:[#allocation58_spill] sm:$0xff] }
 0x553   :  { %10957 = vmatprep.subr.bf16.mxu1 %v19198_v14  ;;  %v19209_v14 = vld [vmem:[#allocation59_spill] sm:$0xff] }
 0x555   :  { %10863 = vmatpush1.bf16.msra.mxu0 %v19199_v13  ;;  %v19210_v13 = vld [vmem:[#allocation60_spill] sm:$0xff] }
 0x556   :  { %10959 = vmatpush1.bf16.msra.mxu1 %v19200_v22  ;;  %10865 = vmatprep.subr.bf16.mxu0 %v19201_v26  ;;  %v19211_v22 = vld [vmem:[#allocation61_spill] sm:$0xff]  ;;  %v19212_v26 = vld [vmem:[#allocation62_spill] sm:$0xff] }
 0x557   :  { %10961 = vmatprep.subr.bf16.mxu1 %v19202_v27  ;;  %v19213_v27 = vld [vmem:[#allocation63_spill] sm:$0xff] }
 0x559   :  { %10867 = vmatpush1.bf16.msra.mxu0 %v19203_v17  ;;  %v19214_v17 = vld [vmem:[#allocation64_spill] sm:$0xff] }
 0x55a   :  { %10963 = vmatpush1.bf16.msra.mxu1 %v19204_v3  ;;  %10869 = vmatprep.subr.bf16.mxu0 %v19205_v4  ;;  %v19215_v3 = vld [vmem:[#allocation65_spill] sm:$0xff]  ;;  %v19216_v4 = vld [vmem:[#allocation66_spill] sm:$0xff] }
 0x55b   :  { %10965 = vmatprep.subr.bf16.mxu1 %v19206_v8  ;;  %v19217_v8 = vld [vmem:[#allocation67_spill] sm:$0xff] }
 0x55d   :  { %10871 = vmatpush1.bf16.msra.mxu0 %v19207_v9  ;;  %v19218_v9 = vld [vmem:[#allocation68_spill] sm:$0xff] }
 0x55e   :  { %10967 = vmatpush1.bf16.msra.mxu1 %v19208_v53  ;;  %10873 = vmatprep.subr.bf16.mxu0 %v19209_v14  ;;  %v19219_v53 = vld [vmem:[#allocation69_spill] sm:$0xff]  ;;  %v19220_v14 = vld [vmem:[#allocation70_spill] sm:$0xff] }
 0x55f   :  { %10969 = vmatprep.subr.bf16.mxu1 %v19210_v13  ;;  %v19221_v13 = vld [vmem:[#allocation71_spill] sm:$0xff] }
 0x561   :  { %10875 = vmatpush1.bf16.msra.mxu0 %v19211_v22  ;;  %v19222_v22 = vld [vmem:[#allocation72_spill] sm:$0xff] }
 0x562   :  { %10971 = vmatpush1.bf16.msra.mxu1 %v19212_v26  ;;  %10877 = vmatprep.subr.bf16.mxu0 %v19213_v27  ;;  %v19223_v26 = vld [vmem:[#allocation73_spill] sm:$0xff]  ;;  %v19224_v27 = vld [vmem:[#allocation74_spill] sm:$0xff] }
 0x563   :  { %10973 = vmatprep.subr.bf16.mxu1 %v19214_v17  ;;  %v19225_v17 = vld [vmem:[#allocation75_spill] sm:$0xff] }
 0x565   :  { %10879 = vmatpush1.bf16.msra.mxu0 %v19215_v3  ;;  %v19226_v3 = vld [vmem:[#allocation76_spill] sm:$0xff] }
 0x566   :  { %10975 = vmatpush1.bf16.msra.mxu1 %v19216_v4  ;;  %10881 = vmatprep.subr.bf16.mxu0 %v19217_v8  ;;  %v19227_v4 = vld [vmem:[#allocation77_spill] sm:$0xff]  ;;  %v19228_v8 = vld [vmem:[#allocation78_spill] sm:$0xff] }
 0x567   :  { %10977 = vmatprep.subr.bf16.mxu1 %v19218_v9  ;;  %v19229_v9 = vld [vmem:[#allocation79_spill] sm:$0xff] }
 0x569   :  { %10883 = vmatpush1.bf16.msra.mxu0 %v19219_v53  ;;  %v19230_v53 = vld [vmem:[#allocation80_spill] sm:$0xff] }
 0x56a   :  { %10979 = vmatpush1.bf16.msra.mxu1 %v19220_v14  ;;  %10885 = vmatprep.subr.bf16.mxu0 %v19221_v13 }
 0x56b   :  { %10981 = vmatprep.subr.bf16.mxu1 %v19222_v22 }
 0x56d   :  { %10887 = vmatpush1.bf16.msra.mxu0 %v19223_v26 }
 0x56e   :  { %10983 = vmatpush1.bf16.msra.mxu1 %v19224_v27  ;;  %10889 = vmatprep.subr.bf16.mxu0 %v19225_v17  ;;  %v8924_v17 = vld [vmem:[%s17789_s0 + $0x30] sm:$0xff] }
 0x56f   :  { %10985 = vmatprep.subr.bf16.mxu1 %v19226_v3 }
 0x571   :  { %10891 = vmatpush1.bf16.msra.mxu0 %v19227_v4 }
 0x572   :  { %10987 = vmatpush1.bf16.msra.mxu1 %v19228_v8  ;;  %10893 = vmatprep.subr.bf16.mxu0 %v19229_v9  ;;  %v8925_v9 = vld [vmem:[%s17789_s0 + $0x38] sm:$0xff]  ;;  %v3542_v8 = vadd.f32 %v8924_v17, %v3504_v31 }
 0x573   :  { %10989 = vmatprep.subr.bf16.mxu1 %v19230_v53 }
 0x574   :  { %v3553_v52 = vrot.slane %v3542_v8, 6 }
 0x5a7   :  { %v3045_v14 = vpop.f32.mrb[14].mxu0 }
 0x5a8   :  { %v3187_v13 = vpop.f32.mrb[14].mxu1  ;;  %v3047_v6 = vpop.f32.mrb[15].mxu0 }
 0x5a9   :  { %v3505_v22 = vcombine.low %v3045_v14, %v3047_v6  ;;  %v3189_v18 = vpop.f32.mrb[15].mxu1  ;;  %v8927_v14 = vmul.f32 -1.442695, %v3542_v8 }
 0x5aa   :  { %v3506_v26 = vcombine.low %v3187_v13, %v3189_v18 }
 0x5ab   :  { %v3513_v3 = vrot.slane %v3505_v22, %v15159_v32 }
 0x5ac   :  { %v3520_v4 = vrot.slane %v3506_v26, %v15159_v32 }
 0x5ae   :  { %v3521_v53 = vcombine.low %v3513_v3, %v3520_v4 }
 0x5b0   :  { %v3543_v27 = vadd.f32 %v8925_v9, %v3521_v53 }
 0x5b2   :  { %v3554_v48 = vrot.slane %v3543_v27, 6  ;;  %v3564_v9 = vrot.slane %v3543_v27, 4 }
 0x5b4   :  { %v3555_v6 = vsel %vm1589_vm0, %v3553_v52, %v3554_v48  ;;  %v8926_v52 = vld [vmem:[%s17789_s0 + $0x40] sm:$0xff] }
 0x5b5   :  { %v8928_v18 = vmul.f32 -1.442695, %v3555_v6 }
 0x5b7   :  { %13921 = vpow2.f32 %v8928_v18 }
 0x5b8   :  { %13923 = vpow2.f32 %v8927_v14 }
 0x5c1   :  { %v13922_v15 = vpop.eup %13921 }
 0x5c2   :  { %v13924_v31 = vpop.eup %13923  ;;  %v3560_v48 = vadd.f32 1.0, %v13922_v15 }
 0x5c3   :  { %v3548_v4 = vadd.f32 1.0, %v13924_v31 }
 0x5c4   :  { %13925 = vrcp.f32 %v3560_v48  ;;  %v19232_v48 = vld [vmem:[#allocation94_spill] sm:$0xff] }
 0x5c5   :  { %13927 = vrcp.f32 %v3548_v4  ;;  %v19233_v4 = vld [vmem:[#allocation95_spill] sm:$0xff] }
 0x607   :  { %v3329_v13 = vpop.f32.mrb[16].mxu0 }
 0x608   :  { %v3471_v29 = vpop.f32.mrb[16].mxu1  ;;  %v3331_v22 = vpop.f32.mrb[17].mxu0 }
 0x609   :  { %v3522_v42 = vcombine.low %v3329_v13, %v3331_v22  ;;  %v3473_v26 = vpop.f32.mrb[17].mxu1 }
 0x60a   :  { %v3523_v5 = vcombine.low %v3471_v29, %v3473_v26 }
 0x60b   :  { %v3530_v45 = vrot.slane %v3522_v42, %v15159_v32 }
 0x60c   :  { %v3537_v17 = vrot.slane %v3523_v5, %v15159_v32  ;;  %v13926_v5 = vpop.eup %13925 }
 0x60d   :  { %v13928_v18 = vpop.eup %13927  ;;  %v3577_v22 = vmul.f32 %v13926_v5, %v15566_v63  ;;  %v19231_v63 = vld [vmem:[#allocation93_spill] sm:$0xff]  ;;  %v19240_v5 = vld [vmem:[#allocation102_spill] sm:$0xff] }
 0x60e   :  { %v3538_v3 = vcombine.low %v3530_v45, %v3537_v17 }
 0x610   :  { %v3544_v8 = vadd.f32 %v8926_v52, %v3538_v3 }
 0x612   :  { %v3565_v53 = vrot.slane %v3544_v8, 4  ;;  %v3569_v6 = vrot.slane %v3544_v8, 2  ;;  %v19234_v8 = vld [vmem:[#allocation96_spill] sm:$0xff] }
 0x614   :  { %v3566_v29 = vsel %vm1601_vm1, %v3564_v9, %v3565_v53  ;;  %v8929_v42 = vmul.f32 -1.442695, %v3569_v6  ;;  %v19235_v9 = vld [vmem:[#allocation97_spill] sm:$0xff]  ;;  %v19236_v53 = vld [vmem:[#allocation98_spill] sm:$0xff]  ;;  %v19237_v6 = vld [vmem:[#allocation99_spill] sm:$0xff] }
 0x615   :  { %13929 = vtanh.f32 %v3566_v29  ;;  %v19238_v29 = vld [vmem:[#allocation100_spill] sm:$0xff] }
 0x616   :  { %13931 = vpow2.f32 %v8929_v42  ;;  %v19239_v42 = vld [vmem:[#allocation101_spill] sm:$0xff] }
 0x61f   :  { %v13930_v14 = vpop.eup %13929 }
 0x620   :  { %v13932_v13 = vpop.eup %13931  ;;  %v3578_v45 = vmul.f32 %v13930_v14, %v13928_v18  ;;  %v19241_v18 = vld [vmem:[#allocation103_spill] sm:$0xff]  ;;  %v19242_v14 = vld [vmem:[#allocation104_spill] sm:$0xff] }
 0x621   :  { %v3574_v15 = vadd.f32 1.0, %v13932_v13  ;;  %v19243_v13 = vld [vmem:[#allocation105_spill] sm:$0xff] }
 0x622   :  { %v15909_v26 = vadd.f32 %v3578_v45, %v3577_v22  ;;  %v19244_v22 = vld [vmem:[#allocation106_spill] sm:$0xff]  ;;  %v19245_v45 = vld [vmem:[#allocation107_spill] sm:$0xff] }
 0x623   :  { %13933 = vrcp.f32 %v3574_v15  ;;  %v19246_v15 = vld [vmem:[#allocation108_spill] sm:$0xff] }
 0x624   :  { %13935 = vtanh.f32 %v15909_v26 }
 0x62d   :  { %v13934_v27 = vpop.eup %13933 }
 0x62e   :  { %v13936_v17 = vpop.eup %13935 }
 0x62f   :  { %v3581_v31 = vmul.f32 %v13936_v17, %v13934_v27  ;;  %v19247_v17 = vld [vmem:[#allocation109_spill] sm:$0xff] }
 0x631   :  { %v15913_v52 = vrot.slane %v3581_v31, %v15159_v32  ;;  %v3587_v27 = vcombine.high %v3581_v31, %v3581_v31  ;;  %v19252_v31 = vld [vmem:[#allocation114_spill] sm:$0xff] }
 0x633   :  { %v15917_v3 = vcombine.high %v15913_v52, %v15913_v52 }
 0x635   :  { %3670 = vmatprep.mubr.f32.mxu0 %v15917_v3  ;;  %3812 = vmatprep.mubr.f32.mxu1 %v15917_v3 }
 0x636   :  { %3671 = vmatmul.mubr.f32.vlgmr.msra.gmra.mrb[18].mxu0 %v15913_v52  ;;  %3813 = vmatmul.mubr.f32.vlgmr.msra.gmra.mrb[18].mxu1 %v15913_v52 }
 0x637   :  { %10895 = vmatpush1.bf16.msra.mxu0 %v18737_v46  ;;  %10991 = vmatpush1.bf16.msra.mxu1 %v18738_v30 }
 0x638   :  { %10897 = vmatprep.subr.bf16.mxu0 %v18739_v33  ;;  %10993 = vmatprep.subr.bf16.mxu1 %v18740_v23 }
 0x639   :  { %3741 = vmatprep.mubr.f32.mxu0 %v18494_v56  ;;  %3883 = vmatprep.mubr.f32.mxu1 %v18494_v56 }
 0x63b   :  { %10899 = vmatpush1.bf16.msra.mxu0 %v18741_v10  ;;  %10995 = vmatpush1.bf16.msra.mxu1 %v18983_v38 }
 0x63c   :  { %10901 = vmatprep.subr.bf16.mxu0 %v18984_v43  ;;  %10997 = vmatprep.subr.bf16.mxu1 %v18985_v50 }
 0x63f   :  { %10903 = vmatpush1.bf16.msra.mxu0 %v18986_v39  ;;  %10999 = vmatpush1.bf16.msra.mxu1 %v18987_v40 }
 0x640   :  { %10905 = vmatprep.subr.bf16.mxu0 %v18988_v62  ;;  %11001 = vmatprep.subr.bf16.mxu1 %v18989_v36 }
 0x643   :  { %10907 = vmatpush1.bf16.msra.mxu0 %v19231_v63  ;;  %11003 = vmatpush1.bf16.msra.mxu1 %v19232_v48 }
 0x644   :  { %10909 = vmatprep.subr.bf16.mxu0 %v19233_v4  ;;  %11005 = vmatprep.subr.bf16.mxu1 %v19234_v8 }
 0x647   :  { %10911 = vmatpush1.bf16.msra.mxu0 %v19235_v9  ;;  %11007 = vmatpush1.bf16.msra.mxu1 %v19236_v53 }
 0x648   :  { %10913 = vmatprep.subr.bf16.mxu0 %v19237_v6  ;;  %11009 = vmatprep.subr.bf16.mxu1 %v19238_v29  ;;  %v19248_v29 = vld [vmem:[#allocation110_spill] sm:$0xff] }
 0x64b   :  { %10915 = vmatpush1.bf16.msra.mxu0 %v19239_v42  ;;  %11011 = vmatpush1.bf16.msra.mxu1 %v19240_v5  ;;  %v15956_v42 = vrot.slane %v3587_v27, %v15159_v32  ;;  %v19249_v5 = vld [vmem:[#allocation111_spill] sm:$0xff]  ;;  %v19254_v27 = vld [vmem:[#allocation116_spill] sm:$0xff] }
 0x64c   :  { %10917 = vmatprep.subr.bf16.mxu0 %v19241_v18  ;;  %11013 = vmatprep.subr.bf16.mxu1 %v19242_v14  ;;  %v19250_v18 = vld [vmem:[#allocation112_spill] sm:$0xff]  ;;  %v19263_v14 = vld [vmem:[#allocation125_spill] sm:$0xff] }
 0x64f   :  { %10919 = vmatpush1.bf16.msra.mxu0 %v19243_v13  ;;  %11015 = vmatpush1.bf16.msra.mxu1 %v19244_v22  ;;  %v19251_v22 = vld [vmem:[#allocation113_spill] sm:$0xff]  ;;  %v19261_v13 = vld [vmem:[#allocation123_spill] sm:$0xff] }
 0x650   :  { %10921 = vmatprep.subr.bf16.mxu0 %v19245_v45  ;;  %11017 = vmatprep.subr.bf16.mxu1 %v19246_v15  ;;  %v19258_v15 = vld [vmem:[#allocation120_spill] sm:$0xff]  ;;  %v19259_v45 = vld [vmem:[#allocation121_spill] sm:$0xff] }
 0x653   :  { %10923 = vmatpush1.bf16.msra.mxu0 %v19247_v17  ;;  %11019 = vmatpush1.bf16.msra.mxu1 %v19248_v29  ;;  %v19253_v29 = vld [vmem:[#allocation115_spill] sm:$0xff]  ;;  %v19255_v17 = vld [vmem:[#allocation117_spill] sm:$0xff] }
 0x654   :  { %11021 = vmatprep.subr.bf16.mxu0 %v19249_v5  ;;  %11117 = vmatprep.subr.bf16.mxu1 %v19250_v18  ;;  %v19256_v5 = vld [vmem:[#allocation118_spill] sm:$0xff]  ;;  %v19257_v18 = vld [vmem:[#allocation119_spill] sm:$0xff] }
 0x656   :  { %3742 = vmatmul.mubr.f32.vlgmr.msra.gmra.mrb[18].mxu0 %v15956_v42  ;;  %3884 = vmatmul.mubr.f32.vlgmr.msra.gmra.mrb[18].mxu1 %v15956_v42 }
 0x657   :  { %11023 = vmatpush1.bf16.msra.mxu0 %v19251_v22  ;;  %3954 = vmatprep.mubr.f32.mxu0 %v15917_v3  ;;  %v19260_v22 = vld [vmem:[#allocation122_spill] sm:$0xff] }
 0x658   :  { %11119 = vmatpush1.bf16.msra.mxu1 %v19252_v31  ;;  %4096 = vmatprep.mubr.f32.mxu1 %v15917_v3  ;;  %v19262_v31 = vld [vmem:[#allocation124_spill] sm:$0xff] }
 0x659   :  { %11025 = vmatprep.subr.bf16.mxu0 %v19253_v29  ;;  %11121 = vmatprep.subr.bf16.mxu1 %v19254_v27  ;;  %v19264_v29 = vld [vmem:[#allocation126_spill] sm:$0xff]  ;;  %v19265_v27 = vld [vmem:[#allocation127_spill] sm:$0xff] }
 0x65b   :  { %11027 = vmatpush1.bf16.msra.mxu0 %v19255_v17  ;;  %v19266_v17 = vld [vmem:[#allocation128_spill] sm:$0xff] }
 0x65c   :  { %11123 = vmatpush1.bf16.msra.mxu1 %v19256_v5  ;;  %11029 = vmatprep.subr.bf16.mxu0 %v19257_v18  ;;  %v19267_v5 = vld [vmem:[#allocation129_spill] sm:$0xff]  ;;  %v19268_v18 = vld [vmem:[#allocation130_spill] sm:$0xff] }
 0x65d   :  { %11125 = vmatprep.subr.bf16.mxu1 %v19258_v15  ;;  %v19269_v15 = vld [vmem:[#allocation131_spill] sm:$0xff] }
 0x65f   :  { %11031 = vmatpush1.bf16.msra.mxu0 %v19259_v45  ;;  %v19270_v45 = vld [vmem:[#allocation132_spill] sm:$0xff] }
 0x660   :  { %11127 = vmatpush1.bf16.msra.mxu1 %v19260_v22  ;;  %11033 = vmatprep.subr.bf16.mxu0 %v19261_v13  ;;  %v19271_v22 = vld [vmem:[#allocation133_spill] sm:$0xff]  ;;  %v19272_v13 = vld [vmem:[#allocation134_spill] sm:$0xff] }
 0x661   :  { %11129 = vmatprep.subr.bf16.mxu1 %v19262_v31  ;;  %v19273_v31 = vld [vmem:[#allocation135_spill] sm:$0xff] }
 0x663   :  { %11035 = vmatpush1.bf16.msra.mxu0 %v19263_v14  ;;  %v19274_v14 = vld [vmem:[#allocation136_spill] sm:$0xff] }
 0x664   :  { %11131 = vmatpush1.bf16.msra.mxu1 %v19264_v29  ;;  %11037 = vmatprep.subr.bf16.mxu0 %v19265_v27  ;;  %v19275_v29 = vld [vmem:[#allocation137_spill] sm:$0xff]  ;;  %v19276_v27 = vld [vmem:[#allocation138_spill] sm:$0xff] }
 0x665   :  { %11133 = vmatprep.subr.bf16.mxu1 %v19266_v17  ;;  %v19277_v17 = vld [vmem:[#allocation139_spill] sm:$0xff] }
 0x667   :  { %11039 = vmatpush1.bf16.msra.mxu0 %v19267_v5  ;;  %v19278_v5 = vld [vmem:[#allocation140_spill] sm:$0xff] }
 0x668   :  { %11135 = vmatpush1.bf16.msra.mxu1 %v19268_v18  ;;  %11041 = vmatprep.subr.bf16.mxu0 %v19269_v15  ;;  %v19279_v18 = vld [vmem:[#allocation141_spill] sm:$0xff]  ;;  %v19280_v15 = vld [vmem:[#allocation142_spill] sm:$0xff] }
 0x669   :  { %11137 = vmatprep.subr.bf16.mxu1 %v19270_v45  ;;  %v19281_v45 = vld [vmem:[#allocation143_spill] sm:$0xff] }
 0x66b   :  { %11043 = vmatpush1.bf16.msra.mxu0 %v19271_v22  ;;  %v19282_v22 = vld [vmem:[#allocation144_spill] sm:$0xff] }
 0x66c   :  { %11139 = vmatpush1.bf16.msra.mxu1 %v19272_v13  ;;  %11045 = vmatprep.subr.bf16.mxu0 %v19273_v31  ;;  %v19283_v13 = vld [vmem:[#allocation145_spill] sm:$0xff]  ;;  %v19284_v31 = vld [vmem:[#allocation146_spill] sm:$0xff] }
 0x66d   :  { %11141 = vmatprep.subr.bf16.mxu1 %v19274_v14  ;;  %v19285_v14 = vld [vmem:[#allocation147_spill] sm:$0xff] }
 0x66f   :  { %11047 = vmatpush1.bf16.msra.mxu0 %v19275_v29  ;;  %v19286_v29 = vld [vmem:[#allocation148_spill] sm:$0xff] }
 0x670   :  { %11143 = vmatpush1.bf16.msra.mxu1 %v19276_v27  ;;  %11049 = vmatprep.subr.bf16.mxu0 %v19277_v17  ;;  %v19287_v27 = vld [vmem:[#allocation149_spill] sm:$0xff]  ;;  %v19288_v17 = vld [vmem:[#allocation150_spill] sm:$0xff] }
 0x671   :  { %11145 = vmatprep.subr.bf16.mxu1 %v19278_v5  ;;  %v19289_v5 = vld [vmem:[#allocation151_spill] sm:$0xff] }
 0x673   :  { %11051 = vmatpush1.bf16.msra.mxu0 %v19279_v18  ;;  %v19290_v18 = vld [vmem:[#allocation152_spill] sm:$0xff] }
 0x674   :  { %11147 = vmatpush1.bf16.msra.mxu1 %v19280_v15  ;;  %11053 = vmatprep.subr.bf16.mxu0 %v19281_v45  ;;  %v19291_v15 = vld [vmem:[#allocation153_spill] sm:$0xff]  ;;  %v19292_v45 = vld [vmem:[#allocation154_spill] sm:$0xff] }
 0x675   :  { %11149 = vmatprep.subr.bf16.mxu1 %v19282_v22  ;;  %v19293_v22 = vld [vmem:[#allocation155_spill] sm:$0xff] }
 0x677   :  { %11055 = vmatpush1.bf16.msra.mxu0 %v19283_v13  ;;  %v19294_v13 = vld [vmem:[#allocation156_spill] sm:$0xff] }
 0x678   :  { %11151 = vmatpush1.bf16.msra.mxu1 %v19284_v31  ;;  %11057 = vmatprep.subr.bf16.mxu0 %v19285_v14  ;;  %v19295_v31 = vld [vmem:[#allocation157_spill] sm:$0xff]  ;;  %v19296_v14 = vld [vmem:[#allocation158_spill] sm:$0xff] }
 0x679   :  { %11153 = vmatprep.subr.bf16.mxu1 %v19286_v29  ;;  %v19297_v29 = vld [vmem:[#allocation159_spill] sm:$0xff] }
 0x67b   :  { %11059 = vmatpush1.bf16.msra.mxu0 %v19287_v27  ;;  %v19298_v27 = vld [vmem:[#allocation160_spill] sm:$0xff] }
 0x67c   :  { %11155 = vmatpush1.bf16.msra.mxu1 %v19288_v17  ;;  %11061 = vmatprep.subr.bf16.mxu0 %v19289_v5  ;;  %v19299_v17 = vld [vmem:[#allocation161_spill] sm:$0xff]  ;;  %v19300_v5 = vld [vmem:[#allocation162_spill] sm:$0xff] }
 0x67d   :  { %11157 = vmatprep.subr.bf16.mxu1 %v19290_v18  ;;  %v19301_v18 = vld [vmem:[#allocation163_spill] sm:$0xff] }
 0x67f   :  { %11063 = vmatpush1.bf16.msra.mxu0 %v19291_v15  ;;  %v19302_v15 = vld [vmem:[#allocation164_spill] sm:$0xff] }
 0x680   :  { %11159 = vmatpush1.bf16.msra.mxu1 %v19292_v45  ;;  %11065 = vmatprep.subr.bf16.mxu0 %v19293_v22  ;;  %v19303_v45 = vld [vmem:[#allocation165_spill] sm:$0xff]  ;;  %v19304_v22 = vld [vmem:[#allocation166_spill] sm:$0xff] }
 0x681   :  { %11161 = vmatprep.subr.bf16.mxu1 %v19294_v13  ;;  %v19305_v13 = vld [vmem:[#allocation167_spill] sm:$0xff] }
 0x683   :  { %11067 = vmatpush1.bf16.msra.mxu0 %v19295_v31  ;;  %v19306_v31 = vld [vmem:[#allocation168_spill] sm:$0xff] }
 0x684   :  { %11163 = vmatpush1.bf16.msra.mxu1 %v19296_v14  ;;  %11069 = vmatprep.subr.bf16.mxu0 %v19297_v29  ;;  %v19307_v14 = vld [vmem:[#allocation169_spill] sm:$0xff]  ;;  %v19308_v29 = vld [vmem:[#allocation170_spill] sm:$0xff] }
 0x685   :  { %11165 = vmatprep.subr.bf16.mxu1 %v19298_v27  ;;  %v19309_v27 = vld [vmem:[#allocation171_spill] sm:$0xff] }
 0x687   :  { %11071 = vmatpush1.bf16.msra.mxu0 %v19299_v17  ;;  %v19310_v17 = vld [vmem:[#allocation172_spill] sm:$0xff] }
 0x688   :  { %11167 = vmatpush1.bf16.msra.mxu1 %v19300_v5  ;;  %11073 = vmatprep.subr.bf16.mxu0 %v19301_v18  ;;  %v19311_v5 = vld [vmem:[#allocation173_spill] sm:$0xff]  ;;  %v19312_v18 = vld [vmem:[#allocation174_spill] sm:$0xff] }
 0x689   :  { %11169 = vmatprep.subr.bf16.mxu1 %v19302_v15  ;;  %v19313_v15 = vld [vmem:[#allocation175_spill] sm:$0xff] }
 0x68b   :  { %11075 = vmatpush1.bf16.msra.mxu0 %v19303_v45  ;;  %v19314_v45 = vld [vmem:[#allocation176_spill] sm:$0xff] }
 0x68c   :  { %11171 = vmatpush1.bf16.msra.mxu1 %v19304_v22  ;;  %11077 = vmatprep.subr.bf16.mxu0 %v19305_v13  ;;  %v19328_v13 = vld [vmem:[#allocation191_spill] sm:$0xff] }
 0x68d   :  { %11173 = vmatprep.subr.bf16.mxu1 %v19306_v31  ;;  %v19315_v31 = vld [vmem:[#allocation177_spill] sm:$0xff] }
 0x68f   :  { %11079 = vmatpush1.bf16.msra.mxu0 %v19307_v14  ;;  %v19316_v14 = vld [vmem:[#allocation178_spill] sm:$0xff] }
 0x690   :  { %11175 = vmatpush1.bf16.msra.mxu1 %v19308_v29  ;;  %11081 = vmatprep.subr.bf16.mxu0 %v19309_v27  ;;  %v19317_v29 = vld [vmem:[#allocation179_spill] sm:$0xff]  ;;  %v19318_v27 = vld [vmem:[#allocation180_spill] sm:$0xff] }
 0x691   :  { %11177 = vmatprep.subr.bf16.mxu1 %v19310_v17  ;;  %v19323_v17 = vld [vmem:[#allocation185_spill] sm:$0xff] }
 0x693   :  { %11083 = vmatpush1.bf16.msra.mxu0 %v19311_v5  ;;  %v19322_v5 = vld [vmem:[#allocation184_spill] sm:$0xff] }
 0x694   :  { %11179 = vmatpush1.bf16.msra.mxu1 %v19312_v18  ;;  %11085 = vmatprep.subr.bf16.mxu0 %v19313_v15  ;;  %v19319_v18 = vld [vmem:[#allocation181_spill] sm:$0xff]  ;;  %v19320_v15 = vld [vmem:[#allocation182_spill] sm:$0xff] }
 0x695   :  { %11181 = vmatprep.subr.bf16.mxu1 %v19314_v45  ;;  %v19321_v45 = vld [vmem:[#allocation183_spill] sm:$0xff] }
 0x696   :  { %3955 = vmatmul.mubr.f32.vlgmr.msra.gmra.mrb[20].mxu0 %v15913_v52 }
 0x697   :  { %4097 = vmatmul.mubr.f32.vlgmr.msra.gmra.mrb[20].mxu1 %v15913_v52  ;;  %11087 = vmatpush1.bf16.msra.mxu0 %v19315_v31  ;;  %v19324_v31 = vld [vmem:[#allocation186_spill] sm:$0xff] }
 0x698   :  { %11183 = vmatpush1.bf16.msra.mxu1 %v19316_v14  ;;  %11089 = vmatprep.subr.bf16.mxu0 %v19317_v29  ;;  %v19325_v29 = vld [vmem:[#allocation188_spill] sm:$0xff]  ;;  %v19327_v14 = vld [vmem:[#allocation190_spill] sm:$0xff] }
 0x699   :  { %11185 = vmatprep.subr.bf16.mxu1 %v19318_v27  ;;  %4025 = vmatprep.mubr.f32.mxu0 %v18494_v56  ;;  %v19326_v27 = vld [vmem:[#allocation189_spill] sm:$0xff] }
 0x69a   :  { %4167 = vmatprep.mubr.f32.mxu1 %v18494_v56 }
 0x69b   :  { %11091 = vmatpush1.bf16.msra.mxu0 %v19319_v18  ;;  %v19329_v18 = vld [vmem:[#allocation192_spill] sm:$0xff] }
 0x69c   :  { %11187 = vmatpush1.bf16.msra.mxu1 %v19320_v15  ;;  %11093 = vmatprep.subr.bf16.mxu0 %v19321_v45  ;;  %v19330_v15 = vld [vmem:[#allocation193_spill] sm:$0xff]  ;;  %v19331_v45 = vld [vmem:[#allocation194_spill] sm:$0xff] }
 0x69d   :  { %11189 = vmatprep.subr.bf16.mxu1 %v19322_v5  ;;  %v19332_v5 = vld [vmem:[#allocation195_spill] sm:$0xff] }
 0x69f   :  { %11095 = vmatpush1.bf16.msra.mxu0 %v19323_v17  ;;  %v19333_v17 = vld [vmem:[#allocation196_spill] sm:$0xff] }
 0x6a0   :  { %11191 = vmatpush1.bf16.msra.mxu1 %v19324_v31  ;;  %11097 = vmatprep.subr.bf16.mxu0 %v19084_v19  ;;  %v19334_v31 = vld [vmem:[#allocation197_spill] sm:$0xff] }
 0x6a1   :  { %11193 = vmatprep.subr.bf16.mxu1 %v19325_v29  ;;  %v19335_v29 = vld [vmem:[#allocation199_spill] sm:$0xff] }
 0x6a3   :  { %11099 = vmatpush1.bf16.msra.mxu0 %v19326_v27  ;;  %v19336_v27 = vld [vmem:[#allocation200_spill] sm:$0xff] }
 0x6a4   :  { %11195 = vmatpush1.bf16.msra.mxu1 %v19327_v14  ;;  %11101 = vmatprep.subr.bf16.mxu0 %v19328_v13  ;;  %v19337_v14 = vld [vmem:[#allocation201_spill] sm:$0xff]  ;;  %v19338_v13 = vld [vmem:[#allocation202_spill] sm:$0xff] }
 0x6a5   :  { %11197 = vmatprep.subr.bf16.mxu1 %v19329_v18  ;;  %v19339_v18 = vld [vmem:[#allocation203_spill] sm:$0xff] }
 0x6a7   :  { %11103 = vmatpush1.bf16.msra.mxu0 %v19330_v15  ;;  %v19340_v15 = vld [vmem:[#allocation204_spill] sm:$0xff] }
 0x6a8   :  { %11199 = vmatpush1.bf16.msra.mxu1 %v19331_v45  ;;  %11105 = vmatprep.subr.bf16.mxu0 %v19332_v5  ;;  %v19341_v45 = vld [vmem:[#allocation205_spill] sm:$0xff]  ;;  %v19342_v5 = vld [vmem:[#allocation206_spill] sm:$0xff] }
 0x6a9   :  { %11201 = vmatprep.subr.bf16.mxu1 %v19333_v17  ;;  %v19343_v17 = vld [vmem:[#allocation207_spill] sm:$0xff] }
 0x6ab   :  { %11107 = vmatpush1.bf16.msra.mxu0 %v19334_v31  ;;  %v19344_v31 = vld [vmem:[#allocation208_spill] sm:$0xff] }
 0x6ac   :  { %11203 = vmatpush1.bf16.msra.mxu1 %v18854_v54  ;;  %11109 = vmatprep.subr.bf16.mxu0 %v19335_v29  ;;  %v19355_v29 = vld [vmem:[#allocation219_spill] sm:$0xff] }
 0x6ad   :  { %11205 = vmatprep.subr.bf16.mxu1 %v19336_v27  ;;  %v19345_v27 = vld [vmem:[#allocation209_spill] sm:$0xff] }
 0x6af   :  { %11111 = vmatpush1.bf16.msra.mxu0 %v19337_v14  ;;  %v19353_v14 = vld [vmem:[#allocation217_spill] sm:$0xff] }
 0x6b0   :  { %11207 = vmatpush1.bf16.msra.mxu1 %v19338_v13  ;;  %11113 = vmatprep.subr.bf16.mxu0 %v19339_v18  ;;  %v19346_v13 = vld [vmem:[#allocation210_spill] sm:$0xff]  ;;  %v19352_v18 = vld [vmem:[#allocation216_spill] sm:$0xff] }
 0x6b1   :  { %11209 = vmatprep.subr.bf16.mxu1 %v19340_v15  ;;  %v19347_v15 = vld [vmem:[#allocation211_spill] sm:$0xff] }
 0x6b3   :  { %11115 = vmatpush1.bf16.msra.mxu0 %v19341_v45  ;;  %v19348_v45 = vld [vmem:[#allocation212_spill] sm:$0xff] }
 0x6b4   :  { %11211 = vmatpush1.bf16.msra.mxu1 %v19342_v5  ;;  %11213 = vmatprep.subr.bf16.mxu0 %v19343_v17  ;;  %v19349_v5 = vld [vmem:[#allocation213_spill] sm:$0xff]  ;;  %v19350_v17 = vld [vmem:[#allocation214_spill] sm:$0xff] }
 0x6b5   :  { %11309 = vmatprep.subr.bf16.mxu1 %v19344_v31  ;;  %v19351_v31 = vld [vmem:[#allocation215_spill] sm:$0xff] }
 0x6b6   :  { %4026 = vmatmul.mubr.f32.vlgmr.msra.gmra.mrb[20].mxu0 %v15956_v42 }
 0x6b7   :  { %4168 = vmatmul.mubr.f32.vlgmr.msra.gmra.mrb[20].mxu1 %v15956_v42  ;;  %11215 = vmatpush1.bf16.msra.mxu0 %v19345_v27  ;;  %v19354_v27 = vld [vmem:[#allocation218_spill] sm:$0xff] }
 0x6b8   :  { %4238 = vmatprep.mubr.f32.mxu0 %v15917_v3  ;;  %11311 = vmatpush1.bf16.msra.mxu1 %v19346_v13  ;;  %v19356_v13 = vld [vmem:[#allocation220_spill] sm:$0xff] }
 0x6b9   :  { %4380 = vmatprep.mubr.f32.mxu1 %v15917_v3  ;;  %11217 = vmatprep.subr.bf16.mxu0 %v19347_v15  ;;  %v19357_v3 = vld [vmem:[#allocation221_spill] sm:$0xff]  ;;  %v19358_v15 = vld [vmem:[#allocation222_spill] sm:$0xff] }
 0x6ba   :  { %11313 = vmatprep.subr.bf16.mxu1 %v19348_v45  ;;  %v19359_v45 = vld [vmem:[#allocation223_spill] sm:$0xff] }
 0x6bb   :  { %11219 = vmatpush1.bf16.msra.mxu0 %v19349_v5  ;;  %v19360_v5 = vld [vmem:[#allocation224_spill] sm:$0xff] }
 0x6bc   :  { %11315 = vmatpush1.bf16.msra.mxu1 %v19350_v17  ;;  %11221 = vmatprep.subr.bf16.mxu0 %v19351_v31  ;;  %v19361_v17 = vld [vmem:[#allocation225_spill] sm:$0xff]  ;;  %v19362_v31 = vld [vmem:[#allocation226_spill] sm:$0xff] }
 0x6bd   :  { %11317 = vmatprep.subr.bf16.mxu1 %v19352_v18  ;;  %v19363_v18 = vld [vmem:[#allocation227_spill] sm:$0xff] }
 0x6bf   :  { %11223 = vmatpush1.bf16.msra.mxu0 %v19353_v14  ;;  %v19364_v14 = vld [vmem:[#allocation228_spill] sm:$0xff] }
 0x6c0   :  { %11319 = vmatpush1.bf16.msra.mxu1 %v19354_v27  ;;  %11225 = vmatprep.subr.bf16.mxu0 %v19355_v29  ;;  %v19365_v27 = vld [vmem:[#allocation229_spill] sm:$0xff]  ;;  %v19366_v29 = vld [vmem:[#allocation230_spill] sm:$0xff] }
 0x6c1   :  { %11321 = vmatprep.subr.bf16.mxu1 %v19356_v13  ;;  %v19367_v13 = vld [vmem:[#allocation231_spill] sm:$0xff] }
 0x6c3   :  { %11227 = vmatpush1.bf16.msra.mxu0 %v19357_v3  ;;  %v19368_v3 = vld [vmem:[#allocation232_spill] sm:$0xff] }
 0x6c4   :  { %11323 = vmatpush1.bf16.msra.mxu1 %v19358_v15  ;;  %11229 = vmatprep.subr.bf16.mxu0 %v19359_v45  ;;  %v19369_v15 = vld [vmem:[#allocation233_spill] sm:$0xff]  ;;  %v19370_v45 = vld [vmem:[#allocation234_spill] sm:$0xff] }
 0x6c5   :  { %11325 = vmatprep.subr.bf16.mxu1 %v19360_v5  ;;  %v19371_v5 = vld [vmem:[#allocation235_spill] sm:$0xff] }
 0x6c7   :  { %11231 = vmatpush1.bf16.msra.mxu0 %v19361_v17  ;;  %v19372_v17 = vld [vmem:[#allocation236_spill] sm:$0xff] }
 0x6c8   :  { %11327 = vmatpush1.bf16.msra.mxu1 %v19362_v31  ;;  %11233 = vmatprep.subr.bf16.mxu0 %v19363_v18  ;;  %v19373_v31 = vld [vmem:[#allocation237_spill] sm:$0xff]  ;;  %v19374_v18 = vld [vmem:[#allocation238_spill] sm:$0xff] }
 0x6c9   :  { %11329 = vmatprep.subr.bf16.mxu1 %v19364_v14  ;;  %v19375_v14 = vld [vmem:[#allocation239_spill] sm:$0xff] }
 0x6cb   :  { %11235 = vmatpush1.bf16.msra.mxu0 %v19365_v27  ;;  %v19376_v27 = vld [vmem:[#allocation240_spill] sm:$0xff] }
 0x6cc   :  { %11331 = vmatpush1.bf16.msra.mxu1 %v19366_v29  ;;  %11237 = vmatprep.subr.bf16.mxu0 %v19367_v13  ;;  %v19377_v29 = vld [vmem:[#allocation241_spill] sm:$0xff]  ;;  %v19378_v13 = vld [vmem:[#allocation242_spill] sm:$0xff] }
 0x6cd   :  { %11333 = vmatprep.subr.bf16.mxu1 %v19368_v3  ;;  %v19379_v3 = vld [vmem:[#allocation243_spill] sm:$0xff] }
 0x6cf   :  { %11239 = vmatpush1.bf16.msra.mxu0 %v19369_v15  ;;  %v19380_v15 = vld [vmem:[#allocation244_spill] sm:$0xff] }
 0x6d0   :  { %11335 = vmatpush1.bf16.msra.mxu1 %v19370_v45  ;;  %11241 = vmatprep.subr.bf16.mxu0 %v19371_v5  ;;  %v19381_v45 = vld [vmem:[#allocation245_spill] sm:$0xff]  ;;  %v19382_v5 = vld [vmem:[#allocation246_spill] sm:$0xff] }
 0x6d1   :  { %11337 = vmatprep.subr.bf16.mxu1 %v19372_v17  ;;  %v19383_v17 = vld [vmem:[#allocation247_spill] sm:$0xff] }
 0x6d3   :  { %11243 = vmatpush1.bf16.msra.mxu0 %v19373_v31  ;;  %v19384_v31 = vld [vmem:[#allocation248_spill] sm:$0xff] }
 0x6d4   :  { %11339 = vmatpush1.bf16.msra.mxu1 %v19374_v18  ;;  %11245 = vmatprep.subr.bf16.mxu0 %v19375_v14  ;;  %v19385_v18 = vld [vmem:[#allocation249_spill] sm:$0xff]  ;;  %v19386_v14 = vld [vmem:[#allocation250_spill] sm:$0xff] }
 0x6d5   :  { %11341 = vmatprep.subr.bf16.mxu1 %v19376_v27 }
 0x6d7   :  { %11247 = vmatpush1.bf16.msra.mxu0 %v19377_v29  ;;  %v19387_v29 = vld [vmem:[#allocation252_spill] sm:$0xff] }
 0x6d8   :  { %11343 = vmatpush1.bf16.msra.mxu1 %v19378_v13  ;;  %11249 = vmatprep.subr.bf16.mxu0 %v19379_v3  ;;  %v19388_v13 = vld [vmem:[#allocation253_spill] sm:$0xff]  ;;  %v19389_v3 = vld [vmem:[#allocation254_spill] sm:$0xff] }
 0x6d9   :  { %11345 = vmatprep.subr.bf16.mxu1 %v19380_v15  ;;  %v19390_v15 = vld [vmem:[#allocation255_spill] sm:$0xff] }
 0x6db   :  { %11251 = vmatpush1.bf16.msra.mxu0 %v19381_v45  ;;  %v19391_v45 = vld [vmem:[#allocation256_spill] sm:$0xff] }
 0x6dc   :  { %11347 = vmatpush1.bf16.msra.mxu1 %v19382_v5  ;;  %11253 = vmatprep.subr.bf16.mxu0 %v19383_v17  ;;  %v19392_v5 = vld [vmem:[#allocation257_spill] sm:$0xff]  ;;  %v19393_v17 = vld [vmem:[#allocation258_spill] sm:$0xff] }
 0x6dd   :  { %11349 = vmatprep.subr.bf16.mxu1 %v19384_v31  ;;  %v19394_v31 = vld [vmem:[#allocation259_spill] sm:$0xff] }
 0x6df   :  { %11255 = vmatpush1.bf16.msra.mxu0 %v19385_v18  ;;  %v19395_v18 = vld [vmem:[#allocation260_spill] sm:$0xff] }
 0x6e0   :  { %11351 = vmatpush1.bf16.msra.mxu1 %v19386_v14  ;;  %11257 = vmatprep.subr.bf16.mxu0 %v19147_v44  ;;  %v19396_v14 = vld [vmem:[#allocation261_spill] sm:$0xff] }
 0x6e1   :  { %11353 = vmatprep.subr.bf16.mxu1 %v19387_v29 }
 0x6e3   :  { %11259 = vmatpush1.bf16.msra.mxu0 %v19388_v13  ;;  %v19397_v13 = vld [vmem:[#allocation264_spill] sm:$0xff] }
 0x6e4   :  { %11355 = vmatpush1.bf16.msra.mxu1 %v19389_v3  ;;  %11261 = vmatprep.subr.bf16.mxu0 %v19390_v15  ;;  %v19398_v3 = vld [vmem:[#allocation265_spill] sm:$0xff]  ;;  %v19399_v15 = vld [vmem:[#allocation266_spill] sm:$0xff] }
 0x6e5   :  { %11357 = vmatprep.subr.bf16.mxu1 %v19391_v45  ;;  %v19400_v45 = vld [vmem:[#allocation267_spill] sm:$0xff] }
 0x6e7   :  { %11263 = vmatpush1.bf16.msra.mxu0 %v19392_v5 }
 0x6e8   :  { %11359 = vmatpush1.bf16.msra.mxu1 %v19393_v17  ;;  %11265 = vmatprep.subr.bf16.mxu0 %v19394_v31  ;;  %v19401_v31 = vld [vmem:[#allocation270_spill] sm:$0xff] }
 0x6e9   :  { %11361 = vmatprep.subr.bf16.mxu1 %v19395_v18  ;;  %v19402_v18 = vld [vmem:[#allocation271_spill] sm:$0xff] }
 0x6eb   :  { %11267 = vmatpush1.bf16.msra.mxu0 %v19396_v14  ;;  %v19403_v14 = vld [vmem:[#allocation272_spill] sm:$0xff] }
 0x6ec   :  { %11363 = vmatpush1.bf16.msra.mxu1 %v18918_v11  ;;  %11269 = vmatprep.subr.bf16.mxu0 %v19158_v57 }
 0x6ed   :  { %11365 = vmatprep.subr.bf16.mxu1 %v19397_v13 }
 0x6ef   :  { %11271 = vmatpush1.bf16.msra.mxu0 %v19398_v3 }
 0x6f0   :  { %11367 = vmatpush1.bf16.msra.mxu1 %v19399_v15  ;;  %11273 = vmatprep.subr.bf16.mxu0 %v19400_v45 }
 0x6f1   :  { %11369 = vmatprep.subr.bf16.mxu1 %v19163_v1 }
 0x6f3   :  { %11275 = vmatpush1.bf16.msra.mxu0 %v19164_v51 }
 0x6f4   :  { %11371 = vmatpush1.bf16.msra.mxu1 %v19401_v31  ;;  %11277 = vmatprep.subr.bf16.mxu0 %v19402_v18 }
 0x6f5   :  { %11373 = vmatprep.subr.bf16.mxu1 %v19403_v14 }
 0x6f6   :  { %4239 = vmatmul.mubr.f32.vlgmr.msra.gmra.mrb[22].mxu0 %v15913_v52 }
 0x6f7   :  { %4381 = vmatmul.mubr.f32.vlgmr.msra.gmra.mrb[22].mxu1 %v15913_v52  ;;  %11279 = vmatpush1.bf16.msra.mxu0 %v19168_v7  ;;  %v19404_v52 = vld [vmem:[#allocation294_spill] sm:$0xff] }
 0x6f8   :  { %11375 = vmatpush1.bf16.msra.mxu1 %v19169_v25  ;;  %11281 = vmatprep.subr.bf16.mxu0 %v19170_v35 }
 0x6f9   :  { %11377 = vmatprep.subr.bf16.mxu1 %v19171_v34  ;;  %4309 = vmatprep.mubr.f32.mxu0 %v18494_v56 }
 0x6fa   :  { %4451 = vmatprep.mubr.f32.mxu1 %v18494_v56 }
 0x6fb   :  { %11283 = vmatpush1.bf16.msra.mxu0 %v19172_v37 }
 0x6fc   :  { %11379 = vmatpush1.bf16.msra.mxu1 %v19173_v2  ;;  %11285 = vmatprep.subr.bf16.mxu0 %v19174_v16 }
 0x6fd   :  { %11381 = vmatprep.subr.bf16.mxu1 %v18936_v55  ;;  %v19441_v55 = vld [vmem:[#allocation43_spill] sm:$0xff] }
 0x6ff   :  { %11287 = vmatpush1.bf16.msra.mxu0 %v19175_v20  ;;  %v19439_v20 = vld [vmem:[#allocation41_spill] sm:$0xff] }
 0x700   :  { %11383 = vmatpush1.bf16.msra.mxu1 %v18938_v59  ;;  %11289 = vmatprep.subr.bf16.mxu0 %v18939_v47  ;;  %v19435_v59 = vld [vmem:[#allocation37_spill] sm:$0xff] }
 0x701   :  { %11385 = vmatprep.subr.bf16.mxu1 %v18940_v60  ;;  %v19405_v60 = vld [vmem:[#allocation295_spill] sm:$0xff] }
 0x703   :  { %11291 = vmatpush1.bf16.msra.mxu0 %v18941_v41  ;;  %v19406_v41 = vld [vmem:[#allocation296_spill] sm:$0xff] }
 0x704   :  { %11387 = vmatpush1.bf16.msra.mxu1 %v18942_v28  ;;  %11293 = vmatprep.subr.bf16.mxu0 %v18943_v0  ;;  %v19407_v28 = vld [vmem:[#allocation297_spill] sm:$0xff]  ;;  %v19408_v0 = vld [vmem:[#allocation298_spill] sm:$0xff] }
 0x705   :  { %11389 = vmatprep.subr.bf16.mxu1 %v18944_v12  ;;  %v19409_v12 = vld [vmem:[#allocation299_spill] sm:$0xff] }
 0x707   :  { %11295 = vmatpush1.bf16.msra.mxu0 %v18945_v24  ;;  %v19410_v24 = vld [vmem:[#allocation300_spill] sm:$0xff] }
 0x708   :  { %11391 = vmatpush1.bf16.msra.mxu1 %v18946_v49  ;;  %11297 = vmatprep.subr.bf16.mxu0 %v15097_v21  ;;  %v19411_v49 = vld [vmem:[#allocation301_spill] sm:$0xff]  ;;  %v19412_v21 = vld [vmem:[#allocation302_spill] sm:$0xff] }
 0x709   :  { %11393 = vmatprep.subr.bf16.mxu1 %v18947_v58  ;;  %v19413_v58 = vld [vmem:[#allocation15_spill] sm:$0xff] }
 0x70b   :  { %11299 = vmatpush1.bf16.msra.mxu0 %v15103_v61  ;;  %v19414_v61 = vld [vmem:[#allocation16_spill] sm:$0xff] }
 0x70c   :  { %11395 = vmatpush1.bf16.msra.mxu1 %v19404_v52  ;;  %11301 = vmatprep.subr.bf16.mxu0 %v19405_v60  ;;  %v19424_v60 = vld [vmem:[#allocation26_spill] sm:$0xff]  ;;  %v19434_v52 = vld [vmem:[#allocation36_spill] sm:$0xff] }
 0x70d   :  { %11397 = vmatprep.subr.bf16.mxu1 %v19406_v41  ;;  %v19415_v41 = vld [vmem:[#allocation17_spill] sm:$0xff] }
 0x70f   :  { %11303 = vmatpush1.bf16.msra.mxu0 %v19407_v28  ;;  %v19416_v28 = vld [vmem:[#allocation18_spill] sm:$0xff] }
 0x710   :  { %11399 = vmatpush1.bf16.msra.mxu1 %v19408_v0  ;;  %11305 = vmatprep.subr.bf16.mxu0 %v19409_v12  ;;  %v19417_v0 = vld [vmem:[#allocation19_spill] sm:$0xff]  ;;  %v19418_v12 = vld [vmem:[#allocation20_spill] sm:$0xff] }
 0x711   :  { %11401 = vmatprep.subr.bf16.mxu1 %v19410_v24  ;;  %v19419_v24 = vld [vmem:[#allocation21_spill] sm:$0xff] }
 0x713   :  { %11307 = vmatpush1.bf16.msra.mxu0 %v19411_v49  ;;  %v19420_v49 = vld [vmem:[#allocation22_spill] sm:$0xff] }
 0x714   :  { %11403 = vmatpush1.bf16.msra.mxu1 %v19412_v21  ;;  %11405 = vmatprep.subr.bf16.mxu0 %v19413_v58  ;;  %v19421_v21 = vld [vmem:[#allocation23_spill] sm:$0xff]  ;;  %v19422_v58 = vld [vmem:[#allocation24_spill] sm:$0xff] }
 0x715   :  { %11501 = vmatprep.subr.bf16.mxu1 %v19414_v61  ;;  %v19423_v61 = vld [vmem:[#allocation25_spill] sm:$0xff] }
 0x716   :  { %4310 = vmatmul.mubr.f32.vlgmr.msra.gmra.mrb[22].mxu0 %v15956_v42 }
 0x717   :  { %4452 = vmatmul.mubr.f32.vlgmr.msra.gmra.mrb[22].mxu1 %v15956_v42  ;;  %11407 = vmatpush1.bf16.msra.mxu0 %v19415_v41  ;;  %v19425_v42 = vld [vmem:[#allocation27_spill] sm:$0xff]  ;;  %v19426_v41 = vld [vmem:[#allocation28_spill] sm:$0xff] }
 0x718   :  { %11503 = vmatpush1.bf16.msra.mxu1 %v19416_v28  ;;  %11409 = vmatprep.subr.bf16.mxu0 %v19417_v0  ;;  %v19427_v28 = vld [vmem:[#allocation29_spill] sm:$0xff]  ;;  %v19428_v0 = vld [vmem:[#allocation30_spill] sm:$0xff] }
 0x719   :  { %11505 = vmatprep.subr.bf16.mxu1 %v19418_v12  ;;  %v19429_v12 = vld [vmem:[#allocation31_spill] sm:$0xff] }
 0x71b   :  { %11411 = vmatpush1.bf16.msra.mxu0 %v19419_v24  ;;  %v19430_v24 = vld [vmem:[#allocation32_spill] sm:$0xff] }
 0x71c   :  { %11507 = vmatpush1.bf16.msra.mxu1 %v19420_v49  ;;  %11413 = vmatprep.subr.bf16.mxu0 %v19421_v21  ;;  %v19431_v49 = vld [vmem:[#allocation33_spill] sm:$0xff]  ;;  %v19432_v21 = vld [vmem:[#allocation34_spill] sm:$0xff] }
 0x71d   :  { %11509 = vmatprep.subr.bf16.mxu1 %v19422_v58  ;;  %v19433_v58 = vld [vmem:[#allocation35_spill] sm:$0xff] }
 0x71f   :  { %11415 = vmatpush1.bf16.msra.mxu0 %v19423_v61 }
 0x720   :  { %11511 = vmatpush1.bf16.msra.mxu1 %v19424_v60  ;;  %11417 = vmatprep.subr.bf16.mxu0 %v19425_v42 }
 0x721   :  { %11513 = vmatprep.subr.bf16.mxu1 %v19426_v41 }
 0x723   :  { %11419 = vmatpush1.bf16.msra.mxu0 %v19427_v28 }
 0x724   :  { %11515 = vmatpush1.bf16.msra.mxu1 %v19428_v0  ;;  %11421 = vmatprep.subr.bf16.mxu0 %v19429_v12  ;;  %v19436_v0 = vld [vmem:[#allocation38_spill] sm:$0xff]  ;;  %v19437_v12 = vld [vmem:[#allocation39_spill] sm:$0xff] }
 0x725   :  { %11517 = vmatprep.subr.bf16.mxu1 %v19430_v24  ;;  %v19438_v24 = vld [vmem:[#allocation40_spill] sm:$0xff] }
 0x727   :  { %11423 = vmatpush1.bf16.msra.mxu0 %v19431_v49 }
 0x728   :  { %11519 = vmatpush1.bf16.msra.mxu1 %v19432_v21  ;;  %11425 = vmatprep.subr.bf16.mxu0 %v19433_v58 }
 0x729   :  { %v3743_v61 = vpop.f32.mrb[18].mxu0  ;;  %v3885_v60 = vpop.f32.mrb[18].mxu1  ;;  %11521 = vmatprep.subr.bf16.mxu1 %v19434_v52  ;;  %v19440_v52 = vld [vmem:[#allocation42_spill] sm:$0xff] }
 0x72a   :  { %v3745_v42 = vpop.f32.mrb[19].mxu0  ;;  %v3887_v41 = vpop.f32.mrb[19].mxu1 }
 0x72b   :  { %v4470_v47 = vcombine.low %v3743_v61, %v3745_v42  ;;  %v4471_v28 = vcombine.low %v3885_v60, %v3887_v41  ;;  %11427 = vmatpush1.bf16.msra.mxu0 %v19435_v59  ;;  %v19442_v61 = vld [vmem:[#allocation44_spill] sm:$0xff]  ;;  %v19443_v60 = vld [vmem:[#allocation45_spill] sm:$0xff]  ;;  %v19444_v41 = vld [vmem:[#allocation46_spill] sm:$0xff] }
 0x72c   :  { %11523 = vmatpush1.bf16.msra.mxu1 %v19436_v0  ;;  %11429 = vmatprep.subr.bf16.mxu0 %v19437_v12  ;;  %v19445_v42 = vld [vmem:[#allocation47_spill] sm:$0xff] }
 0x72d   :  { %v4478_v49 = vrot.slane %v4470_v47, %v15159_v32  ;;  %v4485_v21 = vrot.slane %v4471_v28, %v15159_v32  ;;  %11525 = vmatprep.subr.bf16.mxu1 %v19438_v24  ;;  %v19446_v47 = vld [vmem:[#allocation48_spill] sm:$0xff]  ;;  %v19447_v28 = vld [vmem:[#allocation49_spill] sm:$0xff]  ;;  %v19448_v24 = vld [vmem:[#allocation50_spill] sm:$0xff] }
 0x72f   :  { %v4486_v58 = vcombine.low %v4478_v49, %v4485_v21  ;;  %11431 = vmatpush1.bf16.msra.mxu0 %v19439_v20  ;;  %v19449_v21 = vld [vmem:[#allocation51_spill] sm:$0xff]  ;;  %v19450_v49 = vld [vmem:[#allocation52_spill] sm:$0xff] }
 0x730   :  { %11527 = vmatpush1.bf16.msra.mxu1 %v19440_v52  ;;  %11433 = vmatprep.subr.bf16.mxu0 %v19441_v55  ;;  %v19451_v52 = vld [vmem:[#allocation53_spill] sm:$0xff]  ;;  %v19452_v55 = vld [vmem:[#allocation54_spill] sm:$0xff] }
 0x731   :  { %11529 = vmatprep.subr.bf16.mxu1 %v19442_v61  ;;  %v19453_v61 = vld [vmem:[#allocation55_spill] sm:$0xff] }
 0x733   :  { %11435 = vmatpush1.bf16.msra.mxu0 %v19443_v60  ;;  %v19454_v60 = vld [vmem:[#allocation56_spill] sm:$0xff] }
 0x734   :  { %11531 = vmatpush1.bf16.msra.mxu1 %v19444_v41  ;;  %11437 = vmatprep.subr.bf16.mxu0 %v19445_v42  ;;  %v19455_v41 = vld [vmem:[#allocation57_spill] sm:$0xff]  ;;  %v19456_v42 = vld [vmem:[#allocation58_spill] sm:$0xff] }
 0x735   :  { %11533 = vmatprep.subr.bf16.mxu1 %v19446_v47  ;;  %v19457_v47 = vld [vmem:[#allocation59_spill] sm:$0xff] }
 0x737   :  { %11439 = vmatpush1.bf16.msra.mxu0 %v19447_v28  ;;  %v19458_v28 = vld [vmem:[#allocation60_spill] sm:$0xff] }
 0x738   :  { %11535 = vmatpush1.bf16.msra.mxu1 %v19448_v24  ;;  %11441 = vmatprep.subr.bf16.mxu0 %v19449_v21  ;;  %v19459_v24 = vld [vmem:[#allocation61_spill] sm:$0xff]  ;;  %v19460_v21 = vld [vmem:[#allocation62_spill] sm:$0xff] }
 0x739   :  { %11537 = vmatprep.subr.bf16.mxu1 %v19450_v49  ;;  %v19461_v49 = vld [vmem:[#allocation63_spill] sm:$0xff] }
 0x73b   :  { %11443 = vmatpush1.bf16.msra.mxu0 %v19451_v52  ;;  %v19462_v52 = vld [vmem:[#allocation64_spill] sm:$0xff] }
 0x73c   :  { %11539 = vmatpush1.bf16.msra.mxu1 %v19452_v55  ;;  %11445 = vmatprep.subr.bf16.mxu0 %v19453_v61  ;;  %v19463_v55 = vld [vmem:[#allocation65_spill] sm:$0xff]  ;;  %v19464_v61 = vld [vmem:[#allocation66_spill] sm:$0xff] }
 0x73d   :  { %11541 = vmatprep.subr.bf16.mxu1 %v19454_v60  ;;  %v19465_v60 = vld [vmem:[#allocation67_spill] sm:$0xff] }
 0x73f   :  { %11447 = vmatpush1.bf16.msra.mxu0 %v19455_v41  ;;  %v19466_v41 = vld [vmem:[#allocation68_spill] sm:$0xff] }
 0x740   :  { %11543 = vmatpush1.bf16.msra.mxu1 %v19456_v42  ;;  %11449 = vmatprep.subr.bf16.mxu0 %v19457_v47  ;;  %v19467_v42 = vld [vmem:[#allocation69_spill] sm:$0xff]  ;;  %v19468_v47 = vld [vmem:[#allocation70_spill] sm:$0xff] }
 0x741   :  { %11545 = vmatprep.subr.bf16.mxu1 %v19458_v28  ;;  %v19469_v28 = vld [vmem:[#allocation71_spill] sm:$0xff] }
 0x743   :  { %11451 = vmatpush1.bf16.msra.mxu0 %v19459_v24  ;;  %v19470_v24 = vld [vmem:[#allocation72_spill] sm:$0xff] }
 0x744   :  { %11547 = vmatpush1.bf16.msra.mxu1 %v19460_v21  ;;  %11453 = vmatprep.subr.bf16.mxu0 %v19461_v49  ;;  %v19471_v21 = vld [vmem:[#allocation73_spill] sm:$0xff]  ;;  %v19472_v49 = vld [vmem:[#allocation74_spill] sm:$0xff] }
 0x745   :  { %11549 = vmatprep.subr.bf16.mxu1 %v19462_v52  ;;  %v19473_v52 = vld [vmem:[#allocation75_spill] sm:$0xff] }
 0x747   :  { %11455 = vmatpush1.bf16.msra.mxu0 %v19463_v55  ;;  %v19474_v55 = vld [vmem:[#allocation76_spill] sm:$0xff] }
 0x748   :  { %11551 = vmatpush1.bf16.msra.mxu1 %v19464_v61  ;;  %11457 = vmatprep.subr.bf16.mxu0 %v19465_v60  ;;  %v19475_v61 = vld [vmem:[#allocation77_spill] sm:$0xff]  ;;  %v19476_v60 = vld [vmem:[#allocation78_spill] sm:$0xff] }
 0x749   :  { %11553 = vmatprep.subr.bf16.mxu1 %v19466_v41  ;;  %v19477_v41 = vld [vmem:[#allocation79_spill] sm:$0xff] }
 0x74b   :  { %11459 = vmatpush1.bf16.msra.mxu0 %v19467_v42  ;;  %v19478_v42 = vld [vmem:[#allocation80_spill] sm:$0xff] }
 0x74c   :  { %11555 = vmatpush1.bf16.msra.mxu1 %v19468_v47  ;;  %11461 = vmatprep.subr.bf16.mxu0 %v19469_v28 }
 0x74d   :  { %11557 = vmatprep.subr.bf16.mxu1 %v19470_v24 }
 0x74f   :  { %11463 = vmatpush1.bf16.msra.mxu0 %v19471_v21 }
 0x750   :  { %11559 = vmatpush1.bf16.msra.mxu1 %v19472_v49  ;;  %11465 = vmatprep.subr.bf16.mxu0 %v19473_v52  ;;  %v8930_v52 = vld [vmem:[%s17789_s0 + $0x48] sm:$0xff] }
 0x751   :  { %11561 = vmatprep.subr.bf16.mxu1 %v19474_v55 }
 0x753   :  { %11467 = vmatpush1.bf16.msra.mxu0 %v19475_v61 }
 0x754   :  { %11563 = vmatpush1.bf16.msra.mxu1 %v19476_v60  ;;  %11469 = vmatprep.subr.bf16.mxu0 %v19477_v41  ;;  %v8931_v41 = vld [vmem:[%s17789_s0 + $0x50] sm:$0xff]  ;;  %v4524_v60 = vadd.f32 %v8930_v52, %v4486_v58 }
 0x755   :  { %11565 = vmatprep.subr.bf16.mxu1 %v19478_v42 }
 0x756   :  { %v4535_v0 = vrot.slane %v4524_v60, 6 }
 0x789   :  { %v4027_v47 = vpop.f32.mrb[20].mxu0 }
 0x78a   :  { %v4169_v28 = vpop.f32.mrb[20].mxu1  ;;  %v4029_v20 = vpop.f32.mrb[21].mxu0 }
 0x78b   :  { %v4487_v24 = vcombine.low %v4027_v47, %v4029_v20  ;;  %v4171_v12 = vpop.f32.mrb[21].mxu1  ;;  %v8933_v47 = vmul.f32 -1.442695, %v4524_v60 }
 0x78c   :  { %v4488_v21 = vcombine.low %v4169_v28, %v4171_v12 }
 0x78d   :  { %v4495_v55 = vrot.slane %v4487_v24, %v15159_v32 }
 0x78e   :  { %v4502_v61 = vrot.slane %v4488_v21, %v15159_v32 }
 0x790   :  { %v4503_v42 = vcombine.low %v4495_v55, %v4502_v61 }
 0x792   :  { %v4525_v49 = vadd.f32 %v8931_v41, %v4503_v42 }
 0x794   :  { %v4536_v59 = vrot.slane %v4525_v49, 6  ;;  %v4546_v41 = vrot.slane %v4525_v49, 4 }
 0x796   :  { %v4537_v20 = vsel %vm1589_vm0, %v4535_v0, %v4536_v59  ;;  %v8932_v0 = vld [vmem:[%s17789_s0 + $0x58] sm:$0xff] }
 0x797   :  { %v8934_v12 = vmul.f32 -1.442695, %v4537_v20 }
 0x799   :  { %13937 = vpow2.f32 %v8934_v12 }
 0x79a   :  { %13939 = vpow2.f32 %v8933_v47 }
 0x7a3   :  { %v13938_v35 = vpop.eup %13937 }
 0x7a4   :  { %v13940_v58 = vpop.eup %13939  ;;  %v4542_v52 = vadd.f32 1.0, %v13938_v35 }
 0x7a5   :  { %v4530_v61 = vadd.f32 1.0, %v13940_v58 }
 0x7a6   :  { %13941 = vrcp.f32 %v4542_v52  ;;  %v19480_v52 = vld [vmem:[#allocation101_spill] sm:$0xff] }
 0x7a7   :  { %13943 = vrcp.f32 %v4530_v61  ;;  %v19481_v61 = vld [vmem:[#allocation102_spill] sm:$0xff] }
 0x7e9   :  { %v4311_v28 = vpop.f32.mrb[22].mxu0 }
 0x7ea   :  { %v4453_v16 = vpop.f32.mrb[22].mxu1  ;;  %v4313_v24 = vpop.f32.mrb[23].mxu0 }
 0x7eb   :  { %v4504_v2 = vcombine.low %v4311_v28, %v4313_v24  ;;  %v4455_v21 = vpop.f32.mrb[23].mxu1 }
 0x7ec   :  { %v4505_v37 = vcombine.low %v4453_v16, %v4455_v21 }
 0x7ed   :  { %v4512_v34 = vrot.slane %v4504_v2, %v15159_v32 }
 0x7ee   :  { %v4519_v55 = vrot.slane %v4505_v37, %v15159_v32  ;;  %v13942_v37 = vpop.eup %13941 }
 0x7ef   :  { %v13944_v12 = vpop.eup %13943  ;;  %v4559_v24 = vmul.f32 %v13942_v37, %v15909_v26  ;;  %v19479_v26 = vld [vmem:[#allocation100_spill] sm:$0xff] }
 0x7f0   :  { %v4520_v59 = vcombine.low %v4512_v34, %v4519_v55 }
 0x7f2   :  { %v4526_v60 = vadd.f32 %v8932_v0, %v4520_v59 }
 0x7f4   :  { %v4547_v42 = vrot.slane %v4526_v60, 4  ;;  %v4551_v20 = vrot.slane %v4526_v60, 2  ;;  %v19482_v60 = vld [vmem:[#allocation103_spill] sm:$0xff] }
 0x7f6   :  { %v4548_v16 = vsel %vm1601_vm1, %v4546_v41, %v4547_v42  ;;  %v8935_v2 = vmul.f32 -1.442695, %v4551_v20  ;;  %v19483_v41 = vld [vmem:[#allocation104_spill] sm:$0xff]  ;;  %v19484_v42 = vld [vmem:[#allocation105_spill] sm:$0xff]  ;;  %v19485_v20 = vld [vmem:[#allocation106_spill] sm:$0xff] }
 0x7f7   :  { %13945 = vtanh.f32 %v4548_v16  ;;  %v19486_v16 = vld [vmem:[#allocation107_spill] sm:$0xff] }
 0x7f8   :  { %13947 = vpow2.f32 %v8935_v2  ;;  %v19487_v2 = vld [vmem:[#allocation108_spill] sm:$0xff] }
 0x801   :  { %v13946_v47 = vpop.eup %13945 }
 0x802   :  { %v13948_v28 = vpop.eup %13947  ;;  %v4560_v34 = vmul.f32 %v13946_v47, %v13944_v12  ;;  %v19488_v12 = vld [vmem:[#allocation109_spill] sm:$0xff]  ;;  %v19489_v47 = vld [vmem:[#allocation110_spill] sm:$0xff] }
 0x803   :  { %v4556_v35 = vadd.f32 1.0, %v13948_v28 }
 0x804   :  { %v16252_v21 = vadd.f32 %v4560_v34, %v4559_v24  ;;  %v19490_v24 = vld [vmem:[#allocation111_spill] sm:$0xff]  ;;  %v19491_v34 = vld [vmem:[#allocation112_spill] sm:$0xff] }
 0x805   :  { %13949 = vrcp.f32 %v4556_v35  ;;  %v19492_v35 = vld [vmem:[#allocation113_spill] sm:$0xff] }
 0x806   :  { %13951 = vtanh.f32 %v16252_v21 }
 0x80f   :  { %v13950_v49 = vpop.eup %13949 }
 0x810   :  { %v13952_v55 = vpop.eup %13951 }
 0x811   :  { %v4563_v58 = vmul.f32 %v13952_v55, %v13950_v49  ;;  %v19493_v49 = vld [vmem:[#allocation114_spill] sm:$0xff]  ;;  %v19494_v55 = vld [vmem:[#allocation115_spill] sm:$0xff] }
 0x813   :  { %v16256_v0 = vrot.slane %v4563_v58, %v15159_v32  ;;  %v4569_v37 = vcombine.high %v4563_v58, %v4563_v58  ;;  %v19495_v58 = vld [vmem:[#allocation116_spill] sm:$0xff] }
 0x815   :  { %v16260_v59 = vcombine.high %v16256_v0, %v16256_v0  ;;  %v16299_v28 = vrot.slane %v4569_v37, %v15159_v32  ;;  %v19496_v37 = vld [vmem:[#allocation117_spill] sm:$0xff] }
 0x817   :  { %4652 = vmatprep.mubr.f32.mxu0 %v16260_v59  ;;  %4794 = vmatprep.mubr.f32.mxu1 %v16260_v59 }
 0x818   :  { %4653 = vmatmul.mubr.f32.vlgmr.msra.gmra.mrb[24].mxu0 %v16256_v0  ;;  %4795 = vmatmul.mubr.f32.vlgmr.msra.gmra.mrb[24].mxu1 %v16256_v0 }
 0x819   :  { %11471 = vmatpush1.bf16.msra.mxu0 %v18737_v46  ;;  %11567 = vmatpush1.bf16.msra.mxu1 %v18738_v30 }
 0x81a   :  { %11473 = vmatprep.subr.bf16.mxu0 %v18739_v33  ;;  %11569 = vmatprep.subr.bf16.mxu1 %v18740_v23 }
 0x81b   :  { %4723 = vmatprep.mubr.f32.mxu0 %v18494_v56  ;;  %4865 = vmatprep.mubr.f32.mxu1 %v18494_v56 }
 0x81d   :  { %11475 = vmatpush1.bf16.msra.mxu0 %v18741_v10  ;;  %11571 = vmatpush1.bf16.msra.mxu1 %v18983_v38 }
 0x81e   :  { %11477 = vmatprep.subr.bf16.mxu0 %v18984_v43  ;;  %11573 = vmatprep.subr.bf16.mxu1 %v18985_v50 }
 0x821   :  { %11479 = vmatpush1.bf16.msra.mxu0 %v18986_v39  ;;  %11575 = vmatpush1.bf16.msra.mxu1 %v18987_v40 }
 0x822   :  { %11481 = vmatprep.subr.bf16.mxu0 %v18988_v62  ;;  %11577 = vmatprep.subr.bf16.mxu1 %v18989_v36 }
 0x825   :  { %11483 = vmatpush1.bf16.msra.mxu0 %v19231_v63  ;;  %11579 = vmatpush1.bf16.msra.mxu1 %v19232_v48 }
 0x826   :  { %11485 = vmatprep.subr.bf16.mxu0 %v19233_v4  ;;  %11581 = vmatprep.subr.bf16.mxu1 %v19234_v8 }
 0x829   :  { %11487 = vmatpush1.bf16.msra.mxu0 %v19235_v9  ;;  %11583 = vmatpush1.bf16.msra.mxu1 %v19236_v53 }
 0x82a   :  { %11489 = vmatprep.subr.bf16.mxu0 %v19237_v6  ;;  %11585 = vmatprep.subr.bf16.mxu1 %v19479_v26 }
 0x82d   :  { %11491 = vmatpush1.bf16.msra.mxu0 %v19480_v52  ;;  %11587 = vmatpush1.bf16.msra.mxu1 %v19481_v61 }
 0x82e   :  { %11493 = vmatprep.subr.bf16.mxu0 %v19482_v60  ;;  %11589 = vmatprep.subr.bf16.mxu1 %v19483_v41 }
 0x831   :  { %11495 = vmatpush1.bf16.msra.mxu0 %v19484_v42  ;;  %11591 = vmatpush1.bf16.msra.mxu1 %v19485_v20 }
 0x832   :  { %11497 = vmatprep.subr.bf16.mxu0 %v19486_v16  ;;  %11593 = vmatprep.subr.bf16.mxu1 %v19487_v2  ;;  %v19502_v2 = vld [vmem:[#allocation123_spill] sm:$0xff]  ;;  %v19504_v16 = vld [vmem:[#allocation125_spill] sm:$0xff] }
 0x835   :  { %11499 = vmatpush1.bf16.msra.mxu0 %v19488_v12  ;;  %11595 = vmatpush1.bf16.msra.mxu1 %v19489_v47  ;;  %v19499_v47 = vld [vmem:[#allocation120_spill] sm:$0xff]  ;;  %v19500_v12 = vld [vmem:[#allocation121_spill] sm:$0xff] }
 0x836   :  { %11597 = vmatprep.subr.bf16.mxu0 %v19490_v24  ;;  %11693 = vmatprep.subr.bf16.mxu1 %v19491_v34  ;;  %v19497_v24 = vld [vmem:[#allocation118_spill] sm:$0xff]  ;;  %v19498_v34 = vld [vmem:[#allocation119_spill] sm:$0xff] }
 0x838   :  { %4724 = vmatmul.mubr.f32.vlgmr.msra.gmra.mrb[24].mxu0 %v16299_v28  ;;  %4866 = vmatmul.mubr.f32.vlgmr.msra.gmra.mrb[24].mxu1 %v16299_v28 }
 0x839   :  { %11599 = vmatpush1.bf16.msra.mxu0 %v19492_v35  ;;  %4936 = vmatprep.mubr.f32.mxu0 %v16260_v59  ;;  %v19501_v35 = vld [vmem:[#allocation122_spill] sm:$0xff] }
 0x83a   :  { %11695 = vmatpush1.bf16.msra.mxu1 %v19493_v49  ;;  %5078 = vmatprep.mubr.f32.mxu1 %v16260_v59  ;;  %v19503_v49 = vld [vmem:[#allocation124_spill] sm:$0xff] }
 0x83b   :  { %11601 = vmatprep.subr.bf16.mxu0 %v19494_v55  ;;  %11697 = vmatprep.subr.bf16.mxu1 %v19495_v58  ;;  %v19505_v55 = vld [vmem:[#allocation126_spill] sm:$0xff]  ;;  %v19506_v58 = vld [vmem:[#allocation127_spill] sm:$0xff] }
 0x83d   :  { %11603 = vmatpush1.bf16.msra.mxu0 %v19496_v37  ;;  %v19507_v37 = vld [vmem:[#allocation128_spill] sm:$0xff] }
 0x83e   :  { %11699 = vmatpush1.bf16.msra.mxu1 %v19497_v24  ;;  %11605 = vmatprep.subr.bf16.mxu0 %v19498_v34  ;;  %v19508_v24 = vld [vmem:[#allocation129_spill] sm:$0xff]  ;;  %v19509_v34 = vld [vmem:[#allocation130_spill] sm:$0xff] }
 0x83f   :  { %11701 = vmatprep.subr.bf16.mxu1 %v19499_v47  ;;  %v19510_v47 = vld [vmem:[#allocation131_spill] sm:$0xff] }
 0x841   :  { %11607 = vmatpush1.bf16.msra.mxu0 %v19500_v12  ;;  %v19511_v12 = vld [vmem:[#allocation132_spill] sm:$0xff] }
 0x842   :  { %11703 = vmatpush1.bf16.msra.mxu1 %v19501_v35  ;;  %11609 = vmatprep.subr.bf16.mxu0 %v19502_v2  ;;  %v19512_v35 = vld [vmem:[#allocation133_spill] sm:$0xff]  ;;  %v19513_v2 = vld [vmem:[#allocation134_spill] sm:$0xff] }
 0x843   :  { %11705 = vmatprep.subr.bf16.mxu1 %v19503_v49  ;;  %v19514_v49 = vld [vmem:[#allocation135_spill] sm:$0xff] }
 0x845   :  { %11611 = vmatpush1.bf16.msra.mxu0 %v19504_v16  ;;  %v19515_v16 = vld [vmem:[#allocation136_spill] sm:$0xff] }
 0x846   :  { %11707 = vmatpush1.bf16.msra.mxu1 %v19505_v55  ;;  %11613 = vmatprep.subr.bf16.mxu0 %v19506_v58  ;;  %v19516_v55 = vld [vmem:[#allocation137_spill] sm:$0xff]  ;;  %v19517_v58 = vld [vmem:[#allocation138_spill] sm:$0xff] }
 0x847   :  { %11709 = vmatprep.subr.bf16.mxu1 %v19507_v37  ;;  %v19518_v37 = vld [vmem:[#allocation139_spill] sm:$0xff] }
 0x849   :  { %11615 = vmatpush1.bf16.msra.mxu0 %v19508_v24  ;;  %v19519_v24 = vld [vmem:[#allocation140_spill] sm:$0xff] }
 0x84a   :  { %11711 = vmatpush1.bf16.msra.mxu1 %v19509_v34  ;;  %11617 = vmatprep.subr.bf16.mxu0 %v19510_v47  ;;  %v19520_v34 = vld [vmem:[#allocation141_spill] sm:$0xff]  ;;  %v19521_v47 = vld [vmem:[#allocation142_spill] sm:$0xff] }
 0x84b   :  { %11713 = vmatprep.subr.bf16.mxu1 %v19511_v12  ;;  %v19522_v12 = vld [vmem:[#allocation143_spill] sm:$0xff] }
 0x84d   :  { %11619 = vmatpush1.bf16.msra.mxu0 %v19512_v35  ;;  %v19523_v35 = vld [vmem:[#allocation144_spill] sm:$0xff] }
 0x84e   :  { %11715 = vmatpush1.bf16.msra.mxu1 %v19513_v2  ;;  %11621 = vmatprep.subr.bf16.mxu0 %v19514_v49  ;;  %v19524_v2 = vld [vmem:[#allocation145_spill] sm:$0xff]  ;;  %v19525_v49 = vld [vmem:[#allocation146_spill] sm:$0xff] }
 0x84f   :  { %11717 = vmatprep.subr.bf16.mxu1 %v19515_v16  ;;  %v19526_v16 = vld [vmem:[#allocation147_spill] sm:$0xff] }
 0x851   :  { %11623 = vmatpush1.bf16.msra.mxu0 %v19516_v55  ;;  %v19527_v55 = vld [vmem:[#allocation148_spill] sm:$0xff] }
 0x852   :  { %11719 = vmatpush1.bf16.msra.mxu1 %v19517_v58  ;;  %11625 = vmatprep.subr.bf16.mxu0 %v19518_v37  ;;  %v19528_v58 = vld [vmem:[#allocation149_spill] sm:$0xff]  ;;  %v19529_v37 = vld [vmem:[#allocation150_spill] sm:$0xff] }
 0x853   :  { %11721 = vmatprep.subr.bf16.mxu1 %v19519_v24  ;;  %v19530_v24 = vld [vmem:[#allocation151_spill] sm:$0xff] }
 0x855   :  { %11627 = vmatpush1.bf16.msra.mxu0 %v19520_v34  ;;  %v19531_v34 = vld [vmem:[#allocation152_spill] sm:$0xff] }
 0x856   :  { %11723 = vmatpush1.bf16.msra.mxu1 %v19521_v47  ;;  %11629 = vmatprep.subr.bf16.mxu0 %v19522_v12  ;;  %v19532_v47 = vld [vmem:[#allocation153_spill] sm:$0xff]  ;;  %v19533_v12 = vld [vmem:[#allocation154_spill] sm:$0xff] }
 0x857   :  { %11725 = vmatprep.subr.bf16.mxu1 %v19523_v35  ;;  %v19534_v35 = vld [vmem:[#allocation155_spill] sm:$0xff] }
 0x859   :  { %11631 = vmatpush1.bf16.msra.mxu0 %v19524_v2  ;;  %v19535_v2 = vld [vmem:[#allocation156_spill] sm:$0xff] }
 0x85a   :  { %11727 = vmatpush1.bf16.msra.mxu1 %v19525_v49  ;;  %11633 = vmatprep.subr.bf16.mxu0 %v19526_v16  ;;  %v19536_v49 = vld [vmem:[#allocation157_spill] sm:$0xff]  ;;  %v19537_v16 = vld [vmem:[#allocation158_spill] sm:$0xff] }
 0x85b   :  { %11729 = vmatprep.subr.bf16.mxu1 %v19527_v55  ;;  %v19538_v55 = vld [vmem:[#allocation159_spill] sm:$0xff] }
 0x85d   :  { %11635 = vmatpush1.bf16.msra.mxu0 %v19528_v58  ;;  %v19539_v58 = vld [vmem:[#allocation160_spill] sm:$0xff] }
 0x85e   :  { %11731 = vmatpush1.bf16.msra.mxu1 %v19529_v37  ;;  %11637 = vmatprep.subr.bf16.mxu0 %v19530_v24  ;;  %v19540_v37 = vld [vmem:[#allocation161_spill] sm:$0xff]  ;;  %v19541_v24 = vld [vmem:[#allocation162_spill] sm:$0xff] }
 0x85f   :  { %11733 = vmatprep.subr.bf16.mxu1 %v19531_v34  ;;  %v19542_v34 = vld [vmem:[#allocation163_spill] sm:$0xff] }
 0x861   :  { %11639 = vmatpush1.bf16.msra.mxu0 %v19532_v47  ;;  %v19543_v47 = vld [vmem:[#allocation164_spill] sm:$0xff] }
 0x862   :  { %11735 = vmatpush1.bf16.msra.mxu1 %v19533_v12  ;;  %11641 = vmatprep.subr.bf16.mxu0 %v19534_v35  ;;  %v19544_v12 = vld [vmem:[#allocation165_spill] sm:$0xff] }
 0x863   :  { %11737 = vmatprep.subr.bf16.mxu1 %v19535_v2  ;;  %v19545_v2 = vld [vmem:[#allocation167_spill] sm:$0xff] }
 0x865   :  { %11643 = vmatpush1.bf16.msra.mxu0 %v19536_v49  ;;  %v19546_v49 = vld [vmem:[#allocation168_spill] sm:$0xff] }
 0x866   :  { %11739 = vmatpush1.bf16.msra.mxu1 %v19537_v16  ;;  %11645 = vmatprep.subr.bf16.mxu0 %v19538_v55  ;;  %v19547_v16 = vld [vmem:[#allocation169_spill] sm:$0xff]  ;;  %v19548_v55 = vld [vmem:[#allocation170_spill] sm:$0xff] }
 0x867   :  { %11741 = vmatprep.subr.bf16.mxu1 %v19539_v58  ;;  %v19549_v58 = vld [vmem:[#allocation171_spill] sm:$0xff] }
 0x869   :  { %11647 = vmatpush1.bf16.msra.mxu0 %v19540_v37  ;;  %v19550_v37 = vld [vmem:[#allocation172_spill] sm:$0xff] }
 0x86a   :  { %11743 = vmatpush1.bf16.msra.mxu1 %v19541_v24  ;;  %11649 = vmatprep.subr.bf16.mxu0 %v19542_v34  ;;  %v19551_v24 = vld [vmem:[#allocation173_spill] sm:$0xff]  ;;  %v19552_v34 = vld [vmem:[#allocation174_spill] sm:$0xff] }
 0x86b   :  { %11745 = vmatprep.subr.bf16.mxu1 %v19543_v47  ;;  %v19553_v47 = vld [vmem:[#allocation175_spill] sm:$0xff] }
 0x86d   :  { %11651 = vmatpush1.bf16.msra.mxu0 %v19544_v12  ;;  %v19554_v12 = vld [vmem:[#allocation176_spill] sm:$0xff] }
 0x86e   :  { %11747 = vmatpush1.bf16.msra.mxu1 %v19304_v22  ;;  %11653 = vmatprep.subr.bf16.mxu0 %v19545_v2  ;;  %v19568_v2 = vld [vmem:[#allocation191_spill] sm:$0xff] }
 0x86f   :  { %11749 = vmatprep.subr.bf16.mxu1 %v19546_v49  ;;  %v19555_v49 = vld [vmem:[#allocation177_spill] sm:$0xff] }
 0x871   :  { %11655 = vmatpush1.bf16.msra.mxu0 %v19547_v16  ;;  %v19556_v16 = vld [vmem:[#allocation178_spill] sm:$0xff] }
 0x872   :  { %11751 = vmatpush1.bf16.msra.mxu1 %v19548_v55  ;;  %11657 = vmatprep.subr.bf16.mxu0 %v19549_v58  ;;  %v19557_v55 = vld [vmem:[#allocation179_spill] sm:$0xff]  ;;  %v19558_v58 = vld [vmem:[#allocation180_spill] sm:$0xff] }
 0x873   :  { %11753 = vmatprep.subr.bf16.mxu1 %v19550_v37  ;;  %v19563_v37 = vld [vmem:[#allocation185_spill] sm:$0xff] }
 0x875   :  { %11659 = vmatpush1.bf16.msra.mxu0 %v19551_v24  ;;  %v19562_v24 = vld [vmem:[#allocation184_spill] sm:$0xff] }
 0x876   :  { %11755 = vmatpush1.bf16.msra.mxu1 %v19552_v34  ;;  %11661 = vmatprep.subr.bf16.mxu0 %v19553_v47  ;;  %v19559_v34 = vld [vmem:[#allocation181_spill] sm:$0xff]  ;;  %v19560_v47 = vld [vmem:[#allocation182_spill] sm:$0xff] }
 0x877   :  { %11757 = vmatprep.subr.bf16.mxu1 %v19554_v12  ;;  %v19561_v12 = vld [vmem:[#allocation183_spill] sm:$0xff] }
 0x878   :  { %4937 = vmatmul.mubr.f32.vlgmr.msra.gmra.mrb[26].mxu0 %v16256_v0 }
 0x879   :  { %5079 = vmatmul.mubr.f32.vlgmr.msra.gmra.mrb[26].mxu1 %v16256_v0  ;;  %11663 = vmatpush1.bf16.msra.mxu0 %v19555_v49  ;;  %v19564_v49 = vld [vmem:[#allocation186_spill] sm:$0xff] }
 0x87a   :  { %11759 = vmatpush1.bf16.msra.mxu1 %v19556_v16  ;;  %11665 = vmatprep.subr.bf16.mxu0 %v19557_v55  ;;  %v19565_v55 = vld [vmem:[#allocation188_spill] sm:$0xff]  ;;  %v19567_v16 = vld [vmem:[#allocation190_spill] sm:$0xff] }
 0x87b   :  { %11761 = vmatprep.subr.bf16.mxu1 %v19558_v58  ;;  %5007 = vmatprep.mubr.f32.mxu0 %v18494_v56  ;;  %v19566_v58 = vld [vmem:[#allocation189_spill] sm:$0xff] }
 0x87c   :  { %5149 = vmatprep.mubr.f32.mxu1 %v18494_v56 }
 0x87d   :  { %11667 = vmatpush1.bf16.msra.mxu0 %v19559_v34  ;;  %v19569_v34 = vld [vmem:[#allocation192_spill] sm:$0xff] }
 0x87e   :  { %11763 = vmatpush1.bf16.msra.mxu1 %v19560_v47  ;;  %11669 = vmatprep.subr.bf16.mxu0 %v19561_v12  ;;  %v19570_v47 = vld [vmem:[#allocation193_spill] sm:$0xff]  ;;  %v19571_v12 = vld [vmem:[#allocation194_spill] sm:$0xff] }
 0x87f   :  { %11765 = vmatprep.subr.bf16.mxu1 %v19562_v24  ;;  %v19572_v24 = vld [vmem:[#allocation195_spill] sm:$0xff] }
 0x881   :  { %11671 = vmatpush1.bf16.msra.mxu0 %v19563_v37  ;;  %v19573_v37 = vld [vmem:[#allocation196_spill] sm:$0xff] }
 0x882   :  { %11767 = vmatpush1.bf16.msra.mxu1 %v19564_v49  ;;  %11673 = vmatprep.subr.bf16.mxu0 %v19084_v19  ;;  %v19574_v49 = vld [vmem:[#allocation197_spill] sm:$0xff] }
 0x883   :  { %11769 = vmatprep.subr.bf16.mxu1 %v19565_v55  ;;  %v19575_v55 = vld [vmem:[#allocation199_spill] sm:$0xff] }
 0x885   :  { %11675 = vmatpush1.bf16.msra.mxu0 %v19566_v58  ;;  %v19576_v58 = vld [vmem:[#allocation200_spill] sm:$0xff] }
 0x886   :  { %11771 = vmatpush1.bf16.msra.mxu1 %v19567_v16  ;;  %11677 = vmatprep.subr.bf16.mxu0 %v19568_v2  ;;  %v19577_v16 = vld [vmem:[#allocation201_spill] sm:$0xff]  ;;  %v19578_v2 = vld [vmem:[#allocation202_spill] sm:$0xff] }
 0x887   :  { %11773 = vmatprep.subr.bf16.mxu1 %v19569_v34  ;;  %v19579_v34 = vld [vmem:[#allocation203_spill] sm:$0xff] }
 0x889   :  { %11679 = vmatpush1.bf16.msra.mxu0 %v19570_v47  ;;  %v19580_v47 = vld [vmem:[#allocation204_spill] sm:$0xff] }
 0x88a   :  { %11775 = vmatpush1.bf16.msra.mxu1 %v19571_v12  ;;  %11681 = vmatprep.subr.bf16.mxu0 %v19572_v24  ;;  %v19581_v12 = vld [vmem:[#allocation205_spill] sm:$0xff]  ;;  %v19582_v24 = vld [vmem:[#allocation206_spill] sm:$0xff] }
 0x88b   :  { %11777 = vmatprep.subr.bf16.mxu1 %v19573_v37  ;;  %v19583_v37 = vld [vmem:[#allocation207_spill] sm:$0xff] }
 0x88d   :  { %11683 = vmatpush1.bf16.msra.mxu0 %v19574_v49  ;;  %v19584_v49 = vld [vmem:[#allocation208_spill] sm:$0xff] }
 0x88e   :  { %11779 = vmatpush1.bf16.msra.mxu1 %v18854_v54  ;;  %11685 = vmatprep.subr.bf16.mxu0 %v19575_v55  ;;  %v19595_v55 = vld [vmem:[#allocation219_spill] sm:$0xff] }
 0x88f   :  { %11781 = vmatprep.subr.bf16.mxu1 %v19576_v58  ;;  %v19585_v58 = vld [vmem:[#allocation209_spill] sm:$0xff] }
 0x891   :  { %11687 = vmatpush1.bf16.msra.mxu0 %v19577_v16  ;;  %v19593_v16 = vld [vmem:[#allocation217_spill] sm:$0xff] }
 0x892   :  { %11783 = vmatpush1.bf16.msra.mxu1 %v19578_v2  ;;  %11689 = vmatprep.subr.bf16.mxu0 %v19579_v34  ;;  %v19586_v2 = vld [vmem:[#allocation210_spill] sm:$0xff]  ;;  %v19592_v34 = vld [vmem:[#allocation216_spill] sm:$0xff] }
 0x893   :  { %11785 = vmatprep.subr.bf16.mxu1 %v19580_v47  ;;  %v19587_v47 = vld [vmem:[#allocation211_spill] sm:$0xff] }
 0x895   :  { %11691 = vmatpush1.bf16.msra.mxu0 %v19581_v12  ;;  %v19588_v12 = vld [vmem:[#allocation212_spill] sm:$0xff] }
 0x896   :  { %11787 = vmatpush1.bf16.msra.mxu1 %v19582_v24  ;;  %11789 = vmatprep.subr.bf16.mxu0 %v19583_v37  ;;  %v19589_v24 = vld [vmem:[#allocation213_spill] sm:$0xff]  ;;  %v19590_v37 = vld [vmem:[#allocation214_spill] sm:$0xff] }
 0x897   :  { %11885 = vmatprep.subr.bf16.mxu1 %v19584_v49  ;;  %v19591_v49 = vld [vmem:[#allocation215_spill] sm:$0xff] }
 0x898   :  { %5008 = vmatmul.mubr.f32.vlgmr.msra.gmra.mrb[26].mxu0 %v16299_v28 }
 0x899   :  { %5150 = vmatmul.mubr.f32.vlgmr.msra.gmra.mrb[26].mxu1 %v16299_v28  ;;  %11791 = vmatpush1.bf16.msra.mxu0 %v19585_v58  ;;  %v19594_v58 = vld [vmem:[#allocation218_spill] sm:$0xff] }
 0x89a   :  { %5220 = vmatprep.mubr.f32.mxu0 %v16260_v59  ;;  %11887 = vmatpush1.bf16.msra.mxu1 %v19586_v2  ;;  %v19596_v2 = vld [vmem:[#allocation220_spill] sm:$0xff] }
 0x89b   :  { %5362 = vmatprep.mubr.f32.mxu1 %v16260_v59  ;;  %11793 = vmatprep.subr.bf16.mxu0 %v19587_v47  ;;  %v19597_v59 = vld [vmem:[#allocation221_spill] sm:$0xff]  ;;  %v19598_v47 = vld [vmem:[#allocation222_spill] sm:$0xff] }
 0x89c   :  { %11889 = vmatprep.subr.bf16.mxu1 %v19588_v12  ;;  %v19599_v12 = vld [vmem:[#allocation223_spill] sm:$0xff] }
 0x89d   :  { %11795 = vmatpush1.bf16.msra.mxu0 %v19589_v24  ;;  %v19600_v24 = vld [vmem:[#allocation224_spill] sm:$0xff] }
 0x89e   :  { %11891 = vmatpush1.bf16.msra.mxu1 %v19590_v37  ;;  %11797 = vmatprep.subr.bf16.mxu0 %v19591_v49  ;;  %v19601_v37 = vld [vmem:[#allocation225_spill] sm:$0xff]  ;;  %v19602_v49 = vld [vmem:[#allocation226_spill] sm:$0xff] }
 0x89f   :  { %11893 = vmatprep.subr.bf16.mxu1 %v19592_v34  ;;  %v19603_v34 = vld [vmem:[#allocation227_spill] sm:$0xff] }
 0x8a1   :  { %11799 = vmatpush1.bf16.msra.mxu0 %v19593_v16  ;;  %v19604_v16 = vld [vmem:[#allocation228_spill] sm:$0xff] }
 0x8a2   :  { %11895 = vmatpush1.bf16.msra.mxu1 %v19594_v58  ;;  %11801 = vmatprep.subr.bf16.mxu0 %v19595_v55  ;;  %v19605_v58 = vld [vmem:[#allocation229_spill] sm:$0xff]  ;;  %v19606_v55 = vld [vmem:[#allocation230_spill] sm:$0xff] }
 0x8a3   :  { %11897 = vmatprep.subr.bf16.mxu1 %v19596_v2  ;;  %v19607_v2 = vld [vmem:[#allocation231_spill] sm:$0xff] }
 0x8a5   :  { %11803 = vmatpush1.bf16.msra.mxu0 %v19597_v59  ;;  %v19608_v59 = vld [vmem:[#allocation232_spill] sm:$0xff] }
 0x8a6   :  { %11899 = vmatpush1.bf16.msra.mxu1 %v19598_v47  ;;  %11805 = vmatprep.subr.bf16.mxu0 %v19599_v12  ;;  %v19609_v47 = vld [vmem:[#allocation233_spill] sm:$0xff]  ;;  %v19610_v12 = vld [vmem:[#allocation234_spill] sm:$0xff] }
 0x8a7   :  { %11901 = vmatprep.subr.bf16.mxu1 %v19600_v24  ;;  %v19611_v24 = vld [vmem:[#allocation235_spill] sm:$0xff] }
 0x8a9   :  { %11807 = vmatpush1.bf16.msra.mxu0 %v19601_v37  ;;  %v19612_v37 = vld [vmem:[#allocation236_spill] sm:$0xff] }
 0x8aa   :  { %11903 = vmatpush1.bf16.msra.mxu1 %v19602_v49  ;;  %11809 = vmatprep.subr.bf16.mxu0 %v19603_v34  ;;  %v19613_v49 = vld [vmem:[#allocation237_spill] sm:$0xff]  ;;  %v19614_v34 = vld [vmem:[#allocation238_spill] sm:$0xff] }
 0x8ab   :  { %11905 = vmatprep.subr.bf16.mxu1 %v19604_v16  ;;  %v19615_v16 = vld [vmem:[#allocation239_spill] sm:$0xff] }
 0x8ad   :  { %11811 = vmatpush1.bf16.msra.mxu0 %v19605_v58 }
 0x8ae   :  { %11907 = vmatpush1.bf16.msra.mxu1 %v19606_v55  ;;  %11813 = vmatprep.subr.bf16.mxu0 %v19607_v2  ;;  %v19616_v55 = vld [vmem:[#allocation241_spill] sm:$0xff]  ;;  %v19617_v2 = vld [vmem:[#allocation242_spill] sm:$0xff] }
 0x8af   :  { %11909 = vmatprep.subr.bf16.mxu1 %v19608_v59  ;;  %v19618_v59 = vld [vmem:[#allocation243_spill] sm:$0xff] }
 0x8b1   :  { %11815 = vmatpush1.bf16.msra.mxu0 %v19609_v47  ;;  %v19619_v47 = vld [vmem:[#allocation244_spill] sm:$0xff] }
 0x8b2   :  { %11911 = vmatpush1.bf16.msra.mxu1 %v19610_v12  ;;  %11817 = vmatprep.subr.bf16.mxu0 %v19611_v24  ;;  %v19620_v12 = vld [vmem:[#allocation245_spill] sm:$0xff]  ;;  %v19621_v24 = vld [vmem:[#allocation246_spill] sm:$0xff] }
 0x8b3   :  { %11913 = vmatprep.subr.bf16.mxu1 %v19612_v37  ;;  %v19622_v37 = vld [vmem:[#allocation247_spill] sm:$0xff] }
 0x8b5   :  { %11819 = vmatpush1.bf16.msra.mxu0 %v19613_v49  ;;  %v19623_v49 = vld [vmem:[#allocation248_spill] sm:$0xff] }
 0x8b6   :  { %11915 = vmatpush1.bf16.msra.mxu1 %v19614_v34  ;;  %11821 = vmatprep.subr.bf16.mxu0 %v19615_v16  ;;  %v19624_v34 = vld [vmem:[#allocation249_spill] sm:$0xff]  ;;  %v19625_v16 = vld [vmem:[#allocation250_spill] sm:$0xff] }
 0x8b7   :  { %11917 = vmatprep.subr.bf16.mxu1 %v19376_v27 }
 0x8b9   :  { %11823 = vmatpush1.bf16.msra.mxu0 %v19616_v55 }
 0x8ba   :  { %11919 = vmatpush1.bf16.msra.mxu1 %v19617_v2  ;;  %11825 = vmatprep.subr.bf16.mxu0 %v19618_v59  ;;  %v19626_v2 = vld [vmem:[#allocation253_spill] sm:$0xff]  ;;  %v19627_v59 = vld [vmem:[#allocation254_spill] sm:$0xff] }
 0x8bb   :  { %11921 = vmatprep.subr.bf16.mxu1 %v19619_v47  ;;  %v19628_v47 = vld [vmem:[#allocation255_spill] sm:$0xff] }
 0x8bd   :  { %11827 = vmatpush1.bf16.msra.mxu0 %v19620_v12  ;;  %v19629_v12 = vld [vmem:[#allocation256_spill] sm:$0xff] }
 0x8be   :  { %11923 = vmatpush1.bf16.msra.mxu1 %v19621_v24  ;;  %11829 = vmatprep.subr.bf16.mxu0 %v19622_v37 }
 0x8bf   :  { %11925 = vmatprep.subr.bf16.mxu1 %v19623_v49  ;;  %v19630_v49 = vld [vmem:[#allocation259_spill] sm:$0xff] }
 0x8c1   :  { %11831 = vmatpush1.bf16.msra.mxu0 %v19624_v34  ;;  %v19631_v34 = vld [vmem:[#allocation260_spill] sm:$0xff] }
 0x8c2   :  { %11927 = vmatpush1.bf16.msra.mxu1 %v19625_v16  ;;  %11833 = vmatprep.subr.bf16.mxu0 %v19147_v44  ;;  %v19632_v16 = vld [vmem:[#allocation261_spill] sm:$0xff] }
 0x8c3   :  { %11929 = vmatprep.subr.bf16.mxu1 %v19387_v29 }
 0x8c5   :  { %11835 = vmatpush1.bf16.msra.mxu0 %v19626_v2 }
 0x8c6   :  { %11931 = vmatpush1.bf16.msra.mxu1 %v19627_v59  ;;  %11837 = vmatprep.subr.bf16.mxu0 %v19628_v47 }
 0x8c7   :  { %11933 = vmatprep.subr.bf16.mxu1 %v19629_v12 }
 0x8c9   :  { %11839 = vmatpush1.bf16.msra.mxu0 %v19392_v5 }
 0x8ca   :  { %11935 = vmatpush1.bf16.msra.mxu1 %v19393_v17  ;;  %11841 = vmatprep.subr.bf16.mxu0 %v19630_v49 }
 0x8cb   :  { %11937 = vmatprep.subr.bf16.mxu1 %v19631_v34 }
 0x8cd   :  { %11843 = vmatpush1.bf16.msra.mxu0 %v19632_v16  ;;  %v19689_v16 = vld [vmem:[#allocation43_spill] sm:$0xff] }
 0x8ce   :  { %11939 = vmatpush1.bf16.msra.mxu1 %v18918_v11  ;;  %11845 = vmatprep.subr.bf16.mxu0 %v19158_v57  ;;  %v19683_v57 = vld [vmem:[#allocation37_spill] sm:$0xff] }
 0x8cf   :  { %11941 = vmatprep.subr.bf16.mxu1 %v19397_v13  ;;  %v19687_v11 = vld [vmem:[#allocation41_spill] sm:$0xff] }
 0x8d1   :  { %11847 = vmatpush1.bf16.msra.mxu0 %v19398_v3  ;;  %v19645_v3 = vld [vmem:[#allocation287_spill] sm:$0xff] }
 0x8d2   :  { %11943 = vmatpush1.bf16.msra.mxu1 %v19399_v15  ;;  %11849 = vmatprep.subr.bf16.mxu0 %v19400_v45  ;;  %v19633_v15 = vld [vmem:[#allocation275_spill] sm:$0xff]  ;;  %v19634_v45 = vld [vmem:[#allocation276_spill] sm:$0xff] }
 0x8d3   :  { %11945 = vmatprep.subr.bf16.mxu1 %v19163_v1  ;;  %v19644_v1 = vld [vmem:[#allocation286_spill] sm:$0xff] }
 0x8d5   :  { %11851 = vmatpush1.bf16.msra.mxu0 %v19164_v51  ;;  %v19638_v51 = vld [vmem:[#allocation280_spill] sm:$0xff] }
 0x8d6   :  { %11947 = vmatpush1.bf16.msra.mxu1 %v19401_v31  ;;  %11853 = vmatprep.subr.bf16.mxu0 %v19402_v18  ;;  %v19635_v31 = vld [vmem:[#allocation277_spill] sm:$0xff]  ;;  %v19636_v18 = vld [vmem:[#allocation278_spill] sm:$0xff] }
 0x8d7   :  { %11949 = vmatprep.subr.bf16.mxu1 %v19403_v14  ;;  %v19637_v14 = vld [vmem:[#allocation279_spill] sm:$0xff] }
 0x8d8   :  { %5221 = vmatmul.mubr.f32.vlgmr.msra.gmra.mrb[28].mxu0 %v16256_v0 }
 0x8d9   :  { %5363 = vmatmul.mubr.f32.vlgmr.msra.gmra.mrb[28].mxu1 %v16256_v0  ;;  %11855 = vmatpush1.bf16.msra.mxu0 %v19168_v7  ;;  %v19639_v0 = vld [vmem:[#allocation281_spill] sm:$0xff]  ;;  %v19640_v7 = vld [vmem:[#allocation282_spill] sm:$0xff] }
 0x8da   :  { %11951 = vmatpush1.bf16.msra.mxu1 %v19169_v25  ;;  %11857 = vmatprep.subr.bf16.mxu0 %v19633_v15  ;;  %v19641_v25 = vld [vmem:[#allocation283_spill] sm:$0xff]  ;;  %v19642_v15 = vld [vmem:[#allocation284_spill] sm:$0xff] }
 0x8db   :  { %11953 = vmatprep.subr.bf16.mxu1 %v19634_v45  ;;  %5291 = vmatprep.mubr.f32.mxu0 %v18494_v56  ;;  %v19643_v45 = vld [vmem:[#allocation285_spill] sm:$0xff] }
 0x8dc   :  { %5433 = vmatprep.mubr.f32.mxu1 %v18494_v56 }
 0x8dd   :  { %11859 = vmatpush1.bf16.msra.mxu0 %v19635_v31  ;;  %v19646_v31 = vld [vmem:[#allocation288_spill] sm:$0xff] }
 0x8de   :  { %11955 = vmatpush1.bf16.msra.mxu1 %v19636_v18  ;;  %11861 = vmatprep.subr.bf16.mxu0 %v19637_v14  ;;  %v19647_v18 = vld [vmem:[#allocation289_spill] sm:$0xff]  ;;  %v19648_v14 = vld [vmem:[#allocation290_spill] sm:$0xff] }
 0x8df   :  { %11957 = vmatprep.subr.bf16.mxu1 %v19638_v51  ;;  %v19649_v51 = vld [vmem:[#allocation291_spill] sm:$0xff] }
 0x8e1   :  { %11863 = vmatpush1.bf16.msra.mxu0 %v19639_v0  ;;  %v19650_v0 = vld [vmem:[#allocation292_spill] sm:$0xff] }
 0x8e2   :  { %11959 = vmatpush1.bf16.msra.mxu1 %v19640_v7  ;;  %11865 = vmatprep.subr.bf16.mxu0 %v19641_v25  ;;  %v19651_v7 = vld [vmem:[#allocation293_spill] sm:$0xff]  ;;  %v19652_v25 = vld [vmem:[#allocation294_spill] sm:$0xff] }
 0x8e3   :  { %11961 = vmatprep.subr.bf16.mxu1 %v19642_v15  ;;  %v19653_v15 = vld [vmem:[#allocation295_spill] sm:$0xff] }
 0x8e5   :  { %11867 = vmatpush1.bf16.msra.mxu0 %v19643_v45  ;;  %v19654_v45 = vld [vmem:[#allocation296_spill] sm:$0xff] }
 0x8e6   :  { %11963 = vmatpush1.bf16.msra.mxu1 %v19644_v1  ;;  %11869 = vmatprep.subr.bf16.mxu0 %v19645_v3  ;;  %v19655_v1 = vld [vmem:[#allocation297_spill] sm:$0xff]  ;;  %v19656_v3 = vld [vmem:[#allocation298_spill] sm:$0xff] }
 0x8e7   :  { %11965 = vmatprep.subr.bf16.mxu1 %v19646_v31  ;;  %v19657_v31 = vld [vmem:[#allocation299_spill] sm:$0xff] }
 0x8e9   :  { %11871 = vmatpush1.bf16.msra.mxu0 %v19647_v18  ;;  %v19658_v18 = vld [vmem:[#allocation300_spill] sm:$0xff] }
 0x8ea   :  { %11967 = vmatpush1.bf16.msra.mxu1 %v19648_v14  ;;  %11873 = vmatprep.subr.bf16.mxu0 %v19649_v51  ;;  %v19659_v14 = vld [vmem:[#allocation301_spill] sm:$0xff]  ;;  %v19660_v51 = vld [vmem:[#allocation302_spill] sm:$0xff] }
 0x8eb   :  { %11969 = vmatprep.subr.bf16.mxu1 %v19650_v0  ;;  %v19661_v0 = vld [vmem:[#allocation15_spill] sm:$0xff] }
 0x8ed   :  { %11875 = vmatpush1.bf16.msra.mxu0 %v19651_v7  ;;  %v19662_v7 = vld [vmem:[#allocation16_spill] sm:$0xff] }
 0x8ee   :  { %11971 = vmatpush1.bf16.msra.mxu1 %v19652_v25  ;;  %11877 = vmatprep.subr.bf16.mxu0 %v19653_v15  ;;  %v19672_v15 = vld [vmem:[#allocation26_spill] sm:$0xff]  ;;  %v19682_v25 = vld [vmem:[#allocation36_spill] sm:$0xff] }
 0x8ef   :  { %11973 = vmatprep.subr.bf16.mxu1 %v19654_v45  ;;  %v19663_v45 = vld [vmem:[#allocation17_spill] sm:$0xff] }
 0x8f1   :  { %11879 = vmatpush1.bf16.msra.mxu0 %v19655_v1  ;;  %v19664_v1 = vld [vmem:[#allocation18_spill] sm:$0xff] }
 0x8f2   :  { %11975 = vmatpush1.bf16.msra.mxu1 %v19656_v3  ;;  %11881 = vmatprep.subr.bf16.mxu0 %v19657_v31  ;;  %v19665_v3 = vld [vmem:[#allocation19_spill] sm:$0xff]  ;;  %v19666_v31 = vld [vmem:[#allocation20_spill] sm:$0xff] }
 0x8f3   :  { %11977 = vmatprep.subr.bf16.mxu1 %v19658_v18  ;;  %v19667_v18 = vld [vmem:[#allocation21_spill] sm:$0xff] }
 0x8f5   :  { %11883 = vmatpush1.bf16.msra.mxu0 %v19659_v14  ;;  %v19668_v14 = vld [vmem:[#allocation22_spill] sm:$0xff] }
 0x8f6   :  { %11979 = vmatpush1.bf16.msra.mxu1 %v19660_v51  ;;  %11981 = vmatprep.subr.bf16.mxu0 %v19661_v0  ;;  %v19669_v51 = vld [vmem:[#allocation23_spill] sm:$0xff]  ;;  %v19670_v0 = vld [vmem:[#allocation24_spill] sm:$0xff] }
 0x8f7   :  { %12077 = vmatprep.subr.bf16.mxu1 %v19662_v7  ;;  %v19671_v7 = vld [vmem:[#allocation25_spill] sm:$0xff] }
 0x8f8   :  { %5292 = vmatmul.mubr.f32.vlgmr.msra.gmra.mrb[28].mxu0 %v16299_v28 }
 0x8f9   :  { %5434 = vmatmul.mubr.f32.vlgmr.msra.gmra.mrb[28].mxu1 %v16299_v28  ;;  %11983 = vmatpush1.bf16.msra.mxu0 %v19663_v45  ;;  %v19673_v28 = vld [vmem:[#allocation27_spill] sm:$0xff]  ;;  %v19674_v45 = vld [vmem:[#allocation28_spill] sm:$0xff] }
 0x8fa   :  { %12079 = vmatpush1.bf16.msra.mxu1 %v19664_v1  ;;  %11985 = vmatprep.subr.bf16.mxu0 %v19665_v3  ;;  %v19675_v1 = vld [vmem:[#allocation29_spill] sm:$0xff]  ;;  %v19676_v3 = vld [vmem:[#allocation30_spill] sm:$0xff] }
 0x8fb   :  { %12081 = vmatprep.subr.bf16.mxu1 %v19666_v31  ;;  %v19677_v31 = vld [vmem:[#allocation31_spill] sm:$0xff] }
 0x8fd   :  { %11987 = vmatpush1.bf16.msra.mxu0 %v19667_v18  ;;  %v19678_v18 = vld [vmem:[#allocation32_spill] sm:$0xff] }
 0x8fe   :  { %12083 = vmatpush1.bf16.msra.mxu1 %v19668_v14  ;;  %11989 = vmatprep.subr.bf16.mxu0 %v19669_v51  ;;  %v19679_v14 = vld [vmem:[#allocation33_spill] sm:$0xff]  ;;  %v19680_v51 = vld [vmem:[#allocation34_spill] sm:$0xff] }
 0x8ff   :  { %12085 = vmatprep.subr.bf16.mxu1 %v19670_v0  ;;  %v19681_v0 = vld [vmem:[#allocation35_spill] sm:$0xff] }
 0x901   :  { %11991 = vmatpush1.bf16.msra.mxu0 %v19671_v7 }
 0x902   :  { %12087 = vmatpush1.bf16.msra.mxu1 %v19672_v15  ;;  %11993 = vmatprep.subr.bf16.mxu0 %v19673_v28 }
 0x903   :  { %12089 = vmatprep.subr.bf16.mxu1 %v19674_v45 }
 0x905   :  { %11995 = vmatpush1.bf16.msra.mxu0 %v19675_v1 }
 0x906   :  { %12091 = vmatpush1.bf16.msra.mxu1 %v19676_v3  ;;  %11997 = vmatprep.subr.bf16.mxu0 %v19677_v31  ;;  %v19684_v3 = vld [vmem:[#allocation38_spill] sm:$0xff]  ;;  %v19685_v31 = vld [vmem:[#allocation39_spill] sm:$0xff] }
 0x907   :  { %12093 = vmatprep.subr.bf16.mxu1 %v19678_v18  ;;  %v19686_v18 = vld [vmem:[#allocation40_spill] sm:$0xff] }
 0x909   :  { %11999 = vmatpush1.bf16.msra.mxu0 %v19679_v14 }
 0x90a   :  { %12095 = vmatpush1.bf16.msra.mxu1 %v19680_v51  ;;  %12001 = vmatprep.subr.bf16.mxu0 %v19681_v0 }
 0x90b   :  { %v4725_v7 = vpop.f32.mrb[24].mxu0  ;;  %v4867_v15 = vpop.f32.mrb[24].mxu1  ;;  %12097 = vmatprep.subr.bf16.mxu1 %v19682_v25  ;;  %v19688_v25 = vld [vmem:[#allocation42_spill] sm:$0xff] }
 0x90c   :  { %v4727_v28 = vpop.f32.mrb[25].mxu0  ;;  %v4869_v45 = vpop.f32.mrb[25].mxu1 }
 0x90d   :  { %v5452_v13 = vcombine.low %v4725_v7, %v4727_v28  ;;  %v5453_v1 = vcombine.low %v4867_v15, %v4869_v45  ;;  %12003 = vmatpush1.bf16.msra.mxu0 %v19683_v57  ;;  %v19690_v7 = vld [vmem:[#allocation44_spill] sm:$0xff]  ;;  %v19691_v45 = vld [vmem:[#allocation45_spill] sm:$0xff]  ;;  %v19692_v15 = vld [vmem:[#allocation46_spill] sm:$0xff] }
 0x90e   :  { %12099 = vmatpush1.bf16.msra.mxu1 %v19684_v3  ;;  %12005 = vmatprep.subr.bf16.mxu0 %v19685_v31  ;;  %v19693_v28 = vld [vmem:[#allocation47_spill] sm:$0xff] }
 0x90f   :  { %v5460_v14 = vrot.slane %v5452_v13, %v15159_v32  ;;  %v5467_v51 = vrot.slane %v5453_v1, %v15159_v32  ;;  %12101 = vmatprep.subr.bf16.mxu1 %v19686_v18  ;;  %v19694_v13 = vld [vmem:[#allocation48_spill] sm:$0xff]  ;;  %v19695_v1 = vld [vmem:[#allocation49_spill] sm:$0xff]  ;;  %v19696_v18 = vld [vmem:[#allocation50_spill] sm:$0xff] }
 0x911   :  { %v5468_v0 = vcombine.low %v5460_v14, %v5467_v51  ;;  %12007 = vmatpush1.bf16.msra.mxu0 %v19687_v11  ;;  %v19697_v51 = vld [vmem:[#allocation51_spill] sm:$0xff]  ;;  %v19698_v14 = vld [vmem:[#allocation52_spill] sm:$0xff] }
 0x912   :  { %12103 = vmatpush1.bf16.msra.mxu1 %v19688_v25  ;;  %12009 = vmatprep.subr.bf16.mxu0 %v19689_v16  ;;  %v19699_v25 = vld [vmem:[#allocation53_spill] sm:$0xff]  ;;  %v19700_v16 = vld [vmem:[#allocation54_spill] sm:$0xff] }
 0x913   :  { %12105 = vmatprep.subr.bf16.mxu1 %v19690_v7  ;;  %v19701_v7 = vld [vmem:[#allocation55_spill] sm:$0xff] }
 0x915   :  { %12011 = vmatpush1.bf16.msra.mxu0 %v19691_v45  ;;  %v19702_v45 = vld [vmem:[#allocation56_spill] sm:$0xff] }
 0x916   :  { %12107 = vmatpush1.bf16.msra.mxu1 %v19692_v15  ;;  %12013 = vmatprep.subr.bf16.mxu0 %v19693_v28  ;;  %v19703_v15 = vld [vmem:[#allocation57_spill] sm:$0xff]  ;;  %v19704_v28 = vld [vmem:[#allocation58_spill] sm:$0xff] }
 0x917   :  { %12109 = vmatprep.subr.bf16.mxu1 %v19694_v13  ;;  %v19705_v13 = vld [vmem:[#allocation59_spill] sm:$0xff] }
 0x919   :  { %12015 = vmatpush1.bf16.msra.mxu0 %v19695_v1  ;;  %v19706_v1 = vld [vmem:[#allocation60_spill] sm:$0xff] }
 0x91a   :  { %12111 = vmatpush1.bf16.msra.mxu1 %v19696_v18  ;;  %12017 = vmatprep.subr.bf16.mxu0 %v19697_v51  ;;  %v19707_v18 = vld [vmem:[#allocation61_spill] sm:$0xff]  ;;  %v19708_v51 = vld [vmem:[#allocation62_spill] sm:$0xff] }
 0x91b   :  { %12113 = vmatprep.subr.bf16.mxu1 %v19698_v14  ;;  %v19709_v14 = vld [vmem:[#allocation63_spill] sm:$0xff] }
 0x91d   :  { %12019 = vmatpush1.bf16.msra.mxu0 %v19699_v25  ;;  %v19710_v25 = vld [vmem:[#allocation64_spill] sm:$0xff] }
 0x91e   :  { %12115 = vmatpush1.bf16.msra.mxu1 %v19700_v16  ;;  %12021 = vmatprep.subr.bf16.mxu0 %v19701_v7  ;;  %v19711_v16 = vld [vmem:[#allocation65_spill] sm:$0xff]  ;;  %v19712_v7 = vld [vmem:[#allocation66_spill] sm:$0xff] }
 0x91f   :  { %12117 = vmatprep.subr.bf16.mxu1 %v19702_v45  ;;  %v19713_v45 = vld [vmem:[#allocation67_spill] sm:$0xff] }
 0x921   :  { %12023 = vmatpush1.bf16.msra.mxu0 %v19703_v15  ;;  %v19714_v15 = vld [vmem:[#allocation68_spill] sm:$0xff] }
 0x922   :  { %12119 = vmatpush1.bf16.msra.mxu1 %v19704_v28  ;;  %12025 = vmatprep.subr.bf16.mxu0 %v19705_v13  ;;  %v19715_v28 = vld [vmem:[#allocation69_spill] sm:$0xff]  ;;  %v19716_v13 = vld [vmem:[#allocation70_spill] sm:$0xff] }
 0x923   :  { %12121 = vmatprep.subr.bf16.mxu1 %v19706_v1  ;;  %v19717_v1 = vld [vmem:[#allocation71_spill] sm:$0xff] }
 0x925   :  { %12027 = vmatpush1.bf16.msra.mxu0 %v19707_v18  ;;  %v19718_v18 = vld [vmem:[#allocation72_spill] sm:$0xff] }
 0x926   :  { %12123 = vmatpush1.bf16.msra.mxu1 %v19708_v51  ;;  %12029 = vmatprep.subr.bf16.mxu0 %v19709_v14  ;;  %v19719_v51 = vld [vmem:[#allocation73_spill] sm:$0xff]  ;;  %v19720_v14 = vld [vmem:[#allocation74_spill] sm:$0xff] }
 0x927   :  { %12125 = vmatprep.subr.bf16.mxu1 %v19710_v25  ;;  %v19721_v25 = vld [vmem:[#allocation75_spill] sm:$0xff] }
 0x929   :  { %12031 = vmatpush1.bf16.msra.mxu0 %v19711_v16  ;;  %v19722_v16 = vld [vmem:[#allocation76_spill] sm:$0xff] }
 0x92a   :  { %12127 = vmatpush1.bf16.msra.mxu1 %v19712_v7  ;;  %12033 = vmatprep.subr.bf16.mxu0 %v19713_v45  ;;  %v19723_v7 = vld [vmem:[#allocation77_spill] sm:$0xff]  ;;  %v19724_v45 = vld [vmem:[#allocation78_spill] sm:$0xff] }
 0x92b   :  { %12129 = vmatprep.subr.bf16.mxu1 %v19714_v15  ;;  %v19725_v15 = vld [vmem:[#allocation79_spill] sm:$0xff] }
 0x92d   :  { %12035 = vmatpush1.bf16.msra.mxu0 %v19715_v28  ;;  %v19726_v28 = vld [vmem:[#allocation80_spill] sm:$0xff] }
 0x92e   :  { %12131 = vmatpush1.bf16.msra.mxu1 %v19716_v13  ;;  %12037 = vmatprep.subr.bf16.mxu0 %v19717_v1 }
 0x92f   :  { %12133 = vmatprep.subr.bf16.mxu1 %v19718_v18 }
 0x931   :  { %12039 = vmatpush1.bf16.msra.mxu0 %v19719_v51 }
 0x932   :  { %12135 = vmatpush1.bf16.msra.mxu1 %v19720_v14  ;;  %12041 = vmatprep.subr.bf16.mxu0 %v19721_v25  ;;  %v8936_v25 = vld [vmem:[%s17789_s0 + $0x60] sm:$0xff] }
 0x933   :  { %12137 = vmatprep.subr.bf16.mxu1 %v19722_v16 }
 0x935   :  { %12043 = vmatpush1.bf16.msra.mxu0 %v19723_v7 }
 0x936   :  { %12139 = vmatpush1.bf16.msra.mxu1 %v19724_v45  ;;  %12045 = vmatprep.subr.bf16.mxu0 %v19725_v15  ;;  %v8937_v15 = vld [vmem:[%s17789_s0 + $0x68] sm:$0xff]  ;;  %v5506_v45 = vadd.f32 %v8936_v25, %v5468_v0 }
 0x937   :  { %12141 = vmatprep.subr.bf16.mxu1 %v19726_v28 }
 0x938   :  { %v5517_v3 = vrot.slane %v5506_v45, 6 }
 0x96b   :  { %v5009_v13 = vpop.f32.mrb[26].mxu0 }
 0x96c   :  { %v5151_v1 = vpop.f32.mrb[26].mxu1  ;;  %v5011_v11 = vpop.f32.mrb[27].mxu0 }
 0x96d   :  { %v5469_v18 = vcombine.low %v5009_v13, %v5011_v11  ;;  %v5153_v31 = vpop.f32.mrb[27].mxu1  ;;  %v8939_v13 = vmul.f32 -1.442695, %v5506_v45 }
 0x96e   :  { %v5470_v51 = vcombine.low %v5151_v1, %v5153_v31 }
 0x96f   :  { %v5477_v16 = vrot.slane %v5469_v18, %v15159_v32 }
 0x970   :  { %v5484_v7 = vrot.slane %v5470_v51, %v15159_v32 }
 0x972   :  { %v5485_v28 = vcombine.low %v5477_v16, %v5484_v7 }
 0x974   :  { %v5507_v14 = vadd.f32 %v8937_v15, %v5485_v28 }
 0x976   :  { %v5518_v57 = vrot.slane %v5507_v14, 6  ;;  %v5528_v15 = vrot.slane %v5507_v14, 4 }
 0x978   :  { %v5519_v11 = vsel %vm1589_vm0, %v5517_v3, %v5518_v57  ;;  %v8938_v57 = vld [vmem:[%s17789_s0 + $0x70] sm:$0xff] }
 0x979   :  { %v8940_v31 = vmul.f32 -1.442695, %v5519_v11 }
 0x97b   :  { %13953 = vpow2.f32 %v8940_v31 }
 0x97c   :  { %13955 = vpow2.f32 %v8939_v13 }
 0x985   :  { %v13954_v12 = vpop.eup %13953 }
 0x986   :  { %v13956_v16 = vpop.eup %13955  ;;  %v5524_v0 = vadd.f32 1.0, %v13954_v12 }
 0x987   :  { %v5512_v7 = vadd.f32 1.0, %v13956_v16 }
 0x988   :  { %13957 = vrcp.f32 %v5524_v0  ;;  %v19728_v0 = vld [vmem:[#allocation108_spill] sm:$0xff] }
 0x989   :  { %13959 = vrcp.f32 %v5512_v7 }
 0x9cb   :  { %v5293_v1 = vpop.f32.mrb[28].mxu0 }
 0x9cc   :  { %v5435_v34 = vpop.f32.mrb[28].mxu1  ;;  %v5295_v18 = vpop.f32.mrb[29].mxu0 }
 0x9cd   :  { %v5486_v49 = vcombine.low %v5293_v1, %v5295_v18  ;;  %v5437_v51 = vpop.f32.mrb[29].mxu1 }
 0x9ce   :  { %v5487_v17 = vcombine.low %v5435_v34, %v5437_v51 }
 0x9cf   :  { %v5494_v5 = vrot.slane %v5486_v49, %v15159_v32 }
 0x9d0   :  { %v5501_v25 = vrot.slane %v5487_v17, %v15159_v32  ;;  %v13958_v17 = vpop.eup %13957 }
 0x9d1   :  { %v13960_v31 = vpop.eup %13959  ;;  %v5541_v18 = vmul.f32 %v13958_v17, %v16252_v21  ;;  %v19727_v21 = vld [vmem:[#allocation107_spill] sm:$0xff]  ;;  %v19734_v17 = vld [vmem:[#allocation114_spill] sm:$0xff] }
 0x9d2   :  { %v5502_v3 = vcombine.low %v5494_v5, %v5501_v25 }
 0x9d4   :  { %v5508_v45 = vadd.f32 %v8938_v57, %v5502_v3 }
 0x9d6   :  { %v5529_v28 = vrot.slane %v5508_v45, 4  ;;  %v5533_v11 = vrot.slane %v5508_v45, 2  ;;  %v19729_v45 = vld [vmem:[#allocation109_spill] sm:$0xff] }
 0x9d8   :  { %v5530_v34 = vsel %vm1601_vm1, %v5528_v15, %v5529_v28  ;;  %v8941_v49 = vmul.f32 -1.442695, %v5533_v11  ;;  %v19730_v15 = vld [vmem:[#allocation110_spill] sm:$0xff]  ;;  %v19731_v11 = vld [vmem:[#allocation111_spill] sm:$0xff] }
 0x9d9   :  { %13961 = vtanh.f32 %v5530_v34  ;;  %v19732_v34 = vld [vmem:[#allocation112_spill] sm:$0xff] }
 0x9da   :  { %13963 = vpow2.f32 %v8941_v49  ;;  %v19733_v49 = vld [vmem:[#allocation113_spill] sm:$0xff] }
 0x9e3   :  { %v13962_v13 = vpop.eup %13961 }
 0x9e4   :  { %v13964_v1 = vpop.eup %13963  ;;  %v5542_v5 = vmul.f32 %v13962_v13, %v13960_v31  ;;  %v19735_v31 = vld [vmem:[#allocation115_spill] sm:$0xff]  ;;  %v19736_v13 = vld [vmem:[#allocation116_spill] sm:$0xff] }
 0x9e5   :  { %v5538_v12 = vadd.f32 1.0, %v13964_v1  ;;  %v19737_v1 = vld [vmem:[#allocation117_spill] sm:$0xff] }
 0x9e6   :  { %v16595_v51 = vadd.f32 %v5542_v5, %v5541_v18  ;;  %v19738_v18 = vld [vmem:[#allocation118_spill] sm:$0xff]  ;;  %v19739_v5 = vld [vmem:[#allocation119_spill] sm:$0xff] }
 0x9e7   :  { %13965 = vrcp.f32 %v5538_v12  ;;  %v19740_v12 = vld [vmem:[#allocation120_spill] sm:$0xff] }
 0x9e8   :  { %13967 = vtanh.f32 %v16595_v51 }
 0x9f1   :  { %v13966_v14 = vpop.eup %13965 }
 0x9f2   :  { %v13968_v25 = vpop.eup %13967 }
 0x9f3   :  { %v5545_v16 = vmul.f32 %v13968_v25, %v13966_v14  ;;  %v19741_v14 = vld [vmem:[#allocation121_spill] sm:$0xff]  ;;  %v19742_v25 = vld [vmem:[#allocation122_spill] sm:$0xff] }
 0x9f5   :  { %v16599_v57 = vrot.slane %v5545_v16, %v15159_v32  ;;  %v5551_v7 = vcombine.high %v5545_v16, %v5545_v16  ;;  %v19743_v16 = vld [vmem:[#allocation123_spill] sm:$0xff] }
 0x9f7   :  { %v16603_v3 = vcombine.high %v16599_v57, %v16599_v57  ;;  %v16642_v28 = vrot.slane %v5551_v7, %v15159_v32  ;;  %v19744_v7 = vld [vmem:[#allocation124_spill] sm:$0xff] }
 0x9f9   :  { %5634 = vmatprep.mubr.f32.mxu0 %v16603_v3  ;;  %5776 = vmatprep.mubr.f32.mxu1 %v16603_v3 }
 0x9fa   :  { %5635 = vmatmul.mubr.f32.vlgmr.msra.gmra.mrb[30].mxu0 %v16599_v57  ;;  %5777 = vmatmul.mubr.f32.vlgmr.msra.gmra.mrb[30].mxu1 %v16599_v57 }
 0x9fb   :  { %12047 = vmatpush1.bf16.msra.mxu0 %v18737_v46  ;;  %12143 = vmatpush1.bf16.msra.mxu1 %v18738_v30 }
 0x9fc   :  { %12049 = vmatprep.subr.bf16.mxu0 %v18739_v33  ;;  %12145 = vmatprep.subr.bf16.mxu1 %v18740_v23 }
 0x9fd   :  { %5705 = vmatprep.mubr.f32.mxu0 %v18494_v56  ;;  %5847 = vmatprep.mubr.f32.mxu1 %v18494_v56 }
 0x9ff   :  { %12051 = vmatpush1.bf16.msra.mxu0 %v18741_v10  ;;  %12147 = vmatpush1.bf16.msra.mxu1 %v18983_v38 }
 0xa00   :  { %12053 = vmatprep.subr.bf16.mxu0 %v18984_v43  ;;  %12149 = vmatprep.subr.bf16.mxu1 %v18985_v50 }
 0xa03   :  { %12055 = vmatpush1.bf16.msra.mxu0 %v18986_v39  ;;  %12151 = vmatpush1.bf16.msra.mxu1 %v18987_v40 }
 0xa04   :  { %12057 = vmatprep.subr.bf16.mxu0 %v18988_v62  ;;  %12153 = vmatprep.subr.bf16.mxu1 %v18989_v36 }
 0xa07   :  { %12059 = vmatpush1.bf16.msra.mxu0 %v19231_v63  ;;  %12155 = vmatpush1.bf16.msra.mxu1 %v19232_v48 }
 0xa08   :  { %12061 = vmatprep.subr.bf16.mxu0 %v19233_v4  ;;  %12157 = vmatprep.subr.bf16.mxu1 %v19234_v8 }
 0xa0b   :  { %12063 = vmatpush1.bf16.msra.mxu0 %v19235_v9  ;;  %12159 = vmatpush1.bf16.msra.mxu1 %v19236_v53 }
 0xa0c   :  { %12065 = vmatprep.subr.bf16.mxu0 %v19237_v6  ;;  %12161 = vmatprep.subr.bf16.mxu1 %v19479_v26 }
 0xa0f   :  { %12067 = vmatpush1.bf16.msra.mxu0 %v19480_v52  ;;  %12163 = vmatpush1.bf16.msra.mxu1 %v19481_v61 }
 0xa10   :  { %12069 = vmatprep.subr.bf16.mxu0 %v19482_v60  ;;  %12165 = vmatprep.subr.bf16.mxu1 %v19483_v41 }
 0xa13   :  { %12071 = vmatpush1.bf16.msra.mxu0 %v19484_v42  ;;  %12167 = vmatpush1.bf16.msra.mxu1 %v19485_v20 }
 0xa14   :  { %12073 = vmatprep.subr.bf16.mxu0 %v19727_v21  ;;  %12169 = vmatprep.subr.bf16.mxu1 %v19728_v0 }
 0xa17   :  { %12075 = vmatpush1.bf16.msra.mxu0 %v19729_v45  ;;  %12171 = vmatpush1.bf16.msra.mxu1 %v19730_v15 }
 0xa18   :  { %12173 = vmatprep.subr.bf16.mxu0 %v19731_v11  ;;  %12269 = vmatprep.subr.bf16.mxu1 %v19732_v34 }
 0xa1a   :  { %5706 = vmatmul.mubr.f32.vlgmr.msra.gmra.mrb[30].mxu0 %v16642_v28  ;;  %5848 = vmatmul.mubr.f32.vlgmr.msra.gmra.mrb[30].mxu1 %v16642_v28 }
 0xa1b   :  { %12175 = vmatpush1.bf16.msra.mxu0 %v19733_v49  ;;  %5918 = vmatprep.mubr.f32.mxu0 %v16603_v3 }
 0xa1c   :  { %12271 = vmatpush1.bf16.msra.mxu1 %v19734_v17  ;;  %6060 = vmatprep.mubr.f32.mxu1 %v16603_v3  ;;  %v19745_v17 = vld [vmem:[#allocation125_spill] sm:$0xff] }
 0xa1d   :  { %12177 = vmatprep.subr.bf16.mxu0 %v19735_v31  ;;  %12273 = vmatprep.subr.bf16.mxu1 %v19736_v13  ;;  %v19746_v31 = vld [vmem:[#allocation126_spill] sm:$0xff]  ;;  %v19747_v13 = vld [vmem:[#allocation127_spill] sm:$0xff] }
 0xa1f   :  { %12179 = vmatpush1.bf16.msra.mxu0 %v19737_v1  ;;  %v19748_v1 = vld [vmem:[#allocation128_spill] sm:$0xff] }
 0xa20   :  { %12275 = vmatpush1.bf16.msra.mxu1 %v19738_v18  ;;  %12181 = vmatprep.subr.bf16.mxu0 %v19739_v5  ;;  %v19749_v18 = vld [vmem:[#allocation129_spill] sm:$0xff]  ;;  %v19750_v5 = vld [vmem:[#allocation130_spill] sm:$0xff] }
 0xa21   :  { %12277 = vmatprep.subr.bf16.mxu1 %v19740_v12  ;;  %v19751_v12 = vld [vmem:[#allocation131_spill] sm:$0xff] }
 0xa23   :  { %12183 = vmatpush1.bf16.msra.mxu0 %v19741_v14  ;;  %v19752_v14 = vld [vmem:[#allocation132_spill] sm:$0xff] }
 0xa24   :  { %12279 = vmatpush1.bf16.msra.mxu1 %v19742_v25  ;;  %12185 = vmatprep.subr.bf16.mxu0 %v19743_v16  ;;  %v19753_v25 = vld [vmem:[#allocation133_spill] sm:$0xff]  ;;  %v19754_v16 = vld [vmem:[#allocation134_spill] sm:$0xff] }
 0xa25   :  { %12281 = vmatprep.subr.bf16.mxu1 %v19744_v7  ;;  %v19755_v7 = vld [vmem:[#allocation135_spill] sm:$0xff] }
 0xa27   :  { %12187 = vmatpush1.bf16.msra.mxu0 %v19745_v17  ;;  %v19756_v17 = vld [vmem:[#allocation136_spill] sm:$0xff] }
 0xa28   :  { %12283 = vmatpush1.bf16.msra.mxu1 %v19746_v31  ;;  %12189 = vmatprep.subr.bf16.mxu0 %v19747_v13  ;;  %v19757_v31 = vld [vmem:[#allocation137_spill] sm:$0xff]  ;;  %v19758_v13 = vld [vmem:[#allocation138_spill] sm:$0xff] }
 0xa29   :  { %12285 = vmatprep.subr.bf16.mxu1 %v19748_v1  ;;  %v19759_v1 = vld [vmem:[#allocation139_spill] sm:$0xff] }
 0xa2b   :  { %12191 = vmatpush1.bf16.msra.mxu0 %v19749_v18  ;;  %v19760_v18 = vld [vmem:[#allocation140_spill] sm:$0xff] }
 0xa2c   :  { %12287 = vmatpush1.bf16.msra.mxu1 %v19750_v5  ;;  %12193 = vmatprep.subr.bf16.mxu0 %v19751_v12  ;;  %v19761_v5 = vld [vmem:[#allocation141_spill] sm:$0xff]  ;;  %v19762_v12 = vld [vmem:[#allocation142_spill] sm:$0xff] }
 0xa2d   :  { %12289 = vmatprep.subr.bf16.mxu1 %v19752_v14  ;;  %v19763_v14 = vld [vmem:[#allocation143_spill] sm:$0xff] }
 0xa2f   :  { %12195 = vmatpush1.bf16.msra.mxu0 %v19753_v25  ;;  %v19764_v25 = vld [vmem:[#allocation144_spill] sm:$0xff] }
 0xa30   :  { %12291 = vmatpush1.bf16.msra.mxu1 %v19754_v16  ;;  %12197 = vmatprep.subr.bf16.mxu0 %v19755_v7  ;;  %v19765_v16 = vld [vmem:[#allocation145_spill] sm:$0xff]  ;;  %v19766_v7 = vld [vmem:[#allocation146_spill] sm:$0xff] }
 0xa31   :  { %12293 = vmatprep.subr.bf16.mxu1 %v19756_v17  ;;  %v19767_v17 = vld [vmem:[#allocation147_spill] sm:$0xff] }
 0xa33   :  { %12199 = vmatpush1.bf16.msra.mxu0 %v19757_v31  ;;  %v19768_v31 = vld [vmem:[#allocation148_spill] sm:$0xff] }
 0xa34   :  { %12295 = vmatpush1.bf16.msra.mxu1 %v19758_v13  ;;  %12201 = vmatprep.subr.bf16.mxu0 %v19759_v1  ;;  %v19769_v13 = vld [vmem:[#allocation149_spill] sm:$0xff]  ;;  %v19770_v1 = vld [vmem:[#allocation150_spill] sm:$0xff] }
 0xa35   :  { %12297 = vmatprep.subr.bf16.mxu1 %v19760_v18  ;;  %v19771_v18 = vld [vmem:[#allocation151_spill] sm:$0xff] }
 0xa37   :  { %12203 = vmatpush1.bf16.msra.mxu0 %v19761_v5  ;;  %v19772_v5 = vld [vmem:[#allocation152_spill] sm:$0xff] }
 0xa38   :  { %12299 = vmatpush1.bf16.msra.mxu1 %v19762_v12  ;;  %12205 = vmatprep.subr.bf16.mxu0 %v19763_v14  ;;  %v19773_v12 = vld [vmem:[#allocation153_spill] sm:$0xff]  ;;  %v19774_v14 = vld [vmem:[#allocation154_spill] sm:$0xff] }
 0xa39   :  { %12301 = vmatprep.subr.bf16.mxu1 %v19764_v25 }
 0xa3b   :  { %12207 = vmatpush1.bf16.msra.mxu0 %v19765_v16  ;;  %v19775_v16 = vld [vmem:[#allocation156_spill] sm:$0xff] }
 0xa3c   :  { %12303 = vmatpush1.bf16.msra.mxu1 %v19766_v7  ;;  %12209 = vmatprep.subr.bf16.mxu0 %v19767_v17  ;;  %v19776_v7 = vld [vmem:[#allocation157_spill] sm:$0xff]  ;;  %v19777_v17 = vld [vmem:[#allocation158_spill] sm:$0xff] }
 0xa3d   :  { %12305 = vmatprep.subr.bf16.mxu1 %v19768_v31  ;;  %v19778_v31 = vld [vmem:[#allocation159_spill] sm:$0xff] }
 0xa3f   :  { %12211 = vmatpush1.bf16.msra.mxu0 %v19769_v13  ;;  %v19779_v13 = vld [vmem:[#allocation160_spill] sm:$0xff] }
 0xa40   :  { %12307 = vmatpush1.bf16.msra.mxu1 %v19770_v1  ;;  %12213 = vmatprep.subr.bf16.mxu0 %v19771_v18  ;;  %v19780_v1 = vld [vmem:[#allocation161_spill] sm:$0xff]  ;;  %v19781_v18 = vld [vmem:[#allocation162_spill] sm:$0xff] }
 0xa41   :  { %12309 = vmatprep.subr.bf16.mxu1 %v19772_v5  ;;  %v19782_v5 = vld [vmem:[#allocation163_spill] sm:$0xff] }
 0xa43   :  { %12215 = vmatpush1.bf16.msra.mxu0 %v19773_v12  ;;  %v19783_v12 = vld [vmem:[#allocation164_spill] sm:$0xff] }
 0xa44   :  { %12311 = vmatpush1.bf16.msra.mxu1 %v19774_v14  ;;  %12217 = vmatprep.subr.bf16.mxu0 %v19534_v35  ;;  %v19784_v14 = vld [vmem:[#allocation165_spill] sm:$0xff] }
 0xa45   :  { %12313 = vmatprep.subr.bf16.mxu1 %v19775_v16  ;;  %v19785_v16 = vld [vmem:[#allocation167_spill] sm:$0xff] }
 0xa47   :  { %12219 = vmatpush1.bf16.msra.mxu0 %v19776_v7  ;;  %v19786_v7 = vld [vmem:[#allocation168_spill] sm:$0xff] }
 0xa48   :  { %12315 = vmatpush1.bf16.msra.mxu1 %v19777_v17  ;;  %12221 = vmatprep.subr.bf16.mxu0 %v19778_v31  ;;  %v19787_v17 = vld [vmem:[#allocation169_spill] sm:$0xff]  ;;  %v19788_v31 = vld [vmem:[#allocation170_spill] sm:$0xff] }
 0xa49   :  { %12317 = vmatprep.subr.bf16.mxu1 %v19779_v13  ;;  %v19789_v13 = vld [vmem:[#allocation171_spill] sm:$0xff] }
 0xa4b   :  { %12223 = vmatpush1.bf16.msra.mxu0 %v19780_v1  ;;  %v19790_v1 = vld [vmem:[#allocation172_spill] sm:$0xff] }
 0xa4c   :  { %12319 = vmatpush1.bf16.msra.mxu1 %v19781_v18  ;;  %12225 = vmatprep.subr.bf16.mxu0 %v19782_v5  ;;  %v19791_v18 = vld [vmem:[#allocation173_spill] sm:$0xff]  ;;  %v19792_v5 = vld [vmem:[#allocation174_spill] sm:$0xff] }
 0xa4d   :  { %12321 = vmatprep.subr.bf16.mxu1 %v19783_v12  ;;  %v19793_v12 = vld [vmem:[#allocation175_spill] sm:$0xff] }
 0xa4f   :  { %12227 = vmatpush1.bf16.msra.mxu0 %v19784_v14  ;;  %v19794_v14 = vld [vmem:[#allocation176_spill] sm:$0xff] }
 0xa50   :  { %12323 = vmatpush1.bf16.msra.mxu1 %v19304_v22  ;;  %12229 = vmatprep.subr.bf16.mxu0 %v19785_v16  ;;  %v19808_v16 = vld [vmem:[#allocation191_spill] sm:$0xff] }
 0xa51   :  { %12325 = vmatprep.subr.bf16.mxu1 %v19786_v7  ;;  %v19795_v7 = vld [vmem:[#allocation177_spill] sm:$0xff] }
 0xa53   :  { %12231 = vmatpush1.bf16.msra.mxu0 %v19787_v17  ;;  %v19796_v17 = vld [vmem:[#allocation178_spill] sm:$0xff] }
 0xa54   :  { %12327 = vmatpush1.bf16.msra.mxu1 %v19788_v31  ;;  %12233 = vmatprep.subr.bf16.mxu0 %v19789_v13  ;;  %v19797_v31 = vld [vmem:[#allocation179_spill] sm:$0xff]  ;;  %v19798_v13 = vld [vmem:[#allocation180_spill] sm:$0xff] }
 0xa55   :  { %12329 = vmatprep.subr.bf16.mxu1 %v19790_v1  ;;  %v19803_v1 = vld [vmem:[#allocation185_spill] sm:$0xff] }
 0xa57   :  { %12235 = vmatpush1.bf16.msra.mxu0 %v19791_v18  ;;  %v19802_v18 = vld [vmem:[#allocation184_spill] sm:$0xff] }
 0xa58   :  { %12331 = vmatpush1.bf16.msra.mxu1 %v19792_v5  ;;  %12237 = vmatprep.subr.bf16.mxu0 %v19793_v12  ;;  %v19799_v5 = vld [vmem:[#allocation181_spill] sm:$0xff]  ;;  %v19800_v12 = vld [vmem:[#allocation182_spill] sm:$0xff] }
 0xa59   :  { %12333 = vmatprep.subr.bf16.mxu1 %v19794_v14  ;;  %v19801_v14 = vld [vmem:[#allocation183_spill] sm:$0xff] }
 0xa5a   :  { %5919 = vmatmul.mubr.f32.vlgmr.msra.gmra.mrb[32].mxu0 %v16599_v57 }
 0xa5b   :  { %6061 = vmatmul.mubr.f32.vlgmr.msra.gmra.mrb[32].mxu1 %v16599_v57  ;;  %12239 = vmatpush1.bf16.msra.mxu0 %v19795_v7  ;;  %v19804_v7 = vld [vmem:[#allocation186_spill] sm:$0xff] }
 0xa5c   :  { %12335 = vmatpush1.bf16.msra.mxu1 %v19796_v17  ;;  %12241 = vmatprep.subr.bf16.mxu0 %v19797_v31  ;;  %v19805_v31 = vld [vmem:[#allocation188_spill] sm:$0xff]  ;;  %v19807_v17 = vld [vmem:[#allocation190_spill] sm:$0xff] }
 0xa5d   :  { %12337 = vmatprep.subr.bf16.mxu1 %v19798_v13  ;;  %5989 = vmatprep.mubr.f32.mxu0 %v18494_v56  ;;  %v19806_v13 = vld [vmem:[#allocation189_spill] sm:$0xff] }
 0xa5e   :  { %6131 = vmatprep.mubr.f32.mxu1 %v18494_v56 }
 0xa5f   :  { %12243 = vmatpush1.bf16.msra.mxu0 %v19799_v5  ;;  %v19809_v5 = vld [vmem:[#allocation192_spill] sm:$0xff] }
 0xa60   :  { %12339 = vmatpush1.bf16.msra.mxu1 %v19800_v12  ;;  %12245 = vmatprep.subr.bf16.mxu0 %v19801_v14  ;;  %v19810_v12 = vld [vmem:[#allocation193_spill] sm:$0xff]  ;;  %v19811_v14 = vld [vmem:[#allocation194_spill] sm:$0xff] }
 0xa61   :  { %12341 = vmatprep.subr.bf16.mxu1 %v19802_v18  ;;  %v19812_v18 = vld [vmem:[#allocation195_spill] sm:$0xff] }
 0xa63   :  { %12247 = vmatpush1.bf16.msra.mxu0 %v19803_v1  ;;  %v19813_v1 = vld [vmem:[#allocation196_spill] sm:$0xff] }
 0xa64   :  { %12343 = vmatpush1.bf16.msra.mxu1 %v19804_v7  ;;  %12249 = vmatprep.subr.bf16.mxu0 %v19084_v19  ;;  %v19814_v7 = vld [vmem:[#allocation197_spill] sm:$0xff] }
 0xa65   :  { %12345 = vmatprep.subr.bf16.mxu1 %v19805_v31  ;;  %v19815_v31 = vld [vmem:[#allocation199_spill] sm:$0xff] }
 0xa67   :  { %12251 = vmatpush1.bf16.msra.mxu0 %v19806_v13  ;;  %v19816_v13 = vld [vmem:[#allocation200_spill] sm:$0xff] }
 0xa68   :  { %12347 = vmatpush1.bf16.msra.mxu1 %v19807_v17  ;;  %12253 = vmatprep.subr.bf16.mxu0 %v19808_v16  ;;  %v19817_v17 = vld [vmem:[#allocation201_spill] sm:$0xff]  ;;  %v19818_v16 = vld [vmem:[#allocation202_spill] sm:$0xff] }
 0xa69   :  { %12349 = vmatprep.subr.bf16.mxu1 %v19809_v5  ;;  %v19819_v5 = vld [vmem:[#allocation203_spill] sm:$0xff] }
 0xa6b   :  { %12255 = vmatpush1.bf16.msra.mxu0 %v19810_v12  ;;  %v19820_v12 = vld [vmem:[#allocation204_spill] sm:$0xff] }
 0xa6c   :  { %12351 = vmatpush1.bf16.msra.mxu1 %v19811_v14  ;;  %12257 = vmatprep.subr.bf16.mxu0 %v19812_v18  ;;  %v19821_v14 = vld [vmem:[#allocation205_spill] sm:$0xff]  ;;  %v19822_v18 = vld [vmem:[#allocation206_spill] sm:$0xff] }
 0xa6d   :  { %12353 = vmatprep.subr.bf16.mxu1 %v19813_v1  ;;  %v19823_v1 = vld [vmem:[#allocation207_spill] sm:$0xff] }
 0xa6f   :  { %12259 = vmatpush1.bf16.msra.mxu0 %v19814_v7  ;;  %v19824_v7 = vld [vmem:[#allocation208_spill] sm:$0xff] }
 0xa70   :  { %12355 = vmatpush1.bf16.msra.mxu1 %v18854_v54  ;;  %12261 = vmatprep.subr.bf16.mxu0 %v19815_v31  ;;  %v19835_v31 = vld [vmem:[#allocation219_spill] sm:$0xff] }
 0xa71   :  { %12357 = vmatprep.subr.bf16.mxu1 %v19816_v13  ;;  %v19825_v13 = vld [vmem:[#allocation209_spill] sm:$0xff] }
 0xa73   :  { %12263 = vmatpush1.bf16.msra.mxu0 %v19817_v17  ;;  %v19833_v17 = vld [vmem:[#allocation217_spill] sm:$0xff] }
 0xa74   :  { %12359 = vmatpush1.bf16.msra.mxu1 %v19818_v16  ;;  %12265 = vmatprep.subr.bf16.mxu0 %v19819_v5  ;;  %v19826_v16 = vld [vmem:[#allocation210_spill] sm:$0xff]  ;;  %v19832_v5 = vld [vmem:[#allocation216_spill] sm:$0xff] }
 0xa75   :  { %12361 = vmatprep.subr.bf16.mxu1 %v19820_v12  ;;  %v19827_v12 = vld [vmem:[#allocation211_spill] sm:$0xff] }
 0xa77   :  { %12267 = vmatpush1.bf16.msra.mxu0 %v19821_v14  ;;  %v19828_v14 = vld [vmem:[#allocation212_spill] sm:$0xff] }
 0xa78   :  { %12363 = vmatpush1.bf16.msra.mxu1 %v19822_v18  ;;  %12365 = vmatprep.subr.bf16.mxu0 %v19823_v1  ;;  %v19829_v18 = vld [vmem:[#allocation213_spill] sm:$0xff]  ;;  %v19830_v1 = vld [vmem:[#allocation214_spill] sm:$0xff] }
 0xa79   :  { %12461 = vmatprep.subr.bf16.mxu1 %v19824_v7  ;;  %v19831_v7 = vld [vmem:[#allocation215_spill] sm:$0xff] }
 0xa7a   :  { %5990 = vmatmul.mubr.f32.vlgmr.msra.gmra.mrb[32].mxu0 %v16642_v28 }
 0xa7b   :  { %6132 = vmatmul.mubr.f32.vlgmr.msra.gmra.mrb[32].mxu1 %v16642_v28  ;;  %12367 = vmatpush1.bf16.msra.mxu0 %v19825_v13  ;;  %v19834_v13 = vld [vmem:[#allocation218_spill] sm:$0xff] }
 0xa7c   :  { %6202 = vmatprep.mubr.f32.mxu0 %v16603_v3  ;;  %12463 = vmatpush1.bf16.msra.mxu1 %v19826_v16  ;;  %v19836_v16 = vld [vmem:[#allocation220_spill] sm:$0xff] }
 0xa7d   :  { %6344 = vmatprep.mubr.f32.mxu1 %v16603_v3  ;;  %12369 = vmatprep.subr.bf16.mxu0 %v19827_v12  ;;  %v19837_v3 = vld [vmem:[#allocation221_spill] sm:$0xff]  ;;  %v19838_v12 = vld [vmem:[#allocation222_spill] sm:$0xff] }
 0xa7e   :  { %12465 = vmatprep.subr.bf16.mxu1 %v19828_v14  ;;  %v19839_v14 = vld [vmem:[#allocation223_spill] sm:$0xff] }
 0xa7f   :  { %12371 = vmatpush1.bf16.msra.mxu0 %v19829_v18  ;;  %v19840_v18 = vld [vmem:[#allocation224_spill] sm:$0xff] }
 0xa80   :  { %12467 = vmatpush1.bf16.msra.mxu1 %v19830_v1  ;;  %12373 = vmatprep.subr.bf16.mxu0 %v19831_v7  ;;  %v19841_v1 = vld [vmem:[#allocation225_spill] sm:$0xff]  ;;  %v19842_v7 = vld [vmem:[#allocation226_spill] sm:$0xff] }
 0xa81   :  { %12469 = vmatprep.subr.bf16.mxu1 %v19832_v5  ;;  %v19843_v5 = vld [vmem:[#allocation227_spill] sm:$0xff] }
 0xa83   :  { %12375 = vmatpush1.bf16.msra.mxu0 %v19833_v17  ;;  %v19844_v17 = vld [vmem:[#allocation228_spill] sm:$0xff] }
 0xa84   :  { %12471 = vmatpush1.bf16.msra.mxu1 %v19834_v13  ;;  %12377 = vmatprep.subr.bf16.mxu0 %v19835_v31  ;;  %v19845_v31 = vld [vmem:[#allocation230_spill] sm:$0xff] }
 0xa85   :  { %12473 = vmatprep.subr.bf16.mxu1 %v19836_v16  ;;  %v19846_v16 = vld [vmem:[#allocation231_spill] sm:$0xff] }
 0xa87   :  { %12379 = vmatpush1.bf16.msra.mxu0 %v19837_v3  ;;  %v19847_v3 = vld [vmem:[#allocation232_spill] sm:$0xff] }
 0xa88   :  { %12475 = vmatpush1.bf16.msra.mxu1 %v19838_v12  ;;  %12381 = vmatprep.subr.bf16.mxu0 %v19839_v14  ;;  %v19848_v12 = vld [vmem:[#allocation233_spill] sm:$0xff]  ;;  %v19849_v14 = vld [vmem:[#allocation234_spill] sm:$0xff] }
 0xa89   :  { %12477 = vmatprep.subr.bf16.mxu1 %v19840_v18  ;;  %v19850_v18 = vld [vmem:[#allocation235_spill] sm:$0xff] }
 0xa8b   :  { %12383 = vmatpush1.bf16.msra.mxu0 %v19841_v1  ;;  %v19851_v1 = vld [vmem:[#allocation236_spill] sm:$0xff] }
 0xa8c   :  { %12479 = vmatpush1.bf16.msra.mxu1 %v19842_v7  ;;  %12385 = vmatprep.subr.bf16.mxu0 %v19843_v5  ;;  %v19852_v7 = vld [vmem:[#allocation237_spill] sm:$0xff]  ;;  %v19853_v5 = vld [vmem:[#allocation238_spill] sm:$0xff] }
 0xa8d   :  { %12481 = vmatprep.subr.bf16.mxu1 %v19844_v17  ;;  %v19854_v17 = vld [vmem:[#allocation239_spill] sm:$0xff] }
 0xa8f   :  { %12387 = vmatpush1.bf16.msra.mxu0 %v19605_v58 }
 0xa90   :  { %12483 = vmatpush1.bf16.msra.mxu1 %v19845_v31  ;;  %12389 = vmatprep.subr.bf16.mxu0 %v19846_v16  ;;  %v19855_v16 = vld [vmem:[#allocation242_spill] sm:$0xff] }
 0xa91   :  { %12485 = vmatprep.subr.bf16.mxu1 %v19847_v3  ;;  %v19856_v3 = vld [vmem:[#allocation243_spill] sm:$0xff] }
 0xa93   :  { %12391 = vmatpush1.bf16.msra.mxu0 %v19848_v12  ;;  %v19857_v12 = vld [vmem:[#allocation244_spill] sm:$0xff] }
 0xa94   :  { %12487 = vmatpush1.bf16.msra.mxu1 %v19849_v14  ;;  %12393 = vmatprep.subr.bf16.mxu0 %v19850_v18  ;;  %v19858_v14 = vld [vmem:[#allocation245_spill] sm:$0xff] }
 0xa95   :  { %12489 = vmatprep.subr.bf16.mxu1 %v19851_v1 }
 0xa97   :  { %12395 = vmatpush1.bf16.msra.mxu0 %v19852_v7  ;;  %v19859_v7 = vld [vmem:[#allocation248_spill] sm:$0xff] }
 0xa98   :  { %12491 = vmatpush1.bf16.msra.mxu1 %v19853_v5  ;;  %12397 = vmatprep.subr.bf16.mxu0 %v19854_v17  ;;  %v19860_v5 = vld [vmem:[#allocation249_spill] sm:$0xff]  ;;  %v19861_v17 = vld [vmem:[#allocation250_spill] sm:$0xff] }
 0xa99   :  { %12493 = vmatprep.subr.bf16.mxu1 %v19376_v27 }
 0xa9b   :  { %12399 = vmatpush1.bf16.msra.mxu0 %v19616_v55 }
 0xa9c   :  { %12495 = vmatpush1.bf16.msra.mxu1 %v19855_v16  ;;  %12401 = vmatprep.subr.bf16.mxu0 %v19856_v3  ;;  %v19935_v3 = vld [vmem:[#allocation41_spill] sm:$0xff]  ;;  %v19937_v16 = vld [vmem:[#allocation43_spill] sm:$0xff] }
 0xa9d   :  { %12497 = vmatprep.subr.bf16.mxu1 %v19857_v12  ;;  %v19931_v12 = vld [vmem:[#allocation37_spill] sm:$0xff] }
 0xa9f   :  { %12403 = vmatpush1.bf16.msra.mxu0 %v19858_v14  ;;  %v19862_v14 = vld [vmem:[#allocation256_spill] sm:$0xff] }
 0xaa0   :  { %12499 = vmatpush1.bf16.msra.mxu1 %v19621_v24  ;;  %12405 = vmatprep.subr.bf16.mxu0 %v19622_v37  ;;  %v19863_v24 = vld [vmem:[#allocation257_spill] sm:$0xff]  ;;  %v19864_v37 = vld [vmem:[#allocation258_spill] sm:$0xff] }
 0xaa1   :  { %12501 = vmatprep.subr.bf16.mxu1 %v19859_v7  ;;  %v19865_v7 = vld [vmem:[#allocation259_spill] sm:$0xff] }
 0xaa3   :  { %12407 = vmatpush1.bf16.msra.mxu0 %v19860_v5  ;;  %v19866_v5 = vld [vmem:[#allocation260_spill] sm:$0xff] }
 0xaa4   :  { %12503 = vmatpush1.bf16.msra.mxu1 %v19861_v17  ;;  %12409 = vmatprep.subr.bf16.mxu0 %v19147_v44  ;;  %v19867_v17 = vld [vmem:[#allocation261_spill] sm:$0xff]  ;;  %v19868_v44 = vld [vmem:[#allocation262_spill] sm:$0xff] }
 0xaa5   :  { %12505 = vmatprep.subr.bf16.mxu1 %v19387_v29  ;;  %v19869_v29 = vld [vmem:[#allocation263_spill] sm:$0xff] }
 0xaa7   :  { %12411 = vmatpush1.bf16.msra.mxu0 %v19626_v2  ;;  %v19870_v2 = vld [vmem:[#allocation264_spill] sm:$0xff] }
 0xaa8   :  { %12507 = vmatpush1.bf16.msra.mxu1 %v19627_v59  ;;  %12413 = vmatprep.subr.bf16.mxu0 %v19628_v47  ;;  %v19871_v59 = vld [vmem:[#allocation265_spill] sm:$0xff]  ;;  %v19872_v47 = vld [vmem:[#allocation266_spill] sm:$0xff] }
 0xaa9   :  { %12509 = vmatprep.subr.bf16.mxu1 %v19862_v14  ;;  %v19873_v14 = vld [vmem:[#allocation267_spill] sm:$0xff] }
 0xaab   :  { %12415 = vmatpush1.bf16.msra.mxu0 %v19863_v24  ;;  %v19874_v24 = vld [vmem:[#allocation268_spill] sm:$0xff] }
 0xaac   :  { %12511 = vmatpush1.bf16.msra.mxu1 %v19864_v37  ;;  %12417 = vmatprep.subr.bf16.mxu0 %v19865_v7  ;;  %v19875_v37 = vld [vmem:[#allocation269_spill] sm:$0xff]  ;;  %v19876_v7 = vld [vmem:[#allocation270_spill] sm:$0xff] }
 0xaad   :  { %12513 = vmatprep.subr.bf16.mxu1 %v19866_v5  ;;  %v19877_v5 = vld [vmem:[#allocation271_spill] sm:$0xff] }
 0xaaf   :  { %12419 = vmatpush1.bf16.msra.mxu0 %v19867_v17  ;;  %v19878_v17 = vld [vmem:[#allocation272_spill] sm:$0xff] }
 0xab0   :  { %12515 = vmatpush1.bf16.msra.mxu1 %v19868_v44  ;;  %12421 = vmatprep.subr.bf16.mxu0 %v19869_v29  ;;  %v19893_v29 = vld [vmem:[#allocation287_spill] sm:$0xff] }
 0xab1   :  { %12517 = vmatprep.subr.bf16.mxu1 %v19870_v2  ;;  %v19879_v2 = vld [vmem:[#allocation273_spill] sm:$0xff] }
 0xab3   :  { %12423 = vmatpush1.bf16.msra.mxu0 %v19871_v59  ;;  %v19880_v59 = vld [vmem:[#allocation274_spill] sm:$0xff] }
 0xab4   :  { %12519 = vmatpush1.bf16.msra.mxu1 %v19872_v47  ;;  %12425 = vmatprep.subr.bf16.mxu0 %v19873_v14  ;;  %v19881_v47 = vld [vmem:[#allocation275_spill] sm:$0xff]  ;;  %v19882_v14 = vld [vmem:[#allocation276_spill] sm:$0xff] }
 0xab5   :  { %12521 = vmatprep.subr.bf16.mxu1 %v19874_v24  ;;  %v19892_v24 = vld [vmem:[#allocation286_spill] sm:$0xff] }
 0xab7   :  { %12427 = vmatpush1.bf16.msra.mxu0 %v19875_v37  ;;  %v19886_v37 = vld [vmem:[#allocation280_spill] sm:$0xff] }
 0xab8   :  { %12523 = vmatpush1.bf16.msra.mxu1 %v19876_v7  ;;  %12429 = vmatprep.subr.bf16.mxu0 %v19877_v5  ;;  %v19883_v7 = vld [vmem:[#allocation277_spill] sm:$0xff]  ;;  %v19884_v5 = vld [vmem:[#allocation278_spill] sm:$0xff] }
 0xab9   :  { %12525 = vmatprep.subr.bf16.mxu1 %v19878_v17  ;;  %v19885_v17 = vld [vmem:[#allocation279_spill] sm:$0xff] }
 0xaba   :  { %6203 = vmatmul.mubr.f32.vlgmr.msra.gmra.mrb[34].mxu0 %v16599_v57 }
 0xabb   :  { %6345 = vmatmul.mubr.f32.vlgmr.msra.gmra.mrb[34].mxu1 %v16599_v57  ;;  %12431 = vmatpush1.bf16.msra.mxu0 %v19879_v2  ;;  %v19887_v57 = vld [vmem:[#allocation281_spill] sm:$0xff]  ;;  %v19888_v2 = vld [vmem:[#allocation282_spill] sm:$0xff] }
 0xabc   :  { %12527 = vmatpush1.bf16.msra.mxu1 %v19880_v59  ;;  %12433 = vmatprep.subr.bf16.mxu0 %v19881_v47  ;;  %v19889_v59 = vld [vmem:[#allocation283_spill] sm:$0xff]  ;;  %v19890_v47 = vld [vmem:[#allocation284_spill] sm:$0xff] }
 0xabd   :  { %12529 = vmatprep.subr.bf16.mxu1 %v19882_v14  ;;  %6273 = vmatprep.mubr.f32.mxu0 %v18494_v56  ;;  %v19891_v14 = vld [vmem:[#allocation285_spill] sm:$0xff] }
 0xabe   :  { %6415 = vmatprep.mubr.f32.mxu1 %v18494_v56 }
 0xabf   :  { %12435 = vmatpush1.bf16.msra.mxu0 %v19883_v7  ;;  %v19894_v7 = vld [vmem:[#allocation288_spill] sm:$0xff] }
 0xac0   :  { %12531 = vmatpush1.bf16.msra.mxu1 %v19884_v5  ;;  %12437 = vmatprep.subr.bf16.mxu0 %v19885_v17  ;;  %v19895_v5 = vld [vmem:[#allocation289_spill] sm:$0xff]  ;;  %v19896_v17 = vld [vmem:[#allocation290_spill] sm:$0xff] }
 0xac1   :  { %12533 = vmatprep.subr.bf16.mxu1 %v19886_v37  ;;  %v19897_v37 = vld [vmem:[#allocation291_spill] sm:$0xff] }
 0xac3   :  { %12439 = vmatpush1.bf16.msra.mxu0 %v19887_v57  ;;  %v19898_v57 = vld [vmem:[#allocation292_spill] sm:$0xff] }
 0xac4   :  { %12535 = vmatpush1.bf16.msra.mxu1 %v19888_v2  ;;  %12441 = vmatprep.subr.bf16.mxu0 %v19889_v59  ;;  %v19899_v2 = vld [vmem:[#allocation293_spill] sm:$0xff]  ;;  %v19900_v59 = vld [vmem:[#allocation294_spill] sm:$0xff] }
 0xac5   :  { %12537 = vmatprep.subr.bf16.mxu1 %v19890_v47  ;;  %v19901_v47 = vld [vmem:[#allocation295_spill] sm:$0xff] }
 0xac7   :  { %12443 = vmatpush1.bf16.msra.mxu0 %v19891_v14  ;;  %v19902_v14 = vld [vmem:[#allocation296_spill] sm:$0xff] }
 0xac8   :  { %12539 = vmatpush1.bf16.msra.mxu1 %v19892_v24  ;;  %12445 = vmatprep.subr.bf16.mxu0 %v19893_v29  ;;  %v19903_v24 = vld [vmem:[#allocation297_spill] sm:$0xff]  ;;  %v19904_v29 = vld [vmem:[#allocation298_spill] sm:$0xff] }
 0xac9   :  { %12541 = vmatprep.subr.bf16.mxu1 %v19894_v7  ;;  %v19905_v7 = vld [vmem:[#allocation299_spill] sm:$0xff] }
 0xacb   :  { %12447 = vmatpush1.bf16.msra.mxu0 %v19895_v5  ;;  %v19906_v5 = vld [vmem:[#allocation300_spill] sm:$0xff] }
 0xacc   :  { %12543 = vmatpush1.bf16.msra.mxu1 %v19896_v17  ;;  %12449 = vmatprep.subr.bf16.mxu0 %v19897_v37  ;;  %v19907_v17 = vld [vmem:[#allocation301_spill] sm:$0xff]  ;;  %v19908_v37 = vld [vmem:[#allocation302_spill] sm:$0xff] }
 0xacd   :  { %12545 = vmatprep.subr.bf16.mxu1 %v19898_v57  ;;  %v19909_v57 = vld [vmem:[#allocation15_spill] sm:$0xff] }
 0xacf   :  { %12451 = vmatpush1.bf16.msra.mxu0 %v19899_v2  ;;  %v19910_v2 = vld [vmem:[#allocation16_spill] sm:$0xff] }
 0xad0   :  { %12547 = vmatpush1.bf16.msra.mxu1 %v19900_v59  ;;  %12453 = vmatprep.subr.bf16.mxu0 %v19901_v47  ;;  %v19920_v47 = vld [vmem:[#allocation26_spill] sm:$0xff]  ;;  %v19930_v59 = vld [vmem:[#allocation36_spill] sm:$0xff] }
 0xad1   :  { %12549 = vmatprep.subr.bf16.mxu1 %v19902_v14  ;;  %v19911_v14 = vld [vmem:[#allocation17_spill] sm:$0xff] }
 0xad3   :  { %12455 = vmatpush1.bf16.msra.mxu0 %v19903_v24  ;;  %v19912_v24 = vld [vmem:[#allocation18_spill] sm:$0xff] }
 0xad4   :  { %12551 = vmatpush1.bf16.msra.mxu1 %v19904_v29  ;;  %12457 = vmatprep.subr.bf16.mxu0 %v19905_v7  ;;  %v19913_v29 = vld [vmem:[#allocation19_spill] sm:$0xff]  ;;  %v19914_v7 = vld [vmem:[#allocation20_spill] sm:$0xff] }
 0xad5   :  { %12553 = vmatprep.subr.bf16.mxu1 %v19906_v5  ;;  %v19915_v5 = vld [vmem:[#allocation21_spill] sm:$0xff] }
 0xad7   :  { %12459 = vmatpush1.bf16.msra.mxu0 %v19907_v17  ;;  %v19916_v17 = vld [vmem:[#allocation22_spill] sm:$0xff] }
 0xad8   :  { %12555 = vmatpush1.bf16.msra.mxu1 %v19908_v37  ;;  %12557 = vmatprep.subr.bf16.mxu0 %v19909_v57  ;;  %v19917_v37 = vld [vmem:[#allocation23_spill] sm:$0xff]  ;;  %v19918_v57 = vld [vmem:[#allocation24_spill] sm:$0xff] }
 0xad9   :  { %12653 = vmatprep.subr.bf16.mxu1 %v19910_v2  ;;  %v19919_v2 = vld [vmem:[#allocation25_spill] sm:$0xff] }
 0xada   :  { %6274 = vmatmul.mubr.f32.vlgmr.msra.gmra.mrb[34].mxu0 %v16642_v28 }
 0xadb   :  { %6416 = vmatmul.mubr.f32.vlgmr.msra.gmra.mrb[34].mxu1 %v16642_v28  ;;  %12559 = vmatpush1.bf16.msra.mxu0 %v19911_v14  ;;  %v19921_v28 = vld [vmem:[#allocation27_spill] sm:$0xff]  ;;  %v19922_v14 = vld [vmem:[#allocation28_spill] sm:$0xff] }
 0xadc   :  { %12655 = vmatpush1.bf16.msra.mxu1 %v19912_v24  ;;  %12561 = vmatprep.subr.bf16.mxu0 %v19913_v29  ;;  %v19923_v24 = vld [vmem:[#allocation29_spill] sm:$0xff]  ;;  %v19924_v29 = vld [vmem:[#allocation30_spill] sm:$0xff] }
 0xadd   :  { %12657 = vmatprep.subr.bf16.mxu1 %v19914_v7  ;;  %v19925_v7 = vld [vmem:[#allocation31_spill] sm:$0xff] }
 0xadf   :  { %12563 = vmatpush1.bf16.msra.mxu0 %v19915_v5  ;;  %v19926_v5 = vld [vmem:[#allocation32_spill] sm:$0xff] }
 0xae0   :  { %12659 = vmatpush1.bf16.msra.mxu1 %v19916_v17  ;;  %12565 = vmatprep.subr.bf16.mxu0 %v19917_v37  ;;  %v19927_v17 = vld [vmem:[#allocation33_spill] sm:$0xff]  ;;  %v19928_v37 = vld [vmem:[#allocation34_spill] sm:$0xff] }
 0xae1   :  { %12661 = vmatprep.subr.bf16.mxu1 %v19918_v57  ;;  %v19929_v57 = vld [vmem:[#allocation35_spill] sm:$0xff] }
 0xae3   :  { %12567 = vmatpush1.bf16.msra.mxu0 %v19919_v2 }
 0xae4   :  { %12663 = vmatpush1.bf16.msra.mxu1 %v19920_v47  ;;  %12569 = vmatprep.subr.bf16.mxu0 %v19921_v28 }
 0xae5   :  { %12665 = vmatprep.subr.bf16.mxu1 %v19922_v14 }
 0xae7   :  { %12571 = vmatpush1.bf16.msra.mxu0 %v19923_v24 }
 0xae8   :  { %12667 = vmatpush1.bf16.msra.mxu1 %v19924_v29  ;;  %12573 = vmatprep.subr.bf16.mxu0 %v19925_v7  ;;  %v19932_v29 = vld [vmem:[#allocation38_spill] sm:$0xff]  ;;  %v19933_v7 = vld [vmem:[#allocation39_spill] sm:$0xff] }
 0xae9   :  { %12669 = vmatprep.subr.bf16.mxu1 %v19926_v5  ;;  %v19934_v5 = vld [vmem:[#allocation40_spill] sm:$0xff] }
 0xaeb   :  { %12575 = vmatpush1.bf16.msra.mxu0 %v19927_v17 }
 0xaec   :  { %12671 = vmatpush1.bf16.msra.mxu1 %v19928_v37  ;;  %12577 = vmatprep.subr.bf16.mxu0 %v19929_v57 }
 0xaed   :  { %v5707_v2 = vpop.f32.mrb[30].mxu0  ;;  %v5849_v47 = vpop.f32.mrb[30].mxu1  ;;  %12673 = vmatprep.subr.bf16.mxu1 %v19930_v59  ;;  %v19936_v59 = vld [vmem:[#allocation42_spill] sm:$0xff] }
 0xaee   :  { %v5709_v28 = vpop.f32.mrb[31].mxu0  ;;  %v5851_v14 = vpop.f32.mrb[31].mxu1 }
 0xaef   :  { %v6434_v44 = vcombine.low %v5707_v2, %v5709_v28  ;;  %v6435_v24 = vcombine.low %v5849_v47, %v5851_v14  ;;  %12579 = vmatpush1.bf16.msra.mxu0 %v19931_v12  ;;  %v19938_v2 = vld [vmem:[#allocation44_spill] sm:$0xff]  ;;  %v19939_v47 = vld [vmem:[#allocation45_spill] sm:$0xff]  ;;  %v19940_v14 = vld [vmem:[#allocation46_spill] sm:$0xff] }
 0xaf0   :  { %12675 = vmatpush1.bf16.msra.mxu1 %v19932_v29  ;;  %12581 = vmatprep.subr.bf16.mxu0 %v19933_v7  ;;  %v19941_v28 = vld [vmem:[#allocation47_spill] sm:$0xff] }
 0xaf1   :  { %v6442_v17 = vrot.slane %v6434_v44, %v15159_v32  ;;  %v6449_v37 = vrot.slane %v6435_v24, %v15159_v32  ;;  %12677 = vmatprep.subr.bf16.mxu1 %v19934_v5  ;;  %v19942_v44 = vld [vmem:[#allocation48_spill] sm:$0xff]  ;;  %v19943_v24 = vld [vmem:[#allocation49_spill] sm:$0xff]  ;;  %v19944_v5 = vld [vmem:[#allocation50_spill] sm:$0xff] }
 0xaf3   :  { %v6450_v57 = vcombine.low %v6442_v17, %v6449_v37  ;;  %12583 = vmatpush1.bf16.msra.mxu0 %v19935_v3  ;;  %v19945_v37 = vld [vmem:[#allocation51_spill] sm:$0xff]  ;;  %v19946_v17 = vld [vmem:[#allocation52_spill] sm:$0xff] }
 0xaf4   :  { %12679 = vmatpush1.bf16.msra.mxu1 %v19936_v59  ;;  %12585 = vmatprep.subr.bf16.mxu0 %v19937_v16  ;;  %v19947_v59 = vld [vmem:[#allocation53_spill] sm:$0xff]  ;;  %v19948_v16 = vld [vmem:[#allocation54_spill] sm:$0xff] }
 0xaf5   :  { %12681 = vmatprep.subr.bf16.mxu1 %v19938_v2  ;;  %v19949_v2 = vld [vmem:[#allocation55_spill] sm:$0xff] }
 0xaf7   :  { %12587 = vmatpush1.bf16.msra.mxu0 %v19939_v47  ;;  %v19950_v47 = vld [vmem:[#allocation56_spill] sm:$0xff] }
 0xaf8   :  { %12683 = vmatpush1.bf16.msra.mxu1 %v19940_v14  ;;  %12589 = vmatprep.subr.bf16.mxu0 %v19941_v28  ;;  %v19951_v14 = vld [vmem:[#allocation57_spill] sm:$0xff]  ;;  %v19952_v28 = vld [vmem:[#allocation58_spill] sm:$0xff] }
 0xaf9   :  { %12685 = vmatprep.subr.bf16.mxu1 %v19942_v44  ;;  %v19953_v44 = vld [vmem:[#allocation59_spill] sm:$0xff] }
 0xafb   :  { %12591 = vmatpush1.bf16.msra.mxu0 %v19943_v24  ;;  %v19954_v24 = vld [vmem:[#allocation60_spill] sm:$0xff] }
 0xafc   :  { %12687 = vmatpush1.bf16.msra.mxu1 %v19944_v5  ;;  %12593 = vmatprep.subr.bf16.mxu0 %v19945_v37  ;;  %v19955_v5 = vld [vmem:[#allocation61_spill] sm:$0xff]  ;;  %v19956_v37 = vld [vmem:[#allocation62_spill] sm:$0xff] }
 0xafd   :  { %12689 = vmatprep.subr.bf16.mxu1 %v19946_v17  ;;  %v19957_v17 = vld [vmem:[#allocation63_spill] sm:$0xff] }
 0xaff   :  { %12595 = vmatpush1.bf16.msra.mxu0 %v19947_v59  ;;  %v19958_v59 = vld [vmem:[#allocation64_spill] sm:$0xff] }
 0xb00   :  { %12691 = vmatpush1.bf16.msra.mxu1 %v19948_v16  ;;  %12597 = vmatprep.subr.bf16.mxu0 %v19949_v2  ;;  %v19959_v16 = vld [vmem:[#allocation65_spill] sm:$0xff]  ;;  %v19960_v2 = vld [vmem:[#allocation66_spill] sm:$0xff] }
 0xb01   :  { %12693 = vmatprep.subr.bf16.mxu1 %v19950_v47  ;;  %v19961_v47 = vld [vmem:[#allocation67_spill] sm:$0xff] }
 0xb03   :  { %12599 = vmatpush1.bf16.msra.mxu0 %v19951_v14  ;;  %v19962_v14 = vld [vmem:[#allocation68_spill] sm:$0xff] }
 0xb04   :  { %12695 = vmatpush1.bf16.msra.mxu1 %v19952_v28  ;;  %12601 = vmatprep.subr.bf16.mxu0 %v19953_v44  ;;  %v19963_v28 = vld [vmem:[#allocation69_spill] sm:$0xff]  ;;  %v19964_v44 = vld [vmem:[#allocation70_spill] sm:$0xff] }
 0xb05   :  { %12697 = vmatprep.subr.bf16.mxu1 %v19954_v24  ;;  %v19965_v24 = vld [vmem:[#allocation71_spill] sm:$0xff] }
 0xb07   :  { %12603 = vmatpush1.bf16.msra.mxu0 %v19955_v5  ;;  %v19966_v5 = vld [vmem:[#allocation72_spill] sm:$0xff] }
 0xb08   :  { %12699 = vmatpush1.bf16.msra.mxu1 %v19956_v37  ;;  %12605 = vmatprep.subr.bf16.mxu0 %v19957_v17  ;;  %v19967_v37 = vld [vmem:[#allocation73_spill] sm:$0xff]  ;;  %v19968_v17 = vld [vmem:[#allocation74_spill] sm:$0xff] }
 0xb09   :  { %12701 = vmatprep.subr.bf16.mxu1 %v19958_v59  ;;  %v19969_v59 = vld [vmem:[#allocation75_spill] sm:$0xff] }
 0xb0b   :  { %12607 = vmatpush1.bf16.msra.mxu0 %v19959_v16  ;;  %v19970_v16 = vld [vmem:[#allocation76_spill] sm:$0xff] }
 0xb0c   :  { %12703 = vmatpush1.bf16.msra.mxu1 %v19960_v2  ;;  %12609 = vmatprep.subr.bf16.mxu0 %v19961_v47  ;;  %v19971_v2 = vld [vmem:[#allocation77_spill] sm:$0xff]  ;;  %v19972_v47 = vld [vmem:[#allocation78_spill] sm:$0xff] }
 0xb0d   :  { %12705 = vmatprep.subr.bf16.mxu1 %v19962_v14  ;;  %v19973_v14 = vld [vmem:[#allocation79_spill] sm:$0xff] }
 0xb0f   :  { %12611 = vmatpush1.bf16.msra.mxu0 %v19963_v28  ;;  %v19974_v28 = vld [vmem:[#allocation80_spill] sm:$0xff] }
 0xb10   :  { %12707 = vmatpush1.bf16.msra.mxu1 %v19964_v44  ;;  %12613 = vmatprep.subr.bf16.mxu0 %v19965_v24 }
 0xb11   :  { %12709 = vmatprep.subr.bf16.mxu1 %v19966_v5 }
 0xb13   :  { %12615 = vmatpush1.bf16.msra.mxu0 %v19967_v37 }
 0xb14   :  { %12711 = vmatpush1.bf16.msra.mxu1 %v19968_v17  ;;  %12617 = vmatprep.subr.bf16.mxu0 %v19969_v59  ;;  %v8942_v59 = vld [vmem:[%s17789_s0 + $0x78] sm:$0xff] }
 0xb15   :  { %12713 = vmatprep.subr.bf16.mxu1 %v19970_v16 }
 0xb17   :  { %12619 = vmatpush1.bf16.msra.mxu0 %v19971_v2 }
 0xb18   :  { %12715 = vmatpush1.bf16.msra.mxu1 %v19972_v47  ;;  %12621 = vmatprep.subr.bf16.mxu0 %v19973_v14  ;;  %v8943_v14 = vld [vmem:[%s17789_s0 + $0x80] sm:$0xff]  ;;  %v6488_v47 = vadd.f32 %v8942_v59, %v6450_v57 }
 0xb19   :  { %12717 = vmatprep.subr.bf16.mxu1 %v19974_v28 }
 0xb1a   :  { %v6499_v29 = vrot.slane %v6488_v47, 6 }
 0xb4d   :  { %v5991_v44 = vpop.f32.mrb[32].mxu0 }
 0xb4e   :  { %v6133_v24 = vpop.f32.mrb[32].mxu1  ;;  %v5993_v3 = vpop.f32.mrb[33].mxu0 }
 0xb4f   :  { %v6451_v5 = vcombine.low %v5991_v44, %v5993_v3  ;;  %v6135_v7 = vpop.f32.mrb[33].mxu1  ;;  %v8945_v44 = vmul.f32 -1.442695, %v6488_v47 }
 0xb50   :  { %v6452_v37 = vcombine.low %v6133_v24, %v6135_v7 }
 0xb51   :  { %v6459_v16 = vrot.slane %v6451_v5, %v15159_v32 }
 0xb52   :  { %v6466_v2 = vrot.slane %v6452_v37, %v15159_v32 }
 0xb54   :  { %v6467_v28 = vcombine.low %v6459_v16, %v6466_v2 }
 0xb56   :  { %v6489_v17 = vadd.f32 %v8943_v14, %v6467_v28 }
 0xb58   :  { %v6500_v12 = vrot.slane %v6489_v17, 6  ;;  %v6510_v14 = vrot.slane %v6489_v17, 4 }
 0xb5a   :  { %v6501_v3 = vsel %vm1589_vm0, %v6499_v29, %v6500_v12  ;;  %v8944_v29 = vld [vmem:[%s17789_s0 + $0x88] sm:$0xff] }
 0xb5b   :  { %v8946_v7 = vmul.f32 -1.442695, %v6501_v3 }
 0xb5d   :  { %13969 = vpow2.f32 %v8946_v7 }
 0xb5e   :  { %13971 = vpow2.f32 %v8945_v44 }
 0xb67   :  { %v13970_v31 = vpop.eup %13969 }
 0xb68   :  { %v13972_v16 = vpop.eup %13971  ;;  %v6506_v57 = vadd.f32 1.0, %v13970_v31 }
 0xb69   :  { %v6494_v2 = vadd.f32 1.0, %v13972_v16 }
 0xb6a   :  { %13973 = vrcp.f32 %v6506_v57 }
 0xb6b   :  { %13975 = vrcp.f32 %v6494_v2  ;;  %v19975_v2 = vld [vmem:[#allocation114_spill] sm:$0xff] }
 0xbad   :  { %v6275_v24 = vpop.f32.mrb[34].mxu0 }
 0xbae   :  { %v6417_v55 = vpop.f32.mrb[34].mxu1  ;;  %v6277_v5 = vpop.f32.mrb[35].mxu0 }
 0xbaf   :  { %v6468_v27 = vcombine.low %v6275_v24, %v6277_v5  ;;  %v6419_v37 = vpop.f32.mrb[35].mxu1 }
 0xbb0   :  { %v6469_v1 = vcombine.low %v6417_v55, %v6419_v37 }
 0xbb1   :  { %v6476_v18 = vrot.slane %v6468_v27, %v15159_v32 }
 0xbb2   :  { %v6483_v59 = vrot.slane %v6469_v1, %v15159_v32  ;;  %v13974_v1 = vpop.eup %13973 }
 0xbb3   :  { %v13976_v7 = vpop.eup %13975  ;;  %v6523_v5 = vmul.f32 %v13974_v1, %v16595_v51  ;;  %v19982_v1 = vld [vmem:[#allocation121_spill] sm:$0xff] }
 0xbb4   :  { %v6484_v12 = vcombine.low %v6476_v18, %v6483_v59 }
 0xbb6   :  { %v6490_v47 = vadd.f32 %v8944_v29, %v6484_v12 }
 0xbb8   :  { %v6511_v28 = vrot.slane %v6490_v47, 4  ;;  %v6515_v3 = vrot.slane %v6490_v47, 2  ;;  %v19976_v47 = vld [vmem:[#allocation115_spill] sm:$0xff] }
 0xbba   :  { %v6512_v55 = vsel %vm1601_vm1, %v6510_v14, %v6511_v28  ;;  %v8947_v27 = vmul.f32 -1.442695, %v6515_v3  ;;  %v19977_v14 = vld [vmem:[#allocation116_spill] sm:$0xff]  ;;  %v19978_v28 = vld [vmem:[#allocation117_spill] sm:$0xff]  ;;  %v19979_v3 = vld [vmem:[#allocation118_spill] sm:$0xff] }
 0xbbb   :  { %13977 = vtanh.f32 %v6512_v55  ;;  %v19980_v55 = vld [vmem:[#allocation119_spill] sm:$0xff] }
 0xbbc   :  { %13979 = vpow2.f32 %v8947_v27  ;;  %v19981_v27 = vld [vmem:[#allocation120_spill] sm:$0xff] }
 0xbc5   :  { %v13978_v44 = vpop.eup %13977 }
 0xbc6   :  { %v13980_v24 = vpop.eup %13979  ;;  %v6524_v18 = vmul.f32 %v13978_v44, %v13976_v7  ;;  %v19983_v7 = vld [vmem:[#allocation122_spill] sm:$0xff]  ;;  %v19984_v44 = vld [vmem:[#allocation123_spill] sm:$0xff] }
 0xbc7   :  { %v6520_v31 = vadd.f32 1.0, %v13980_v24  ;;  %v19985_v24 = vld [vmem:[#allocation124_spill] sm:$0xff] }
 0xbc8   :  { %v16938_v37 = vadd.f32 %v6524_v18, %v6523_v5  ;;  %v19986_v5 = vld [vmem:[#allocation125_spill] sm:$0xff]  ;;  %v19987_v18 = vld [vmem:[#allocation126_spill] sm:$0xff] }
 0xbc9   :  { %13981 = vrcp.f32 %v6520_v31  ;;  %v19988_v31 = vld [vmem:[#allocation127_spill] sm:$0xff] }
 0xbca   :  { %13983 = vtanh.f32 %v16938_v37 }
 0xbd3   :  { %v13982_v17 = vpop.eup %13981 }
 0xbd4   :  { %v13984_v59 = vpop.eup %13983 }
 0xbd5   :  { %v6527_v16 = vmul.f32 %v13984_v59, %v13982_v17  ;;  %v19989_v17 = vld [vmem:[#allocation128_spill] sm:$0xff]  ;;  %v19990_v59 = vld [vmem:[#allocation129_spill] sm:$0xff] }
 0xbd7   :  { %v16942_v29 = vrot.slane %v6527_v16, %v15159_v32  ;;  %v6533_v51 = vcombine.high %v6527_v16, %v6527_v16  ;;  %v19991_v16 = vld [vmem:[#allocation130_spill] sm:$0xff] }
 0xbd9   :  { %v16946_v12 = vcombine.high %v16942_v29, %v16942_v29  ;;  %v16985_v57 = vrot.slane %v6533_v51, %v15159_v32  ;;  %v19992_v51 = vld [vmem:[#allocation131_spill] sm:$0xff] }
 0xbdb   :  { %6616 = vmatprep.mubr.f32.mxu0 %v16946_v12  ;;  %6758 = vmatprep.mubr.f32.mxu1 %v16946_v12 }
 0xbdc   :  { %6617 = vmatmul.mubr.f32.vlgmr.msra.gmra.mrb[36].mxu0 %v16942_v29  ;;  %6759 = vmatmul.mubr.f32.vlgmr.msra.gmra.mrb[36].mxu1 %v16942_v29 }
 0xbdd   :  { %12623 = vmatpush1.bf16.msra.mxu0 %v18737_v46  ;;  %12719 = vmatpush1.bf16.msra.mxu1 %v18738_v30 }
 0xbde   :  { %12625 = vmatprep.subr.bf16.mxu0 %v18739_v33  ;;  %12721 = vmatprep.subr.bf16.mxu1 %v18740_v23 }
 0xbdf   :  { %6687 = vmatprep.mubr.f32.mxu0 %v18494_v56  ;;  %6829 = vmatprep.mubr.f32.mxu1 %v18494_v56 }
 0xbe1   :  { %12627 = vmatpush1.bf16.msra.mxu0 %v18741_v10  ;;  %12723 = vmatpush1.bf16.msra.mxu1 %v18983_v38 }
 0xbe2   :  { %12629 = vmatprep.subr.bf16.mxu0 %v18984_v43  ;;  %12725 = vmatprep.subr.bf16.mxu1 %v18985_v50 }
 0xbe5   :  { %12631 = vmatpush1.bf16.msra.mxu0 %v18986_v39  ;;  %12727 = vmatpush1.bf16.msra.mxu1 %v18987_v40 }
 0xbe6   :  { %12633 = vmatprep.subr.bf16.mxu0 %v18988_v62  ;;  %12729 = vmatprep.subr.bf16.mxu1 %v18989_v36 }
 0xbe9   :  { %12635 = vmatpush1.bf16.msra.mxu0 %v19231_v63  ;;  %12731 = vmatpush1.bf16.msra.mxu1 %v19232_v48 }
 0xbea   :  { %12637 = vmatprep.subr.bf16.mxu0 %v19233_v4  ;;  %12733 = vmatprep.subr.bf16.mxu1 %v19234_v8 }
 0xbed   :  { %12639 = vmatpush1.bf16.msra.mxu0 %v19235_v9  ;;  %12735 = vmatpush1.bf16.msra.mxu1 %v19236_v53 }
 0xbee   :  { %12641 = vmatprep.subr.bf16.mxu0 %v19237_v6  ;;  %12737 = vmatprep.subr.bf16.mxu1 %v19479_v26 }
 0xbf1   :  { %12643 = vmatpush1.bf16.msra.mxu0 %v19480_v52  ;;  %12739 = vmatpush1.bf16.msra.mxu1 %v19481_v61 }
 0xbf2   :  { %12645 = vmatprep.subr.bf16.mxu0 %v19482_v60  ;;  %12741 = vmatprep.subr.bf16.mxu1 %v19483_v41 }
 0xbf5   :  { %12647 = vmatpush1.bf16.msra.mxu0 %v19484_v42  ;;  %12743 = vmatpush1.bf16.msra.mxu1 %v19485_v20 }
 0xbf6   :  { %12649 = vmatprep.subr.bf16.mxu0 %v19727_v21  ;;  %12745 = vmatprep.subr.bf16.mxu1 %v19728_v0 }
 0xbf9   :  { %12651 = vmatpush1.bf16.msra.mxu0 %v19729_v45  ;;  %12747 = vmatpush1.bf16.msra.mxu1 %v19730_v15 }
 0xbfa   :  { %12749 = vmatprep.subr.bf16.mxu0 %v19731_v11  ;;  %12845 = vmatprep.subr.bf16.mxu1 %v19732_v34 }
 0xbfc   :  { %6688 = vmatmul.mubr.f32.vlgmr.msra.gmra.mrb[36].mxu0 %v16985_v57  ;;  %6830 = vmatmul.mubr.f32.vlgmr.msra.gmra.mrb[36].mxu1 %v16985_v57 }
 0xbfd   :  { %12751 = vmatpush1.bf16.msra.mxu0 %v19733_v49  ;;  %6900 = vmatprep.mubr.f32.mxu0 %v16946_v12 }
 0xbfe   :  { %12847 = vmatpush1.bf16.msra.mxu1 %v19975_v2  ;;  %7042 = vmatprep.mubr.f32.mxu1 %v16946_v12 }
 0xbff   :  { %12753 = vmatprep.subr.bf16.mxu0 %v19976_v47  ;;  %12849 = vmatprep.subr.bf16.mxu1 %v19977_v14 }
 0xc01   :  { %12755 = vmatpush1.bf16.msra.mxu0 %v19978_v28 }
 0xc02   :  { %12851 = vmatpush1.bf16.msra.mxu1 %v19979_v3  ;;  %12757 = vmatprep.subr.bf16.mxu0 %v19980_v55 }
 0xc03   :  { %12853 = vmatprep.subr.bf16.mxu1 %v19981_v27 }
 0xc05   :  { %12759 = vmatpush1.bf16.msra.mxu0 %v19982_v1  ;;  %v19993_v1 = vld [vmem:[#allocation132_spill] sm:$0xff] }
 0xc06   :  { %12855 = vmatpush1.bf16.msra.mxu1 %v19983_v7  ;;  %12761 = vmatprep.subr.bf16.mxu0 %v19984_v44  ;;  %v19994_v7 = vld [vmem:[#allocation133_spill] sm:$0xff]  ;;  %v19995_v44 = vld [vmem:[#allocation134_spill] sm:$0xff] }
 0xc07   :  { %12857 = vmatprep.subr.bf16.mxu1 %v19985_v24  ;;  %v19996_v24 = vld [vmem:[#allocation135_spill] sm:$0xff] }
 0xc09   :  { %12763 = vmatpush1.bf16.msra.mxu0 %v19986_v5  ;;  %v19997_v5 = vld [vmem:[#allocation136_spill] sm:$0xff] }
 0xc0a   :  { %12859 = vmatpush1.bf16.msra.mxu1 %v19987_v18  ;;  %12765 = vmatprep.subr.bf16.mxu0 %v19988_v31  ;;  %v19998_v18 = vld [vmem:[#allocation137_spill] sm:$0xff]  ;;  %v19999_v31 = vld [vmem:[#allocation138_spill] sm:$0xff] }
 0xc0b   :  { %12861 = vmatprep.subr.bf16.mxu1 %v19989_v17  ;;  %v20000_v17 = vld [vmem:[#allocation139_spill] sm:$0xff] }
 0xc0d   :  { %12767 = vmatpush1.bf16.msra.mxu0 %v19990_v59  ;;  %v20001_v59 = vld [vmem:[#allocation140_spill] sm:$0xff] }
 0xc0e   :  { %12863 = vmatpush1.bf16.msra.mxu1 %v19991_v16  ;;  %12769 = vmatprep.subr.bf16.mxu0 %v19992_v51  ;;  %v20002_v16 = vld [vmem:[#allocation141_spill] sm:$0xff]  ;;  %v20003_v51 = vld [vmem:[#allocation142_spill] sm:$0xff] }
 0xc0f   :  { %12865 = vmatprep.subr.bf16.mxu1 %v19993_v1  ;;  %v20004_v1 = vld [vmem:[#allocation143_spill] sm:$0xff] }
 0xc11   :  { %12771 = vmatpush1.bf16.msra.mxu0 %v19994_v7 }
 0xc12   :  { %12867 = vmatpush1.bf16.msra.mxu1 %v19995_v44  ;;  %12773 = vmatprep.subr.bf16.mxu0 %v19996_v24  ;;  %v20005_v44 = vld [vmem:[#allocation145_spill] sm:$0xff]  ;;  %v20006_v24 = vld [vmem:[#allocation146_spill] sm:$0xff] }
 0xc13   :  { %12869 = vmatprep.subr.bf16.mxu1 %v19997_v5  ;;  %v20007_v5 = vld [vmem:[#allocation147_spill] sm:$0xff] }
 0xc15   :  { %12775 = vmatpush1.bf16.msra.mxu0 %v19998_v18  ;;  %v20008_v18 = vld [vmem:[#allocation148_spill] sm:$0xff] }
 0xc16   :  { %12871 = vmatpush1.bf16.msra.mxu1 %v19999_v31  ;;  %12777 = vmatprep.subr.bf16.mxu0 %v20000_v17  ;;  %v20009_v31 = vld [vmem:[#allocation149_spill] sm:$0xff]  ;;  %v20010_v17 = vld [vmem:[#allocation150_spill] sm:$0xff] }
 0xc17   :  { %12873 = vmatprep.subr.bf16.mxu1 %v20001_v59  ;;  %v20011_v59 = vld [vmem:[#allocation151_spill] sm:$0xff] }
 0xc19   :  { %12779 = vmatpush1.bf16.msra.mxu0 %v20002_v16  ;;  %v20012_v16 = vld [vmem:[#allocation152_spill] sm:$0xff] }
 0xc1a   :  { %12875 = vmatpush1.bf16.msra.mxu1 %v20003_v51  ;;  %12781 = vmatprep.subr.bf16.mxu0 %v20004_v1  ;;  %v20013_v51 = vld [vmem:[#allocation153_spill] sm:$0xff]  ;;  %v20014_v1 = vld [vmem:[#allocation154_spill] sm:$0xff] }
 0xc1b   :  { %12877 = vmatprep.subr.bf16.mxu1 %v19764_v25 }
 0xc1d   :  { %12783 = vmatpush1.bf16.msra.mxu0 %v20005_v44  ;;  %v20015_v44 = vld [vmem:[#allocation156_spill] sm:$0xff] }
 0xc1e   :  { %12879 = vmatpush1.bf16.msra.mxu1 %v20006_v24  ;;  %12785 = vmatprep.subr.bf16.mxu0 %v20007_v5  ;;  %v20016_v24 = vld [vmem:[#allocation157_spill] sm:$0xff]  ;;  %v20017_v5 = vld [vmem:[#allocation158_spill] sm:$0xff] }
 0xc1f   :  { %12881 = vmatprep.subr.bf16.mxu1 %v20008_v18  ;;  %v20018_v18 = vld [vmem:[#allocation159_spill] sm:$0xff] }
 0xc21   :  { %12787 = vmatpush1.bf16.msra.mxu0 %v20009_v31  ;;  %v20019_v31 = vld [vmem:[#allocation160_spill] sm:$0xff] }
 0xc22   :  { %12883 = vmatpush1.bf16.msra.mxu1 %v20010_v17  ;;  %12789 = vmatprep.subr.bf16.mxu0 %v20011_v59  ;;  %v20020_v17 = vld [vmem:[#allocation161_spill] sm:$0xff]  ;;  %v20021_v59 = vld [vmem:[#allocation162_spill] sm:$0xff] }
 0xc23   :  { %12885 = vmatprep.subr.bf16.mxu1 %v20012_v16  ;;  %v20022_v16 = vld [vmem:[#allocation163_spill] sm:$0xff] }
 0xc25   :  { %12791 = vmatpush1.bf16.msra.mxu0 %v20013_v51  ;;  %v20023_v51 = vld [vmem:[#allocation164_spill] sm:$0xff] }
 0xc26   :  { %12887 = vmatpush1.bf16.msra.mxu1 %v20014_v1  ;;  %12793 = vmatprep.subr.bf16.mxu0 %v19534_v35  ;;  %v20024_v1 = vld [vmem:[#allocation165_spill] sm:$0xff] }
 0xc27   :  { %12889 = vmatprep.subr.bf16.mxu1 %v20015_v44  ;;  %v20025_v44 = vld [vmem:[#allocation167_spill] sm:$0xff] }
 0xc29   :  { %12795 = vmatpush1.bf16.msra.mxu0 %v20016_v24  ;;  %v20026_v24 = vld [vmem:[#allocation168_spill] sm:$0xff] }
 0xc2a   :  { %12891 = vmatpush1.bf16.msra.mxu1 %v20017_v5  ;;  %12797 = vmatprep.subr.bf16.mxu0 %v20018_v18  ;;  %v20027_v5 = vld [vmem:[#allocation169_spill] sm:$0xff]  ;;  %v20028_v18 = vld [vmem:[#allocation170_spill] sm:$0xff] }
 0xc2b   :  { %12893 = vmatprep.subr.bf16.mxu1 %v20019_v31  ;;  %v20029_v31 = vld [vmem:[#allocation171_spill] sm:$0xff] }
 0xc2d   :  { %12799 = vmatpush1.bf16.msra.mxu0 %v20020_v17  ;;  %v20030_v17 = vld [vmem:[#allocation172_spill] sm:$0xff] }
 0xc2e   :  { %12895 = vmatpush1.bf16.msra.mxu1 %v20021_v59  ;;  %12801 = vmatprep.subr.bf16.mxu0 %v20022_v16  ;;  %v20031_v59 = vld [vmem:[#allocation173_spill] sm:$0xff]  ;;  %v20032_v16 = vld [vmem:[#allocation174_spill] sm:$0xff] }
 0xc2f   :  { %12897 = vmatprep.subr.bf16.mxu1 %v20023_v51  ;;  %v20033_v51 = vld [vmem:[#allocation175_spill] sm:$0xff] }
 0xc31   :  { %12803 = vmatpush1.bf16.msra.mxu0 %v20024_v1  ;;  %v20034_v1 = vld [vmem:[#allocation176_spill] sm:$0xff] }
 0xc32   :  { %12899 = vmatpush1.bf16.msra.mxu1 %v19304_v22  ;;  %12805 = vmatprep.subr.bf16.mxu0 %v20025_v44  ;;  %v20048_v44 = vld [vmem:[#allocation191_spill] sm:$0xff] }
 0xc33   :  { %12901 = vmatprep.subr.bf16.mxu1 %v20026_v24  ;;  %v20035_v24 = vld [vmem:[#allocation177_spill] sm:$0xff] }
 0xc35   :  { %12807 = vmatpush1.bf16.msra.mxu0 %v20027_v5  ;;  %v20036_v5 = vld [vmem:[#allocation178_spill] sm:$0xff] }
 0xc36   :  { %12903 = vmatpush1.bf16.msra.mxu1 %v20028_v18  ;;  %12809 = vmatprep.subr.bf16.mxu0 %v20029_v31  ;;  %v20037_v18 = vld [vmem:[#allocation179_spill] sm:$0xff]  ;;  %v20038_v31 = vld [vmem:[#allocation180_spill] sm:$0xff] }
 0xc37   :  { %12905 = vmatprep.subr.bf16.mxu1 %v20030_v17  ;;  %v20043_v17 = vld [vmem:[#allocation185_spill] sm:$0xff] }
 0xc39   :  { %12811 = vmatpush1.bf16.msra.mxu0 %v20031_v59  ;;  %v20042_v59 = vld [vmem:[#allocation184_spill] sm:$0xff] }
 0xc3a   :  { %12907 = vmatpush1.bf16.msra.mxu1 %v20032_v16  ;;  %12813 = vmatprep.subr.bf16.mxu0 %v20033_v51  ;;  %v20039_v16 = vld [vmem:[#allocation181_spill] sm:$0xff]  ;;  %v20040_v51 = vld [vmem:[#allocation182_spill] sm:$0xff] }
 0xc3b   :  { %12909 = vmatprep.subr.bf16.mxu1 %v20034_v1  ;;  %v20041_v1 = vld [vmem:[#allocation183_spill] sm:$0xff] }
 0xc3c   :  { %6901 = vmatmul.mubr.f32.vlgmr.msra.gmra.mrb[38].mxu0 %v16942_v29 }
 0xc3d   :  { %7043 = vmatmul.mubr.f32.vlgmr.msra.gmra.mrb[38].mxu1 %v16942_v29  ;;  %12815 = vmatpush1.bf16.msra.mxu0 %v20035_v24  ;;  %v20044_v24 = vld [vmem:[#allocation186_spill] sm:$0xff] }
 0xc3e   :  { %12911 = vmatpush1.bf16.msra.mxu1 %v20036_v5  ;;  %12817 = vmatprep.subr.bf16.mxu0 %v20037_v18  ;;  %v20045_v18 = vld [vmem:[#allocation188_spill] sm:$0xff]  ;;  %v20047_v5 = vld [vmem:[#allocation190_spill] sm:$0xff] }
 0xc3f   :  { %12913 = vmatprep.subr.bf16.mxu1 %v20038_v31  ;;  %6971 = vmatprep.mubr.f32.mxu0 %v18494_v56  ;;  %v20046_v31 = vld [vmem:[#allocation189_spill] sm:$0xff] }
 0xc40   :  { %7113 = vmatprep.mubr.f32.mxu1 %v18494_v56 }
 0xc41   :  { %12819 = vmatpush1.bf16.msra.mxu0 %v20039_v16  ;;  %v20049_v16 = vld [vmem:[#allocation192_spill] sm:$0xff] }
 0xc42   :  { %12915 = vmatpush1.bf16.msra.mxu1 %v20040_v51  ;;  %12821 = vmatprep.subr.bf16.mxu0 %v20041_v1  ;;  %v20050_v51 = vld [vmem:[#allocation193_spill] sm:$0xff]  ;;  %v20051_v1 = vld [vmem:[#allocation194_spill] sm:$0xff] }
 0xc43   :  { %12917 = vmatprep.subr.bf16.mxu1 %v20042_v59  ;;  %v20052_v59 = vld [vmem:[#allocation195_spill] sm:$0xff] }
 0xc45   :  { %12823 = vmatpush1.bf16.msra.mxu0 %v20043_v17  ;;  %v20053_v17 = vld [vmem:[#allocation196_spill] sm:$0xff] }
 0xc46   :  { %12919 = vmatpush1.bf16.msra.mxu1 %v20044_v24  ;;  %12825 = vmatprep.subr.bf16.mxu0 %v19084_v19  ;;  %v20054_v24 = vld [vmem:[#allocation197_spill] sm:$0xff] }
 0xc47   :  { %12921 = vmatprep.subr.bf16.mxu1 %v20045_v18  ;;  %v20055_v18 = vld [vmem:[#allocation199_spill] sm:$0xff] }
 0xc49   :  { %12827 = vmatpush1.bf16.msra.mxu0 %v20046_v31  ;;  %v20056_v31 = vld [vmem:[#allocation200_spill] sm:$0xff] }
 0xc4a   :  { %12923 = vmatpush1.bf16.msra.mxu1 %v20047_v5  ;;  %12829 = vmatprep.subr.bf16.mxu0 %v20048_v44  ;;  %v20057_v5 = vld [vmem:[#allocation201_spill] sm:$0xff]  ;;  %v20058_v44 = vld [vmem:[#allocation202_spill] sm:$0xff] }
 0xc4b   :  { %12925 = vmatprep.subr.bf16.mxu1 %v20049_v16  ;;  %v20059_v16 = vld [vmem:[#allocation203_spill] sm:$0xff] }
 0xc4d   :  { %12831 = vmatpush1.bf16.msra.mxu0 %v20050_v51  ;;  %v20060_v51 = vld [vmem:[#allocation204_spill] sm:$0xff] }
 0xc4e   :  { %12927 = vmatpush1.bf16.msra.mxu1 %v20051_v1  ;;  %12833 = vmatprep.subr.bf16.mxu0 %v20052_v59  ;;  %v20061_v1 = vld [vmem:[#allocation205_spill] sm:$0xff]  ;;  %v20062_v59 = vld [vmem:[#allocation206_spill] sm:$0xff] }
 0xc4f   :  { %12929 = vmatprep.subr.bf16.mxu1 %v20053_v17  ;;  %v20063_v17 = vld [vmem:[#allocation207_spill] sm:$0xff] }
 0xc51   :  { %12835 = vmatpush1.bf16.msra.mxu0 %v20054_v24  ;;  %v20064_v24 = vld [vmem:[#allocation208_spill] sm:$0xff] }
 0xc52   :  { %12931 = vmatpush1.bf16.msra.mxu1 %v18854_v54  ;;  %12837 = vmatprep.subr.bf16.mxu0 %v20055_v18  ;;  %v20183_v18 = vld [vmem:[#allocation41_spill] sm:$0xff]  ;;  %v20185_v54 = vld [vmem:[#allocation43_spill] sm:$0xff] }
 0xc53   :  { %12933 = vmatprep.subr.bf16.mxu1 %v20056_v31  ;;  %v20065_v31 = vld [vmem:[#allocation209_spill] sm:$0xff] }
 0xc55   :  { %12839 = vmatpush1.bf16.msra.mxu0 %v20057_v5  ;;  %v20073_v5 = vld [vmem:[#allocation217_spill] sm:$0xff] }
 0xc56   :  { %12935 = vmatpush1.bf16.msra.mxu1 %v20058_v44  ;;  %12841 = vmatprep.subr.bf16.mxu0 %v20059_v16  ;;  %v20066_v44 = vld [vmem:[#allocation210_spill] sm:$0xff]  ;;  %v20072_v16 = vld [vmem:[#allocation216_spill] sm:$0xff] }
 0xc57   :  { %12937 = vmatprep.subr.bf16.mxu1 %v20060_v51  ;;  %v20067_v51 = vld [vmem:[#allocation211_spill] sm:$0xff] }
 0xc59   :  { %12843 = vmatpush1.bf16.msra.mxu0 %v20061_v1  ;;  %v20068_v1 = vld [vmem:[#allocation212_spill] sm:$0xff] }
 0xc5a   :  { %12939 = vmatpush1.bf16.msra.mxu1 %v20062_v59  ;;  %12941 = vmatprep.subr.bf16.mxu0 %v20063_v17  ;;  %v20069_v59 = vld [vmem:[#allocation213_spill] sm:$0xff]  ;;  %v20070_v17 = vld [vmem:[#allocation214_spill] sm:$0xff] }
 0xc5b   :  { %13037 = vmatprep.subr.bf16.mxu1 %v20064_v24  ;;  %v20071_v24 = vld [vmem:[#allocation215_spill] sm:$0xff] }
 0xc5c   :  { %6972 = vmatmul.mubr.f32.vlgmr.msra.gmra.mrb[38].mxu0 %v16985_v57 }
 0xc5d   :  { %7114 = vmatmul.mubr.f32.vlgmr.msra.gmra.mrb[38].mxu1 %v16985_v57  ;;  %12943 = vmatpush1.bf16.msra.mxu0 %v20065_v31  ;;  %v20074_v31 = vld [vmem:[#allocation219_spill] sm:$0xff] }
 0xc5e   :  { %7184 = vmatprep.mubr.f32.mxu0 %v16946_v12  ;;  %13039 = vmatpush1.bf16.msra.mxu1 %v20066_v44  ;;  %v20075_v44 = vld [vmem:[#allocation220_spill] sm:$0xff] }
 0xc5f   :  { %7326 = vmatprep.mubr.f32.mxu1 %v16946_v12  ;;  %12945 = vmatprep.subr.bf16.mxu0 %v20067_v51  ;;  %v20076_v12 = vld [vmem:[#allocation221_spill] sm:$0xff]  ;;  %v20077_v51 = vld [vmem:[#allocation222_spill] sm:$0xff] }
 0xc60   :  { %13041 = vmatprep.subr.bf16.mxu1 %v20068_v1  ;;  %v20078_v1 = vld [vmem:[#allocation223_spill] sm:$0xff] }
 0xc61   :  { %12947 = vmatpush1.bf16.msra.mxu0 %v20069_v59  ;;  %v20079_v59 = vld [vmem:[#allocation224_spill] sm:$0xff] }
 0xc62   :  { %13043 = vmatpush1.bf16.msra.mxu1 %v20070_v17  ;;  %12949 = vmatprep.subr.bf16.mxu0 %v20071_v24  ;;  %v20080_v17 = vld [vmem:[#allocation225_spill] sm:$0xff]  ;;  %v20081_v24 = vld [vmem:[#allocation226_spill] sm:$0xff] }
 0xc63   :  { %13045 = vmatprep.subr.bf16.mxu1 %v20072_v16  ;;  %v20082_v16 = vld [vmem:[#allocation227_spill] sm:$0xff] }
 0xc65   :  { %12951 = vmatpush1.bf16.msra.mxu0 %v20073_v5  ;;  %v20083_v5 = vld [vmem:[#allocation228_spill] sm:$0xff] }
 0xc66   :  { %13047 = vmatpush1.bf16.msra.mxu1 %v19834_v13  ;;  %12953 = vmatprep.subr.bf16.mxu0 %v20074_v31  ;;  %v20084_v31 = vld [vmem:[#allocation230_spill] sm:$0xff]  ;;  %v20179_v13 = vld [vmem:[#allocation37_spill] sm:$0xff] }
 0xc67   :  { %13049 = vmatprep.subr.bf16.mxu1 %v20075_v44  ;;  %v20085_v44 = vld [vmem:[#allocation231_spill] sm:$0xff] }
 0xc69   :  { %12955 = vmatpush1.bf16.msra.mxu0 %v20076_v12  ;;  %v20086_v12 = vld [vmem:[#allocation232_spill] sm:$0xff] }
 0xc6a   :  { %13051 = vmatpush1.bf16.msra.mxu1 %v20077_v51  ;;  %12957 = vmatprep.subr.bf16.mxu0 %v20078_v1  ;;  %v20087_v51 = vld [vmem:[#allocation233_spill] sm:$0xff]  ;;  %v20088_v1 = vld [vmem:[#allocation234_spill] sm:$0xff] }
 0xc6b   :  { %13053 = vmatprep.subr.bf16.mxu1 %v20079_v59  ;;  %v20089_v59 = vld [vmem:[#allocation235_spill] sm:$0xff] }
 0xc6d   :  { %12959 = vmatpush1.bf16.msra.mxu0 %v20080_v17  ;;  %v20090_v17 = vld [vmem:[#allocation236_spill] sm:$0xff] }
 0xc6e   :  { %13055 = vmatpush1.bf16.msra.mxu1 %v20081_v24  ;;  %12961 = vmatprep.subr.bf16.mxu0 %v20082_v16  ;;  %v20091_v24 = vld [vmem:[#allocation237_spill] sm:$0xff]  ;;  %v20092_v16 = vld [vmem:[#allocation238_spill] sm:$0xff] }
 0xc6f   :  { %13057 = vmatprep.subr.bf16.mxu1 %v20083_v5  ;;  %v20093_v5 = vld [vmem:[#allocation239_spill] sm:$0xff] }
 0xc71   :  { %12963 = vmatpush1.bf16.msra.mxu0 %v19605_v58  ;;  %v20094_v58 = vld [vmem:[#allocation240_spill] sm:$0xff] }
 0xc72   :  { %13059 = vmatpush1.bf16.msra.mxu1 %v20084_v31  ;;  %12965 = vmatprep.subr.bf16.mxu0 %v20085_v44  ;;  %v20095_v31 = vld [vmem:[#allocation241_spill] sm:$0xff]  ;;  %v20096_v44 = vld [vmem:[#allocation242_spill] sm:$0xff] }
 0xc73   :  { %13061 = vmatprep.subr.bf16.mxu1 %v20086_v12  ;;  %v20097_v12 = vld [vmem:[#allocation243_spill] sm:$0xff] }
 0xc75   :  { %12967 = vmatpush1.bf16.msra.mxu0 %v20087_v51  ;;  %v20098_v51 = vld [vmem:[#allocation244_spill] sm:$0xff] }
 0xc76   :  { %13063 = vmatpush1.bf16.msra.mxu1 %v20088_v1  ;;  %12969 = vmatprep.subr.bf16.mxu0 %v20089_v59  ;;  %v20099_v1 = vld [vmem:[#allocation245_spill] sm:$0xff]  ;;  %v20100_v59 = vld [vmem:[#allocation246_spill] sm:$0xff] }
 0xc77   :  { %13065 = vmatprep.subr.bf16.mxu1 %v20090_v17  ;;  %v20101_v17 = vld [vmem:[#allocation247_spill] sm:$0xff] }
 0xc79   :  { %12971 = vmatpush1.bf16.msra.mxu0 %v20091_v24  ;;  %v20102_v24 = vld [vmem:[#allocation248_spill] sm:$0xff] }
 0xc7a   :  { %13067 = vmatpush1.bf16.msra.mxu1 %v20092_v16  ;;  %12973 = vmatprep.subr.bf16.mxu0 %v20093_v5  ;;  %v20103_v16 = vld [vmem:[#allocation249_spill] sm:$0xff]  ;;  %v20104_v5 = vld [vmem:[#allocation250_spill] sm:$0xff] }
 0xc7b   :  { %13069 = vmatprep.subr.bf16.mxu1 %v20094_v58  ;;  %v20105_v58 = vld [vmem:[#allocation251_spill] sm:$0xff] }
 0xc7d   :  { %12975 = vmatpush1.bf16.msra.mxu0 %v20095_v31  ;;  %v20106_v31 = vld [vmem:[#allocation252_spill] sm:$0xff] }
 0xc7e   :  { %13071 = vmatpush1.bf16.msra.mxu1 %v20096_v44  ;;  %12977 = vmatprep.subr.bf16.mxu0 %v20097_v12  ;;  %v20107_v44 = vld [vmem:[#allocation253_spill] sm:$0xff]  ;;  %v20108_v12 = vld [vmem:[#allocation254_spill] sm:$0xff] }
 0xc7f   :  { %13073 = vmatprep.subr.bf16.mxu1 %v20098_v51  ;;  %v20109_v51 = vld [vmem:[#allocation255_spill] sm:$0xff] }
 0xc81   :  { %12979 = vmatpush1.bf16.msra.mxu0 %v20099_v1  ;;  %v20110_v1 = vld [vmem:[#allocation256_spill] sm:$0xff] }
 0xc82   :  { %13075 = vmatpush1.bf16.msra.mxu1 %v20100_v59  ;;  %12981 = vmatprep.subr.bf16.mxu0 %v20101_v17  ;;  %v20111_v59 = vld [vmem:[#allocation257_spill] sm:$0xff]  ;;  %v20112_v17 = vld [vmem:[#allocation258_spill] sm:$0xff] }
 0xc83   :  { %13077 = vmatprep.subr.bf16.mxu1 %v20102_v24  ;;  %v20113_v24 = vld [vmem:[#allocation259_spill] sm:$0xff] }
 0xc85   :  { %12983 = vmatpush1.bf16.msra.mxu0 %v20103_v16  ;;  %v20114_v16 = vld [vmem:[#allocation260_spill] sm:$0xff] }
 0xc86   :  { %13079 = vmatpush1.bf16.msra.mxu1 %v20104_v5  ;;  %12985 = vmatprep.subr.bf16.mxu0 %v20105_v58  ;;  %v20115_v5 = vld [vmem:[#allocation261_spill] sm:$0xff]  ;;  %v20116_v58 = vld [vmem:[#allocation262_spill] sm:$0xff] }
 0xc87   :  { %13081 = vmatprep.subr.bf16.mxu1 %v20106_v31  ;;  %v20117_v31 = vld [vmem:[#allocation263_spill] sm:$0xff] }
 0xc89   :  { %12987 = vmatpush1.bf16.msra.mxu0 %v20107_v44  ;;  %v20118_v44 = vld [vmem:[#allocation264_spill] sm:$0xff] }
 0xc8a   :  { %13083 = vmatpush1.bf16.msra.mxu1 %v20108_v12  ;;  %12989 = vmatprep.subr.bf16.mxu0 %v20109_v51  ;;  %v20119_v12 = vld [vmem:[#allocation265_spill] sm:$0xff]  ;;  %v20120_v51 = vld [vmem:[#allocation266_spill] sm:$0xff] }
 0xc8b   :  { %13085 = vmatprep.subr.bf16.mxu1 %v20110_v1  ;;  %v20121_v1 = vld [vmem:[#allocation267_spill] sm:$0xff] }
 0xc8d   :  { %12991 = vmatpush1.bf16.msra.mxu0 %v20111_v59  ;;  %v20122_v59 = vld [vmem:[#allocation268_spill] sm:$0xff] }
 0xc8e   :  { %13087 = vmatpush1.bf16.msra.mxu1 %v20112_v17  ;;  %12993 = vmatprep.subr.bf16.mxu0 %v20113_v24  ;;  %v20123_v17 = vld [vmem:[#allocation269_spill] sm:$0xff]  ;;  %v20124_v24 = vld [vmem:[#allocation270_spill] sm:$0xff] }
 0xc8f   :  { %13089 = vmatprep.subr.bf16.mxu1 %v20114_v16  ;;  %v20125_v16 = vld [vmem:[#allocation271_spill] sm:$0xff] }
 0xc91   :  { %12995 = vmatpush1.bf16.msra.mxu0 %v20115_v5  ;;  %v20126_v5 = vld [vmem:[#allocation272_spill] sm:$0xff] }
 0xc92   :  { %13091 = vmatpush1.bf16.msra.mxu1 %v20116_v58  ;;  %12997 = vmatprep.subr.bf16.mxu0 %v20117_v31  ;;  %v20141_v31 = vld [vmem:[#allocation287_spill] sm:$0xff] }
 0xc93   :  { %13093 = vmatprep.subr.bf16.mxu1 %v20118_v44  ;;  %v20127_v44 = vld [vmem:[#allocation273_spill] sm:$0xff] }
 0xc95   :  { %12999 = vmatpush1.bf16.msra.mxu0 %v20119_v12  ;;  %v20128_v12 = vld [vmem:[#allocation274_spill] sm:$0xff] }
 0xc96   :  { %13095 = vmatpush1.bf16.msra.mxu1 %v20120_v51  ;;  %13001 = vmatprep.subr.bf16.mxu0 %v20121_v1  ;;  %v20129_v51 = vld [vmem:[#allocation275_spill] sm:$0xff]  ;;  %v20130_v1 = vld [vmem:[#allocation276_spill] sm:$0xff] }
 0xc97   :  { %13097 = vmatprep.subr.bf16.mxu1 %v20122_v59  ;;  %v20140_v59 = vld [vmem:[#allocation286_spill] sm:$0xff] }
 0xc99   :  { %13003 = vmatpush1.bf16.msra.mxu0 %v20123_v17  ;;  %v20134_v17 = vld [vmem:[#allocation280_spill] sm:$0xff] }
 0xc9a   :  { %13099 = vmatpush1.bf16.msra.mxu1 %v20124_v24  ;;  %13005 = vmatprep.subr.bf16.mxu0 %v20125_v16  ;;  %v20131_v24 = vld [vmem:[#allocation277_spill] sm:$0xff]  ;;  %v20132_v16 = vld [vmem:[#allocation278_spill] sm:$0xff] }
 0xc9b   :  { %13101 = vmatprep.subr.bf16.mxu1 %v20126_v5  ;;  %v20133_v5 = vld [vmem:[#allocation279_spill] sm:$0xff] }
 0xc9c   :  { %7185 = vmatmul.mubr.f32.vlgmr.msra.gmra.mrb[40].mxu0 %v16942_v29 }
 0xc9d   :  { %7327 = vmatmul.mubr.f32.vlgmr.msra.gmra.mrb[40].mxu1 %v16942_v29  ;;  %13007 = vmatpush1.bf16.msra.mxu0 %v20127_v44  ;;  %v20135_v29 = vld [vmem:[#allocation281_spill] sm:$0xff]  ;;  %v20136_v44 = vld [vmem:[#allocation282_spill] sm:$0xff] }
 0xc9e   :  { %13103 = vmatpush1.bf16.msra.mxu1 %v20128_v12  ;;  %13009 = vmatprep.subr.bf16.mxu0 %v20129_v51  ;;  %v20137_v12 = vld [vmem:[#allocation283_spill] sm:$0xff]  ;;  %v20138_v51 = vld [vmem:[#allocation284_spill] sm:$0xff] }
 0xc9f   :  { %13105 = vmatprep.subr.bf16.mxu1 %v20130_v1  ;;  %7255 = vmatprep.mubr.f32.mxu0 %v18494_v56  ;;  %v20139_v1 = vld [vmem:[#allocation285_spill] sm:$0xff] }
 0xca0   :  { %7397 = vmatprep.mubr.f32.mxu1 %v18494_v56 }
 0xca1   :  { %13011 = vmatpush1.bf16.msra.mxu0 %v20131_v24  ;;  %v20142_v24 = vld [vmem:[#allocation288_spill] sm:$0xff] }
 0xca2   :  { %13107 = vmatpush1.bf16.msra.mxu1 %v20132_v16  ;;  %13013 = vmatprep.subr.bf16.mxu0 %v20133_v5  ;;  %v20143_v16 = vld [vmem:[#allocation289_spill] sm:$0xff]  ;;  %v20144_v5 = vld [vmem:[#allocation290_spill] sm:$0xff] }
 0xca3   :  { %13109 = vmatprep.subr.bf16.mxu1 %v20134_v17  ;;  %v20145_v17 = vld [vmem:[#allocation291_spill] sm:$0xff] }
 0xca5   :  { %13015 = vmatpush1.bf16.msra.mxu0 %v20135_v29  ;;  %v20146_v29 = vld [vmem:[#allocation292_spill] sm:$0xff] }
 0xca6   :  { %13111 = vmatpush1.bf16.msra.mxu1 %v20136_v44  ;;  %13017 = vmatprep.subr.bf16.mxu0 %v20137_v12  ;;  %v20147_v44 = vld [vmem:[#allocation293_spill] sm:$0xff]  ;;  %v20148_v12 = vld [vmem:[#allocation294_spill] sm:$0xff] }
 0xca7   :  { %13113 = vmatprep.subr.bf16.mxu1 %v20138_v51  ;;  %v20149_v51 = vld [vmem:[#allocation295_spill] sm:$0xff] }
 0xca9   :  { %13019 = vmatpush1.bf16.msra.mxu0 %v20139_v1  ;;  %v20150_v1 = vld [vmem:[#allocation296_spill] sm:$0xff] }
 0xcaa   :  { %13115 = vmatpush1.bf16.msra.mxu1 %v20140_v59  ;;  %13021 = vmatprep.subr.bf16.mxu0 %v20141_v31  ;;  %v20151_v59 = vld [vmem:[#allocation297_spill] sm:$0xff]  ;;  %v20152_v31 = vld [vmem:[#allocation298_spill] sm:$0xff] }
 0xcab   :  { %13117 = vmatprep.subr.bf16.mxu1 %v20142_v24  ;;  %v20153_v24 = vld [vmem:[#allocation299_spill] sm:$0xff] }
 0xcad   :  { %13023 = vmatpush1.bf16.msra.mxu0 %v20143_v16  ;;  %v20154_v16 = vld [vmem:[#allocation300_spill] sm:$0xff] }
 0xcae   :  { %13119 = vmatpush1.bf16.msra.mxu1 %v20144_v5  ;;  %13025 = vmatprep.subr.bf16.mxu0 %v20145_v17  ;;  %v20155_v5 = vld [vmem:[#allocation301_spill] sm:$0xff]  ;;  %v20156_v17 = vld [vmem:[#allocation302_spill] sm:$0xff] }
 0xcaf   :  { %13121 = vmatprep.subr.bf16.mxu1 %v20146_v29  ;;  %v20157_v29 = vld [vmem:[#allocation15_spill] sm:$0xff] }
 0xcb1   :  { %13027 = vmatpush1.bf16.msra.mxu0 %v20147_v44  ;;  %v20158_v44 = vld [vmem:[#allocation16_spill] sm:$0xff] }
 0xcb2   :  { %13123 = vmatpush1.bf16.msra.mxu1 %v20148_v12  ;;  %13029 = vmatprep.subr.bf16.mxu0 %v20149_v51  ;;  %v20168_v51 = vld [vmem:[#allocation26_spill] sm:$0xff]  ;;  %v20178_v12 = vld [vmem:[#allocation36_spill] sm:$0xff] }
 0xcb3   :  { %13125 = vmatprep.subr.bf16.mxu1 %v20150_v1  ;;  %v20159_v1 = vld [vmem:[#allocation17_spill] sm:$0xff] }
 0xcb5   :  { %13031 = vmatpush1.bf16.msra.mxu0 %v20151_v59  ;;  %v20160_v59 = vld [vmem:[#allocation18_spill] sm:$0xff] }
 0xcb6   :  { %13127 = vmatpush1.bf16.msra.mxu1 %v20152_v31  ;;  %13033 = vmatprep.subr.bf16.mxu0 %v20153_v24  ;;  %v20161_v31 = vld [vmem:[#allocation19_spill] sm:$0xff]  ;;  %v20162_v24 = vld [vmem:[#allocation20_spill] sm:$0xff] }
 0xcb7   :  { %13129 = vmatprep.subr.bf16.mxu1 %v20154_v16  ;;  %v20163_v16 = vld [vmem:[#allocation21_spill] sm:$0xff] }
 0xcb9   :  { %13035 = vmatpush1.bf16.msra.mxu0 %v20155_v5  ;;  %v20164_v5 = vld [vmem:[#allocation22_spill] sm:$0xff] }
 0xcba   :  { %13131 = vmatpush1.bf16.msra.mxu1 %v20156_v17  ;;  %13133 = vmatprep.subr.bf16.mxu0 %v20157_v29  ;;  %v20165_v17 = vld [vmem:[#allocation23_spill] sm:$0xff]  ;;  %v20166_v29 = vld [vmem:[#allocation24_spill] sm:$0xff] }
 0xcbb   :  { %13229 = vmatprep.subr.bf16.mxu1 %v20158_v44  ;;  %v20167_v44 = vld [vmem:[#allocation25_spill] sm:$0xff] }
 0xcbc   :  { %7256 = vmatmul.mubr.f32.vlgmr.msra.gmra.mrb[40].mxu0 %v16985_v57 }
 0xcbd   :  { %7398 = vmatmul.mubr.f32.vlgmr.msra.gmra.mrb[40].mxu1 %v16985_v57  ;;  %13135 = vmatpush1.bf16.msra.mxu0 %v20159_v1  ;;  %v20169_v57 = vld [vmem:[#allocation27_spill] sm:$0xff]  ;;  %v20170_v1 = vld [vmem:[#allocation28_spill] sm:$0xff] }
 0xcbe   :  { %13231 = vmatpush1.bf16.msra.mxu1 %v20160_v59  ;;  %13137 = vmatprep.subr.bf16.mxu0 %v20161_v31  ;;  %v20171_v59 = vld [vmem:[#allocation29_spill] sm:$0xff]  ;;  %v20172_v31 = vld [vmem:[#allocation30_spill] sm:$0xff] }
 0xcbf   :  { %13233 = vmatprep.subr.bf16.mxu1 %v20162_v24  ;;  %v20173_v24 = vld [vmem:[#allocation31_spill] sm:$0xff] }
 0xcc1   :  { %13139 = vmatpush1.bf16.msra.mxu0 %v20163_v16  ;;  %v20174_v16 = vld [vmem:[#allocation32_spill] sm:$0xff] }
 0xcc2   :  { %13235 = vmatpush1.bf16.msra.mxu1 %v20164_v5  ;;  %13141 = vmatprep.subr.bf16.mxu0 %v20165_v17  ;;  %v20175_v5 = vld [vmem:[#allocation33_spill] sm:$0xff]  ;;  %v20176_v17 = vld [vmem:[#allocation34_spill] sm:$0xff] }
 0xcc3   :  { %13237 = vmatprep.subr.bf16.mxu1 %v20166_v29  ;;  %v20177_v29 = vld [vmem:[#allocation35_spill] sm:$0xff] }
 0xcc5   :  { %13143 = vmatpush1.bf16.msra.mxu0 %v20167_v44 }
 0xcc6   :  { %13239 = vmatpush1.bf16.msra.mxu1 %v20168_v51  ;;  %13145 = vmatprep.subr.bf16.mxu0 %v20169_v57 }
 0xcc7   :  { %13241 = vmatprep.subr.bf16.mxu1 %v20170_v1 }
 0xcc9   :  { %13147 = vmatpush1.bf16.msra.mxu0 %v20171_v59 }
 0xcca   :  { %13243 = vmatpush1.bf16.msra.mxu1 %v20172_v31  ;;  %13149 = vmatprep.subr.bf16.mxu0 %v20173_v24  ;;  %v20180_v31 = vld [vmem:[#allocation38_spill] sm:$0xff]  ;;  %v20181_v24 = vld [vmem:[#allocation39_spill] sm:$0xff] }
 0xccb   :  { %13245 = vmatprep.subr.bf16.mxu1 %v20174_v16 }
 0xccd   :  { %13151 = vmatpush1.bf16.msra.mxu0 %v20175_v5 }
 0xcce   :  { %13247 = vmatpush1.bf16.msra.mxu1 %v20176_v17  ;;  %13153 = vmatprep.subr.bf16.mxu0 %v20177_v29  ;;  %v20182_v17 = vld [vmem:[#allocation40_spill] sm:$0xff] }
 0xccf   :  { %v6689_v44 = vpop.f32.mrb[36].mxu0  ;;  %v6831_v51 = vpop.f32.mrb[36].mxu1  ;;  %13249 = vmatprep.subr.bf16.mxu1 %v20178_v12  ;;  %v20184_v12 = vld [vmem:[#allocation42_spill] sm:$0xff] }
 0xcd0   :  { %v6691_v57 = vpop.f32.mrb[37].mxu0  ;;  %v6833_v1 = vpop.f32.mrb[37].mxu1 }
 0xcd1   :  { %v7416_v58 = vcombine.low %v6689_v44, %v6691_v57  ;;  %v7417_v59 = vcombine.low %v6831_v51, %v6833_v1  ;;  %13155 = vmatpush1.bf16.msra.mxu0 %v20179_v13  ;;  %v20186_v44 = vld [vmem:[#allocation44_spill] sm:$0xff]  ;;  %v20187_v13 = vld [vmem:[#allocation45_spill] sm:$0xff]  ;;  %v20188_v51 = vld [vmem:[#allocation46_spill] sm:$0xff] }
 0xcd2   :  { %13251 = vmatpush1.bf16.msra.mxu1 %v20180_v31  ;;  %13157 = vmatprep.subr.bf16.mxu0 %v20181_v24  ;;  %v20189_v57 = vld [vmem:[#allocation47_spill] sm:$0xff]  ;;  %v20191_v1 = vld [vmem:[#allocation49_spill] sm:$0xff] }
 0xcd3   :  { %v7424_v16 = vrot.slane %v7416_v58, %v15159_v32  ;;  %v7431_v5 = vrot.slane %v7417_v59, %v15159_v32  ;;  %13253 = vmatprep.subr.bf16.mxu1 %v20182_v17  ;;  %v20190_v58 = vld [vmem:[#allocation48_spill] sm:$0xff]  ;;  %v20192_v59 = vld [vmem:[#allocation50_spill] sm:$0xff]  ;;  %v20193_v31 = vld [vmem:[#allocation51_spill] sm:$0xff] }
 0xcd4   :  { %v20195_v24 = vld [vmem:[#allocation53_spill] sm:$0xff] }
 0xcd5   :  { %v7432_v29 = vcombine.low %v7424_v16, %v7431_v5  ;;  %13159 = vmatpush1.bf16.msra.mxu0 %v20183_v18  ;;  %v20194_v18 = vld [vmem:[#allocation52_spill] sm:$0xff]  ;;  %v20197_v16 = vld [vmem:[#allocation55_spill] sm:$0xff]  ;;  %v20199_v17 = vld [vmem:[#allocation57_spill] sm:$0xff] }
 0xcd6   :  { %13255 = vmatpush1.bf16.msra.mxu1 %v20184_v12  ;;  %13161 = vmatprep.subr.bf16.mxu0 %v20185_v54  ;;  %v20196_v54 = vld [vmem:[#allocation54_spill] sm:$0xff]  ;;  %v20198_v5 = vld [vmem:[#allocation56_spill] sm:$0xff] }
 0xcd7   :  { %13257 = vmatprep.subr.bf16.mxu1 %v20186_v44  ;;  %v20200_v12 = vld [vmem:[#allocation58_spill] sm:$0xff]  ;;  %v20201_v44 = vld [vmem:[#allocation59_spill] sm:$0xff] }
 0xcd9   :  { %13163 = vmatpush1.bf16.msra.mxu0 %v20187_v13  ;;  %v20202_v13 = vld [vmem:[#allocation60_spill] sm:$0xff] }
 0xcda   :  { %13259 = vmatpush1.bf16.msra.mxu1 %v20188_v51  ;;  %13165 = vmatprep.subr.bf16.mxu0 %v20189_v57  ;;  %v20203_v51 = vld [vmem:[#allocation61_spill] sm:$0xff]  ;;  %v20204_v57 = vld [vmem:[#allocation62_spill] sm:$0xff] }
 0xcdb   :  { %13261 = vmatprep.subr.bf16.mxu1 %v20190_v58  ;;  %v20205_v58 = vld [vmem:[#allocation63_spill] sm:$0xff] }
 0xcdd   :  { %13167 = vmatpush1.bf16.msra.mxu0 %v20191_v1  ;;  %v20206_v1 = vld [vmem:[#allocation64_spill] sm:$0xff] }
 0xcde   :  { %13263 = vmatpush1.bf16.msra.mxu1 %v20192_v59  ;;  %13169 = vmatprep.subr.bf16.mxu0 %v20193_v31  ;;  %v20207_v59 = vld [vmem:[#allocation65_spill] sm:$0xff]  ;;  %v20208_v31 = vld [vmem:[#allocation66_spill] sm:$0xff] }
 0xcdf   :  { %13265 = vmatprep.subr.bf16.mxu1 %v20194_v18  ;;  %v20209_v18 = vld [vmem:[#allocation67_spill] sm:$0xff] }
 0xce1   :  { %13171 = vmatpush1.bf16.msra.mxu0 %v20195_v24  ;;  %v20210_v24 = vld [vmem:[#allocation68_spill] sm:$0xff] }
 0xce2   :  { %13267 = vmatpush1.bf16.msra.mxu1 %v20196_v54  ;;  %13173 = vmatprep.subr.bf16.mxu0 %v20197_v16  ;;  %v20211_v54 = vld [vmem:[#allocation69_spill] sm:$0xff]  ;;  %v20212_v16 = vld [vmem:[#allocation70_spill] sm:$0xff] }
 0xce3   :  { %13269 = vmatprep.subr.bf16.mxu1 %v20198_v5  ;;  %v20213_v5 = vld [vmem:[#allocation71_spill] sm:$0xff] }
 0xce5   :  { %13175 = vmatpush1.bf16.msra.mxu0 %v20199_v17  ;;  %v20214_v17 = vld [vmem:[#allocation72_spill] sm:$0xff] }
 0xce6   :  { %13271 = vmatpush1.bf16.msra.mxu1 %v20200_v12  ;;  %13177 = vmatprep.subr.bf16.mxu0 %v20201_v44  ;;  %v20215_v12 = vld [vmem:[#allocation73_spill] sm:$0xff]  ;;  %v20216_v44 = vld [vmem:[#allocation74_spill] sm:$0xff] }
 0xce7   :  { %13273 = vmatprep.subr.bf16.mxu1 %v20202_v13  ;;  %v20217_v13 = vld [vmem:[#allocation75_spill] sm:$0xff] }
 0xce9   :  { %13179 = vmatpush1.bf16.msra.mxu0 %v20203_v51  ;;  %v20218_v51 = vld [vmem:[#allocation76_spill] sm:$0xff] }
 0xcea   :  { %13275 = vmatpush1.bf16.msra.mxu1 %v20204_v57  ;;  %13181 = vmatprep.subr.bf16.mxu0 %v20205_v58  ;;  %v20219_v57 = vld [vmem:[#allocation77_spill] sm:$0xff]  ;;  %v20220_v58 = vld [vmem:[#allocation78_spill] sm:$0xff] }
 0xceb   :  { %13277 = vmatprep.subr.bf16.mxu1 %v20206_v1  ;;  %v20221_v1 = vld [vmem:[#allocation79_spill] sm:$0xff] }
 0xced   :  { %13183 = vmatpush1.bf16.msra.mxu0 %v20207_v59  ;;  %v20222_v59 = vld [vmem:[#allocation80_spill] sm:$0xff] }
 0xcee   :  { %13279 = vmatpush1.bf16.msra.mxu1 %v20208_v31  ;;  %13185 = vmatprep.subr.bf16.mxu0 %v20209_v18 }
 0xcef   :  { %13281 = vmatprep.subr.bf16.mxu1 %v20210_v24 }
 0xcf1   :  { %13187 = vmatpush1.bf16.msra.mxu0 %v20211_v54 }
 0xcf2   :  { %13283 = vmatpush1.bf16.msra.mxu1 %v20212_v16  ;;  %13189 = vmatprep.subr.bf16.mxu0 %v20213_v5 }
 0xcf3   :  { %13285 = vmatprep.subr.bf16.mxu1 %v20214_v17  ;;  %v8948_v17 = vld [vmem:[%s17789_s0 + $0x90] sm:$0xff] }
 0xcf5   :  { %13191 = vmatpush1.bf16.msra.mxu0 %v20215_v12 }
 0xcf6   :  { %13287 = vmatpush1.bf16.msra.mxu1 %v20216_v44  ;;  %13193 = vmatprep.subr.bf16.mxu0 %v20217_v13  ;;  %v8949_v13 = vld [vmem:[%s17789_s0 + $0x98] sm:$0xff] }
 0xcf7   :  { %13289 = vmatprep.subr.bf16.mxu1 %v20218_v51  ;;  %v7470_v51 = vadd.f32 %v8948_v17, %v7432_v29 }
 0xcf9   :  { %13195 = vmatpush1.bf16.msra.mxu0 %v20219_v57 }
 0xcfa   :  { %13291 = vmatpush1.bf16.msra.mxu1 %v20220_v58  ;;  %13197 = vmatprep.subr.bf16.mxu0 %v20221_v1  ;;  %v7481_v1 = vrot.slane %v7470_v51, 6 }
 0xcfb   :  { %13293 = vmatprep.subr.bf16.mxu1 %v20222_v59 }
 0xd2f   :  { %v6973_v31 = vpop.f32.mrb[38].mxu0 }
 0xd30   :  { %v7115_v18 = vpop.f32.mrb[38].mxu1  ;;  %v6975_v24 = vpop.f32.mrb[39].mxu0 }
 0xd31   :  { %v7433_v54 = vcombine.low %v6973_v31, %v6975_v24  ;;  %v7117_v16 = vpop.f32.mrb[39].mxu1  ;;  %v8951_v24 = vmul.f32 -1.442695, %v7470_v51 }
 0xd32   :  { %v7434_v5 = vcombine.low %v7115_v18, %v7117_v16 }
 0xd33   :  { %v7441_v12 = vrot.slane %v7433_v54, %v15159_v32 }
 0xd34   :  { %v7448_v44 = vrot.slane %v7434_v5, %v15159_v32 }
 0xd36   :  { %v7449_v57 = vcombine.low %v7441_v12, %v7448_v44  ;;  %v8950_v12 = vld [vmem:[%s17789_s0 + $0xa0] sm:$0xff] }
 0xd38   :  { %v7471_v58 = vadd.f32 %v8949_v13, %v7449_v57 }
 0xd3a   :  { %v7482_v59 = vrot.slane %v7471_v58, 6 }
 0xd3c   :  { %v7483_v31 = vsel %vm1589_vm0, %v7481_v1, %v7482_v59  ;;  %v7492_v1 = vrot.slane %v7471_v58, 4 }
 0xd3d   :  { %v8952_v18 = vmul.f32 -1.442695, %v7483_v31 }
 0xd3f   :  { %13985 = vpow2.f32 %v8952_v18 }
 0xd40   :  { %13987 = vpow2.f32 %v8951_v24 }
 0xd49   :  { %v13986_v7 = vpop.eup %13985 }
 0xd4a   :  { %v13988_v17 = vpop.eup %13987  ;;  %v7488_v13 = vadd.f32 1.0, %v13986_v7 }
 0xd4b   :  { %v7476_v51 = vadd.f32 1.0, %v13988_v17 }
 0xd4c   :  { %13989 = vrcp.f32 %v7488_v13  ;;  %v20262_v13 = vld [vmem:[#allocation160_spill] sm:$0xff] }
 0xd4d   :  { %13991 = vrcp.f32 %v7476_v51  ;;  %v20263_v51 = vld [vmem:[#allocation161_spill] sm:$0xff] }
 0xd8f   :  { %v7257_v16 = vpop.f32.mrb[40].mxu0 }
 0xd90   :  { %v7399_v19 = vpop.f32.mrb[40].mxu1  ;;  %v7259_v54 = vpop.f32.mrb[41].mxu0 }
 0xd91   :  { %v7450_v22 = vcombine.low %v7257_v16, %v7259_v54  ;;  %v7401_v5 = vpop.f32.mrb[41].mxu1 }
 0xd92   :  { %v7451_v35 = vcombine.low %v7399_v19, %v7401_v5 }
 0xd93   :  { %v7458_v25 = vrot.slane %v7450_v22, %v15159_v32 }
 0xd94   :  { %v7465_v29 = vrot.slane %v7451_v35, %v15159_v32  ;;  %v13990_v35 = vpop.eup %13989 }
 0xd95   :  { %v13992_v18 = vpop.eup %13991  ;;  %v7505_v54 = vmul.f32 %v13990_v35, %v16938_v37  ;;  %v20254_v37 = vld [vmem:[#allocation152_spill] sm:$0xff] }
 0xd96   :  { %v7466_v44 = vcombine.low %v7458_v25, %v7465_v29  ;;  %v20270_v35 = vld [vmem:[#allocation168_spill] sm:$0xff] }
 0xd98   :  { %v7472_v57 = vadd.f32 %v8950_v12, %v7466_v44 }
 0xd9a   :  { %v7493_v59 = vrot.slane %v7472_v57, 4  ;;  %v7497_v31 = vrot.slane %v7472_v57, 2  ;;  %v20264_v57 = vld [vmem:[#allocation162_spill] sm:$0xff] }
 0xd9c   :  { %v7494_v19 = vsel %vm1601_vm1, %v7492_v1, %v7493_v59  ;;  %v8953_v22 = vmul.f32 -1.442695, %v7497_v31  ;;  %v20265_v1 = vld [vmem:[#allocation163_spill] sm:$0xff]  ;;  %v20266_v59 = vld [vmem:[#allocation164_spill] sm:$0xff]  ;;  %v20267_v31 = vld [vmem:[#allocation165_spill] sm:$0xff] }
 0xd9d   :  { %13993 = vtanh.f32 %v7494_v19  ;;  %v20268_v19 = vld [vmem:[#allocation166_spill] sm:$0xff] }
 0xd9e   :  { %13995 = vpow2.f32 %v8953_v22  ;;  %v20269_v22 = vld [vmem:[#allocation167_spill] sm:$0xff] }
 0xda7   :  { %v13994_v24 = vpop.eup %13993 }
 0xda8   :  { %v13996_v16 = vpop.eup %13995  ;;  %v7506_v25 = vmul.f32 %v13994_v24, %v13992_v18  ;;  %v20271_v18 = vld [vmem:[#allocation169_spill] sm:$0xff]  ;;  %v20272_v24 = vld [vmem:[#allocation170_spill] sm:$0xff] }
 0xda9   :  { %v7502_v7 = vadd.f32 1.0, %v13996_v16  ;;  %v20273_v16 = vld [vmem:[#allocation171_spill] sm:$0xff] }
 0xdaa   :  { %v17281_v5 = vadd.f32 %v7506_v25, %v7505_v54  ;;  %v20274_v54 = vld [vmem:[#allocation172_spill] sm:$0xff]  ;;  %v20275_v25 = vld [vmem:[#allocation173_spill] sm:$0xff] }
 0xdab   :  { %13997 = vrcp.f32 %v7502_v7  ;;  %v20276_v7 = vld [vmem:[#allocation174_spill] sm:$0xff] }
 0xdac   :  { %13999 = vtanh.f32 %v17281_v5 }
 0xdb5   :  { %v13998_v58 = vpop.eup %13997 }
 0xdb6   :  { %v14000_v29 = vpop.eup %13999 }
 0xdb7   :  { %v7509_v17 = vmul.f32 %v14000_v29, %v13998_v58  ;;  %v20277_v58 = vld [vmem:[#allocation175_spill] sm:$0xff]  ;;  %v20278_v29 = vld [vmem:[#allocation176_spill] sm:$0xff] }
 0xdb9   :  { %v17285_v12 = vrot.slane %v7509_v17, %v15159_v32 }
 0xdbb   :  { %v17289_v44 = vcombine.high %v17285_v12, %v17285_v12 }
 0xdbd   :  { %7598 = vmatprep.mubr.f32.mxu0 %v17289_v44  ;;  %7740 = vmatprep.mubr.f32.mxu1 %v17289_v44 }
 0xdbe   :  { %7599 = vmatmul.mubr.f32.vlgmr.msra.gmra.mrb[42].mxu0 %v17285_v12  ;;  %7741 = vmatmul.mubr.f32.vlgmr.msra.gmra.mrb[42].mxu1 %v17285_v12 }
 0xdbf   :  { %13199 = vmatpush1.bf16.msra.mxu0 %v18737_v46  ;;  %13295 = vmatpush1.bf16.msra.mxu1 %v18738_v30  ;;  %v7515_v46 = vcombine.high %v7509_v17, %v7509_v17  ;;  %v20279_v17 = vld [vmem:[#allocation177_spill] sm:$0xff] }
 0xdc0   :  { %13201 = vmatprep.subr.bf16.mxu0 %v18739_v33  ;;  %13297 = vmatprep.subr.bf16.mxu1 %v18740_v23  ;;  %v20223_v33 = vld [vmem:[#allocation121_spill] sm:$0xff]  ;;  %v20224_v23 = vld [vmem:[#allocation122_spill] sm:$0xff] }
 0xdc1   :  { %7669 = vmatprep.mubr.f32.mxu0 %v18494_v56  ;;  %7811 = vmatprep.mubr.f32.mxu1 %v18494_v56  ;;  %v17328_v30 = vrot.slane %v7515_v46, %v15159_v32  ;;  %v20280_v46 = vld [vmem:[#allocation178_spill] sm:$0xff] }
 0xdc3   :  { %13203 = vmatpush1.bf16.msra.mxu0 %v18741_v10  ;;  %13299 = vmatpush1.bf16.msra.mxu1 %v18983_v38  ;;  %v20225_v10 = vld [vmem:[#allocation123_spill] sm:$0xff]  ;;  %v20226_v38 = vld [vmem:[#allocation124_spill] sm:$0xff] }
 0xdc4   :  { %13205 = vmatprep.subr.bf16.mxu0 %v18984_v43  ;;  %13301 = vmatprep.subr.bf16.mxu1 %v18985_v50  ;;  %v20227_v43 = vld [vmem:[#allocation125_spill] sm:$0xff]  ;;  %v20228_v50 = vld [vmem:[#allocation126_spill] sm:$0xff] }
 0xdc7   :  { %13207 = vmatpush1.bf16.msra.mxu0 %v18986_v39  ;;  %13303 = vmatpush1.bf16.msra.mxu1 %v18987_v40  ;;  %v20229_v39 = vld [vmem:[#allocation127_spill] sm:$0xff]  ;;  %v20230_v40 = vld [vmem:[#allocation128_spill] sm:$0xff] }
 0xdc8   :  { %13209 = vmatprep.subr.bf16.mxu0 %v18988_v62  ;;  %13305 = vmatprep.subr.bf16.mxu1 %v18989_v36  ;;  %v20231_v62 = vld [vmem:[#allocation129_spill] sm:$0xff]  ;;  %v20232_v36 = vld [vmem:[#allocation130_spill] sm:$0xff] }
 0xdcb   :  { %13211 = vmatpush1.bf16.msra.mxu0 %v19231_v63  ;;  %13307 = vmatpush1.bf16.msra.mxu1 %v19232_v48  ;;  %v20233_v63 = vld [vmem:[#allocation131_spill] sm:$0xff]  ;;  %v20234_v48 = vld [vmem:[#allocation132_spill] sm:$0xff] }
 0xdcc   :  { %13213 = vmatprep.subr.bf16.mxu0 %v19233_v4  ;;  %13309 = vmatprep.subr.bf16.mxu1 %v19234_v8  ;;  %v20235_v4 = vld [vmem:[#allocation133_spill] sm:$0xff]  ;;  %v20236_v8 = vld [vmem:[#allocation134_spill] sm:$0xff] }
 0xdcf   :  { %13215 = vmatpush1.bf16.msra.mxu0 %v19235_v9  ;;  %13311 = vmatpush1.bf16.msra.mxu1 %v19236_v53  ;;  %v20237_v9 = vld [vmem:[#allocation135_spill] sm:$0xff]  ;;  %v20238_v53 = vld [vmem:[#allocation136_spill] sm:$0xff] }
 0xdd0   :  { %13217 = vmatprep.subr.bf16.mxu0 %v19237_v6  ;;  %13313 = vmatprep.subr.bf16.mxu1 %v19479_v26  ;;  %v20239_v6 = vld [vmem:[#allocation137_spill] sm:$0xff]  ;;  %v20240_v26 = vld [vmem:[#allocation138_spill] sm:$0xff] }
 0xdd3   :  { %13219 = vmatpush1.bf16.msra.mxu0 %v19480_v52  ;;  %13315 = vmatpush1.bf16.msra.mxu1 %v19481_v61  ;;  %v20241_v52 = vld [vmem:[#allocation139_spill] sm:$0xff]  ;;  %v20242_v61 = vld [vmem:[#allocation140_spill] sm:$0xff] }
 0xdd4   :  { %13221 = vmatprep.subr.bf16.mxu0 %v19482_v60  ;;  %13317 = vmatprep.subr.bf16.mxu1 %v19483_v41  ;;  %v20243_v60 = vld [vmem:[#allocation141_spill] sm:$0xff]  ;;  %v20244_v41 = vld [vmem:[#allocation142_spill] sm:$0xff] }
 0xdd7   :  { %13223 = vmatpush1.bf16.msra.mxu0 %v19484_v42  ;;  %13319 = vmatpush1.bf16.msra.mxu1 %v19485_v20  ;;  %v20245_v42 = vld [vmem:[#allocation143_spill] sm:$0xff]  ;;  %v20246_v20 = vld [vmem:[#allocation144_spill] sm:$0xff] }
 0xdd8   :  { %13225 = vmatprep.subr.bf16.mxu0 %v19727_v21  ;;  %13321 = vmatprep.subr.bf16.mxu1 %v19728_v0  ;;  %v20247_v21 = vld [vmem:[#allocation145_spill] sm:$0xff]  ;;  %v20248_v0 = vld [vmem:[#allocation146_spill] sm:$0xff] }
 0xddb   :  { %13227 = vmatpush1.bf16.msra.mxu0 %v19729_v45  ;;  %13323 = vmatpush1.bf16.msra.mxu1 %v19730_v15  ;;  %v20249_v45 = vld [vmem:[#allocation147_spill] sm:$0xff]  ;;  %v20250_v15 = vld [vmem:[#allocation148_spill] sm:$0xff] }
 0xddc   :  { %13325 = vmatprep.subr.bf16.mxu0 %v19731_v11  ;;  %13421 = vmatprep.subr.bf16.mxu1 %v19732_v34  ;;  %v20251_v11 = vld [vmem:[#allocation149_spill] sm:$0xff]  ;;  %v20252_v34 = vld [vmem:[#allocation150_spill] sm:$0xff] }
 0xdde   :  { %7670 = vmatmul.mubr.f32.vlgmr.msra.gmra.mrb[42].mxu0 %v17328_v30  ;;  %7812 = vmatmul.mubr.f32.vlgmr.msra.gmra.mrb[42].mxu1 %v17328_v30 }
 0xddf   :  { %13327 = vmatpush1.bf16.msra.mxu0 %v19733_v49  ;;  %7882 = vmatprep.mubr.f32.mxu0 %v17289_v44  ;;  %v20253_v49 = vld [vmem:[#allocation151_spill] sm:$0xff] }
 0xde0   :  { %13423 = vmatpush1.bf16.msra.mxu1 %v19975_v2  ;;  %8024 = vmatprep.mubr.f32.mxu1 %v17289_v44  ;;  %v20255_v2 = vld [vmem:[#allocation153_spill] sm:$0xff] }
 0xde1   :  { %13329 = vmatprep.subr.bf16.mxu0 %v19976_v47  ;;  %13425 = vmatprep.subr.bf16.mxu1 %v19977_v14  ;;  %v20256_v47 = vld [vmem:[#allocation154_spill] sm:$0xff]  ;;  %v20257_v14 = vld [vmem:[#allocation155_spill] sm:$0xff] }
 0xde3   :  { %13331 = vmatpush1.bf16.msra.mxu0 %v19978_v28  ;;  %v20258_v28 = vld [vmem:[#allocation156_spill] sm:$0xff] }
 0xde4   :  { %13427 = vmatpush1.bf16.msra.mxu1 %v19979_v3  ;;  %13333 = vmatprep.subr.bf16.mxu0 %v19980_v55  ;;  %v20259_v3 = vld [vmem:[#allocation157_spill] sm:$0xff]  ;;  %v20260_v55 = vld [vmem:[#allocation158_spill] sm:$0xff] }
 0xde5   :  { %13429 = vmatprep.subr.bf16.mxu1 %v19981_v27  ;;  %v20261_v27 = vld [vmem:[#allocation159_spill] sm:$0xff] }
 0xde7   :  { %13335 = vmatpush1.bf16.msra.mxu0 %v20223_v33  ;;  %v20281_v33 = vld [vmem:[#allocation179_spill] sm:$0xff] }
 0xde8   :  { %13431 = vmatpush1.bf16.msra.mxu1 %v20224_v23  ;;  %13337 = vmatprep.subr.bf16.mxu0 %v20225_v10  ;;  %v20282_v23 = vld [vmem:[#allocation180_spill] sm:$0xff]  ;;  %v20283_v10 = vld [vmem:[#allocation181_spill] sm:$0xff] }
 0xde9   :  { %13433 = vmatprep.subr.bf16.mxu1 %v20226_v38  ;;  %v20284_v38 = vld [vmem:[#allocation182_spill] sm:$0xff] }
 0xdeb   :  { %13339 = vmatpush1.bf16.msra.mxu0 %v20227_v43  ;;  %v20285_v43 = vld [vmem:[#allocation183_spill] sm:$0xff] }
 0xdec   :  { %13435 = vmatpush1.bf16.msra.mxu1 %v20228_v50  ;;  %13341 = vmatprep.subr.bf16.mxu0 %v20229_v39  ;;  %v20286_v50 = vld [vmem:[#allocation184_spill] sm:$0xff]  ;;  %v20287_v39 = vld [vmem:[#allocation185_spill] sm:$0xff] }
 0xded   :  { %13437 = vmatprep.subr.bf16.mxu1 %v20230_v40  ;;  %v20288_v40 = vld [vmem:[#allocation186_spill] sm:$0xff] }
 0xdef   :  { %13343 = vmatpush1.bf16.msra.mxu0 %v20231_v62  ;;  %v20289_v62 = vld [vmem:[#allocation187_spill] sm:$0xff] }
 0xdf0   :  { %13439 = vmatpush1.bf16.msra.mxu1 %v20232_v36  ;;  %13345 = vmatprep.subr.bf16.mxu0 %v20233_v63  ;;  %v20290_v36 = vld [vmem:[#allocation188_spill] sm:$0xff]  ;;  %v20291_v63 = vld [vmem:[#allocation189_spill] sm:$0xff] }
 0xdf1   :  { %13441 = vmatprep.subr.bf16.mxu1 %v20234_v48  ;;  %v20292_v48 = vld [vmem:[#allocation190_spill] sm:$0xff] }
 0xdf3   :  { %13347 = vmatpush1.bf16.msra.mxu0 %v20235_v4  ;;  %v20293_v4 = vld [vmem:[#allocation191_spill] sm:$0xff] }
 0xdf4   :  { %13443 = vmatpush1.bf16.msra.mxu1 %v20236_v8  ;;  %13349 = vmatprep.subr.bf16.mxu0 %v20237_v9  ;;  %v20294_v8 = vld [vmem:[#allocation192_spill] sm:$0xff]  ;;  %v20295_v9 = vld [vmem:[#allocation193_spill] sm:$0xff] }
 0xdf5   :  { %13445 = vmatprep.subr.bf16.mxu1 %v20238_v53  ;;  %v20296_v53 = vld [vmem:[#allocation194_spill] sm:$0xff] }
 0xdf7   :  { %13351 = vmatpush1.bf16.msra.mxu0 %v20239_v6  ;;  %v20297_v6 = vld [vmem:[#allocation195_spill] sm:$0xff] }
 0xdf8   :  { %13447 = vmatpush1.bf16.msra.mxu1 %v20240_v26  ;;  %13353 = vmatprep.subr.bf16.mxu0 %v20241_v52  ;;  %v20298_v26 = vld [vmem:[#allocation196_spill] sm:$0xff]  ;;  %v20299_v52 = vld [vmem:[#allocation197_spill] sm:$0xff] }
 0xdf9   :  { %13449 = vmatprep.subr.bf16.mxu1 %v20242_v61  ;;  %v20300_v61 = vld [vmem:[#allocation198_spill] sm:$0xff] }
 0xdfb   :  { %13355 = vmatpush1.bf16.msra.mxu0 %v20243_v60  ;;  %v20301_v60 = vld [vmem:[#allocation199_spill] sm:$0xff] }
 0xdfc   :  { %13451 = vmatpush1.bf16.msra.mxu1 %v20244_v41  ;;  %13357 = vmatprep.subr.bf16.mxu0 %v20245_v42  ;;  %v20302_v41 = vld [vmem:[#allocation200_spill] sm:$0xff]  ;;  %v20303_v42 = vld [vmem:[#allocation201_spill] sm:$0xff] }
 0xdfd   :  { %13453 = vmatprep.subr.bf16.mxu1 %v20246_v20  ;;  %v20304_v20 = vld [vmem:[#allocation202_spill] sm:$0xff] }
 0xdff   :  { %13359 = vmatpush1.bf16.msra.mxu0 %v20247_v21  ;;  %v20305_v21 = vld [vmem:[#allocation203_spill] sm:$0xff] }
 0xe00   :  { %13455 = vmatpush1.bf16.msra.mxu1 %v20248_v0  ;;  %13361 = vmatprep.subr.bf16.mxu0 %v20249_v45  ;;  %v20306_v0 = vld [vmem:[#allocation204_spill] sm:$0xff]  ;;  %v20307_v45 = vld [vmem:[#allocation205_spill] sm:$0xff] }
 0xe01   :  { %13457 = vmatprep.subr.bf16.mxu1 %v20250_v15  ;;  %v20308_v15 = vld [vmem:[#allocation206_spill] sm:$0xff] }
 0xe03   :  { %13363 = vmatpush1.bf16.msra.mxu0 %v20251_v11  ;;  %v20309_v11 = vld [vmem:[#allocation207_spill] sm:$0xff] }
 0xe04   :  { %13459 = vmatpush1.bf16.msra.mxu1 %v20252_v34  ;;  %13365 = vmatprep.subr.bf16.mxu0 %v20253_v49  ;;  %v20310_v34 = vld [vmem:[#allocation208_spill] sm:$0xff]  ;;  %v20311_v49 = vld [vmem:[#allocation209_spill] sm:$0xff] }
 0xe05   :  { %13461 = vmatprep.subr.bf16.mxu1 %v20254_v37  ;;  %v20312_v37 = vld [vmem:[#allocation210_spill] sm:$0xff] }
 0xe07   :  { %13367 = vmatpush1.bf16.msra.mxu0 %v20255_v2  ;;  %v20313_v2 = vld [vmem:[#allocation211_spill] sm:$0xff] }
 0xe08   :  { %13463 = vmatpush1.bf16.msra.mxu1 %v20256_v47  ;;  %13369 = vmatprep.subr.bf16.mxu0 %v20257_v14  ;;  %v20314_v47 = vld [vmem:[#allocation212_spill] sm:$0xff]  ;;  %v20315_v14 = vld [vmem:[#allocation213_spill] sm:$0xff] }
 0xe09   :  { %13465 = vmatprep.subr.bf16.mxu1 %v20258_v28  ;;  %v20316_v28 = vld [vmem:[#allocation214_spill] sm:$0xff] }
 0xe0b   :  { %13371 = vmatpush1.bf16.msra.mxu0 %v20259_v3  ;;  %v20317_v3 = vld [vmem:[#allocation215_spill] sm:$0xff] }
 0xe0c   :  { %13467 = vmatpush1.bf16.msra.mxu1 %v20260_v55  ;;  %13373 = vmatprep.subr.bf16.mxu0 %v20261_v27  ;;  %v20318_v55 = vld [vmem:[#allocation216_spill] sm:$0xff]  ;;  %v20319_v27 = vld [vmem:[#allocation217_spill] sm:$0xff] }
 0xe0d   :  { %13469 = vmatprep.subr.bf16.mxu1 %v20262_v13  ;;  %v20320_v13 = vld [vmem:[#allocation218_spill] sm:$0xff] }
 0xe0f   :  { %13375 = vmatpush1.bf16.msra.mxu0 %v20263_v51  ;;  %v20321_v51 = vld [vmem:[#allocation219_spill] sm:$0xff] }
 0xe10   :  { %13471 = vmatpush1.bf16.msra.mxu1 %v20264_v57  ;;  %13377 = vmatprep.subr.bf16.mxu0 %v20265_v1  ;;  %v20322_v57 = vld [vmem:[#allocation220_spill] sm:$0xff]  ;;  %v20324_v1 = vld [vmem:[#allocation222_spill] sm:$0xff] }
 0xe11   :  { %13473 = vmatprep.subr.bf16.mxu1 %v20266_v59  ;;  %v20325_v59 = vld [vmem:[#allocation223_spill] sm:$0xff] }
 0xe13   :  { %13379 = vmatpush1.bf16.msra.mxu0 %v20267_v31  ;;  %v20326_v31 = vld [vmem:[#allocation224_spill] sm:$0xff] }
 0xe14   :  { %13475 = vmatpush1.bf16.msra.mxu1 %v20268_v19  ;;  %13381 = vmatprep.subr.bf16.mxu0 %v20269_v22  ;;  %v20327_v19 = vld [vmem:[#allocation225_spill] sm:$0xff]  ;;  %v20328_v22 = vld [vmem:[#allocation226_spill] sm:$0xff] }
 0xe15   :  { %13477 = vmatprep.subr.bf16.mxu1 %v20270_v35  ;;  %v20329_v35 = vld [vmem:[#allocation227_spill] sm:$0xff] }
 0xe17   :  { %13383 = vmatpush1.bf16.msra.mxu0 %v20271_v18  ;;  %v20330_v18 = vld [vmem:[#allocation228_spill] sm:$0xff] }
 0xe18   :  { %13479 = vmatpush1.bf16.msra.mxu1 %v20272_v24  ;;  %13385 = vmatprep.subr.bf16.mxu0 %v20273_v16  ;;  %v20331_v24 = vld [vmem:[#allocation229_spill] sm:$0xff]  ;;  %v20332_v16 = vld [vmem:[#allocation230_spill] sm:$0xff] }
 0xe19   :  { %13481 = vmatprep.subr.bf16.mxu1 %v20274_v54  ;;  %v20333_v54 = vld [vmem:[#allocation231_spill] sm:$0xff] }
 0xe1b   :  { %13387 = vmatpush1.bf16.msra.mxu0 %v20275_v25  ;;  %v20334_v25 = vld [vmem:[#allocation232_spill] sm:$0xff] }
 0xe1c   :  { %13483 = vmatpush1.bf16.msra.mxu1 %v20276_v7  ;;  %13389 = vmatprep.subr.bf16.mxu0 %v20277_v58  ;;  %v20335_v7 = vld [vmem:[#allocation233_spill] sm:$0xff]  ;;  %v20336_v58 = vld [vmem:[#allocation234_spill] sm:$0xff] }
 0xe1d   :  { %13485 = vmatprep.subr.bf16.mxu1 %v20278_v29  ;;  %v20337_v29 = vld [vmem:[#allocation235_spill] sm:$0xff] }
 0xe1e   :  { %7883 = vmatmul.mubr.f32.vlgmr.msra.gmra.mrb[44].mxu0 %v17285_v12 }
 0xe1f   :  { %8025 = vmatmul.mubr.f32.vlgmr.msra.gmra.mrb[44].mxu1 %v17285_v12  ;;  %13391 = vmatpush1.bf16.msra.mxu0 %v20279_v17  ;;  %v20338_v17 = vld [vmem:[#allocation236_spill] sm:$0xff] }
 0xe20   :  { %13487 = vmatpush1.bf16.msra.mxu1 %v20280_v46  ;;  %13393 = vmatprep.subr.bf16.mxu0 %v20281_v33  ;;  %v20339_v46 = vld [vmem:[#allocation237_spill] sm:$0xff]  ;;  %v20340_v33 = vld [vmem:[#allocation238_spill] sm:$0xff] }
 0xe21   :  { %13489 = vmatprep.subr.bf16.mxu1 %v20282_v23  ;;  %7953 = vmatprep.mubr.f32.mxu0 %v18494_v56  ;;  %v20341_v23 = vld [vmem:[#allocation239_spill] sm:$0xff] }
 0xe22   :  { %8095 = vmatprep.mubr.f32.mxu1 %v18494_v56 }
 0xe23   :  { %13395 = vmatpush1.bf16.msra.mxu0 %v20283_v10  ;;  %v20342_v10 = vld [vmem:[#allocation240_spill] sm:$0xff] }
 0xe24   :  { %13491 = vmatpush1.bf16.msra.mxu1 %v20284_v38  ;;  %13397 = vmatprep.subr.bf16.mxu0 %v20285_v43  ;;  %v20343_v38 = vld [vmem:[#allocation241_spill] sm:$0xff]  ;;  %v20344_v43 = vld [vmem:[#allocation242_spill] sm:$0xff] }
 0xe25   :  { %13493 = vmatprep.subr.bf16.mxu1 %v20286_v50  ;;  %v20345_v50 = vld [vmem:[#allocation243_spill] sm:$0xff] }
 0xe27   :  { %13399 = vmatpush1.bf16.msra.mxu0 %v20287_v39  ;;  %v20346_v39 = vld [vmem:[#allocation244_spill] sm:$0xff] }
 0xe28   :  { %13495 = vmatpush1.bf16.msra.mxu1 %v20288_v40  ;;  %13401 = vmatprep.subr.bf16.mxu0 %v20289_v62  ;;  %v20347_v40 = vld [vmem:[#allocation245_spill] sm:$0xff]  ;;  %v20348_v62 = vld [vmem:[#allocation246_spill] sm:$0xff] }
 0xe29   :  { %13497 = vmatprep.subr.bf16.mxu1 %v20290_v36  ;;  %v20349_v36 = vld [vmem:[#allocation247_spill] sm:$0xff] }
 0xe2b   :  { %13403 = vmatpush1.bf16.msra.mxu0 %v20291_v63  ;;  %v20350_v63 = vld [vmem:[#allocation248_spill] sm:$0xff] }
 0xe2c   :  { %13499 = vmatpush1.bf16.msra.mxu1 %v20292_v48  ;;  %13405 = vmatprep.subr.bf16.mxu0 %v20293_v4  ;;  %v20351_v48 = vld [vmem:[#allocation249_spill] sm:$0xff]  ;;  %v20352_v4 = vld [vmem:[#allocation250_spill] sm:$0xff] }
 0xe2d   :  { %13501 = vmatprep.subr.bf16.mxu1 %v20294_v8  ;;  %v20353_v8 = vld [vmem:[#allocation251_spill] sm:$0xff] }
 0xe2f   :  { %13407 = vmatpush1.bf16.msra.mxu0 %v20295_v9  ;;  %v20354_v9 = vld [vmem:[#allocation252_spill] sm:$0xff] }
 0xe30   :  { %13503 = vmatpush1.bf16.msra.mxu1 %v20296_v53  ;;  %13409 = vmatprep.subr.bf16.mxu0 %v20297_v6  ;;  %v20355_v53 = vld [vmem:[#allocation253_spill] sm:$0xff]  ;;  %v20356_v6 = vld [vmem:[#allocation254_spill] sm:$0xff] }
 0xe31   :  { %13505 = vmatprep.subr.bf16.mxu1 %v20298_v26  ;;  %v20357_v26 = vld [vmem:[#allocation255_spill] sm:$0xff] }
 0xe33   :  { %13411 = vmatpush1.bf16.msra.mxu0 %v20299_v52  ;;  %v20358_v52 = vld [vmem:[#allocation256_spill] sm:$0xff] }
 0xe34   :  { %13507 = vmatpush1.bf16.msra.mxu1 %v20300_v61  ;;  %13413 = vmatprep.subr.bf16.mxu0 %v20301_v60  ;;  %v20359_v61 = vld [vmem:[#allocation257_spill] sm:$0xff]  ;;  %v20360_v60 = vld [vmem:[#allocation258_spill] sm:$0xff] }
 0xe35   :  { %13509 = vmatprep.subr.bf16.mxu1 %v20302_v41  ;;  %v20361_v41 = vld [vmem:[#allocation259_spill] sm:$0xff] }
 0xe37   :  { %13415 = vmatpush1.bf16.msra.mxu0 %v20303_v42  ;;  %v20362_v42 = vld [vmem:[#allocation260_spill] sm:$0xff] }
 0xe38   :  { %13511 = vmatpush1.bf16.msra.mxu1 %v20304_v20  ;;  %13417 = vmatprep.subr.bf16.mxu0 %v20305_v21  ;;  %v20363_v20 = vld [vmem:[#allocation261_spill] sm:$0xff]  ;;  %v20364_v21 = vld [vmem:[#allocation262_spill] sm:$0xff] }
 0xe39   :  { %13513 = vmatprep.subr.bf16.mxu1 %v20306_v0  ;;  %v20365_v0 = vld [vmem:[#allocation263_spill] sm:$0xff] }
 0xe3b   :  { %13419 = vmatpush1.bf16.msra.mxu0 %v20307_v45  ;;  %v20366_v45 = vld [vmem:[#allocation264_spill] sm:$0xff] }
 0xe3c   :  { %13515 = vmatpush1.bf16.msra.mxu1 %v20308_v15  ;;  %13517 = vmatprep.subr.bf16.mxu0 %v20309_v11  ;;  %v20367_v15 = vld [vmem:[#allocation265_spill] sm:$0xff]  ;;  %v20368_v11 = vld [vmem:[#allocation266_spill] sm:$0xff] }
 0xe3d   :  { %13613 = vmatprep.subr.bf16.mxu1 %v20310_v34  ;;  %v20369_v34 = vld [vmem:[#allocation267_spill] sm:$0xff] }
 0xe3e   :  { %7954 = vmatmul.mubr.f32.vlgmr.msra.gmra.mrb[44].mxu0 %v17328_v30 }
 0xe3f   :  { %8096 = vmatmul.mubr.f32.vlgmr.msra.gmra.mrb[44].mxu1 %v17328_v30  ;;  %13519 = vmatpush1.bf16.msra.mxu0 %v20311_v49  ;;  %v20370_v49 = vld [vmem:[#allocation268_spill] sm:$0xff] }
 0xe40   :  { %8166 = vmatprep.mubr.f32.mxu0 %v17289_v44  ;;  %13615 = vmatpush1.bf16.msra.mxu1 %v20312_v37  ;;  %v20371_v37 = vld [vmem:[#allocation269_spill] sm:$0xff] }
 0xe41   :  { %8308 = vmatprep.mubr.f32.mxu1 %v17289_v44  ;;  %13521 = vmatprep.subr.bf16.mxu0 %v20313_v2  ;;  %v20323_v44 = vld [vmem:[#allocation221_spill] sm:$0xff]  ;;  %v20372_v2 = vld [vmem:[#allocation270_spill] sm:$0xff] }
 0xe42   :  { %13617 = vmatprep.subr.bf16.mxu1 %v20314_v47  ;;  %v20373_v47 = vld [vmem:[#allocation271_spill] sm:$0xff] }
 0xe43   :  { %13523 = vmatpush1.bf16.msra.mxu0 %v20315_v14  ;;  %v20374_v14 = vld [vmem:[#allocation272_spill] sm:$0xff] }
 0xe44   :  { %13619 = vmatpush1.bf16.msra.mxu1 %v20316_v28  ;;  %13525 = vmatprep.subr.bf16.mxu0 %v20317_v3  ;;  %v20375_v28 = vld [vmem:[#allocation273_spill] sm:$0xff]  ;;  %v20376_v3 = vld [vmem:[#allocation274_spill] sm:$0xff] }
 0xe45   :  { %13621 = vmatprep.subr.bf16.mxu1 %v20318_v55  ;;  %v20377_v55 = vld [vmem:[#allocation275_spill] sm:$0xff] }
 0xe47   :  { %13527 = vmatpush1.bf16.msra.mxu0 %v20319_v27  ;;  %v20378_v27 = vld [vmem:[#allocation276_spill] sm:$0xff] }
 0xe48   :  { %13623 = vmatpush1.bf16.msra.mxu1 %v20320_v13  ;;  %13529 = vmatprep.subr.bf16.mxu0 %v20321_v51  ;;  %v20379_v13 = vld [vmem:[#allocation277_spill] sm:$0xff]  ;;  %v20380_v51 = vld [vmem:[#allocation278_spill] sm:$0xff] }
 0xe49   :  { %13625 = vmatprep.subr.bf16.mxu1 %v20322_v57  ;;  %v20381_v57 = vld [vmem:[#allocation279_spill] sm:$0xff] }
 0xe4b   :  { %13531 = vmatpush1.bf16.msra.mxu0 %v20323_v44  ;;  %v20382_v44 = vld [vmem:[#allocation280_spill] sm:$0xff] }
 0xe4c   :  { %13627 = vmatpush1.bf16.msra.mxu1 %v20324_v1  ;;  %13533 = vmatprep.subr.bf16.mxu0 %v20325_v59  ;;  %v20384_v1 = vld [vmem:[#allocation282_spill] sm:$0xff]  ;;  %v20385_v59 = vld [vmem:[#allocation283_spill] sm:$0xff] }
 0xe4d   :  { %13629 = vmatprep.subr.bf16.mxu1 %v20326_v31  ;;  %v20386_v31 = vld [vmem:[#allocation284_spill] sm:$0xff] }
 0xe4f   :  { %13535 = vmatpush1.bf16.msra.mxu0 %v20327_v19  ;;  %v20387_v19 = vld [vmem:[#allocation285_spill] sm:$0xff] }
 0xe50   :  { %13631 = vmatpush1.bf16.msra.mxu1 %v20328_v22  ;;  %13537 = vmatprep.subr.bf16.mxu0 %v20329_v35  ;;  %v20388_v22 = vld [vmem:[#allocation286_spill] sm:$0xff]  ;;  %v20389_v35 = vld [vmem:[#allocation287_spill] sm:$0xff] }
 0xe51   :  { %13633 = vmatprep.subr.bf16.mxu1 %v20330_v18  ;;  %v20390_v18 = vld [vmem:[#allocation288_spill] sm:$0xff] }
 0xe53   :  { %13539 = vmatpush1.bf16.msra.mxu0 %v20331_v24  ;;  %v20391_v24 = vld [vmem:[#allocation289_spill] sm:$0xff] }
 0xe54   :  { %13635 = vmatpush1.bf16.msra.mxu1 %v20332_v16  ;;  %13541 = vmatprep.subr.bf16.mxu0 %v20333_v54  ;;  %v20392_v16 = vld [vmem:[#allocation290_spill] sm:$0xff]  ;;  %v20393_v54 = vld [vmem:[#allocation291_spill] sm:$0xff] }
 0xe55   :  { %13637 = vmatprep.subr.bf16.mxu1 %v20334_v25  ;;  %v20394_v25 = vld [vmem:[#allocation292_spill] sm:$0xff] }
 0xe57   :  { %13543 = vmatpush1.bf16.msra.mxu0 %v20335_v7  ;;  %v20395_v7 = vld [vmem:[#allocation293_spill] sm:$0xff] }
 0xe58   :  { %13639 = vmatpush1.bf16.msra.mxu1 %v20336_v58  ;;  %13545 = vmatprep.subr.bf16.mxu0 %v20337_v29  ;;  %v20396_v58 = vld [vmem:[#allocation294_spill] sm:$0xff]  ;;  %v20397_v29 = vld [vmem:[#allocation295_spill] sm:$0xff] }
 0xe59   :  { %13641 = vmatprep.subr.bf16.mxu1 %v20338_v17  ;;  %v20398_v17 = vld [vmem:[#allocation296_spill] sm:$0xff] }
 0xe5b   :  { %13547 = vmatpush1.bf16.msra.mxu0 %v20339_v46  ;;  %v20399_v46 = vld [vmem:[#allocation297_spill] sm:$0xff] }
 0xe5c   :  { %13643 = vmatpush1.bf16.msra.mxu1 %v20340_v33  ;;  %13549 = vmatprep.subr.bf16.mxu0 %v20341_v23  ;;  %v20400_v33 = vld [vmem:[#allocation298_spill] sm:$0xff]  ;;  %v20401_v23 = vld [vmem:[#allocation299_spill] sm:$0xff] }
 0xe5d   :  { %13645 = vmatprep.subr.bf16.mxu1 %v20342_v10  ;;  %v20402_v10 = vld [vmem:[#allocation300_spill] sm:$0xff] }
 0xe5f   :  { %13551 = vmatpush1.bf16.msra.mxu0 %v20343_v38  ;;  %v20403_v38 = vld [vmem:[#allocation301_spill] sm:$0xff] }
 0xe60   :  { %13647 = vmatpush1.bf16.msra.mxu1 %v20344_v43  ;;  %13553 = vmatprep.subr.bf16.mxu0 %v20345_v50  ;;  %v20404_v43 = vld [vmem:[#allocation302_spill] sm:$0xff] }
 0xe61   :  { %13649 = vmatprep.subr.bf16.mxu1 %v20346_v39 }
 0xe63   :  { %13555 = vmatpush1.bf16.msra.mxu0 %v20347_v40 }
 0xe64   :  { %13651 = vmatpush1.bf16.msra.mxu1 %v20348_v62  ;;  %13557 = vmatprep.subr.bf16.mxu0 %v20349_v36 }
 0xe65   :  { %13653 = vmatprep.subr.bf16.mxu1 %v20350_v63 }
 0xe67   :  { %13559 = vmatpush1.bf16.msra.mxu0 %v20351_v48 }
 0xe68   :  { %13655 = vmatpush1.bf16.msra.mxu1 %v20352_v4  ;;  %13561 = vmatprep.subr.bf16.mxu0 %v20353_v8 }
 0xe69   :  { %13657 = vmatprep.subr.bf16.mxu1 %v20354_v9  ;;  %v8508_v9 = vld [vmem:[%s17791_s2 + $0x80] sm:$0xff] }
 0xe6b   :  { %13563 = vmatpush1.bf16.msra.mxu0 %v20355_v53  ;;  %v8524_v53 = vld [vmem:[%s17791_s2 + $0x100] sm:$0xff] }
 0xe6c   :  { %13659 = vmatpush1.bf16.msra.mxu1 %v20356_v6  ;;  %13565 = vmatprep.subr.bf16.mxu0 %v20357_v26  ;;  %v8525_v26 = vld [vmem:[%s17791_s2 + $0x108] sm:$0xff] }
 0xe6d   :  { %13661 = vmatprep.subr.bf16.mxu1 %v20358_v52  ;;  %v8492_v52 = vld [vmem:[%s17791_s2] sm:$0xff] }
 0xe6f   :  { %13567 = vmatpush1.bf16.msra.mxu0 %v20359_v61  ;;  %v8493_v61 = vld [vmem:[%s17791_s2 + $0x8] sm:$0xff] }
 0xe70   :  { %13663 = vmatpush1.bf16.msra.mxu1 %v20360_v60  ;;  %13569 = vmatprep.subr.bf16.mxu0 %v20361_v41  ;;  %v14147_v60 = vmov 0.0|0.0   ;;  %v13741_v41 = vpack.c.bf16 %v8525_v26, %v8524_v53  ;;  %v8536_v53 = vld [vmem:[%s17791_s2 + $0x160] sm:$0xff] }
 0xe71   :  { %13665 = vmatprep.subr.bf16.mxu1 %v20362_v42  ;;  %v13710_v42 = vpack.c.bf16 %v8493_v61, %v8492_v52  ;;  %v8537_v61 = vld [vmem:[%s17791_s2 + $0x168] sm:$0xff] }
 0xe73   :  { %13571 = vmatpush1.bf16.msra.mxu0 %v20363_v20  ;;  %v8510_v20 = vld [vmem:[%s17791_s2 + $0x90] sm:$0xff] }
 0xe74   :  { %13667 = vmatpush1.bf16.msra.mxu1 %v20364_v21  ;;  %13573 = vmatprep.subr.bf16.mxu0 %v20365_v0  ;;  %v8511_v21 = vld [vmem:[%s17791_s2 + $0x98] sm:$0xff]  ;;  %v8526_v0 = vld [vmem:[%s17791_s2 + $0x110] sm:$0xff] }
 0xe75   :  { %13669 = vmatprep.subr.bf16.mxu1 %v20366_v45  ;;  %v13712_v45 = vpack.c.bf16 %v8511_v21, %v8510_v20  ;;  %v8522_v21 = vld [vmem:[%s17791_s2 + $0xf0] sm:$0xff] }
 0xe77   :  { %13575 = vmatpush1.bf16.msra.mxu0 %v20367_v15  ;;  %v8527_v15 = vld [vmem:[%s17791_s2 + $0x118] sm:$0xff] }
 0xe78   :  { %13671 = vmatpush1.bf16.msra.mxu1 %v20368_v11  ;;  %13577 = vmatprep.subr.bf16.mxu0 %v20369_v34  ;;  %v8494_v11 = vld [vmem:[%s17791_s2 + $0x10] sm:$0xff]  ;;  %v8495_v34 = vld [vmem:[%s17791_s2 + $0x18] sm:$0xff] }
 0xe79   :  { %13673 = vmatprep.subr.bf16.mxu1 %v20370_v49  ;;  %v13744_v49 = vpack.c.bf16 %v8527_v15, %v8526_v0  ;;  %v8523_v0 = vld [vmem:[%s17791_s2 + $0xf8] sm:$0xff] }
 0xe7b   :  { %13579 = vmatpush1.bf16.msra.mxu0 %v20371_v37  ;;  %v13714_v37 = vpack.c.bf16 %v8495_v34, %v8494_v11  ;;  %v8955_v11 = vld [vmem:[%s17789_s0 + $0xb0] sm:$0xff] }
 0xe7c   :  { %13675 = vmatpush1.bf16.msra.mxu1 %v20372_v2  ;;  %13581 = vmatprep.subr.bf16.mxu0 %v20373_v47  ;;  %v8512_v2 = vld [vmem:[%s17791_s2 + $0xa0] sm:$0xff]  ;;  %v8513_v47 = vld [vmem:[%s17791_s2 + $0xa8] sm:$0xff] }
 0xe7d   :  { %13677 = vmatprep.subr.bf16.mxu1 %v20374_v14  ;;  %v8528_v14 = vld [vmem:[%s17791_s2 + $0x120] sm:$0xff] }
 0xe7e   :  { %8167 = vmatmul.mubr.f32.vlgmr.msra.gmra.mrb[46].mxu0 %v17285_v12 }
 0xe7f   :  { %8309 = vmatmul.mubr.f32.vlgmr.msra.gmra.mrb[46].mxu1 %v17285_v12  ;;  %13583 = vmatpush1.bf16.msra.mxu0 %v20375_v28  ;;  %v20383_v12 = vld [vmem:[#allocation281_spill] sm:$0xff]  ;;  %v13716_v28 = vpack.c.bf16 %v8513_v47, %v8512_v2  ;;  %v8538_v2 = vld [vmem:[%s17791_s2 + $0x170] sm:$0xff]  ;;  %v13736_v47 = vpack.c.bf16 %v8523_v0, %v8522_v21 }
 0xe80   :  { %13679 = vmatpush1.bf16.msra.mxu1 %v20376_v3  ;;  %13585 = vmatprep.subr.bf16.mxu0 %v20377_v55  ;;  %v8529_v3 = vld [vmem:[%s17791_s2 + $0x128] sm:$0xff]  ;;  %v8496_v55 = vld [vmem:[%s17791_s2 + $0x20] sm:$0xff]  ;;  %v8709_v21 = vld [vmem:[%s17793_s4 + $0x10] sm:$0xff] }
 0xe81   :  { %13681 = vmatprep.subr.bf16.mxu1 %v20378_v27  ;;  %8237 = vmatprep.mubr.f32.mxu0 %v18494_v56  ;;  %v8497_v27 = vld [vmem:[%s17791_s2 + $0x28] sm:$0xff]  ;;  %v8710_v0 = vld [vmem:[%s17793_s4 + $0x18] sm:$0xff] }
 0xe82   :  { %8379 = vmatprep.mubr.f32.mxu1 %v18494_v56 }
 0xe83   :  { %13587 = vmatpush1.bf16.msra.mxu0 %v20379_v13  ;;  %v13747_v13 = vpack.c.bf16 %v8529_v3, %v8528_v14  ;;  %v8539_v14 = vld [vmem:[%s17791_s2 + $0x178] sm:$0xff] }
 0xe84   :  { %13683 = vmatpush1.bf16.msra.mxu1 %v20380_v51  ;;  %13589 = vmatprep.subr.bf16.mxu0 %v20381_v57  ;;  %v13718_v51 = vpack.c.bf16 %v8497_v27, %v8496_v55  ;;  %v8514_v57 = vld [vmem:[%s17791_s2 + $0xb0] sm:$0xff]  ;;  %v8507_v3 = vld [vmem:[%s17791_s2 + $0x78] sm:$0xff] }
 0xe85   :  { %13685 = vmatprep.subr.bf16.mxu1 %v20382_v44  ;;  %v8515_v44 = vld [vmem:[%s17791_s2 + $0xb8] sm:$0xff] }
 0xe87   :  { %13591 = vmatpush1.bf16.msra.mxu0 %v20383_v12  ;;  %v8530_v12 = vld [vmem:[%s17791_s2 + $0x130] sm:$0xff] }
 0xe88   :  { %13687 = vmatpush1.bf16.msra.mxu1 %v20384_v1  ;;  %13593 = vmatprep.subr.bf16.mxu0 %v20385_v59  ;;  %v13720_v1 = vpack.c.bf16 %v8515_v44, %v8514_v57  ;;  %v8531_v59 = vld [vmem:[%s17791_s2 + $0x138] sm:$0xff] }
 0xe89   :  { %13689 = vmatprep.subr.bf16.mxu1 %v20386_v31  ;;  %v8498_v31 = vld [vmem:[%s17791_s2 + $0x30] sm:$0xff] }
 0xe8b   :  { %13595 = vmatpush1.bf16.msra.mxu0 %v20387_v19  ;;  %v8499_v19 = vld [vmem:[%s17791_s2 + $0x38] sm:$0xff] }
 0xe8c   :  { %13691 = vmatpush1.bf16.msra.mxu1 %v20388_v22  ;;  %13597 = vmatprep.subr.bf16.mxu0 %v20389_v35  ;;  %v13750_v22 = vpack.c.bf16 %v8531_v59, %v8530_v12  ;;  %v13722_v35 = vpack.c.bf16 %v8499_v19, %v8498_v31 }
 0xe8d   :  { %13693 = vmatprep.subr.bf16.mxu1 %v20390_v18  ;;  %v8516_v18 = vld [vmem:[%s17791_s2 + $0xc0] sm:$0xff] }
 0xe8f   :  { %13599 = vmatpush1.bf16.msra.mxu0 %v20391_v24  ;;  %v8517_v24 = vld [vmem:[%s17791_s2 + $0xc8] sm:$0xff] }
 0xe90   :  { %13695 = vmatpush1.bf16.msra.mxu1 %v20392_v16  ;;  %13601 = vmatprep.subr.bf16.mxu0 %v20393_v54  ;;  %v8532_v16 = vld [vmem:[%s17791_s2 + $0x140] sm:$0xff]  ;;  %v13724_v54 = vpack.c.bf16 %v8517_v24, %v8516_v18 }
 0xe91   :  { %13697 = vmatprep.subr.bf16.mxu1 %v20394_v25  ;;  %v8533_v25 = vld [vmem:[%s17791_s2 + $0x148] sm:$0xff] }
 0xe93   :  { %13603 = vmatpush1.bf16.msra.mxu0 %v20395_v7  ;;  %v8500_v7 = vld [vmem:[%s17791_s2 + $0x40] sm:$0xff] }
 0xe94   :  { %13699 = vmatpush1.bf16.msra.mxu1 %v20396_v58  ;;  %13605 = vmatprep.subr.bf16.mxu0 %v20397_v29  ;;  %v8501_v58 = vld [vmem:[%s17791_s2 + $0x48] sm:$0xff]  ;;  %v13753_v29 = vpack.c.bf16 %v8533_v25, %v8532_v16  ;;  %v8956_v25 = vld [vmem:[%s17789_s0 + $0xb8] sm:$0xff] }
 0xe95   :  { %13701 = vmatprep.subr.bf16.mxu1 %v20398_v17  ;;  %v13726_v17 = vpack.c.bf16 %v8501_v58, %v8500_v7 }
 0xe97   :  { %13607 = vmatpush1.bf16.msra.mxu0 %v20399_v46  ;;  %v8518_v46 = vld [vmem:[%s17791_s2 + $0xd0] sm:$0xff] }
 0xe98   :  { %13703 = vmatpush1.bf16.msra.mxu1 %v20400_v33  ;;  %13609 = vmatprep.subr.bf16.mxu0 %v20401_v23  ;;  %v8519_v33 = vld [vmem:[%s17791_s2 + $0xd8] sm:$0xff]  ;;  %v8534_v23 = vld [vmem:[%s17791_s2 + $0x150] sm:$0xff] }
 0xe99   :  { %13705 = vmatprep.subr.bf16.mxu1 %v20402_v10  ;;  %v13728_v10 = vpack.c.bf16 %v8519_v33, %v8518_v46 }
 0xe9b   :  { %13611 = vmatpush1.bf16.msra.mxu0 %v20403_v38  ;;  %v8535_v38 = vld [vmem:[%s17791_s2 + $0x158] sm:$0xff] }
 0xe9c   :  { %13707 = vmatpush1.bf16.msra.mxu1 %v20404_v43  ;;  %v8502_v43 = vld [vmem:[%s17791_s2 + $0x50] sm:$0xff] }
 0xe9d   :  { %13740 = vmatprep.subr.bf16.mxu1 %v14147_v60 }
 0xe9e   :  { %8238 = vmatmul.mubr.f32.vlgmr.msra.gmra.mrb[46].mxu0 %v17328_v30 }
 0xe9f   :  { %8380 = vmatmul.mubr.f32.vlgmr.msra.gmra.mrb[46].mxu1 %v17328_v30  ;;  %v8509_v30 = vld [vmem:[%s17791_s2 + $0x88] sm:$0xff] }
 0xea0   :  { %v13708_v6 = vpack.c.bf16 %v8509_v30, %v8508_v9  ;;  %13742 = vmatpush3.bf16.msra.mxu1 %v13741_v41  ;;  %9065 = vmatprep.mubr.msk.f32.mxu1 %vm14148_vm2, %v18494_v56  ;;  %v13756_v9 = vpack.c.bf16 %v8535_v38, %v8534_v23  ;;  %v8504_v41 = vld [vmem:[%s17791_s2 + $0x60] sm:$0xff] }
 0xea1   :  { %13743 = vmatprep.subr.bf16.mxu1 %v14147_v60 }
 0xea2   :  { %13709 = vmatprep.subr.bf16.mxu0 %v13708_v6 }
 0xea3   :  { %13711 = vmatpush3.bf16.msra.mxu0 %v13710_v42  ;;  %v8505_v42 = vld [vmem:[%s17791_s2 + $0x68] sm:$0xff] }
 0xea4   :  { %13713 = vmatprep.subr.bf16.mxu0 %v13712_v45  ;;  %13745 = vmatpush3.bf16.msra.mxu1 %v13744_v49  ;;  %v8954_v45 = vld [vmem:[%s17789_s0 + $0xa8] sm:$0xff]  ;;  %v13759_v49 = vpack.c.bf16 %v8537_v61, %v8536_v53 }
 0xea5   :  { %13746 = vmatprep.subr.bf16.mxu1 %v14147_v60 }
 0xea7   :  { %13715 = vmatpush3.bf16.msra.mxu0 %v13714_v37  ;;  %v13734_v37 = vpack.c.bf16 %v8505_v42, %v8504_v41 }
 0xea8   :  { %13717 = vmatprep.subr.bf16.mxu0 %v13716_v28  ;;  %13748 = vmatpush3.bf16.msra.mxu1 %v13747_v13  ;;  %v8506_v28 = vld [vmem:[%s17791_s2 + $0x70] sm:$0xff] }
 0xea9   :  { %13749 = vmatprep.subr.bf16.mxu1 %v14147_v60  ;;  %v13738_v57 = vpack.c.bf16 %v8507_v3, %v8506_v28  ;;  %v8798_v28 = vld [vmem:[%s17795_s6] sm:$0xff]  ;;  %v8799_v3 = vld [vmem:[%s17795_s6 + $0x8] sm:$0xff] }
 0xeab   :  { %13719 = vmatpush3.bf16.msra.mxu0 %v13718_v51  ;;  %v13762_v51 = vpack.c.bf16 %v8539_v14, %v8538_v2  ;;  %v8715_v2 = vld [vmem:[%s17793_s4 + $0x40] sm:$0xff] }
 0xeac   :  { %13721 = vmatprep.subr.bf16.mxu0 %v13720_v1  ;;  %13751 = vmatpush3.bf16.msra.mxu1 %v13750_v22 }
 0xead   :  { %13752 = vmatprep.subr.bf16.mxu1 %v14147_v60 }
 0xeaf   :  { %13723 = vmatpush3.bf16.msra.mxu0 %v13722_v35 }
 0xeb0   :  { %13725 = vmatprep.subr.bf16.mxu0 %v13724_v54  ;;  %13754 = vmatpush3.bf16.msra.mxu1 %v13753_v29 }
 0xeb1   :  { %v7671_v50 = vpop.f32.mrb[42].mxu0  ;;  %v7813_v39 = vpop.f32.mrb[42].mxu1  ;;  %13755 = vmatprep.subr.bf16.mxu1 %v14147_v60 }
 0xeb2   :  { %v7673_v40 = vpop.f32.mrb[43].mxu0  ;;  %v7815_v62 = vpop.f32.mrb[43].mxu1 }
 0xeb3   :  { %v8398_v36 = vcombine.low %v7671_v50, %v7673_v40  ;;  %v8399_v63 = vcombine.low %v7813_v39, %v7815_v62  ;;  %v8503_v50 = vld [vmem:[%s17791_s2 + $0x58] sm:$0xff]  ;;  %v8520_v40 = vld [vmem:[%s17791_s2 + $0xe0] sm:$0xff]  ;;  %v8521_v62 = vld [vmem:[%s17791_s2 + $0xe8] sm:$0xff]  ;;  %13727 = vmatpush3.bf16.msra.mxu0 %v13726_v17 }
 0xeb4   :  { %v13730_v30 = vpack.c.bf16 %v8503_v50, %v8502_v43  ;;  %13729 = vmatprep.subr.bf16.mxu0 %v13728_v10  ;;  %v13732_v52 = vpack.c.bf16 %v8521_v62, %v8520_v40  ;;  %13757 = vmatpush3.bf16.msra.mxu1 %v13756_v9 }
 0xeb5   :  { %v17541_v48 = vrot.slane %v8398_v36, %v15159_v32  ;;  %v17544_v4 = vrot.slane %v8399_v63, %v15159_v32  ;;  %13758 = vmatprep.subr.bf16.mxu1 %v14147_v60 }
 0xeb7   :  { %v8414_v8 = vcombine.low %v17541_v48, %v17544_v4  ;;  %13731 = vmatpush3.bf16.msra.mxu0 %v13730_v30 }
 0xeb8   :  { %13733 = vmatprep.subr.bf16.mxu0 %v13732_v52  ;;  %13760 = vmatpush3.bf16.msra.mxu1 %v13759_v49  ;;  %v8708_v52 = vld [vmem:[%s17793_s4 + $0x8] sm:$0xff]  ;;  %v8714_v49 = vld [vmem:[%s17793_s4 + $0x38] sm:$0xff] }
 0xeb9   :  { %v8452_v55 = vadd.f32 %v8954_v45, %v8414_v8  ;;  %13761 = vmatprep.subr.bf16.mxu1 %v14147_v60  ;;  %v13768_v45 = vpack.c.bf16 %v8710_v0, %v8709_v21 }
 0xebb   :  { %13735 = vmatpush3.bf16.msra.mxu0 %v13734_v37  ;;  %v8463_v44 = vrot.slane %v8452_v55, 6  ;;  %v8957_v4 = vmul.f32 -1.442695, %v8452_v55  ;;  %v13780_v55 = vpack.c.bf16 %v8799_v3, %v8798_v28 }
 0xebc   :  { %13737 = vmatprep.subr.bf16.mxu0 %v13736_v47  ;;  %13763 = vmatpush3.bf16.msra.mxu1 %v13762_v51  ;;  %v8716_v47 = vld [vmem:[%s17793_s4 + $0x48] sm:$0xff]  ;;  %v8960_v51 = vld [vmem:[#allocation5] ss:$0 sm:$0xff] }
 0xebd   :  { %13779 = vmatprep.subr.bf16.mxu1 %v14147_v60  ;;  %v13777_v14 = vpack.c.bf16 %v8716_v47, %v8715_v2 }
 0xebf   :  { %13739 = vmatpush3.bf16.msra.mxu0 %v13738_v57 }
 0xec0   :  { %13764 = vmatprep.subr.bf16.mxu0 %v14147_v60 }
 0xf11   :  { %v7955_v39 = vpop.f32.mrb[44].mxu0 }
 0xf12   :  { %v8097_v36 = vpop.f32.mrb[44].mxu1  ;;  %v7957_v63 = vpop.f32.mrb[45].mxu0 }
 0xf13   :  { %v8415_v6 = vcombine.low %v7955_v39, %v7957_v63  ;;  %v8099_v26 = vpop.f32.mrb[45].mxu1 }
 0xf14   :  { %v8416_v20 = vcombine.low %v8097_v36, %v8099_v26  ;;  %v8707_v26 = vld [vmem:[%s17793_s4] sm:$0xff] }
 0xf15   :  { %v8423_v15 = vrot.slane %v8415_v6, %v15159_v32 }
 0xf16   :  { %v8430_v34 = vrot.slane %v8416_v20, %v15159_v32  ;;  %v13765_v20 = vpack.c.bf16 %v8708_v52, %v8707_v26 }
 0xf18   :  { %v8431_v27 = vcombine.low %v8423_v15, %v8430_v34  ;;  %v8712_v15 = vld [vmem:[%s17793_s4 + $0x28] sm:$0xff]  ;;  %v8713_v34 = vld [vmem:[%s17793_s4 + $0x30] sm:$0xff] }
 0xf19   :  { %v13774_v37 = vpack.c.bf16 %v8714_v49, %v8713_v34 }
 0xf1a   :  { %v8453_v13 = vadd.f32 %v8955_v11, %v8431_v27 }
 0xf1c   :  { %v8464_v12 = vrot.slane %v8453_v13, 6  ;;  %v8474_v46 = vrot.slane %v8453_v13, 4 }
 0xf1e   :  { %v8465_v1 = vsel %vm1589_vm0, %v8463_v44, %v8464_v12 }
 0xf1f   :  { %v8958_v48 = vmul.f32 -1.442695, %v8465_v1 }
 0xf21   :  { %14001 = vpow2.f32 %v8958_v48  ;;  %v8800_v48 = vld [vmem:[%s17795_s6 + $0x10] sm:$0xf]  ;;  %s14149_s6 = smov [#allocation10]  }
 0xf22   :  { %14003 = vpow2.f32 %v8957_v4  ;;  %v8961_v4 = vld [vmem:[#allocation7] ss:$0 sm:$0xff]  ;;  %s8904_s1 = sshll.u32 %s14149_s6, 4  ;;  %s8905_s1 = int_to_ptr.vmem [resolvable:$true] %s8904_s1 }
 0xf23   :  { %s14109_s2 = scalar_lea.vmem %s8905_s1, 32  ;;  %p14114_p5 = scmp.lt.s32.totalorder %s8905_s1, %s8905_s1 }
 0xf24   :  { %p14110_p4 = scmp.ne.s32.totalorder %s8905_s1, %s14109_s2  ;;  %p14115_p6 = scmp.lt.s32.totalorder %s14109_s2, %s14109_s2 }
 0xf26   :  { %p14116_p7 = por %p14115_p6, %p14114_p5 }
 0xf28   :  { %p14117_p8 = pnand %p14116_p7, %p14110_p4 }
 0xf2b   :  { %v14002_v24 = vpop.eup %14001 }
 0xf2c   :  { %v14004_v54 = vpop.eup %14003  ;;  %v8470_v58 = vadd.f32 1.0, %v14002_v24 }
 0xf2d   :  { %v8458_v29 = vadd.f32 1.0, %v14004_v54 }
 0xf2e   :  { %14005 = vrcp.f32 %v8470_v58 }
 0xf2f   :  { %14007 = vrcp.f32 %v8458_v29 }
 0xf38   :  { %v14006_v43 = vpop.eup %14005 }
 0xf39   :  { %v14008_v50 = vpop.eup %14007  ;;  %v8487_v62 = vmul.f32 %v14006_v43, %v17281_v5 }
 0xf71   :  { %v8239_v8 = vpop.f32.mrb[46].mxu0 }
 0xf72   :  { %v8381_v59 = vpop.f32.mrb[46].mxu1  ;;  %v8241_v31 = vpop.f32.mrb[47].mxu0 }
 0xf73   :  { %v8432_v19 = vcombine.low %v8239_v8, %v8241_v31  ;;  %v8383_v22 = vpop.f32.mrb[47].mxu1  ;;  %v8963_v31 = vld [vmem:[#allocation8] ss:$0 sm:$0xff] }
 0xf74   :  { %v8433_v35 = vcombine.low %v8381_v59, %v8383_v22 }
 0xf75   :  { %v8440_v18 = vrot.slane %v8432_v19, %v15159_v32 }
 0xf76   :  { %v8447_v16 = vrot.slane %v8433_v35, %v15159_v32 }
 0xf78   :  { %v8448_v7 = vcombine.low %v8440_v18, %v8447_v16 }
 0xf7a   :  { %v8454_v17 = vadd.f32 %v8956_v25, %v8448_v7 }
 0xf7c   :  { %v8475_v33 = vrot.slane %v8454_v17, 4  ;;  %v8479_v23 = vrot.slane %v8454_v17, 2 }
 0xf7e   :  { %v8476_v10 = vsel %vm1601_vm1, %v8474_v46, %v8475_v33  ;;  %v8959_v38 = vmul.f32 -1.442695, %v8479_v23 }
 0xf7f   :  { %14009 = vtanh.f32 %v8476_v10 }
 0xf80   :  { %14011 = vpow2.f32 %v8959_v38 }
 0xf89   :  { %v14010_v39 = vpop.eup %14009 }
 0xf8a   :  { %v14012_v40 = vpop.eup %14011  ;;  %v8488_v36 = vmul.f32 %v14010_v39, %v14008_v50 }
 0xf8b   :  { %v8484_v63 = vadd.f32 1.0, %v14012_v40 }
 0xf8c   :  { %v8489_v9 = vadd.f32 %v8488_v36, %v8487_v62 }
 0xf8d   :  { %14013 = vrcp.f32 %v8484_v63 }
 0xf8e   :  { %14015 = vtanh.f32 %v8489_v9 }
 0xf97   :  { %v14014_v30 = vpop.eup %14013 }
 0xf98   :  { %v14016_v53 = vpop.eup %14015 }
 0xf99   :  { %v8491_v6 = vmul.f32 %v14016_v53, %v14014_v30 }
 0xf9b   :  { %v8555_v61 = vrot.slane %v8491_v6, %v15159_v32  ;;  %v8548_v41 = vcombine.high %v8491_v6, %v8491_v6 }
 0xf9d   :  { %v8563_v5 = vcombine.high %v8555_v61, %v8555_v61  ;;  %v8562_v42 = vrot.slane %v8548_v41, %v15159_v32  ;;  %v8711_v32 = vld [vmem:[%s17793_s4 + $0x20] sm:$0xff] }
 0xf9e   :  { %v13771_v11 = vpack.c.bf16 %v8712_v15, %v8711_v32 }
 0xf9f   :  { %8631 = vmatprep.mubr.f32.mxu0 %v8563_v5  ;;  %9066 = vmatmul.mubr.f32.vlgmr.msra.gmra.mrb[48].mxu1 %v8562_v42 }
 0xfa0   :  { %8632 = vmatmul.mubr.f32.vlgmr.msra.gmra.mrb[48].mxu0 %v8555_v61  ;;  %9097 = vmatprep.mubr.msk.f32.mxu1 %vm14148_vm2, %v18494_v56 }
 0xfa1   :  { %13766 = vmatpush3.bf16.msra.mxu0 %v13765_v20  ;;  %9088 = vmatprep.mubr.msk.f32.mxu0 %vm14148_vm2, %v18494_v56 }
 0xfa2   :  { %13767 = vmatprep.subr.bf16.mxu0 %v14147_v60  ;;  %13781 = vmatpush3.bf16.msra.mxu1 %v13780_v55 }
 0xfa3   :  { %9095 = vmatprep.subr.mxu1 %v18494_v56 }
 0xfa5   :  { %13769 = vmatpush3.bf16.msra.mxu0 %v13768_v45 }
 0xfa6   :  { %13770 = vmatprep.subr.bf16.mxu0 %v14147_v60  ;;  %9096 = vmatpush3.msk.msra.mxu1 %vm1601_vm1, %v8800_v48 }
 0xfa9   :  { %13772 = vmatpush3.bf16.msra.mxu0 %v13771_v11 }
 0xfaa   :  { %13773 = vmatprep.subr.bf16.mxu0 %v14147_v60 }
 0xfad   :  { %13775 = vmatpush3.bf16.msra.mxu0 %v13774_v37 }
 0xfae   :  { %13776 = vmatprep.subr.bf16.mxu0 %v14147_v60 }
 0xfb1   :  { %13778 = vmatpush3.bf16.msra.mxu0 %v13777_v14 }
0x1072   :  { %v8703_v60 = vpop.f32.mrb[48].mxu1 }
0x1073   :  { %v8998_v27 = vpop.f32.mrb[48].mxu0  ;;  %v9067_v13 = vpop.f32.mrb[49].mxu1 }
0x1074   :  { %v8999_v57 = vpop.f32.mrb[49].mxu0 }
0x1075   :  { %v9000_v44 = vadd.f32 %v8999_v57, %v8998_v27 }
0x1077   :  { %v8634_v12 = vadd.f32 %v9000_v44, %v8960_v51 }
0x1079   :  { %v8704_v1 = vadd.f32 %v8703_v60, %v8634_v12 }
0x107b   :  { %9089 = vmatmul.mubr.msk.f32.vlgmr.msra.gmra.mrb[50].mxu0 %vm8724_vm3, %v8704_v1 }
0x114e   :  { %v8794_v8 = vpop.f32.mrb[50].mxu0 }
0x114f   :  { %v8795_v56 = vadd.f32 %v8961_v4, %v8794_v8  ;;  %v9090_v59 = vpop.f32.mrb[51].mxu0 }
0x1151   :  { %9098 = vmatmul.mubr.msk.f32.vlgmr.msra.gmra.mrb[50].mxu1 %vm8808_vm4, %v8795_v56 }
0x1224   :  { %v8881_v19 = vpop.f32.mrb[50].mxu1 }
0x1225   :  { %v8882_v22 = vadd.f32 %v8963_v31, %v8881_v19  ;;  %v9099_v35 = vpop.f32.mrb[51].mxu1 }
0x1227   :  { %v8886_v18 = vsel %vm8885_vm5, %v8882_v22, -inf }
0x1228   :  { %8887 = vmax.xlane.f32.xlu0 %v8886_v18 }
0x12b5   :  { %v8888_v24 = vpop.xlane.xlu0 %8887 }
0x12b6   :  { %v8889_v16 = vsub.f32 %v8882_v22, %v8888_v24 }
0x12b8   :  { %v8890_v54 = vmul.f32 1.442695, %v8889_v16 }
0x12ba   :  { %14017 = vpow2.f32 %v8890_v54 }
0x12c4   :  { %v14018_v25 = vpop.eup %14017 }
0x12c5   :  { %v8892_v7 = vsel %vm8885_vm5, %v14018_v25, 0.0 }
0x12c6   :  { %8893 = vadd.xlane.f32.xlu0 %v8892_v7 }
0x1353   :  { %v8894_v58 = vpop.xlane.xlu0 %8893 }
0x1354   :  { %14019 = vrcp.f32 %v8894_v58 }
0x135e   :  { %v14020_v29 = vpop.eup %14019 }
0x135f   :  { %v8896_v17 = vmul.f32 %v14020_v29, %v14018_v25 }
0x1361   :  { %8897 = vst.msk [vmem:[#allocation10] sm:$0x3] %vm8885_vm5, %v8896_v17 }
0x1362   :  { %14120 = shalt.err (!%p14117_p8)
}
0x1363   :  { %s14121_s21 = scalar_lea.hbm %s17797_s8, 32 }
0x1364   :  { %p14122_p9 = scmp.ne.s32.totalorder %s17797_s8, %s14121_s21  ;;  %p14125_p10 = scmp.lt.u32.totalorder %s14121_s21, %s17797_s8 }
0x1366   :  { %p14127_p11 = pnand %p14125_p10, %p14122_p9 }
0x1368   :  { %14130 = shalt.err (!%p14127_p11)
}
0x1369   :  { %8907 = dma.vmem_to_hbm [thread:$0]  %s8905_s1, 32, %s17797_s8, [#allocation4]  }
0x136a   :  { %14137 = dma.done.wait [#allocation4], 32  }
0x136b   :  { %14138 = vsyncadd [#allocation4], 4294967264 }
0x136c   :  { %8911 = vsyncpa [#allocation3], 1 }
0x136d   :  { %8912 = vsyncpa [#allocation6], 1 }
0x136e   :  { %8913 = vsyncpa [#allocation9], 1 }
0x136f   :  { %8914 = vsyncpa [#allocation4], 1 }

</bundles_post_ra>
